<compile_context>
chip_gen: v7x
topology: tpu7x:2x2x1
jax: 0.10.0
libtpu: 0.0.40
codegen_flags: <defaults>
</compile_context>

<pallas_src>
import functools
import math

import jax
import jax.numpy as jnp
from jax import lax
from jax.experimental import pallas as pl
from jax.experimental.pallas import tpu as pltpu


# ----------------------------- shared math helpers ----------------------------
def _elu(x):
    return jnp.where(x > 0, x, jnp.exp(jnp.minimum(x, 0.0)) - 1.0)


def _leaky_relu(x):
    return jnp.where(x > 0, x, 0.01 * x)


def _bdot(a, b):
    """Single-pass MXU matmul: bf16 operands, f32 accumulation."""
    return jnp.dot(a.astype(jnp.bfloat16), b.astype(jnp.bfloat16),
                   preferred_element_type=jnp.float32)


def _fdot(a, b):
    """Exact f32 matmul - used only for tiny (<=6-term) segment-sum reductions."""
    return jnp.dot(a, b, preferred_element_type=jnp.float32,
                   precision=lax.Precision.HIGHEST)


def _bn_rows(x, eps):
    """Train-mode BatchNorm1d (weight=1, bias=0): per-row stats over all cols."""
    mean = jnp.mean(x, axis=1, keepdims=True)
    var = jnp.mean((x - mean) ** 2, axis=1, keepdims=True)
    return (x - mean) * lax.rsqrt(var + eps)


def _bn_rows_masked(x, mask_f, count, eps):
    """Per-row BatchNorm over the `count` columns where mask_f == 1."""
    mean = jnp.sum(x * mask_f, axis=1, keepdims=True) / count
    d = (x - mean) * mask_f
    var = jnp.sum(d * d, axis=1, keepdims=True) / count
    return (x - mean) * lax.rsqrt(var + eps)


def _shift_left(x, k):
    """out[:, j] = x[:, j + k]; zero-fill the (always masked-out) tail."""
    if k == 0:
        return x
    pad = jnp.zeros((x.shape[0], k), x.dtype)
    return jnp.concatenate([x[:, k:], pad], axis=1)


def _mlp(x, w1, b1, w2, b2, eps):
    """MLP from models_NRI: elu(fc1) -> elu(fc2) -> train-mode BatchNorm1d."""
    h = _elu(_bdot(w1, x) + b1)
    h = _elu(_bdot(w2, h) + b2)
    return _bn_rows(h, eps)


# --------------------------------- the kernel ---------------------------------
def _encoder_kernel(recv_ref, send_ref,
                    w1_ref, b1_ref, w2_ref, b2_ref,
                    wp_ref, bp_ref, wa_ref, ba_ref,
                    ge2n_ref, grec_ref, gsend_ref,
                    m1w1_ref, m1b1_ref, m1w2_ref, m1b2_ref,
                    m2w1_ref, m2b1_ref, m2w2_ref, m2b2_ref,
                    m3w1_ref, m3b1_ref, m3w2_ref, m3b2_ref,
                    wo_ref, bo_ref,
                    out_ref, *,
                    n_batch, n_edges, T, K, L1, L3, eps):
    BE = n_batch * n_edges          # number of (batch, edge) samples
    BET = BE * T                    # lane-dense column count

    recv = recv_ref[...]            # [D, B*E*T]
    send = send_ref[...]

    # ---- node2edge_temporal / node2edgediff_temporal (arithmetic parts) ----
    prod = send * recv                                               # [D, BET]
    diff = send - recv
    dist = jnp.sqrt(jnp.sum(diff * diff, axis=0, keepdims=True))     # [1, BET]
    x0 = jnp.concatenate([dist, prod], axis=0)                       # [D+1, BET]

    # ---- in-kernel validity masks + per-edge block-sum indicator ----
    tvec = lax.broadcasted_iota(jnp.int32, (1, T), 1)
    t_in = jnp.concatenate([tvec] * BE, axis=1)                      # 0..T-1 per block
    mask1 = jnp.where(t_in < L1, 1.0, 0.0)                           # valid after conv1
    mask3_b = jnp.logical_and((t_in & 1) == 0, t_in <= 2 * (L3 - 1)) # valid after conv2
    mask3 = jnp.where(mask3_b, 1.0, 0.0)
    r_i = lax.broadcasted_iota(jnp.int32, (BET, BE), 0)
    c_i = lax.broadcasted_iota(jnp.int32, (BET, BE), 1)
    blk = jnp.where(jnp.logical_and(r_i >= c_i * T, r_i < (c_i + 1) * T),
                    1.0, 0.0)                                        # [BET, BE]

    # ---- CNN: conv1 (k=K, valid) -> relu -> bn1 (one lane-dense matmul) ----
    x0col = jnp.concatenate([_shift_left(x0, k) for k in range(K)], axis=0)
    h1 = _bdot(w1_ref[...], x0col) + b1_ref[...]                     # [H, BET]
    h1 = jnp.maximum(h1, 0.0)
    h1 = _bn_rows_masked(h1, mask1, float(BE * L1), eps)
    # TODO(synk): dropout (after bn1 and inside the MLPs) not implemented; the
    # module default do_prob = 0.0 makes it an identity.

    # ---- MaxPool1d(2, 2): pooled slot l lives at column 2*l of its block ----
    h1p = jnp.maximum(h1, _shift_left(h1, 1))

    # ---- conv2 (dilation-2 im2col on the non-compacted grid) -> relu -> bn2 ----
    h1col = jnp.concatenate([_shift_left(h1p, 2 * k) for k in range(K)], axis=0)
    h2 = _bdot(w2_ref[...], h1col) + b2_ref[...]                     # [H, BET]
    h2 = jnp.maximum(h2, 0.0)
    h2 = _bn_rows_masked(h2, mask3, float(BE * L3), eps)

    # ---- 1x1 heads + softmax attention over time + attention-weighted mean ----
    pred = _bdot(wp_ref[...], h2) + bp_ref[...]                      # [H, BET]
    att = _bdot(wa_ref[...], h2) + ba_ref[...]                       # [1, BET]
    att = jnp.where(mask3_b, att, -1e30)
    att = att - jnp.max(att, axis=1, keepdims=True)                  # softmax-invariant
    e = jnp.exp(att) * mask3                                         # zero at invalid cols
    denom = jnp.maximum(_fdot(e, blk), 1e-30)                        # [1, BE] exact f32
    num = _fdot(pred * e, blk)                                       # [H, BE] exact f32
    edge_prob = num / (denom * float(L3))          # == mean_t(pred * softmax(att))

    # ---- encoder head: leaky_relu + residual MLP1 ----
    x = _leaky_relu(edge_prob)                                       # [H, B*E]
    x = x + _mlp(x, m1w1_ref[...], m1b1_ref[...],
                 m1w2_ref[...], m1b2_ref[...], eps)
    x_skip = x

    # ---- edge2node (mean aggregation) + residual MLP2 ----
    xn = _bdot(x, ge2n_ref[...])                                     # [H, B*N]
    xn = xn + _mlp(xn, m2w1_ref[...], m2b1_ref[...],
                   m2w2_ref[...], m2b2_ref[...], eps)

    # ---- node2edge + concat skip + MLP3 + fc_out ----
    xe = _bdot(xn, gsend_ref[...]) * _bdot(xn, grec_ref[...])        # [H, B*E]
    xc = jnp.concatenate([xe, x_skip], axis=0)                       # [2H, B*E]
    x3 = _mlp(xc, m3w1_ref[...], m3b1_ref[...],
              m3w2_ref[...], m3b2_ref[...], eps)
    out_ref[...] = _bdot(wo_ref[...], x3) + bo_ref[...]              # [n_out, B*E]


# --------------------------------- the wrapper ---------------------------------
@jax.jit
def cnn_encoder_sym_forward(inputs, rel_rec, rel_send, params):
    """inputs: [B, N, T, D]; rel_rec/rel_send: [E, N] one-hot -> [B, E, n_out]."""
    B, N, T, D = inputs.shape
    E = rel_rec.shape[0]
    H, Cin, K = params["conv1_w"].shape
    n_out = params["fc_out_w"].shape[0]
    assert Cin == D + 1
    L1 = T - (K - 1)              # after conv1 (valid padding)
    L2 = L1 // 2                  # after MaxPool1d(2, 2)
    L3 = L2 - (K - 1)             # after conv2 (valid padding)
    assert L3 >= 1, "time dimension too short for the CNN stack"

    # one-hot graph gathers (pure data movement) + kernel layout [D, B*E*T]
    exact = lax.Precision.HIGHEST
    recv = jnp.einsum("en,bntd->dbet", rel_rec, inputs,
                      precision=exact).reshape(D, B * E * T)
    send = jnp.einsum("en,bntd->dbet", rel_send, inputs,
                      precision=exact).reshape(D, B * E * T)

    # block-diagonal graph matrices acting on the (b,e)/(b,n) column space
    eye_b = jnp.eye(B, dtype=jnp.float32)
    ge2n = jnp.kron(eye_b, rel_rec) / N          # [B*E, B*N] edge2node mean-agg
    grec = jnp.kron(eye_b, rel_rec.T)            # [B*N, B*E]
    gsend = jnp.kron(eye_b, rel_send.T)          # [B*N, B*E]

    bf16 = jnp.bfloat16

    def imcol(w):  # [Cout, Cin, K] -> [Cout, K*Cin], tap-major (matches kernel)
        co, ci, k = w.shape
        return jnp.transpose(w, (0, 2, 1)).reshape(co, k * ci).astype(bf16)

    def col(b):
        return b.reshape(-1, 1)

    args = (
        recv, send,
        imcol(params["conv1_w"]), col(params["conv1_b"]),
        imcol(params["conv2_w"]), col(params["conv2_b"]),
        params["conv_pred_w"][:, :, 0].astype(bf16), col(params["conv_pred_b"]),
        params["conv_att_w"][:, :, 0].astype(bf16), col(params["conv_att_b"]),
        ge2n, grec, gsend,
        params["mlp1_w1"].astype(bf16), col(params["mlp1_b1"]),
        params["mlp1_w2"].astype(bf16), col(params["mlp1_b2"]),
        params["mlp2_w1"].astype(bf16), col(params["mlp2_b1"]),
        params["mlp2_w2"].astype(bf16), col(params["mlp2_b2"]),
        params["mlp3_w1"].astype(bf16), col(params["mlp3_b1"]),
        params["mlp3_w2"].astype(bf16), col(params["mlp3_b2"]),
        params["fc_out_w"].astype(bf16), col(params["fc_out_b"]),
    )
    vmem = pl.BlockSpec(memory_space=pltpu.MemorySpace.VMEM)
    out = pl.pallas_call(
        functools.partial(_encoder_kernel, n_batch=B, n_edges=E, T=T, K=K,
                          L1=L1, L3=L3, eps=1e-5),
        out_shape=jax.ShapeDtypeStruct((n_out, B * E), jnp.float32),
        in_specs=[vmem] * len(args),
        out_specs=vmem,
        compiler_params=pltpu.CompilerParams(vmem_limit_bytes=32 * 1024 * 1024),
    )(*args)
    return out.T.reshape(B, E, n_out)


# ----------------------------- pure-JAX reference ------------------------------
def _reference_forward(inputs, rel_rec, rel_send, params, eps=1e-5):
    """Mirror of CNNEncoderSym.forward (factor=True, use_motion=False, p=0,
    train-mode BatchNorm).  Matmul/conv operands are rounded to bf16 with f32
    accumulation, matching the kernel's single-pass MXU precision."""
    B, N, T, D = inputs.shape
    E = rel_rec.shape[0]
    bf16, f32 = jnp.bfloat16, jnp.float32
    exact = lax.Precision.HIGHEST

    def bconv(x, w, b):
        y = lax.conv_general_dilated(
            x.astype(bf16), w.astype(bf16), window_strides=(1,), padding="VALID",
            dimension_numbers=("NCH", "OIH", "NCH"), preferred_element_type=f32)
        return y + b[None, :, None]

    def bn(x):
        axes = (0, 2) if x.ndim == 3 else (0,)
        mean = jnp.mean(x, axis=axes, keepdims=True)
        var = jnp.mean((x - mean) ** 2, axis=axes, keepdims=True)
        return (x - mean) * lax.rsqrt(var + eps)

    def linear(x, w, b):
        return jnp.einsum("...i,oi->...o", x.astype(bf16), w.astype(bf16),
                          preferred_element_type=f32) + b

    def mlp(x, w1, b1, w2, b2):
        h = _elu(linear(x, w1, b1))
        h = _elu(linear(h, w2, b2))
        b_, m_, f_ = h.shape
        return bn(h.reshape(b_ * m_, f_)).reshape(b_, m_, f_)

    def gmat(mat, x):
        return jnp.einsum("ij,bjf->bif", mat.astype(bf16), x.astype(bf16),
                          preferred_element_type=f32)

    # node2edge_temporal / node2edgediff_temporal
    xflat = inputs.reshape(B, N, T * D)
    receivers = jnp.einsum("en,bnf->bef", rel_rec, xflat, precision=exact)
    senders = jnp.einsum("en,bnf->bef", rel_send, xflat, precision=exact)
    receivers = jnp.transpose(receivers.reshape(B * E, T, D), (0, 2, 1))
    senders = jnp.transpose(senders.reshape(B * E, T, D), (0, 2, 1))
    edges = senders * receivers
    edge_diffs = jnp.sqrt(jnp.sum((senders - receivers) ** 2, axis=1, keepdims=True))
    x = jnp.concatenate([edge_diffs, edges], axis=1)                 # [BE, D+1, T]

    # CNN
    h = jax.nn.relu(bconv(x, params["conv1_w"], params["conv1_b"]))
    h = bn(h)
    h = lax.reduce_window(h, -jnp.inf, lax.max, (1, 1, 2), (1, 1, 2), "VALID")
    h = jax.nn.relu(bconv(h, params["conv2_w"], params["conv2_b"]))
    h = bn(h)
    pred = bconv(h, params["conv_pred_w"], params["conv_pred_b"])
    att = jax.nn.softmax(bconv(h, params["conv_att_w"], params["conv_att_b"]), axis=-1)
    edge_prob = jnp.mean(pred * att, axis=2)                         # [BE, H]

    # encoder head
    xe = _leaky_relu(edge_prob.reshape(B, E, -1))
    xe = xe + mlp(xe, params["mlp1_w1"], params["mlp1_b1"],
                  params["mlp1_w2"], params["mlp1_b2"])
    x_skip = xe
    xn = gmat(rel_rec.T, xe) / N                                     # edge2node
    xn = xn + mlp(xn, params["mlp2_w1"], params["mlp2_b1"],
                  params["mlp2_w2"], params["mlp2_b2"])
    xed = gmat(rel_send, xn) * gmat(rel_rec, xn)                     # node2edge
    xc = jnp.concatenate([xed, x_skip], axis=2)
    x3 = mlp(xc, params["mlp3_w1"], params["mlp3_b1"],
             params["mlp3_w2"], params["mlp3_b2"])
    return linear(x3, params["fc_out_w"], params["fc_out_b"])


if __name__ == "__main__":
    B, N, T, D = 2, 4, 24, 4          # batch, atoms, timesteps, input dims
    H, n_out, K = 32, 8, 5            # n_hid, n_out, CNN kernel_size
    E = N * (N - 1)                   # number of directed edges

    # fully-connected (no self-loop) relation one-hots, NRI-style
    pairs = [(i, j) for i in range(N) for j in range(N) if i != j]
    rel_rec = jax.nn.one_hot(jnp.array([i for i, _ in pairs]), N, dtype=jnp.float32)
    rel_send = jax.nn.one_hot(jnp.array([j for _, j in pairs]), N, dtype=jnp.float32)

    key = jax.random.PRNGKey(0)
    ks = jax.random.split(key, 16)

    def conv_w(k, shape):             # torch init_weights: normal(0, sqrt(2/(K*Cout)))
        std = math.sqrt(2.0 / (shape[2] * shape[0]))
        return std * jax.random.normal(k, shape, jnp.float32)

    def xavier(k, shape):             # torch xavier_normal_
        std = math.sqrt(2.0 / (shape[0] + shape[1]))
        return std * jax.random.normal(k, shape, jnp.float32)

    def b01(n):
        return jnp.full((n,), 0.1, jnp.float32)

    params = {
        "conv1_w": conv_w(ks[0], (H, D + 1, K)), "conv1_b": b01(H),
        "conv2_w": conv_w(ks[1], (H, H, K)), "conv2_b": b01(H),
        "conv_pred_w": conv_w(ks[2], (H, H, 1)), "conv_pred_b": b01(H),
        "conv_att_w": conv_w(ks[3], (1, H, 1)), "conv_att_b": b01(1),
        "mlp1_w1": xavier(ks[4], (H, H)), "mlp1_b1": b01(H),
        "mlp1_w2": xavier(ks[5], (H, H)), "mlp1_b2": b01(H),
        "mlp2_w1": xavier(ks[6], (H, H)), "mlp2_b1": b01(H),
        "mlp2_w2": xavier(ks[7], (H, H)), "mlp2_b2": b01(H),
        "mlp3_w1": xavier(ks[8], (H, 2 * H)), "mlp3_b1": b01(H),
        "mlp3_w2": xavier(ks[9], (H, H)), "mlp3_b2": b01(H),
        "fc_out_w": xavier(ks[10], (n_out, H)), "fc_out_b": b01(n_out),
    }
    inputs = jax.random.normal(ks[11], (B, N, T, D), jnp.float32)

    out = jax.block_until_ready(
        cnn_encoder_sym_forward(inputs, rel_rec, rel_send, params))
    ref = jax.block_until_ready(
        _reference_forward(inputs, rel_rec, rel_send, params))

    assert out.shape == (B, E, n_out) and out.dtype == jnp.float32
    max_diff = float(jnp.max(jnp.abs(out - ref)))
    # tolerance sized for single-pass bf16 MXU operand rounding (per perf guidance)
    assert jnp.allclose(out, ref, rtol=2e-2, atol=2e-2), f"max abs diff {max_diff}"
    print("KERNEL_OK")
</pallas_src>

<mosaic_0001>
module attributes {stable_mosaic.version = 11 : i64} {
  func.func @_encoder_kernel(%arg0: memref<4x576xf32, #tpu.memory_space<vmem>>, %arg1: memref<4x576xf32, #tpu.memory_space<vmem>>, %arg2: memref<32x25xbf16, #tpu.memory_space<vmem>>, %arg3: memref<32x1xf32, #tpu.memory_space<vmem>>, %arg4: memref<32x160xbf16, #tpu.memory_space<vmem>>, %arg5: memref<32x1xf32, #tpu.memory_space<vmem>>, %arg6: memref<32x32xbf16, #tpu.memory_space<vmem>>, %arg7: memref<32x1xf32, #tpu.memory_space<vmem>>, %arg8: memref<1x32xbf16, #tpu.memory_space<vmem>>, %arg9: memref<1x1xf32, #tpu.memory_space<vmem>>, %arg10: memref<24x8xf32, #tpu.memory_space<vmem>>, %arg11: memref<8x24xf32, #tpu.memory_space<vmem>>, %arg12: memref<8x24xf32, #tpu.memory_space<vmem>>, %arg13: memref<32x32xbf16, #tpu.memory_space<vmem>>, %arg14: memref<32x1xf32, #tpu.memory_space<vmem>>, %arg15: memref<32x32xbf16, #tpu.memory_space<vmem>>, %arg16: memref<32x1xf32, #tpu.memory_space<vmem>>, %arg17: memref<32x32xbf16, #tpu.memory_space<vmem>>, %arg18: memref<32x1xf32, #tpu.memory_space<vmem>>, %arg19: memref<32x32xbf16, #tpu.memory_space<vmem>>, %arg20: memref<32x1xf32, #tpu.memory_space<vmem>>, %arg21: memref<32x64xbf16, #tpu.memory_space<vmem>>, %arg22: memref<32x1xf32, #tpu.memory_space<vmem>>, %arg23: memref<32x32xbf16, #tpu.memory_space<vmem>>, %arg24: memref<32x1xf32, #tpu.memory_space<vmem>>, %arg25: memref<8x32xbf16, #tpu.memory_space<vmem>>, %arg26: memref<8x1xf32, #tpu.memory_space<vmem>>, %arg27: memref<8x24xf32, #tpu.memory_space<vmem>>) attributes {dimension_semantics = [], scalar_prefetch = 0 : i64, scratch_operands = 0 : i64, tpu.core_type = #tpu.core_type<tc>} {
    %c0 = arith.constant 0 : index
    %c0_0 = arith.constant 0 : index
    %0 = vector.load %arg0[%c0, %c0_0] : memref<4x576xf32, #tpu.memory_space<vmem>>, vector<4x576xf32>
    %c0_1 = arith.constant 0 : index
    %c0_2 = arith.constant 0 : index
    %1 = vector.load %arg1[%c0_1, %c0_2] : memref<4x576xf32, #tpu.memory_space<vmem>>, vector<4x576xf32>
    %2 = arith.mulf %1, %0 : vector<4x576xf32>
    %3 = arith.subf %1, %0 : vector<4x576xf32>
    %4 = arith.mulf %3, %3 : vector<4x576xf32>
    %cst = arith.constant dense<0.000000e+00> : vector<576xf32>
    %5 = vector.multi_reduction <add>, %4, %cst [0] : vector<4x576xf32> to vector<576xf32>
    %6 = vector.shape_cast %5 : vector<576xf32> to vector<1x576xf32>
    %7 = math.sqrt %6 : vector<1x576xf32>
    %8 = tpu.concatenate %7, %2 in 0 : vector<1x576xf32>, vector<4x576xf32> -> vector<5x576xf32>
    %9 = tpu.iota {dimensions = array<i32: 1>} : vector<1x24xi32>
    %10 = tpu.concatenate %9, %9, %9, %9, %9, %9, %9, %9, %9, %9, %9, %9, %9, %9, %9, %9 in 1 : vector<1x24xi32>, vector<1x24xi32>, vector<1x24xi32>, vector<1x24xi32>, vector<1x24xi32>, vector<1x24xi32>, vector<1x24xi32>, vector<1x24xi32>, vector<1x24xi32>, vector<1x24xi32>, vector<1x24xi32>, vector<1x24xi32>, vector<1x24xi32>, vector<1x24xi32>, vector<1x24xi32>, vector<1x24xi32> -> vector<1x384xi32>
    %11 = tpu.concatenate %9, %9, %9, %9, %9, %9, %9, %9 in 1 : vector<1x24xi32>, vector<1x24xi32>, vector<1x24xi32>, vector<1x24xi32>, vector<1x24xi32>, vector<1x24xi32>, vector<1x24xi32>, vector<1x24xi32> -> vector<1x192xi32>
    %12 = tpu.concatenate %10, %11 in 1 : vector<1x384xi32>, vector<1x192xi32> -> vector<1x576xi32>
    %c20_i32 = arith.constant 20 : i32
    %13 = vector.broadcast %c20_i32 : i32 to vector<1x576xi32>
    %14 = arith.cmpi slt, %12, %13 : vector<1x576xi32>
    %cst_3 = arith.constant 1.000000e+00 : f32
    %cst_4 = arith.constant 0.000000e+00 : f32
    %15 = vector.broadcast %cst_3 : f32 to vector<1x576xf32>
    %16 = vector.broadcast %cst_4 : f32 to vector<1x576xf32>
    %17 = arith.select %14, %15, %16 : vector<1x576xi1>, vector<1x576xf32>
    %c1_i32 = arith.constant 1 : i32
    %18 = vector.broadcast %c1_i32 : i32 to vector<1x576xi32>
    %19 = arith.andi %12, %18 : vector<1x576xi32>
    %c0_i32 = arith.constant 0 : i32
    %20 = vector.broadcast %c0_i32 : i32 to vector<1x576xi32>
    %21 = arith.cmpi eq, %19, %20 : vector<1x576xi32>
    %c10_i32 = arith.constant 10 : i32
    %22 = vector.broadcast %c10_i32 : i32 to vector<1x576xi32>
    %23 = arith.cmpi sle, %12, %22 : vector<1x576xi32>
    %24 = arith.andi %21, %23 : vector<1x576xi1>
    %cst_5 = arith.constant 1.000000e+00 : f32
    %cst_6 = arith.constant 0.000000e+00 : f32
    %25 = vector.broadcast %cst_5 : f32 to vector<1x576xf32>
    %26 = vector.broadcast %cst_6 : f32 to vector<1x576xf32>
    %27 = arith.select %24, %25, %26 : vector<1x576xi1>, vector<1x576xf32>
    %28 = tpu.iota {dimensions = array<i32: 0>} : vector<576x24xi32>
    %29 = tpu.iota {dimensions = array<i32: 1>} : vector<576x24xi32>
    %c24_i32 = arith.constant 24 : i32
    %30 = vector.broadcast %c24_i32 : i32 to vector<576x24xi32>
    %31 = arith.muli %29, %30 : vector<576x24xi32>
    %32 = arith.cmpi sge, %28, %31 : vector<576x24xi32>
    %c1_i32_7 = arith.constant 1 : i32
    %33 = vector.broadcast %c1_i32_7 : i32 to vector<576x24xi32>
    %34 = arith.addi %29, %33 : vector<576x24xi32>
    %c24_i32_8 = arith.constant 24 : i32
    %35 = vector.broadcast %c24_i32_8 : i32 to vector<576x24xi32>
    %36 = arith.muli %34, %35 : vector<576x24xi32>
    %37 = arith.cmpi slt, %28, %36 : vector<576x24xi32>
    %38 = arith.andi %32, %37 : vector<576x24xi1>
    %cst_9 = arith.constant 1.000000e+00 : f32
    %cst_10 = arith.constant 0.000000e+00 : f32
    %39 = vector.broadcast %cst_9 : f32 to vector<576x24xf32>
    %40 = vector.broadcast %cst_10 : f32 to vector<576x24xf32>
    %41 = arith.select %38, %39, %40 : vector<576x24xi1>, vector<576x24xf32>
    %cst_11 = arith.constant 0.000000e+00 : f32
    %42 = vector.broadcast %cst_11 : f32 to vector<5x1xf32>
    %43 = vector.extract_strided_slice %8 {offsets = [0, 1], sizes = [5, 575], strides = [1, 1]} : vector<5x576xf32> to vector<5x575xf32>
    %44 = tpu.concatenate %43, %42 in 1 : vector<5x575xf32>, vector<5x1xf32> -> vector<5x576xf32>
    %cst_12 = arith.constant 0.000000e+00 : f32
    %45 = vector.broadcast %cst_12 : f32 to vector<5x2xf32>
    %46 = vector.extract_strided_slice %8 {offsets = [0, 2], sizes = [5, 574], strides = [1, 1]} : vector<5x576xf32> to vector<5x574xf32>
    %47 = tpu.concatenate %46, %45 in 1 : vector<5x574xf32>, vector<5x2xf32> -> vector<5x576xf32>
    %cst_13 = arith.constant 0.000000e+00 : f32
    %48 = vector.broadcast %cst_13 : f32 to vector<5x3xf32>
    %49 = vector.extract_strided_slice %8 {offsets = [0, 3], sizes = [5, 573], strides = [1, 1]} : vector<5x576xf32> to vector<5x573xf32>
    %50 = tpu.concatenate %49, %48 in 1 : vector<5x573xf32>, vector<5x3xf32> -> vector<5x576xf32>
    %cst_14 = arith.constant 0.000000e+00 : f32
    %51 = vector.broadcast %cst_14 : f32 to vector<5x4xf32>
    %52 = vector.extract_strided_slice %8 {offsets = [0, 4], sizes = [5, 572], strides = [1, 1]} : vector<5x576xf32> to vector<5x572xf32>
    %53 = tpu.concatenate %52, %51 in 1 : vector<5x572xf32>, vector<5x4xf32> -> vector<5x576xf32>
    %54 = tpu.concatenate %8, %44, %47, %50, %53 in 0 : vector<5x576xf32>, vector<5x576xf32>, vector<5x576xf32>, vector<5x576xf32>, vector<5x576xf32> -> vector<25x576xf32>
    %c0_15 = arith.constant 0 : index
    %c0_16 = arith.constant 0 : index
    %55 = vector.load %arg2[%c0_15, %c0_16] : memref<32x25xbf16, #tpu.memory_space<vmem>>, vector<32x25xbf16>
    %56 = arith.truncf %54 : vector<25x576xf32> to vector<25x576xbf16>
    %cst_17 = arith.constant dense<0.000000e+00> : vector<32x576xf32>
    %57 = tpu.matmul %55, %56, %cst_17 {dimension_numbers = #tpu.dot_dimension_numbers<[1], [0], [0], [1], [0, 0, 1, 1], [], []>} : vector<32x25xbf16>, vector<25x576xbf16>, vector<32x576xf32> -> vector<32x576xf32>
    %c0_18 = arith.constant 0 : index
    %c0_19 = arith.constant 0 : index
    %58 = vector.load %arg3[%c0_18, %c0_19] : memref<32x1xf32, #tpu.memory_space<vmem>>, vector<32x1xf32>
    %59 = vector.broadcast %58 : vector<32x1xf32> to vector<32x576xf32>
    %60 = arith.addf %57, %59 : vector<32x576xf32>
    %cst_20 = arith.constant 0.000000e+00 : f32
    %61 = vector.broadcast %cst_20 : f32 to vector<32x576xf32>
    %62 = arith.maximumf %60, %61 : vector<32x576xf32>
    %63 = vector.broadcast %17 : vector<1x576xf32> to vector<32x576xf32>
    %64 = arith.mulf %62, %63 : vector<32x576xf32>
    %cst_21 = arith.constant dense<0.000000e+00> : vector<32xf32>
    %65 = vector.multi_reduction <add>, %64, %cst_21 [1] : vector<32x576xf32> to vector<32xf32>
    %66 = vector.shape_cast %65 : vector<32xf32> to vector<32x1xf32>
    %cst_22 = arith.constant 4.800000e+02 : f32
    %67 = vector.broadcast %cst_22 : f32 to vector<32x1xf32>
    %68 = arith.divf %66, %67 : vector<32x1xf32>
    %69 = vector.broadcast %68 : vector<32x1xf32> to vector<32x576xf32>
    %70 = arith.subf %62, %69 : vector<32x576xf32>
    %71 = vector.broadcast %17 : vector<1x576xf32> to vector<32x576xf32>
    %72 = arith.mulf %70, %71 : vector<32x576xf32>
    %73 = arith.mulf %72, %72 : vector<32x576xf32>
    %cst_23 = arith.constant dense<0.000000e+00> : vector<32xf32>
    %74 = vector.multi_reduction <add>, %73, %cst_23 [1] : vector<32x576xf32> to vector<32xf32>
    %75 = vector.shape_cast %74 : vector<32xf32> to vector<32x1xf32>
    %cst_24 = arith.constant 4.800000e+02 : f32
    %76 = vector.broadcast %cst_24 : f32 to vector<32x1xf32>
    %77 = arith.divf %75, %76 : vector<32x1xf32>
    %78 = vector.broadcast %68 : vector<32x1xf32> to vector<32x576xf32>
    %79 = arith.subf %62, %78 : vector<32x576xf32>
    %cst_25 = arith.constant 9.99999974E-6 : f32
    %80 = vector.broadcast %cst_25 : f32 to vector<32x1xf32>
    %81 = arith.addf %77, %80 : vector<32x1xf32>
    %82 = math.rsqrt %81 : vector<32x1xf32>
    %83 = vector.broadcast %82 : vector<32x1xf32> to vector<32x576xf32>
    %84 = arith.mulf %79, %83 : vector<32x576xf32>
    %cst_26 = arith.constant 0.000000e+00 : f32
    %85 = vector.broadcast %cst_26 : f32 to vector<32x1xf32>
    %86 = vector.extract_strided_slice %84 {offsets = [0, 1], sizes = [32, 575], strides = [1, 1]} : vector<32x576xf32> to vector<32x575xf32>
    %87 = tpu.concatenate %86, %85 in 1 : vector<32x575xf32>, vector<32x1xf32> -> vector<32x576xf32>
    %88 = arith.maximumf %84, %87 : vector<32x576xf32>
    %cst_27 = arith.constant 0.000000e+00 : f32
    %89 = vector.broadcast %cst_27 : f32 to vector<32x2xf32>
    %90 = vector.extract_strided_slice %88 {offsets = [0, 2], sizes = [32, 574], strides = [1, 1]} : vector<32x576xf32> to vector<32x574xf32>
    %91 = tpu.concatenate %90, %89 in 1 : vector<32x574xf32>, vector<32x2xf32> -> vector<32x576xf32>
    %cst_28 = arith.constant 0.000000e+00 : f32
    %92 = vector.broadcast %cst_28 : f32 to vector<32x4xf32>
    %93 = vector.extract_strided_slice %88 {offsets = [0, 4], sizes = [32, 572], strides = [1, 1]} : vector<32x576xf32> to vector<32x572xf32>
    %94 = tpu.concatenate %93, %92 in 1 : vector<32x572xf32>, vector<32x4xf32> -> vector<32x576xf32>
    %cst_29 = arith.constant 0.000000e+00 : f32
    %95 = vector.broadcast %cst_29 : f32 to vector<32x6xf32>
    %96 = vector.extract_strided_slice %88 {offsets = [0, 6], sizes = [32, 570], strides = [1, 1]} : vector<32x576xf32> to vector<32x570xf32>
    %97 = tpu.concatenate %96, %95 in 1 : vector<32x570xf32>, vector<32x6xf32> -> vector<32x576xf32>
    %cst_30 = arith.constant 0.000000e+00 : f32
    %98 = vector.broadcast %cst_30 : f32 to vector<32x8xf32>
    %99 = vector.extract_strided_slice %88 {offsets = [0, 8], sizes = [32, 568], strides = [1, 1]} : vector<32x576xf32> to vector<32x568xf32>
    %100 = tpu.concatenate %99, %98 in 1 : vector<32x568xf32>, vector<32x8xf32> -> vector<32x576xf32>
    %101 = tpu.concatenate %88, %91, %94, %97, %100 in 0 : vector<32x576xf32>, vector<32x576xf32>, vector<32x576xf32>, vector<32x576xf32>, vector<32x576xf32> -> vector<160x576xf32>
    %c0_31 = arith.constant 0 : index
    %c0_32 = arith.constant 0 : index
    %102 = vector.load %arg4[%c0_31, %c0_32] : memref<32x160xbf16, #tpu.memory_space<vmem>>, vector<32x160xbf16>
    %103 = arith.truncf %101 : vector<160x576xf32> to vector<160x576xbf16>
    %cst_33 = arith.constant dense<0.000000e+00> : vector<32x576xf32>
    %104 = tpu.matmul %102, %103, %cst_33 {dimension_numbers = #tpu.dot_dimension_numbers<[1], [0], [0], [1], [0, 0, 1, 1], [], []>} : vector<32x160xbf16>, vector<160x576xbf16>, vector<32x576xf32> -> vector<32x576xf32>
    %c0_34 = arith.constant 0 : index
    %c0_35 = arith.constant 0 : index
    %105 = vector.load %arg5[%c0_34, %c0_35] : memref<32x1xf32, #tpu.memory_space<vmem>>, vector<32x1xf32>
    %106 = vector.broadcast %105 : vector<32x1xf32> to vector<32x576xf32>
    %107 = arith.addf %104, %106 : vector<32x576xf32>
    %cst_36 = arith.constant 0.000000e+00 : f32
    %108 = vector.broadcast %cst_36 : f32 to vector<32x576xf32>
    %109 = arith.maximumf %107, %108 : vector<32x576xf32>
    %110 = vector.broadcast %27 : vector<1x576xf32> to vector<32x576xf32>
    %111 = arith.mulf %109, %110 : vector<32x576xf32>
    %cst_37 = arith.constant dense<0.000000e+00> : vector<32xf32>
    %112 = vector.multi_reduction <add>, %111, %cst_37 [1] : vector<32x576xf32> to vector<32xf32>
    %113 = vector.shape_cast %112 : vector<32xf32> to vector<32x1xf32>
    %cst_38 = arith.constant 1.440000e+02 : f32
    %114 = vector.broadcast %cst_38 : f32 to vector<32x1xf32>
    %115 = arith.divf %113, %114 : vector<32x1xf32>
    %116 = vector.broadcast %115 : vector<32x1xf32> to vector<32x576xf32>
    %117 = arith.subf %109, %116 : vector<32x576xf32>
    %118 = vector.broadcast %27 : vector<1x576xf32> to vector<32x576xf32>
    %119 = arith.mulf %117, %118 : vector<32x576xf32>
    %120 = arith.mulf %119, %119 : vector<32x576xf32>
    %cst_39 = arith.constant dense<0.000000e+00> : vector<32xf32>
    %121 = vector.multi_reduction <add>, %120, %cst_39 [1] : vector<32x576xf32> to vector<32xf32>
    %122 = vector.shape_cast %121 : vector<32xf32> to vector<32x1xf32>
    %cst_40 = arith.constant 1.440000e+02 : f32
    %123 = vector.broadcast %cst_40 : f32 to vector<32x1xf32>
    %124 = arith.divf %122, %123 : vector<32x1xf32>
    %125 = vector.broadcast %115 : vector<32x1xf32> to vector<32x576xf32>
    %126 = arith.subf %109, %125 : vector<32x576xf32>
    %cst_41 = arith.constant 9.99999974E-6 : f32
    %127 = vector.broadcast %cst_41 : f32 to vector<32x1xf32>
    %128 = arith.addf %124, %127 : vector<32x1xf32>
    %129 = math.rsqrt %128 : vector<32x1xf32>
    %130 = vector.broadcast %129 : vector<32x1xf32> to vector<32x576xf32>
    %131 = arith.mulf %126, %130 : vector<32x576xf32>
    %c0_42 = arith.constant 0 : index
    %c0_43 = arith.constant 0 : index
    %132 = vector.load %arg6[%c0_42, %c0_43] : memref<32x32xbf16, #tpu.memory_space<vmem>>, vector<32x32xbf16>
    %133 = arith.truncf %131 : vector<32x576xf32> to vector<32x576xbf16>
    %cst_44 = arith.constant dense<0.000000e+00> : vector<32x576xf32>
    %134 = tpu.matmul %132, %133, %cst_44 {dimension_numbers = #tpu.dot_dimension_numbers<[1], [0], [0], [1], [0, 0, 1, 1], [], []>} : vector<32x32xbf16>, vector<32x576xbf16>, vector<32x576xf32> -> vector<32x576xf32>
    %c0_45 = arith.constant 0 : index
    %c0_46 = arith.constant 0 : index
    %135 = vector.load %arg7[%c0_45, %c0_46] : memref<32x1xf32, #tpu.memory_space<vmem>>, vector<32x1xf32>
    %136 = vector.broadcast %135 : vector<32x1xf32> to vector<32x576xf32>
    %137 = arith.addf %134, %136 : vector<32x576xf32>
    %c0_47 = arith.constant 0 : index
    %c0_48 = arith.constant 0 : index
    %138 = vector.load %arg8[%c0_47, %c0_48] : memref<1x32xbf16, #tpu.memory_space<vmem>>, vector<1x32xbf16>
    %139 = arith.truncf %131 : vector<32x576xf32> to vector<32x576xbf16>
    %cst_49 = arith.constant dense<0.000000e+00> : vector<1x576xf32>
    %140 = tpu.matmul %138, %139, %cst_49 {dimension_numbers = #tpu.dot_dimension_numbers<[1], [0], [0], [1], [0, 0, 1, 1], [], []>} : vector<1x32xbf16>, vector<32x576xbf16>, vector<1x576xf32> -> vector<1x576xf32>
    %c0_50 = arith.constant 0 : index
    %c0_51 = arith.constant 0 : index
    %141 = vector.load %arg9[%c0_50, %c0_51] : memref<1x1xf32, #tpu.memory_space<vmem>>, vector<1x1xf32>
    %142 = vector.broadcast %141 : vector<1x1xf32> to vector<1x576xf32>
    %143 = arith.addf %140, %142 : vector<1x576xf32>
    %cst_52 = arith.constant -1.000000e+30 : f32
    %144 = vector.broadcast %cst_52 : f32 to vector<1x576xf32>
    %145 = arith.select %24, %143, %144 : vector<1x576xi1>, vector<1x576xf32>
    %cst_53 = arith.constant dense<0xFF800000> : vector<1xf32>
    %146 = vector.multi_reduction <maximumf>, %145, %cst_53 [1] : vector<1x576xf32> to vector<1xf32>
    %147 = vector.shape_cast %146 : vector<1xf32> to vector<1x1xf32>
    %148 = vector.broadcast %147 : vector<1x1xf32> to vector<1x576xf32>
    %149 = arith.subf %145, %148 : vector<1x576xf32>
    %150 = math.exp %149 : vector<1x576xf32>
    %151 = arith.mulf %150, %27 : vector<1x576xf32>
    %cst_54 = arith.constant dense<0.000000e+00> : vector<1x24xf32>
    %152 = tpu.matmul %151, %41, %cst_54 {dimension_numbers = #tpu.dot_dimension_numbers<[1], [0], [0], [1], [0, 0, 1, 1], [], []>, precision = #tpu.contract_precision<fp32>} : vector<1x576xf32>, vector<576x24xf32>, vector<1x24xf32> -> vector<1x24xf32>
    %cst_55 = arith.constant 1.000000e-30 : f32
    %153 = vector.broadcast %cst_55 : f32 to vector<1x24xf32>
    %154 = arith.maximumf %152, %153 : vector<1x24xf32>
    %155 = vector.broadcast %151 : vector<1x576xf32> to vector<32x576xf32>
    %156 = arith.mulf %137, %155 : vector<32x576xf32>
    %cst_56 = arith.constant dense<0.000000e+00> : vector<32x24xf32>
    %157 = tpu.matmul %156, %41, %cst_56 {dimension_numbers = #tpu.dot_dimension_numbers<[1], [0], [0], [1], [0, 0, 1, 1], [], []>, precision = #tpu.contract_precision<fp32>} : vector<32x576xf32>, vector<576x24xf32>, vector<32x24xf32> -> vector<32x24xf32>
    %cst_57 = arith.constant 6.000000e+00 : f32
    %158 = vector.broadcast %cst_57 : f32 to vector<1x24xf32>
    %159 = arith.mulf %154, %158 : vector<1x24xf32>
    %160 = vector.broadcast %159 : vector<1x24xf32> to vector<32x24xf32>
    %161 = arith.divf %157, %160 : vector<32x24xf32>
    %cst_58 = arith.constant 0.000000e+00 : f32
    %162 = vector.broadcast %cst_58 : f32 to vector<32x24xf32>
    %163 = arith.cmpf ogt, %161, %162 : vector<32x24xf32>
    %cst_59 = arith.constant 0.00999999977 : f32
    %164 = vector.broadcast %cst_59 : f32 to vector<32x24xf32>
    %165 = arith.mulf %164, %161 : vector<32x24xf32>
    %166 = arith.select %163, %161, %165 : vector<32x24xi1>, vector<32x24xf32>
    %c0_60 = arith.constant 0 : index
    %c0_61 = arith.constant 0 : index
    %167 = vector.load %arg13[%c0_60, %c0_61] : memref<32x32xbf16, #tpu.memory_space<vmem>>, vector<32x32xbf16>
    %c0_62 = arith.constant 0 : index
    %c0_63 = arith.constant 0 : index
    %168 = vector.load %arg14[%c0_62, %c0_63] : memref<32x1xf32, #tpu.memory_space<vmem>>, vector<32x1xf32>
    %c0_64 = arith.constant 0 : index
    %c0_65 = arith.constant 0 : index
    %169 = vector.load %arg15[%c0_64, %c0_65] : memref<32x32xbf16, #tpu.memory_space<vmem>>, vector<32x32xbf16>
    %c0_66 = arith.constant 0 : index
    %c0_67 = arith.constant 0 : index
    %170 = vector.load %arg16[%c0_66, %c0_67] : memref<32x1xf32, #tpu.memory_space<vmem>>, vector<32x1xf32>
    %171 = arith.truncf %166 : vector<32x24xf32> to vector<32x24xbf16>
    %cst_68 = arith.constant dense<0.000000e+00> : vector<32x24xf32>
    %172 = tpu.matmul %167, %171, %cst_68 {dimension_numbers = #tpu.dot_dimension_numbers<[1], [0], [0], [1], [0, 0, 1, 1], [], []>} : vector<32x32xbf16>, vector<32x24xbf16>, vector<32x24xf32> -> vector<32x24xf32>
    %173 = vector.broadcast %168 : vector<32x1xf32> to vector<32x24xf32>
    %174 = arith.addf %172, %173 : vector<32x24xf32>
    %cst_69 = arith.constant 0.000000e+00 : f32
    %175 = vector.broadcast %cst_69 : f32 to vector<32x24xf32>
    %176 = arith.cmpf ogt, %174, %175 : vector<32x24xf32>
    %cst_70 = arith.constant 0.000000e+00 : f32
    %177 = vector.broadcast %cst_70 : f32 to vector<32x24xf32>
    %178 = arith.minimumf %174, %177 : vector<32x24xf32>
    %179 = math.exp %178 : vector<32x24xf32>
    %cst_71 = arith.constant 1.000000e+00 : f32
    %180 = vector.broadcast %cst_71 : f32 to vector<32x24xf32>
    %181 = arith.subf %179, %180 : vector<32x24xf32>
    %182 = arith.select %176, %174, %181 : vector<32x24xi1>, vector<32x24xf32>
    %183 = arith.truncf %182 : vector<32x24xf32> to vector<32x24xbf16>
    %cst_72 = arith.constant dense<0.000000e+00> : vector<32x24xf32>
    %184 = tpu.matmul %169, %183, %cst_72 {dimension_numbers = #tpu.dot_dimension_numbers<[1], [0], [0], [1], [0, 0, 1, 1], [], []>} : vector<32x32xbf16>, vector<32x24xbf16>, vector<32x24xf32> -> vector<32x24xf32>
    %185 = vector.broadcast %170 : vector<32x1xf32> to vector<32x24xf32>
    %186 = arith.addf %184, %185 : vector<32x24xf32>
    %cst_73 = arith.constant 0.000000e+00 : f32
    %187 = vector.broadcast %cst_73 : f32 to vector<32x24xf32>
    %188 = arith.cmpf ogt, %186, %187 : vector<32x24xf32>
    %cst_74 = arith.constant 0.000000e+00 : f32
    %189 = vector.broadcast %cst_74 : f32 to vector<32x24xf32>
    %190 = arith.minimumf %186, %189 : vector<32x24xf32>
    %191 = math.exp %190 : vector<32x24xf32>
    %cst_75 = arith.constant 1.000000e+00 : f32
    %192 = vector.broadcast %cst_75 : f32 to vector<32x24xf32>
    %193 = arith.subf %191, %192 : vector<32x24xf32>
    %194 = arith.select %188, %186, %193 : vector<32x24xi1>, vector<32x24xf32>
    %cst_76 = arith.constant dense<0.000000e+00> : vector<32xf32>
    %195 = vector.multi_reduction <add>, %194, %cst_76 [1] : vector<32x24xf32> to vector<32xf32>
    %196 = vector.shape_cast %195 : vector<32xf32> to vector<32x1xf32>
    %cst_77 = arith.constant 2.400000e+01 : f32
    %197 = vector.broadcast %cst_77 : f32 to vector<32x1xf32>
    %198 = arith.divf %196, %197 : vector<32x1xf32>
    %199 = vector.broadcast %198 : vector<32x1xf32> to vector<32x24xf32>
    %200 = arith.subf %194, %199 : vector<32x24xf32>
    %201 = arith.mulf %200, %200 : vector<32x24xf32>
    %cst_78 = arith.constant dense<0.000000e+00> : vector<32xf32>
    %202 = vector.multi_reduction <add>, %201, %cst_78 [1] : vector<32x24xf32> to vector<32xf32>
    %203 = vector.shape_cast %202 : vector<32xf32> to vector<32x1xf32>
    %cst_79 = arith.constant 2.400000e+01 : f32
    %204 = vector.broadcast %cst_79 : f32 to vector<32x1xf32>
    %205 = arith.divf %203, %204 : vector<32x1xf32>
    %206 = vector.broadcast %198 : vector<32x1xf32> to vector<32x24xf32>
    %207 = arith.subf %194, %206 : vector<32x24xf32>
    %cst_80 = arith.constant 9.99999974E-6 : f32
    %208 = vector.broadcast %cst_80 : f32 to vector<32x1xf32>
    %209 = arith.addf %205, %208 : vector<32x1xf32>
    %210 = math.rsqrt %209 : vector<32x1xf32>
    %211 = vector.broadcast %210 : vector<32x1xf32> to vector<32x24xf32>
    %212 = arith.mulf %207, %211 : vector<32x24xf32>
    %213 = arith.addf %166, %212 : vector<32x24xf32>
    %c0_81 = arith.constant 0 : index
    %c0_82 = arith.constant 0 : index
    %214 = vector.load %arg10[%c0_81, %c0_82] : memref<24x8xf32, #tpu.memory_space<vmem>>, vector<24x8xf32>
    %215 = arith.truncf %213 : vector<32x24xf32> to vector<32x24xbf16>
    %216 = arith.truncf %214 : vector<24x8xf32> to vector<24x8xbf16>
    %cst_83 = arith.constant dense<0.000000e+00> : vector<32x8xf32>
    %217 = tpu.matmul %215, %216, %cst_83 {dimension_numbers = #tpu.dot_dimension_numbers<[1], [0], [0], [1], [0, 0, 1, 1], [], []>} : vector<32x24xbf16>, vector<24x8xbf16>, vector<32x8xf32> -> vector<32x8xf32>
    %c0_84 = arith.constant 0 : index
    %c0_85 = arith.constant 0 : index
    %218 = vector.load %arg17[%c0_84, %c0_85] : memref<32x32xbf16, #tpu.memory_space<vmem>>, vector<32x32xbf16>
    %c0_86 = arith.constant 0 : index
    %c0_87 = arith.constant 0 : index
    %219 = vector.load %arg18[%c0_86, %c0_87] : memref<32x1xf32, #tpu.memory_space<vmem>>, vector<32x1xf32>
    %c0_88 = arith.constant 0 : index
    %c0_89 = arith.constant 0 : index
    %220 = vector.load %arg19[%c0_88, %c0_89] : memref<32x32xbf16, #tpu.memory_space<vmem>>, vector<32x32xbf16>
    %c0_90 = arith.constant 0 : index
    %c0_91 = arith.constant 0 : index
    %221 = vector.load %arg20[%c0_90, %c0_91] : memref<32x1xf32, #tpu.memory_space<vmem>>, vector<32x1xf32>
    %222 = arith.truncf %217 : vector<32x8xf32> to vector<32x8xbf16>
    %cst_92 = arith.constant dense<0.000000e+00> : vector<32x8xf32>
    %223 = tpu.matmul %218, %222, %cst_92 {dimension_numbers = #tpu.dot_dimension_numbers<[1], [0], [0], [1], [0, 0, 1, 1], [], []>} : vector<32x32xbf16>, vector<32x8xbf16>, vector<32x8xf32> -> vector<32x8xf32>
    %224 = vector.broadcast %219 : vector<32x1xf32> to vector<32x8xf32>
    %225 = arith.addf %223, %224 : vector<32x8xf32>
    %cst_93 = arith.constant 0.000000e+00 : f32
    %226 = vector.broadcast %cst_93 : f32 to vector<32x8xf32>
    %227 = arith.cmpf ogt, %225, %226 : vector<32x8xf32>
    %cst_94 = arith.constant 0.000000e+00 : f32
    %228 = vector.broadcast %cst_94 : f32 to vector<32x8xf32>
    %229 = arith.minimumf %225, %228 : vector<32x8xf32>
    %230 = math.exp %229 : vector<32x8xf32>
    %cst_95 = arith.constant 1.000000e+00 : f32
    %231 = vector.broadcast %cst_95 : f32 to vector<32x8xf32>
    %232 = arith.subf %230, %231 : vector<32x8xf32>
    %233 = arith.select %227, %225, %232 : vector<32x8xi1>, vector<32x8xf32>
    %234 = arith.truncf %233 : vector<32x8xf32> to vector<32x8xbf16>
    %cst_96 = arith.constant dense<0.000000e+00> : vector<32x8xf32>
    %235 = tpu.matmul %220, %234, %cst_96 {dimension_numbers = #tpu.dot_dimension_numbers<[1], [0], [0], [1], [0, 0, 1, 1], [], []>} : vector<32x32xbf16>, vector<32x8xbf16>, vector<32x8xf32> -> vector<32x8xf32>
    %236 = vector.broadcast %221 : vector<32x1xf32> to vector<32x8xf32>
    %237 = arith.addf %235, %236 : vector<32x8xf32>
    %cst_97 = arith.constant 0.000000e+00 : f32
    %238 = vector.broadcast %cst_97 : f32 to vector<32x8xf32>
    %239 = arith.cmpf ogt, %237, %238 : vector<32x8xf32>
    %cst_98 = arith.constant 0.000000e+00 : f32
    %240 = vector.broadcast %cst_98 : f32 to vector<32x8xf32>
    %241 = arith.minimumf %237, %240 : vector<32x8xf32>
    %242 = math.exp %241 : vector<32x8xf32>
    %cst_99 = arith.constant 1.000000e+00 : f32
    %243 = vector.broadcast %cst_99 : f32 to vector<32x8xf32>
    %244 = arith.subf %242, %243 : vector<32x8xf32>
    %245 = arith.select %239, %237, %244 : vector<32x8xi1>, vector<32x8xf32>
    %cst_100 = arith.constant dense<0.000000e+00> : vector<32xf32>
    %246 = vector.multi_reduction <add>, %245, %cst_100 [1] : vector<32x8xf32> to vector<32xf32>
    %247 = vector.shape_cast %246 : vector<32xf32> to vector<32x1xf32>
    %cst_101 = arith.constant 8.000000e+00 : f32
    %248 = vector.broadcast %cst_101 : f32 to vector<32x1xf32>
    %249 = arith.divf %247, %248 : vector<32x1xf32>
    %250 = vector.broadcast %249 : vector<32x1xf32> to vector<32x8xf32>
    %251 = arith.subf %245, %250 : vector<32x8xf32>
    %252 = arith.mulf %251, %251 : vector<32x8xf32>
    %cst_102 = arith.constant dense<0.000000e+00> : vector<32xf32>
    %253 = vector.multi_reduction <add>, %252, %cst_102 [1] : vector<32x8xf32> to vector<32xf32>
    %254 = vector.shape_cast %253 : vector<32xf32> to vector<32x1xf32>
    %cst_103 = arith.constant 8.000000e+00 : f32
    %255 = vector.broadcast %cst_103 : f32 to vector<32x1xf32>
    %256 = arith.divf %254, %255 : vector<32x1xf32>
    %257 = vector.broadcast %249 : vector<32x1xf32> to vector<32x8xf32>
    %258 = arith.subf %245, %257 : vector<32x8xf32>
    %cst_104 = arith.constant 9.99999974E-6 : f32
    %259 = vector.broadcast %cst_104 : f32 to vector<32x1xf32>
    %260 = arith.addf %256, %259 : vector<32x1xf32>
    %261 = math.rsqrt %260 : vector<32x1xf32>
    %262 = vector.broadcast %261 : vector<32x1xf32> to vector<32x8xf32>
    %263 = arith.mulf %258, %262 : vector<32x8xf32>
    %264 = arith.addf %217, %263 : vector<32x8xf32>
    %c0_105 = arith.constant 0 : index
    %c0_106 = arith.constant 0 : index
    %265 = vector.load %arg12[%c0_105, %c0_106] : memref<8x24xf32, #tpu.memory_space<vmem>>, vector<8x24xf32>
    %266 = arith.truncf %264 : vector<32x8xf32> to vector<32x8xbf16>
    %267 = arith.truncf %265 : vector<8x24xf32> to vector<8x24xbf16>
    %cst_107 = arith.constant dense<0.000000e+00> : vector<32x24xf32>
    %268 = tpu.matmul %266, %267, %cst_107 {dimension_numbers = #tpu.dot_dimension_numbers<[1], [0], [0], [1], [0, 0, 1, 1], [], []>} : vector<32x8xbf16>, vector<8x24xbf16>, vector<32x24xf32> -> vector<32x24xf32>
    %c0_108 = arith.constant 0 : index
    %c0_109 = arith.constant 0 : index
    %269 = vector.load %arg11[%c0_108, %c0_109] : memref<8x24xf32, #tpu.memory_space<vmem>>, vector<8x24xf32>
    %270 = arith.truncf %264 : vector<32x8xf32> to vector<32x8xbf16>
    %271 = arith.truncf %269 : vector<8x24xf32> to vector<8x24xbf16>
    %cst_110 = arith.constant dense<0.000000e+00> : vector<32x24xf32>
    %272 = tpu.matmul %270, %271, %cst_110 {dimension_numbers = #tpu.dot_dimension_numbers<[1], [0], [0], [1], [0, 0, 1, 1], [], []>} : vector<32x8xbf16>, vector<8x24xbf16>, vector<32x24xf32> -> vector<32x24xf32>
    %273 = arith.mulf %268, %272 : vector<32x24xf32>
    %274 = tpu.concatenate %273, %213 in 0 : vector<32x24xf32>, vector<32x24xf32> -> vector<64x24xf32>
    %c0_111 = arith.constant 0 : index
    %c0_112 = arith.constant 0 : index
    %275 = vector.load %arg21[%c0_111, %c0_112] : memref<32x64xbf16, #tpu.memory_space<vmem>>, vector<32x64xbf16>
    %c0_113 = arith.constant 0 : index
    %c0_114 = arith.constant 0 : index
    %276 = vector.load %arg22[%c0_113, %c0_114] : memref<32x1xf32, #tpu.memory_space<vmem>>, vector<32x1xf32>
    %c0_115 = arith.constant 0 : index
    %c0_116 = arith.constant 0 : index
    %277 = vector.load %arg23[%c0_115, %c0_116] : memref<32x32xbf16, #tpu.memory_space<vmem>>, vector<32x32xbf16>
    %c0_117 = arith.constant 0 : index
    %c0_118 = arith.constant 0 : index
    %278 = vector.load %arg24[%c0_117, %c0_118] : memref<32x1xf32, #tpu.memory_space<vmem>>, vector<32x1xf32>
    %279 = arith.truncf %274 : vector<64x24xf32> to vector<64x24xbf16>
    %cst_119 = arith.constant dense<0.000000e+00> : vector<32x24xf32>
    %280 = tpu.matmul %275, %279, %cst_119 {dimension_numbers = #tpu.dot_dimension_numbers<[1], [0], [0], [1], [0, 0, 1, 1], [], []>} : vector<32x64xbf16>, vector<64x24xbf16>, vector<32x24xf32> -> vector<32x24xf32>
    %281 = vector.broadcast %276 : vector<32x1xf32> to vector<32x24xf32>
    %282 = arith.addf %280, %281 : vector<32x24xf32>
    %cst_120 = arith.constant 0.000000e+00 : f32
    %283 = vector.broadcast %cst_120 : f32 to vector<32x24xf32>
    %284 = arith.cmpf ogt, %282, %283 : vector<32x24xf32>
    %cst_121 = arith.constant 0.000000e+00 : f32
    %285 = vector.broadcast %cst_121 : f32 to vector<32x24xf32>
    %286 = arith.minimumf %282, %285 : vector<32x24xf32>
    %287 = math.exp %286 : vector<32x24xf32>
    %cst_122 = arith.constant 1.000000e+00 : f32
    %288 = vector.broadcast %cst_122 : f32 to vector<32x24xf32>
    %289 = arith.subf %287, %288 : vector<32x24xf32>
    %290 = arith.select %284, %282, %289 : vector<32x24xi1>, vector<32x24xf32>
    %291 = arith.truncf %290 : vector<32x24xf32> to vector<32x24xbf16>
    %cst_123 = arith.constant dense<0.000000e+00> : vector<32x24xf32>
    %292 = tpu.matmul %277, %291, %cst_123 {dimension_numbers = #tpu.dot_dimension_numbers<[1], [0], [0], [1], [0, 0, 1, 1], [], []>} : vector<32x32xbf16>, vector<32x24xbf16>, vector<32x24xf32> -> vector<32x24xf32>
    %293 = vector.broadcast %278 : vector<32x1xf32> to vector<32x24xf32>
    %294 = arith.addf %292, %293 : vector<32x24xf32>
    %cst_124 = arith.constant 0.000000e+00 : f32
    %295 = vector.broadcast %cst_124 : f32 to vector<32x24xf32>
    %296 = arith.cmpf ogt, %294, %295 : vector<32x24xf32>
    %cst_125 = arith.constant 0.000000e+00 : f32
    %297 = vector.broadcast %cst_125 : f32 to vector<32x24xf32>
    %298 = arith.minimumf %294, %297 : vector<32x24xf32>
    %299 = math.exp %298 : vector<32x24xf32>
    %cst_126 = arith.constant 1.000000e+00 : f32
    %300 = vector.broadcast %cst_126 : f32 to vector<32x24xf32>
    %301 = arith.subf %299, %300 : vector<32x24xf32>
    %302 = arith.select %296, %294, %301 : vector<32x24xi1>, vector<32x24xf32>
    %cst_127 = arith.constant dense<0.000000e+00> : vector<32xf32>
    %303 = vector.multi_reduction <add>, %302, %cst_127 [1] : vector<32x24xf32> to vector<32xf32>
    %304 = vector.shape_cast %303 : vector<32xf32> to vector<32x1xf32>
    %cst_128 = arith.constant 2.400000e+01 : f32
    %305 = vector.broadcast %cst_128 : f32 to vector<32x1xf32>
    %306 = arith.divf %304, %305 : vector<32x1xf32>
    %307 = vector.broadcast %306 : vector<32x1xf32> to vector<32x24xf32>
    %308 = arith.subf %302, %307 : vector<32x24xf32>
    %309 = arith.mulf %308, %308 : vector<32x24xf32>
    %cst_129 = arith.constant dense<0.000000e+00> : vector<32xf32>
    %310 = vector.multi_reduction <add>, %309, %cst_129 [1] : vector<32x24xf32> to vector<32xf32>
    %311 = vector.shape_cast %310 : vector<32xf32> to vector<32x1xf32>
    %cst_130 = arith.constant 2.400000e+01 : f32
    %312 = vector.broadcast %cst_130 : f32 to vector<32x1xf32>
    %313 = arith.divf %311, %312 : vector<32x1xf32>
    %314 = vector.broadcast %306 : vector<32x1xf32> to vector<32x24xf32>
    %315 = arith.subf %302, %314 : vector<32x24xf32>
    %cst_131 = arith.constant 9.99999974E-6 : f32
    %316 = vector.broadcast %cst_131 : f32 to vector<32x1xf32>
    %317 = arith.addf %313, %316 : vector<32x1xf32>
    %318 = math.rsqrt %317 : vector<32x1xf32>
    %319 = vector.broadcast %318 : vector<32x1xf32> to vector<32x24xf32>
    %320 = arith.mulf %315, %319 : vector<32x24xf32>
    %c0_132 = arith.constant 0 : index
    %c0_133 = arith.constant 0 : index
    %321 = vector.load %arg25[%c0_132, %c0_133] : memref<8x32xbf16, #tpu.memory_space<vmem>>, vector<8x32xbf16>
    %322 = arith.truncf %320 : vector<32x24xf32> to vector<32x24xbf16>
    %cst_134 = arith.constant dense<0.000000e+00> : vector<8x24xf32>
    %323 = tpu.matmul %321, %322, %cst_134 {dimension_numbers = #tpu.dot_dimension_numbers<[1], [0], [0], [1], [0, 0, 1, 1], [], []>} : vector<8x32xbf16>, vector<32x24xbf16>, vector<8x24xf32> -> vector<8x24xf32>
    %c0_135 = arith.constant 0 : index
    %c0_136 = arith.constant 0 : index
    %324 = vector.load %arg26[%c0_135, %c0_136] : memref<8x1xf32, #tpu.memory_space<vmem>>, vector<8x1xf32>
    %325 = vector.broadcast %324 : vector<8x1xf32> to vector<8x24xf32>
    %326 = arith.addf %323, %325 : vector<8x24xf32>
    %c0_137 = arith.constant 0 : index
    %c0_138 = arith.constant 0 : index
    %327 = vector.load %arg27[%c0_137, %c0_138] : memref<8x24xf32, #tpu.memory_space<vmem>>, vector<8x24xf32>
    tpu.vector_store %arg27[%c0_137, %c0_138], %326 {strides = array<i32>} : memref<8x24xf32, #tpu.memory_space<vmem>>, vector<8x24xf32>,
    return
  }
}

</mosaic_0001>

<bundles_post_ra>
// kernel: cnn_encoder_sym_forward.1
= control target key start
LH: loop header
LB: loop body
LE: loop exit
PB: predicated region body
PF: predicated region fallthrough
CT: control target
= control target key end

     0   :  { %vm16829_vm0 = vcmask 1043456   ;;  %vm139_vm1 = vcmask 519168   ;;  %vm16832_vm2 = vcmask 1040384   ;;  %s11313_s28 = smov 24   ;;  %s11316_s29 = smov 48   ;;  %vm690_vm13 = vcmask 1031168   ;;  %s16791_s0 = inlined_call_operand.vmem [shape: f32[4,576], index: 0, kind: input, shape index: {}]   ;;  %s16792_s1 = inlined_call_operand.vmem [shape: f32[4,576], index: 1, kind: input, shape index: {}]   ;;  %s16793_s2 = inlined_call_operand.vmem [shape: bf16[32,25], index: 2, kind: input, shape index: {}]   ;;  %s16794_s3 = inlined_call_operand.vmem [shape: f32[32,1], index: 3, kind: input, shape index: {}]   ;;  %s16795_s4 = inlined_call_operand.vmem [shape: bf16[32,160], index: 4, kind: input, shape index: {}]   ;;  %s16796_s5 = inlined_call_operand.vmem [shape: f32[32,1], index: 5, kind: input, shape index: {}]   ;;  %s16797_s9 = inlined_call_operand.<no memory space> [shape: f32[1,1], index: 9, kind: input, shape index: {}]   ;;  %s16798_s7 = inlined_call_operand.vmem [shape: f32[32,1], index: 7, kind: input, shape index: {}]   ;;  %s16799_s14 = inlined_call_operand.vmem [shape: f32[32,1], index: 14, kind: input, shape index: {}]   ;;  %s16800_s16 = inlined_call_operand.vmem [shape: f32[32,1], index: 16, kind: input, shape index: {}]   ;;  %s16801_s6 = inlined_call_operand.vmem [shape: bf16[32,32], index: 6, kind: input, shape index: {}]   ;;  %s16802_s8 = inlined_call_operand.vmem [shape: bf16[1,32], index: 8, kind: input, shape index: {}]   ;;  %s16803_s13 = inlined_call_operand.vmem [shape: bf16[32,32], index: 13, kind: input, shape index: {}]   ;;  %s16804_s15 = inlined_call_operand.vmem [shape: bf16[32,32], index: 15, kind: input, shape index: {}]   ;;  %s16805_s18 = inlined_call_operand.vmem [shape: f32[32,1], index: 18, kind: input, shape index: {}]   ;;  %s16806_s20 = inlined_call_operand.vmem [shape: f32[32,1], index: 20, kind: input, shape index: {}]   ;;  %s16807_s10 = inlined_call_operand.vmem [shape: f32[24,8], index: 10, kind: input, shape index: {}]   ;;  %s16808_s17 = inlined_call_operand.vmem [shape: bf16[32,32], index: 17, kind: input, shape index: {}]   ;;  %s16809_s19 = inlined_call_operand.vmem [shape: bf16[32,32], index: 19, kind: input, shape index: {}]   ;;  %s16810_s22 = inlined_call_operand.vmem [shape: f32[32,1], index: 22, kind: input, shape index: {}]   ;;  %s16811_s24 = inlined_call_operand.vmem [shape: f32[32,1], index: 24, kind: input, shape index: {}]   ;;  %s16812_s12 = inlined_call_operand.vmem [shape: f32[8,24], index: 12, kind: input, shape index: {}]   ;;  %s16813_s11 = inlined_call_operand.vmem [shape: f32[8,24], index: 11, kind: input, shape index: {}]   ;;  %s16814_s21 = inlined_call_operand.vmem [shape: bf16[32,64], index: 21, kind: input, shape index: {}]   ;;  %s16815_s23 = inlined_call_operand.vmem [shape: bf16[32,32], index: 23, kind: input, shape index: {}]   ;;  %s16816_s26 = inlined_call_operand.vmem [shape: f32[8,1], index: 26, kind: input, shape index: {}]   ;;  %s16817_s25 = inlined_call_operand.vmem [shape: bf16[8,32], index: 25, kind: input, shape index: {}]   ;;  %s16818_s27 = inlined_call_operand.vmem [shape: f32[8,24], index: 27, kind: output, shape index: {}]  }
   0x1   :  { %17281 = sst [smem:[#allocation154_spill]] %s16791_s0  ;;  %s11314_s0 = smov 120   ;;  %vm672_vm14 = vcmask 1039360   ;;  %vm696_vm15 = vcmask 506880  }
   0x2   :  { %17282 = sst [smem:[#allocation155_spill]] %s16792_s1  ;;  %s11317_s1 = smov 40  }
   0x3   :  { %17283 = sst [smem:[#allocation156_spill]] %s16793_s2  ;;  %s11309_s2 = smov 125  }
   0x4   :  { %17284 = sst [smem:[#allocation157_spill]] %s16794_s3  ;;  %s11310_s3 = smov 127  }
   0x5   :  { %17285 = sst [smem:[#allocation158_spill]] %s16795_s4  ;;  %s17296_s30 = sld [smem:[#allocation157_spill]] }
   0x6   :  { %17286 = sst [smem:[#allocation159_spill]] %s16796_s5 }
   0x7   :  { %17287 = sst [smem:[#allocation160_spill]] %s16797_s9  ;;  %s11318_s9 = smov 72  }
   0x8   :  { %17288 = sst [smem:[#allocation161_spill]] %s16798_s7  ;;  %s11311_s7 = smov 124  }
   0x9   :  { %17289 = sst [smem:[#allocation162_spill]] %s16799_s14 }
   0xa   :  { %17290 = sst [smem:[#allocation163_spill]] %s16800_s16  ;;  %s17294_s14 = sld [smem:[#allocation154_spill]] }
   0xb   :  { %17291 = sst [smem:[#allocation164_spill]] %s16801_s6  ;;  %s11315_s6 = smov 16  }
   0xc   :  { %17292 = sst [smem:[#allocation165_spill]] %s16802_s8  ;;  %s11319_s8 = smov 64  }
   0xd   :  { %17293 = sst [smem:[#allocation166_spill]] %s16813_s11  ;;  %s17295_s11 = sld [smem:[#allocation155_spill]] }
   0xe   :  { %s11321_s16 = smov 8   ;;  %s17344_s5 = sld [smem:[#allocation162_spill]] }
  0x10   :  { %v89_v0 = vld [vmem:[%s17294_s14] sm:$0xff]  ;;  %v90_v2 = vld [vmem:[%s17294_s14 + $0x8] sm:$0xff]  ;;  %v11489_v5 = vld [vmem:[%s17294_s14 + $0x10] sm:$0xf]  ;;  %s17297_s14 = sld [smem:[#allocation156_spill]] }
  0x13   :  { %v92_v1 = vld [vmem:[%s17295_s11] sm:$0xff]  ;;  %v93_v4 = vld [vmem:[%s17295_s11 + $0x8] sm:$0xff]  ;;  %v11494_v6 = vld [vmem:[%s17295_s11 + $0x10] sm:$0xf]  ;;  %s11308_s11 = smov 126  }
  0x14   :  { %v98_v3 = vsub.f32 %v92_v1, %v89_v0  ;;  %v99_v7 = vsub.f32 %v93_v4, %v90_v2  ;;  %v100_v8 = vsub.f32 %v11494_v6, %v11489_v5  ;;  %v95_v47 = vmul.f32 %v92_v1, %v89_v0 }
  0x15   :  { %v96_v49 = vmul.f32 %v93_v4, %v90_v2 }
  0x16   :  { %v101_v9 = vmul.f32 %v98_v3, %v98_v3  ;;  %v102_v10 = vmul.f32 %v99_v7, %v99_v7  ;;  %v103_v11 = vmul.f32 %v100_v8, %v100_v8  ;;  %v185_v51 = vcombine.high %v95_v47, %v95_v47 }
  0x17   :  { %v186_v52 = vcombine.high %v96_v49, %v96_v49  ;;  %v187_v53 = vrot.slane %v95_v47, 7  ;;  %v189_v55 = vrot.slane %v96_v49, 7 }
  0x18   :  { %v106_v12 = vcombine.high %v101_v9, %v101_v9  ;;  %v111_v13 = vsel %vm16829_vm0, %v101_v9, 0.0  ;;  %v107_v15 = vcombine.high %v102_v10, %v102_v10  ;;  %v125_v16 = vsel %vm16829_vm0, %v102_v10, 0.0 }
  0x19   :  { %v112_v14 = vrot.slane %v111_v13, 4  ;;  %v126_v18 = vrot.slane %v125_v16, 4  ;;  %v140_v19 = vsel %vm139_vm1, %v103_v11, 0.0  ;;  %v188_v54 = vrot.slane %v185_v51, 7 }
  0x1a   :  { %v118_v17 = vsel %vm16829_vm0, %v106_v12, 0.0  ;;  %v132_v22 = vsel %vm16829_vm0, %v107_v15, 0.0  ;;  %v141_v23 = vrot.slane %v140_v19, 4  ;;  %v190_v58 = vrot.slane %v186_v52, 7 }
  0x1b   :  { %v113_v20 = vadd.f32 %v112_v14, %v111_v13  ;;  %v119_v21 = vrot.slane %v118_v17, 4  ;;  %v127_v24 = vadd.f32 %v126_v18, %v125_v16  ;;  %v133_v25 = vrot.slane %v132_v22, 4 }
  0x1c   :  { %v142_v28 = vadd.f32 %v141_v23, %v140_v19  ;;  %v97_v19 = vmul.f32 %v11494_v6, %v11489_v5  ;;  %vm708_vm1 = vcmask 1022976  }
  0x1d   :  { %v114_v26 = vrot.slane %v113_v20, 2  ;;  %v120_v27 = vadd.f32 %v119_v21, %v118_v17  ;;  %v128_v29 = vrot.slane %v127_v24, 2  ;;  %v134_v30 = vadd.f32 %v133_v25, %v132_v22 }
  0x1e   :  { %v143_v33 = vrot.slane %v142_v28, 2  ;;  %v191_v5 = vrot.slane %v97_v19, 7 }
  0x1f   :  { %v115_v31 = vadd.f32 %v114_v26, %v113_v20  ;;  %v121_v32 = vrot.slane %v120_v27, 2  ;;  %v129_v34 = vadd.f32 %v128_v29, %v127_v24  ;;  %v135_v35 = vrot.slane %v134_v30, 2 }
  0x20   :  { %v144_v38 = vadd.f32 %v143_v33, %v142_v28  ;;  %v16836_v28 = vmov 0   ;;  %v203_v29 = vlaneseq  ;;  %v817_v33 = vld [vmem:[%s17296_s30 + $0x10] sm:$0xff] }
  0x21   :  { %v116_v36 = vrot.slane %v115_v31, 1  ;;  %v122_v37 = vadd.f32 %v121_v32, %v120_v27  ;;  %v130_v39 = vrot.slane %v129_v34, 1  ;;  %v136_v40 = vadd.f32 %v135_v35, %v134_v30  ;;  %905 = vmatprep.mubr.bf16.mxu0 %v16836_v28  ;;  %958 = vmatprep.mubr.bf16.mxu1 %v16836_v28  ;;  %v816_v30 = vld [vmem:[%s17296_s30 + $0x8] sm:$0xff] }
  0x22   :  { %v145_v46 = vrot.slane %v144_v38, 1  ;;  %10925 = vset.pattern.permute.xlu1 %v16836_v28  ;;  %10924 = vset.pattern.permute.xlu0 %v16836_v28  ;;  %v11552_v32 = vand.u32 127, %v203_v29 }
  0x23   :  { %v117_v41 = vadd.f32 %v116_v36, %v115_v31  ;;  %v123_v42 = vrot.slane %v122_v37, 1  ;;  %v131_v43 = vadd.f32 %v130_v39, %v129_v34  ;;  %v137_v44 = vrot.slane %v136_v40, 1  ;;  %v815_v31 = vld [vmem:[%s17296_s30] sm:$0xff]  ;;  %v818_v34 = vld [vmem:[%s17296_s30 + $0x18] sm:$0xff] }
  0x24   :  { %v146_v50 = vadd.f32 %v145_v46, %v144_v38 }
  0x25   :  { %v124_v45 = vadd.f32 %v123_v42, %v122_v37  ;;  %11198 = vrsqrt.f32 %v117_v41  ;;  %v138_v48 = vadd.f32 %v137_v44, %v136_v40  ;;  %vm149_vm3 = vcmp.eq.f32.partialorder %v117_v41, inf }
  0x26   :  { %11200 = vrsqrt.f32 %v131_v43  ;;  %vm151_vm4 = vcmp.eq.f32.partialorder %v117_v41, 0.0  ;;  %v152_v57 = vand.u32 2147483648, %v117_v41  ;;  %vm163_vm6 = vcmp.eq.f32.partialorder %v131_v43, inf }
  0x27   :  { %11202 = vrsqrt.f32 %v124_v45  ;;  %vm156_vm5 = vcmp.eq.f32.partialorder %v124_v45, inf  ;;  %v166_v61 = vand.u32 2147483648, %v131_v43  ;;  %vm158_vm7 = vcmp.eq.f32.partialorder %v124_v45, 0.0 }
  0x28   :  { %11204 = vrsqrt.f32 %v138_v48  ;;  %v159_v63 = vand.u32 2147483648, %v124_v45  ;;  %vm165_vm8 = vcmp.eq.f32.partialorder %v131_v43, 0.0  ;;  %vm170_vm9 = vcmp.eq.f32.partialorder %v138_v48, inf }
  0x29   :  { %11206 = vrsqrt.f32 %v146_v50  ;;  %v173_v4 = vand.u32 2147483648, %v138_v48  ;;  %vm172_vm10 = vcmp.eq.f32.partialorder %v138_v48, 0.0  ;;  %vm177_vm11 = vcmp.eq.f32.partialorder %v146_v50, inf }
  0x2a   :  { %v180_v23 = vand.u32 2147483648, %v146_v50  ;;  %vm179_vm12 = vcmp.eq.f32.partialorder %v146_v50, 0.0 }
  0x2f   :  { %v11199_v56 = vpop.eup %11198 }
  0x30   :  { %v11201_v59 = vpop.eup %11200  ;;  %v148_v60 = vmul.f32 %v11199_v56, %v117_v41 }
  0x31   :  { %v11203_v62 = vpop.eup %11202  ;;  %v162_v0 = vmul.f32 %v11201_v59, %v131_v43 }
  0x32   :  { %v11205_v1 = vpop.eup %11204  ;;  %v150_v2 = vsel %vm149_vm3, %v117_v41, %v148_v60  ;;  %v155_v3 = vmul.f32 %v11203_v62, %v124_v45  ;;  %vm778_vm3 = vcmask 1044480  }
  0x33   :  { %v153_v7 = vsel %vm151_vm4, %v152_v57, %v150_v2  ;;  %v164_v8 = vsel %vm163_vm6, %v131_v43, %v162_v0  ;;  %v169_v9 = vmul.f32 %v11205_v1, %v138_v48  ;;  %v11207_v13 = vpop.eup %11206  ;;  %vm784_vm4 = vcmask 1041408  }
  0x34   :  { %v11504_v10 = vsel %vm16832_vm2, %v153_v7, %v187_v53  ;;  %v157_v11 = vsel %vm156_vm5, %v124_v45, %v155_v3  ;;  %v167_v12 = vsel %vm165_vm8, %v166_v61, %v164_v8  ;;  %v176_v20 = vmul.f32 %v11207_v13, %v146_v50 }
  0x35   :  { %680 = vrot.lane.b32.xlu1 %v11504_v10, %s11308_s11  ;;  %v160_v14 = vsel %vm158_vm7, %v159_v63, %v157_v11  ;;  %v11511_v15 = vsel %vm16832_vm2, %v167_v12, %v189_v55  ;;  %v171_v16 = vsel %vm170_vm9, %v138_v48, %v169_v9  ;;  %vm790_vm5 = vcmask 1046528  }
  0x36   :  { %v11514_v17 = vsel %vm16832_vm2, %v160_v14, %v188_v54  ;;  %v174_v18 = vsel %vm172_vm10, %v173_v4, %v171_v16  ;;  %v178_v24 = vsel %vm177_vm11, %v146_v50, %v176_v20  ;;  %vm726_vm6 = vcmask 1014784  }
  0x37   :  { %v10884_v21 = vpack.i.bf16 %v11511_v15, %v11514_v17  ;;  %v11521_v22 = vsel %vm16832_vm2, %v174_v18, %v190_v58  ;;  %v181_v6 = vsel %vm179_vm12, %v180_v23, %v178_v24  ;;  %vm732_vm7 = vcmask 490496  }
  0x38   :  { %v10894_v25 = vpack.i.bf16 %v11521_v22, %v11504_v10  ;;  %v11530_v26 = vsel %vm16832_vm2, %v181_v6, %v191_v5  ;;  %vm678_vm8 = vcmask 515072   ;;  %v11328_v61 = vmov 65535  }
  0x39   :  { %698 = vrot.lane.b32.xlu1 %v11504_v10, %s11309_s2  ;;  %10885 = vrot.lane.b32.xlu0 %v10884_v21, %s11310_s3  ;;  %v10909_v27 = vpack.i.bf16 %v11530_v26, %v11521_v22  ;;  %v856_v62 = vsel %vm16829_vm0, 4294967295, %v11328_v61  ;;  %vm714_vm9 = vcmask 498688   ;;  %vm849_vm10 = vcmask 203776  }
  0x3a   :  { %v11604_v18 = vsel %vm778_vm3, %v856_v62, 0  ;;  %vm16830_vm11 = vcmask 195584   ;;  %vm245_vm12 = vcmask 130048   ;;  %vm243_vm2 = vcmask 982016  }
  0x3d   :  { %10895 = vrot.lane.b32.xlu1 %v10894_v25, %s11310_s3  ;;  %10890 = vrot.lane.b32.xlu0 %v10884_v21, %s11308_s11 }
  0x41   :  { %716 = vrot.lane.b32.xlu1 %v11504_v10, %s11311_s7  ;;  %10900 = vrot.lane.b32.xlu0 %v10884_v21, %s11309_s2 }
  0x45   :  { %10910 = vrot.lane.b32.xlu1 %v10909_v27, %s11308_s11  ;;  %10905 = vrot.lane.b32.xlu0 %v10884_v21, %s11311_s7 }
  0x49   :  { %10920 = vrot.lane.b32.xlu1 %v10909_v27, %s11311_s7  ;;  %670 = vrot.lane.b32.xlu0 %v11530_v26, %s11310_s3 }
  0x4d   :  { %10915 = vrot.lane.b32.xlu0 %v10909_v27, %s11309_s2  ;;  %826 = vperm.xlu1 %10925, %v816_v30   ;;  %s11320_s2 = smov 112  }
  0x51   :  { %821 = vperm.xlu0 %10924, %v815_v31   ;;  %205 = vrot.lane.b32.xlu1 %v11552_v32, %s11313_s28 }
  0x55   :  { %213 = vrot.lane.b32.xlu0 %v11552_v32, %s11314_s0  ;;  %215 = vrot.lane.b32.xlu1 %v11552_v32, %s11315_s6  ;;  %s11322_s6 = smov 96  }
  0x59   :  { %207 = vrot.lane.b32.xlu0 %v11552_v32, %s11316_s29  ;;  %217 = vrot.lane.b32.xlu1 %v11552_v32, %s11317_s1  ;;  %s11323_s29 = smov 88   ;;  %s11324_s1 = smov 32  }
  0x5d   :  { %209 = vrot.lane.b32.xlu0 %v11552_v32, %s11318_s9  ;;  %219 = vrot.lane.b32.xlu1 %v11552_v32, %s11319_s8  ;;  %s11325_s9 = smov 56   ;;  %s11326_s8 = smov 80  }
  0x61   :  { %223 = vrot.lane.b32.xlu0 %v11552_v32, %s11320_s2  ;;  %225 = vrot.lane.b32.xlu1 %v11552_v32, %s11321_s16  ;;  %s11327_s2 = smov 104  }
  0x65   :  { %831 = vperm.xlu0 %10924, %v817_v33   ;;  %836 = vperm.xlu1 %10925, %v818_v34  }
  0x69   :  { %211 = vrot.lane.b32.xlu0 %v11552_v32, %s11322_s6  ;;  %221 = vrot.lane.b32.xlu1 %v11552_v32, %s11323_s29  ;;  %s17306_s29 = sld [smem:[#allocation158_spill]] }
  0x6d   :  { %227 = vrot.lane.b32.xlu0 %v11552_v32, %s11324_s1  ;;  %229 = vrot.lane.b32.xlu1 %v11552_v32, %s11325_s9  ;;  %s17307_s9 = sld [smem:[#allocation159_spill]]  ;;  %s17329_s1 = sld [smem:[#allocation160_spill]] }
  0x71   :  { %231 = vrot.lane.b32.xlu0 %v11552_v32, %s11326_s8  ;;  %233 = vrot.lane.b32.xlu1 %v11552_v32, %s11327_s2  ;;  %s17343_s8 = sld [smem:[#allocation161_spill]] }
  0xa7   :  { %v681_v35 = vpop.permute.xlu1 %680 }
  0xab   :  { %v699_v36 = vpop.permute.xlu1 %698  ;;  %v10886_v37 = vpop.permute.xlu0 %10885 }
  0xac   :  { %v10888_v38 = vunpack.i.h.bf16 %v10886_v37  ;;  %v10887_v39 = vunpack.i.l.bf16 %v10886_v37 }
  0xae   :  { %v674_v47 = vsel %vm672_vm14, %v10887_v39, %v10888_v38 }
  0xaf   :  { %v11576_v40 = vpop.permute.xlu1 %10895  ;;  %v10891_v41 = vpop.permute.xlu0 %10890  ;;  %v736_v58 = vrot.slane %v674_v47, 3 }
  0xb0   :  { %v10898_v42 = vunpack.i.h.bf16 %v11576_v40  ;;  %v10897_v43 = vunpack.i.l.bf16 %v11576_v40  ;;  %v10893_v44 = vunpack.i.h.bf16 %v10891_v41  ;;  %v10892_v45 = vunpack.i.l.bf16 %v10891_v41 }
  0xb1   :  { %v780_v13 = vsel %vm778_vm3, %v11514_v17, %v736_v58 }
  0xb2   :  { %v691_v46 = vsel %vm690_vm13, %v681_v35, %v10892_v45  ;;  %v692_v48 = vsel %vm690_vm13, %v10892_v45, %v10893_v44  ;;  %v673_v49 = vsel %vm672_vm14, %v10897_v43, %v10887_v39  ;;  %v11587_v55 = vsel %vm672_vm14, %v10888_v38, %v10898_v42 }
  0xb3   :  { %v746_v50 = vrot.slane %v691_v46, 6  ;;  %v717_v51 = vpop.permute.xlu1 %716  ;;  %v11584_v52 = vpop.permute.xlu0 %10900  ;;  %v747_v53 = vrot.slane %v692_v48, 6  ;;  %v735_v54 = vrot.slane %v673_v49, 3  ;;  %v737_v63 = vrot.slane %v11587_v55, 3 }
  0xb4   :  { %v10903_v56 = vunpack.i.h.bf16 %v11584_v52  ;;  %v10902_v57 = vunpack.i.l.bf16 %v11584_v52 }
  0xb5   :  { %v786_v3 = vsel %vm784_vm4, %v736_v58, %v747_v53  ;;  %v785_v7 = vsel %vm784_vm4, %v735_v54, %v746_v50  ;;  %v779_v23 = vsel %vm778_vm3, %v11504_v10, %v735_v54  ;;  %v781_v27 = vsel %vm778_vm3, %v11511_v15, %v737_v63 }
  0xb6   :  { %v710_v59 = vsel %vm708_vm1, %v10902_v57, %v10903_v56  ;;  %v709_v60 = vsel %vm708_vm1, %v699_v36, %v10902_v57 }
  0xb7   :  { %v10911_v0 = vpop.permute.xlu1 %10910  ;;  %v10906_v1 = vpop.permute.xlu0 %10905  ;;  %v758_v2 = vrot.slane %v710_v59, 1  ;;  %v757_v4 = vrot.slane %v709_v60, 1 }
  0xb8   :  { %v10913_v8 = vunpack.i.h.bf16 %v10911_v0  ;;  %v10912_v9 = vunpack.i.l.bf16 %v10911_v0  ;;  %v10908_v11 = vunpack.i.h.bf16 %v10906_v1  ;;  %v10907_v12 = vunpack.i.l.bf16 %v10906_v1 }
  0xb9   :  { %v792_v14 = vsel %vm790_vm5, %v786_v3, %v758_v2  ;;  %v791_v16 = vsel %vm790_vm5, %v785_v7, %v757_v4 }
  0xba   :  { %v697_v19 = vsel %vm696_vm15, %v10913_v8, 0.0  ;;  %v727_v20 = vsel %vm726_vm6, %v717_v51, %v10907_v12  ;;  %v728_v21 = vsel %vm726_vm6, %v10907_v12, %v10908_v11  ;;  %v693_v24 = vsel %vm690_vm13, %v10893_v44, %v10912_v9 }
  0xbb   :  { %v10921_v25 = vpop.permute.xlu1 %10920  ;;  %v671_v17 = vpop.permute.xlu0 %670  ;;  %v806_v5 = vpack.c.bf16 %v792_v14, %v780_v13  ;;  %v805_v6 = vpack.c.bf16 %v791_v16, %v779_v23  ;;  %v750_v35 = vrot.slane %v697_v19, 6  ;;  %v769_v10 = vrot.slane %v728_v21, 4 }
  0xbc   :  { %v10923_v30 = vunpack.i.h.bf16 %v10921_v25  ;;  %v10922_v31 = vunpack.i.l.bf16 %v10921_v25  ;;  %v676_v33 = vsel %vm672_vm14, %v10898_v42, %v671_v17  ;;  %v679_v34 = vsel %vm678_vm8, %v671_v17, 0.0 }
  0xbd   :  { %v738_v36 = vrot.slane %v676_v33, 3  ;;  %873 = vmatprep.subr.bf16.mxu0 %v806_v5  ;;  %v768_v37 = vrot.slane %v727_v20, 4  ;;  %v748_v38 = vrot.slane %v693_v24, 6  ;;  %v739_v40 = vrot.slane %v679_v34, 3  ;;  %v11177_v24 = vld [vmem:[%s17297_s14 + $0x8] sm:$0xff]  }
  0xbe   :  { %v733_v39 = vsel %vm732_vm7, %v10923_v30, 0.0  ;;  %874 = vmatpush1.bf16.msra.mxu0 %v805_v6  ;;  %v694_v41 = vsel %vm690_vm13, %v10912_v9, %v10913_v8  ;;  %v729_v15 = vsel %vm726_vm6, %v10908_v11, %v10922_v31  ;;  %v797_v42 = vsel %vm16829_vm0, %v758_v2, %v769_v10 }
  0xbf   :  { %v10916_v43 = vpop.permute.xlu0 %10915  ;;  %v796_v44 = vsel %vm16829_vm0, %v757_v4, %v768_v37  ;;  %v749_v45 = vrot.slane %v694_v41, 6  ;;  %v811_v48 = vpack.c.bf16 %v769_v10, %v797_v42  ;;  %v772_v50 = vrot.slane %v733_v39, 4 }
  0xc0   :  { %v10918_v46 = vunpack.i.h.bf16 %v10916_v43  ;;  %v10917_v47 = vunpack.i.l.bf16 %v10916_v43  ;;  %v810_v49 = vpack.c.bf16 %v768_v37, %v796_v44  ;;  %v730_v51 = vsel %vm726_vm6, %v10922_v31, %v10923_v30 }
  0xc1   :  { %v782_v53 = vsel %vm778_vm3, %v11521_v22, %v738_v36  ;;  %v788_v54 = vsel %vm784_vm4, %v738_v36, %v749_v45  ;;  %v862_v58 = vand.u32 %v11604_v18, %v811_v48  ;;  %v783_v0 = vsel %vm778_vm3, %v11530_v26, %v739_v40  ;;  %v11176_v22 = vld [vmem:[%s17297_s14] sm:$0xff]  }
  0xc2   :  { %v715_v57 = vsel %vm714_vm9, %v10918_v46, 0.0  ;;  %v859_v59 = vand.u32 %v11604_v18, %v810_v49  ;;  %v712_v60 = vsel %vm708_vm1, %v10917_v47, %v10918_v46  ;;  %v711_v1 = vsel %vm708_vm1, %v10903_v56, %v10917_v47 }
  0xc3   :  { %v761_v61 = vrot.slane %v715_v57, 1  ;;  %v760_v62 = vrot.slane %v712_v60, 1  ;;  %875 = vmatprep.subr.bf16.mxu0 %v862_v58  ;;  %v789_v2 = vsel %vm784_vm4, %v739_v40, %v750_v35  ;;  %v759_v3 = vrot.slane %v711_v1, 1 }
  0xc4   :  { %v787_v4 = vsel %vm784_vm4, %v737_v63, %v748_v38  ;;  %v771_v7 = vrot.slane %v730_v51, 4  ;;  %876 = vmatpush1.bf16.msra.mxu0 %v859_v59  ;;  %v770_v8 = vrot.slane %v729_v15, 4  ;;  %vm16831_vm1 = vcmask 64512  }
  0xc5   :  { %v794_v26 = vsel %vm790_vm5, %v788_v54, %v760_v62  ;;  %v795_v52 = vsel %vm790_vm5, %v789_v2, %v761_v61  ;;  %v800_v56 = vsel %vm16829_vm0, %v761_v61, %v772_v50  ;;  %v793_v12 = vsel %vm790_vm5, %v787_v4, %v759_v3 }
  0xc6   :  { %v808_v9 = vpack.c.bf16 %v794_v26, %v782_v53  ;;  %v809_v11 = vpack.c.bf16 %v795_v52, %v783_v0  ;;  %v799_v13 = vsel %vm16829_vm0, %v760_v62, %v771_v7  ;;  %v807_v14 = vpack.c.bf16 %v793_v12, %v781_v27 }
  0xc7   :  { %v813_v16 = vpack.c.bf16 %v771_v7, %v799_v13  ;;  %v814_v55 = vpack.c.bf16 %v772_v50, %v800_v56  ;;  %v798_v63 = vsel %vm16829_vm0, %v759_v3, %v770_v8  ;;  %7872 = vmatmul.mubr.msk.bf16.vlgmr.msra.gmra.mrb[0].mxu0 %vm849_vm10, %v11176_v22  ;;  %vm237_vm3 = vcmask 392192  }
  0xc8   :  { %926 = vmatprep.subr.bf16.mxu1 %v808_v9  ;;  %v812_v19 = vpack.c.bf16 %v770_v8, %v798_v63  ;;  %9534 = vmatprep.subr.bf16.mxu0 %v809_v11  ;;  %vm247_vm4 = vcmask 326656   ;;  %vm16857_vm5 = vcmask 261120   ;;  %vm239_vm9 = vcmask 588800  }
  0xc9   :  { %927 = vmatpush1.bf16.msra.mxu1 %v807_v14  ;;  %v868_v20 = vand.u32 %v11604_v18, %v813_v16  ;;  %v871_v21 = vand.u32 %v11604_v18, %v814_v55  ;;  %9535 = vmatpush3.bf16.msra.mxu0 %v809_v11  ;;  %vm16833_vm0 = vcmask 457728   ;;  %v11681_v57 = vshrl.u32 %v203_v29, 7 }
  0xca   :  { %915 = vmatprep.mubr.bf16.mxu0 %v16836_v28  ;;  %v865_v23 = vand.u32 %v11604_v18, %v812_v19  ;;  %v16834_v4 = vmov 0.0  }
  0xcb   :  { %928 = vmatprep.subr.bf16.mxu1 %v868_v20  ;;  %9536 = vmatprep.subr.bf16.mxu0 %v871_v21  ;;  %17298 = vst [vmem:[#allocation3_spill] sm:$0xff] %v11681_v57 }
  0xcc   :  { %v11663_v25 = vpop.permute.xlu1 %826 }
  0xcd   :  { %929 = vmatpush1.bf16.msra.mxu1 %v865_v23  ;;  %9537 = vmatpush3.bf16.msra.mxu0 %v871_v21 }
  0xcf   :  { %7873 = vmatmul.mubr.msk.bf16.gmra.mrb[4].mxu0 %vm849_vm10, %v11177_v24 }
  0xd0   :  { %7874 = vmatmul.mubr.msk.bf16.vlgmr.msra.gmra.mrb[0].mxu1 %vm849_vm10, %v11176_v22  ;;  %9538 = vmatprep.mubr.msk.bf16.mxu0 %vm849_vm10, %v11176_v22  ;;  %v11665_v18 = vpop.permute.xlu0 %821  ;;  %v206_v17 = vpop.permute.xlu1 %205  ;;  %v11700_v22 = vsub.s32 0, %v11681_v57 }
  0xd1   :  { %968 = vmatprep.mubr.bf16.mxu1 %v16836_v28  ;;  %v236_v38 = vsel %vm16830_vm11, %v11552_v32, %v206_v17  ;;  %vm251_vm11 = vcmask 719872  }
  0xd2   :  { %17299 = vst [vmem:[#allocation4_spill] sm:$0xff] %v11700_v22 }
  0xd4   :  { %v214_v5 = vpop.permute.xlu0 %213  ;;  %v216_v6 = vpop.permute.xlu1 %215 }
  0xd5   :  { %v246_v39 = vsel %vm245_vm12, %v214_v5, %v216_v6  ;;  %vm241_vm12 = vcmask 785408  }
  0xd7   :  { %9539 = vmatmul.mubr.msk.bf16.vlgmr.msra.gmra.mrb[8].mxu0 %vm849_vm10, %v11177_v24 }
  0xd8   :  { %7875 = vmatmul.mubr.msk.bf16.gmra.mrb[4].mxu1 %vm849_vm10, %v11177_v24  ;;  %v208_v27 = vpop.permute.xlu0 %207  ;;  %v218_v30 = vpop.permute.xlu1 %217  ;;  %vm16860_vm10 = vcmask 523264  }
  0xd9   :  { %v238_v43 = vsel %vm237_vm3, %v236_v38, %v208_v27  ;;  %v11674_v42 = vsel %vm247_vm4, %v246_v39, %v218_v30  ;;  %vm253_vm3 = vcmask 916480   ;;  %vm263_vm4 = vcmask 850944  }
  0xdc   :  { %v210_v31 = vpop.permute.xlu0 %209  ;;  %v220_v33 = vpop.permute.xlu1 %219 }
  0xdd   :  { %v240_v46 = vsel %vm239_vm9, %v238_v43, %v210_v31  ;;  %v250_v47 = vsel %vm16860_vm10, %v11674_v42, %v220_v33 }
  0xe0   :  { %v224_v34 = vpop.permute.xlu0 %223  ;;  %v226_v35 = vpop.permute.xlu1 %225 }
  0xe1   :  { %v256_v41 = vsel %vm16831_vm1, %v224_v34, %v226_v35  ;;  %vm261_vm1 = vcmask 654336  }
  0xe4   :  { %v11667_v36 = vpop.permute.xlu0 %831  ;;  %v11669_v10 = vpop.permute.xlu1 %836 }
  0xe8   :  { %v212_v37 = vpop.permute.xlu0 %211  ;;  %v222_v40 = vpop.permute.xlu1 %221 }
  0xe9   :  { %v242_v50 = vsel %vm241_vm12, %v240_v46, %v212_v37  ;;  %v252_v51 = vsel %vm251_vm11, %v250_v47, %v222_v40 }
  0xea   :  { %v11684_v58 = vsel %vm243_vm2, %v242_v50, %v214_v5  ;;  %v11686_v59 = vsel %vm253_vm3, %v252_v51, %v224_v34 }
  0xeb   :  { %vm265_vm9 = vcmp.lt.s32.totalorder %v11684_v58, 20  ;;  %vm281_vm12 = vcmp.le.s32.totalorder %v11684_v58, 10 }
  0xec   :  { %v228_v15 = vpop.permute.xlu0 %227  ;;  %v230_v45 = vpop.permute.xlu1 %229  ;;  %v269_v7 = vsel %vm265_vm9, 1.0, %v16834_v4 }
  0xed   :  { %v258_v44 = vsel %vm16857_vm5, %v256_v41, %v228_v15  ;;  %v11717_v13 = vrot.slane %v269_v7, %v11700_v22 }
  0xee   :  { %v260_v48 = vsel %vm16833_vm0, %v258_v44, %v230_v45  ;;  %vm266_vm0 = vcmp.lt.s32.totalorder %v11686_v59, 20 }
  0xef   :  { %v270_v26 = vsel %vm266_vm0, 1.0, %v16834_v4  ;;  %vm1577_vm0 = vcmask 998400  }
  0xf0   :  { %v232_v49 = vpop.permute.xlu0 %231  ;;  %v234_v54 = vpop.permute.xlu1 %233  ;;  %v11720_v14 = vrot.slane %v270_v26, %v11700_v22 }
  0xf1   :  { %v262_v53 = vsel %vm261_vm1, %v260_v48, %v232_v49  ;;  %vm268_vm1 = vcmp.lt.s32.totalorder %v11674_v42, 20 }
  0xf2   :  { %v11690_v61 = vsel %vm263_vm4, %v262_v53, %v234_v54  ;;  %v272_v16 = vsel %vm268_vm1, 1.0, %v16834_v4  ;;  %vm282_vm4 = vcmp.le.s32.totalorder %v11686_v59, 10 }
  0xf3   :  { %vm267_vm11 = vcmp.lt.s32.totalorder %v11690_v61, 20  ;;  %v11774_v51 = vrot.slane %v272_v16, %v11700_v22 }
  0xf4   :  { %v271_v56 = vsel %vm267_vm11, 1.0, %v16834_v4  ;;  %vm283_vm11 = vcmp.le.s32.totalorder %v11690_v61, 10 }
  0xf5   :  { %v11724_v55 = vrot.slane %v271_v56, %v11700_v22 }
 0x19a   :  { %v907_v60 = vpop.f32.mrb[0].mxu0 }
 0x19b   :  { %v11693_v62 = vadd.f32 %v907_v60, %v11665_v18  ;;  %v909_v0 = vpop.f32.mrb[1].mxu0 }
 0x19c   :  { %v11697_v29 = vadd.f32 %v909_v0, %v11665_v18  ;;  %v911_v1 = vpop.f32.mrb[2].mxu0 }
 0x19d   :  { %v11703_v2 = vadd.f32 %v911_v1, %v11663_v25  ;;  %v913_v3 = vpop.f32.mrb[3].mxu0  ;;  %v1028_v8 = vmax.f32 %v11693_v62, 0.0 }
 0x19e   :  { %v11708_v52 = vadd.f32 %v913_v3, %v11663_v25  ;;  %v1029_v9 = vmax.f32 %v11697_v29, 0.0 }
 0x19f   :  { %v1033_v11 = vmax.f32 %v11703_v2, 0.0  ;;  %v1064_v20 = vmul.f32 %v11717_v13, %v1028_v8 }
 0x1a0   :  { %v1034_v12 = vmax.f32 %v11708_v52, 0.0  ;;  %v1065_v21 = vmul.f32 %v11720_v14, %v1029_v9 }
 0x1a1   :  { %v1069_v6 = vmul.f32 %v11717_v13, %v1033_v11 }
 0x1a2   :  { %v917_v63 = vpop.f32.mrb[4].mxu0  ;;  %v1070_v27 = vmul.f32 %v11720_v14, %v1034_v12  ;;  %v1084_v53 = vadd.f32 %v1065_v21, %v1064_v20 }
 0x1a3   :  { %v960_v19 = vpop.f32.mrb[0].mxu1  ;;  %v11733_v23 = vadd.f32 %v917_v63, %v11667_v36  ;;  %v919_v24 = vpop.f32.mrb[5].mxu0 }
 0x1a4   :  { %v11736_v17 = vadd.f32 %v960_v19, %v11665_v18  ;;  %v962_v5 = vpop.f32.mrb[1].mxu1  ;;  %v11745_v30 = vadd.f32 %v919_v24, %v11667_v36  ;;  %v921_v31 = vpop.f32.mrb[6].mxu0  ;;  %v1091_v54 = vadd.f32 %v1070_v27, %v1069_v6 }
 0x1a5   :  { %v11748_v33 = vadd.f32 %v962_v5, %v11665_v18  ;;  %v964_v34 = vpop.f32.mrb[2].mxu1  ;;  %v1038_v35 = vmax.f32 %v11733_v23, 0.0  ;;  %v11752_v37 = vadd.f32 %v921_v31, %v11669_v10  ;;  %v923_v39 = vpop.f32.mrb[7].mxu0 }
 0x1a6   :  { %v1030_v38 = vmax.f32 %v11736_v17, 0.0  ;;  %v11756_v40 = vadd.f32 %v964_v34, %v11663_v25  ;;  %v966_v41 = vpop.f32.mrb[3].mxu1  ;;  %v16842_v15 = vmax.f32 %v11745_v30, 0.0  ;;  %v11760_v43 = vadd.f32 %v923_v39, %v11669_v10 }
 0x1a7   :  { %v1031_v44 = vmax.f32 %v11748_v33, 0.0  ;;  %v11764_v45 = vadd.f32 %v966_v41, %v11663_v25  ;;  %v16839_v46 = vmax.f32 %v11752_v37, 0.0  ;;  %v1074_v0 = vmul.f32 %v11717_v13, %v1038_v35 }
 0x1a8   :  { %v1066_v47 = vmul.f32 %v11724_v55, %v1030_v38  ;;  %v1035_v48 = vmax.f32 %v11756_v40, 0.0  ;;  %v16838_v49 = vmax.f32 %v11760_v43, 0.0  ;;  %v1075_v1 = vmul.f32 %v11720_v14, %v16842_v15 }
 0x1a9   :  { %v1036_v50 = vmax.f32 %v11764_v45, 0.0  ;;  %v1079_v3 = vmul.f32 %v11717_v13, %v16839_v46  ;;  %v1067_v7 = vmul.f32 %v11717_v13, %v1031_v44 }
 0x1aa   :  { %v1071_v60 = vmul.f32 %v11724_v55, %v1035_v48  ;;  %v9540_v26 = vpop.f32.mrb[8].mxu0  ;;  %v1085_v16 = vadd.f32 %v1084_v53, %v1066_v47  ;;  %v1080_v63 = vmul.f32 %v11720_v14, %v16838_v49 }
 0x1ab   :  { %v970_v56 = vpop.f32.mrb[4].mxu1  ;;  %v11795_v19 = vadd.f32 %v9540_v26, %v11667_v36  ;;  %v1013_v20 = vpop.f32.mrb[9].mxu0  ;;  %v1072_v6 = vmul.f32 %v11717_v13, %v1036_v50 }
 0x1ac   :  { %v11798_v21 = vadd.f32 %v970_v56, %v11667_v36  ;;  %v972_v24 = vpop.f32.mrb[5].mxu1  ;;  %v1092_v5 = vadd.f32 %v1091_v54, %v1071_v60  ;;  %v1014_v27 = vadd.f32 %v1013_v20, %v11665_v18  ;;  %v9541_v31 = vpop.f32.mrb[10].mxu0  ;;  %v1086_v28 = vadd.f32 %v1085_v16, %v1067_v7 }
 0x1ad   :  { %v11805_v34 = vadd.f32 %v972_v24, %v11667_v36  ;;  %v974_v39 = vpop.f32.mrb[6].mxu1  ;;  %v16840_v41 = vmax.f32 %v11795_v19, 0.0  ;;  %v11810_v53 = vadd.f32 %v9541_v31, %v11669_v10  ;;  %v1016_v26 = vpop.f32.mrb[11].mxu0  ;;  %v1098_v24 = vadd.f32 %v1075_v1, %v1074_v0 }
 0x1ae   :  { %v16841_v47 = vmax.f32 %v11798_v21, 0.0  ;;  %v11813_v54 = vadd.f32 %v974_v39, %v11669_v10  ;;  %v976_v60 = vpop.f32.mrb[7].mxu1  ;;  %v1032_v56 = vmax.f32 %v1014_v27, 0.0  ;;  %v1017_v20 = vadd.f32 %v1016_v26, %v11663_v25 }
 0x1af   :  { %v16843_v18 = vmax.f32 %v11805_v34, 0.0  ;;  %v11818_v36 = vadd.f32 %v976_v60, %v11669_v10  ;;  %v1078_v4 = vmul.f32 %v11774_v51, %v16840_v41  ;;  %v1105_v0 = vadd.f32 %v1080_v63, %v1079_v3 }
 0x1b0   :  { %v1076_v31 = vmul.f32 %v11724_v55, %v16841_v47  ;;  %v1045_v39 = vmax.f32 %v11813_v54, 0.0  ;;  %v1068_v27 = vmul.f32 %v11774_v51, %v1032_v56  ;;  %v1037_v26 = vmax.f32 %v1017_v20, 0.0 }
 0x1b1   :  { %v1077_v25 = vmul.f32 %v11717_v13, %v16843_v18  ;;  %v1046_v10 = vmax.f32 %v11818_v36, 0.0  ;;  %v1047_v49 = vmax.f32 %v11810_v53, 0.0  ;;  %v1093_v47 = vadd.f32 %v1092_v5, %v1072_v6 }
 0x1b2   :  { %v1099_v1 = vadd.f32 %v1098_v24, %v1076_v31  ;;  %v1081_v60 = vmul.f32 %v11724_v55, %v1045_v39  ;;  %v1073_v46 = vmul.f32 %v11774_v51, %v1037_v26  ;;  %v1087_v41 = vsel %vm16860_vm10, %v1068_v27, 0.0 }
 0x1b3   :  { %v1082_v20 = vmul.f32 %v11717_v13, %v1046_v10  ;;  %v1088_v18 = vadd.f32 %v1087_v41, %v1086_v28  ;;  %v1101_v24 = vsel %vm16860_vm10, %v1078_v4, 0.0  ;;  %v1083_v31 = vmul.f32 %v11774_v51, %v1047_v49 }
 0x1b4   :  { %v1106_v15 = vadd.f32 %v1105_v0, %v1081_v60  ;;  %v1100_v3 = vadd.f32 %v1099_v1, %v1077_v25  ;;  %v1094_v63 = vsel %vm16860_vm10, %v1073_v46, 0.0 }
 0x1b5   :  { %1089 = vadd.xlane.f32.xlu0 %v1088_v18  ;;  %v1095_v7 = vadd.f32 %v1094_v63, %v1093_v47  ;;  %v1108_v6 = vsel %vm16860_vm10, %v1083_v31, 0.0 }
 0x1b6   :  { %v1102_v16 = vadd.f32 %v1101_v24, %v1100_v3  ;;  %v1107_v5 = vadd.f32 %v1106_v15, %v1082_v20 }
 0x1b7   :  { %1096 = vadd.xlane.f32.xlu1 %v1095_v7 }
 0x1b8   :  { %v1109_v27 = vadd.f32 %v1108_v6, %v1107_v5 }
 0x1b9   :  { %1103 = vadd.xlane.f32.xlu0 %v1102_v16 }
 0x1bd   :  { %1110 = vadd.xlane.f32.xlu0 %v1109_v27 }
 0x242   :  { %v1090_v28 = vpop.xlane.xlu0 %1089 }
 0x243   :  { %v1113_v41 = vmul.f32 0.0020833334, %v1090_v28 }
 0x244   :  { %v1097_v25 = vpop.xlane.xlu1 %1096 }
 0x245   :  { %v1114_v46 = vmul.f32 0.0020833334, %v1097_v25  ;;  %v11849_v4 = vsub.f32 %v1028_v8, %v1113_v41  ;;  %v11853_v47 = vsub.f32 %v1029_v9, %v1113_v41  ;;  %v11857_v15 = vsub.f32 %v1030_v38, %v1113_v41 }
 0x246   :  { %v1104_v18 = vpop.xlane.xlu0 %1103  ;;  %v11861_v0 = vsub.f32 %v1031_v44, %v1113_v41  ;;  %v11863_v1 = vsub.f32 %v1032_v56, %v1113_v41  ;;  %v17300_v25 = vmax.f32 %v11745_v30, 0.0 }
 0x247   :  { %v1137_v62 = vmul.f32 %v11849_v4, %v11717_v13  ;;  %v1138_v8 = vmul.f32 %v11853_v47, %v11720_v14  ;;  %v1139_v29 = vmul.f32 %v11857_v15, %v11724_v55  ;;  %v11877_v33 = vsub.f32 %v1033_v11, %v1114_v46 }
 0x248   :  { %v1140_v9 = vmul.f32 %v11861_v0, %v11717_v13  ;;  %v1141_v17 = vmul.f32 %v11863_v1, %v11774_v51  ;;  %v11881_v38 = vsub.f32 %v1034_v12, %v1114_v46  ;;  %v1115_v44 = vmul.f32 0.0020833334, %v1104_v18 }
 0x249   :  { %v1157_v56 = vmul.f32 %v1137_v62, %v1137_v62  ;;  %v1158_v60 = vmul.f32 %v1138_v8, %v1138_v8  ;;  %v11885_v20 = vsub.f32 %v1035_v48, %v1114_v46  ;;  %v1159_v63 = vmul.f32 %v1139_v29, %v1139_v29 }
 0x24a   :  { %v1111_v3 = vpop.xlane.xlu0 %1110  ;;  %v1161_v24 = vmul.f32 %v1141_v17, %v1141_v17  ;;  %v11889_v7 = vsub.f32 %v1036_v50, %v1114_v46  ;;  %v11891_v2 = vsub.f32 %v1037_v26, %v1114_v46  ;;  %v1160_v11 = vmul.f32 %v1140_v9, %v1140_v9 }
 0x24b   :  { %v1177_v52 = vadd.f32 %v1158_v60, %v1157_v56  ;;  %v1142_v12 = vmul.f32 %v11877_v33, %v11717_v13  ;;  %v1143_v16 = vmul.f32 %v11881_v38, %v11720_v14  ;;  %v1116_v40 = vmul.f32 0.0020833334, %v1111_v3 }
 0x24c   :  { %v1144_v48 = vmul.f32 %v11885_v20, %v11724_v55  ;;  %v1145_v31 = vmul.f32 %v11889_v7, %v11717_v13  ;;  %v1146_v45 = vmul.f32 %v11891_v2, %v11774_v51  ;;  %v11905_v6 = vsub.f32 %v1038_v35, %v1115_v44 }
 0x24d   :  { %v1178_v50 = vadd.f32 %v1177_v52, %v1159_v63  ;;  %v1162_v26 = vmul.f32 %v1142_v12, %v1142_v12  ;;  %v1163_v5 = vmul.f32 %v1143_v16, %v1143_v16  ;;  %v1180_v27 = vsel %vm16860_vm10, %v1161_v24, 0.0 }
 0x24e   :  { %v1164_v28 = vmul.f32 %v1144_v48, %v1144_v48  ;;  %v1166_v41 = vmul.f32 %v1146_v45, %v1146_v45  ;;  %v11910_v46 = vsub.f32 %v17300_v25, %v1115_v44  ;;  %v17301_v8 = vmax.f32 %v11798_v21, 0.0 }
 0x24f   :  { %v1179_v18 = vadd.f32 %v1178_v50, %v1160_v11  ;;  %v1184_v62 = vadd.f32 %v1163_v5, %v1162_v26  ;;  %v17302_v9 = vmax.f32 %v11805_v34, 0.0  ;;  %v1165_v23 = vmul.f32 %v1145_v31, %v1145_v31 }
 0x250   :  { %v11914_v29 = vsub.f32 %v17301_v8, %v1115_v44  ;;  %v17303_v35 = vmax.f32 %v11795_v19, 0.0  ;;  %v1147_v30 = vmul.f32 %v11905_v6, %v11717_v13  ;;  %v1148_v60 = vmul.f32 %v11910_v46, %v11720_v14 }
 0x251   :  { %v11918_v17 = vsub.f32 %v17302_v9, %v1115_v44  ;;  %v1181_v3 = vadd.f32 %v1180_v27, %v1179_v18  ;;  %v1185_v63 = vadd.f32 %v1184_v62, %v1164_v28  ;;  %v17304_v11 = vmax.f32 %v11752_v37, 0.0 }
 0x252   :  { %v11922_v56 = vsub.f32 %v17303_v35, %v1115_v44  ;;  %v1149_v21 = vmul.f32 %v11914_v29, %v11724_v55  ;;  %v1167_v19 = vmul.f32 %v1147_v30, %v1147_v30  ;;  %v1168_v44 = vmul.f32 %v1148_v60, %v1148_v60 }
 0x253   :  { %v1150_v34 = vmul.f32 %v11918_v17, %v11717_v13  ;;  %v11936_v52 = vsub.f32 %v17304_v11, %v1116_v40  ;;  %1182 = vadd.xlane.f32.xlu1 %v1181_v3  ;;  %v1186_v12 = vadd.f32 %v1185_v63, %v1165_v23  ;;  %v1187_v16 = vsel %vm16860_vm10, %v1166_v41, 0.0 }
 0x254   :  { %v1151_v24 = vmul.f32 %v11922_v56, %v11774_v51  ;;  %v1169_v48 = vmul.f32 %v1149_v21, %v1149_v21  ;;  %v17305_v31 = vmax.f32 %v11760_v43, 0.0  ;;  %v1191_v26 = vadd.f32 %v1168_v44, %v1167_v19 }
 0x255   :  { %v1134_v5 = vsub.f32 %v1045_v39, %v1116_v40  ;;  %v1135_v27 = vsub.f32 %v1046_v10, %v1116_v40  ;;  %v1188_v28 = vadd.f32 %v1187_v16, %v1186_v12  ;;  %v11947_v37 = vsub.f32 %v1047_v49, %v1116_v40 }
 0x256   :  { %v1133_v45 = vsub.f32 %v17305_v31, %v1116_v40  ;;  %v1171_v50 = vmul.f32 %v1151_v24, %v1151_v24  ;;  %v1152_v41 = vmul.f32 %v11936_v52, %v11717_v13  ;;  %v1170_v43 = vmul.f32 %v1150_v34, %v1150_v34 }
 0x257   :  { %v1192_v18 = vadd.f32 %v1191_v26, %v1169_v48  ;;  %v1154_v62 = vmul.f32 %v1134_v5, %v11724_v55  ;;  %1189 = vadd.xlane.f32.xlu0 %v1188_v28  ;;  %v1155_v54 = vmul.f32 %v1135_v27, %v11717_v13  ;;  %v1156_v36 = vmul.f32 %v11947_v37, %v11774_v51 }
 0x258   :  { %v1153_v25 = vmul.f32 %v1133_v45, %v11720_v14  ;;  %v1172_v39 = vmul.f32 %v1152_v41, %v1152_v41  ;;  %v1194_v49 = vsel %vm16860_vm10, %v1171_v50, 0.0 }
 0x259   :  { %v1193_v53 = vadd.f32 %v1192_v18, %v1170_v43  ;;  %v1174_v40 = vmul.f32 %v1154_v62, %v1154_v62  ;;  %v1176_v23 = vmul.f32 %v1156_v36, %v1156_v36  ;;  %v1175_v14 = vmul.f32 %v1155_v54, %v1155_v54 }
 0x25a   :  { %v1173_v10 = vmul.f32 %v1153_v25, %v1153_v25 }
 0x25b   :  { %v1195_v9 = vadd.f32 %v1194_v49, %v1193_v53  ;;  %v1201_v55 = vsel %vm16860_vm10, %v1176_v23, 0.0 }
 0x25c   :  { %v1198_v8 = vadd.f32 %v1173_v10, %v1172_v39 }
 0x25d   :  { %1196 = vadd.xlane.f32.xlu1 %v1195_v9 }
 0x25e   :  { %v1199_v35 = vadd.f32 %v1198_v8, %v1174_v40 }
 0x260   :  { %v1200_v30 = vadd.f32 %v1199_v35, %v1175_v14 }
 0x262   :  { %v1202_v60 = vadd.f32 %v1201_v55, %v1200_v30 }
 0x264   :  { %1203 = vadd.xlane.f32.xlu0 %v1202_v60 }
 0x2e0   :  { %v1183_v13 = vpop.xlane.xlu1 %1182 }
 0x2e1   :  { %v1205_v3 = vmul.f32 0.0020833334, %v1183_v13 }
 0x2e3   :  { %v1209_v51 = vadd.f32 1e-05, %v1205_v3 }
 0x2e4   :  { %v1190_v63 = vpop.xlane.xlu0 %1189 }
 0x2e5   :  { %11208 = vrsqrt.f32 %v1209_v51  ;;  %v1206_v21 = vmul.f32 0.0020833334, %v1190_v63 }
 0x2e7   :  { %v1210_v34 = vadd.f32 1e-05, %v1206_v21 }
 0x2e9   :  { %11210 = vrsqrt.f32 %v1210_v34 }
 0x2ea   :  { %v1197_v24 = vpop.xlane.xlu1 %1196 }
 0x2eb   :  { %v1207_v19 = vmul.f32 0.0020833334, %v1197_v24 }
 0x2ed   :  { %v1211_v44 = vadd.f32 1e-05, %v1207_v19 }
 0x2ef   :  { %11212 = vrsqrt.f32 %v1211_v44  ;;  %v11209_v12 = vpop.eup %11208 }
 0x2f0   :  { %v1218_v48 = vmul.f32 %v11209_v12, %v11853_v47  ;;  %v1219_v31 = vmul.f32 %v11209_v12, %v11857_v15  ;;  %v11968_v47 = vmul.f32 %v11209_v12, %v11861_v0 }
 0x2f1   :  { %v1204_v11 = vpop.xlane.xlu0 %1203 }
 0x2f2   :  { %v1208_v16 = vmul.f32 0.0020833334, %v1204_v11  ;;  %v10931_v26 = vpack.i.bf16 %v1219_v31, %v1218_v48 }
 0x2f3   :  { %v11211_v28 = vpop.eup %11210 }
 0x2f4   :  { %v1212_v50 = vadd.f32 1e-05, %v1208_v16  ;;  %10932 = vrot.lane.b32.xlu1 %v10931_v26, %s11310_s3  ;;  %v11964_v62 = vmul.f32 %v11211_v28, %v11881_v38  ;;  %v11984_v10 = vmul.f32 %v11211_v28, %v11885_v20  ;;  %v11987_v0 = vmul.f32 %v11211_v28, %v11889_v7 }
 0x2f5   :  { %v12003_v20 = vmul.f32 %v11209_v12, %v11863_v1  ;;  %v12007_v7 = vmul.f32 %v11209_v12, %v11849_v4 }
 0x2f6   :  { %11214 = vrsqrt.f32 %v1212_v50 }
 0x2f9   :  { %v11213_v41 = vpop.eup %11212 }
 0x2fa   :  { %v1228_v25 = vmul.f32 %v11213_v41, %v11910_v46  ;;  %v1229_v43 = vmul.f32 %v11213_v41, %v11914_v29  ;;  %v11971_v15 = vmul.f32 %v11213_v41, %v11918_v17  ;;  %v10941_v46 = vpack.i.bf16 %v11964_v62, %v11968_v47 }
 0x2fb   :  { %v12019_v1 = vmul.f32 %v11213_v41, %v11905_v6  ;;  %v12028_v40 = vmul.f32 %v11213_v41, %v11922_v56 }
 0x2fc   :  { %v10926_v18 = vpack.i.bf16 %v1229_v43, %v1228_v25 }
 0x2fe   :  { %10927 = vrot.lane.b32.xlu0 %v10926_v18, %s11310_s3 }
 0x300   :  { %v11215_v54 = vpop.eup %11214 }
 0x301   :  { %v11973_v36 = vmul.f32 %v11215_v54, %v1133_v45  ;;  %v11977_v39 = vmul.f32 %v11215_v54, %v1134_v5  ;;  %v11979_v29 = vmul.f32 %v11215_v54, %v1135_v27  ;;  %v11994_v45 = vmul.f32 %v11211_v28, %v11891_v2 }
 0x302   :  { %10942 = vrot.lane.b32.xlu0 %v10941_v46, %s11310_s3  ;;  %v10951_v5 = vpack.i.bf16 %v11987_v0, %v11984_v10  ;;  %v11999_v27 = vmul.f32 %v11211_v28, %v11877_v33  ;;  %v12014_v49 = vmul.f32 %v11215_v54, %v11936_v52  ;;  %v12024_v33 = vmul.f32 %v11215_v54, %v11947_v37 }
 0x303   :  { %v10936_v38 = vpack.i.bf16 %v11973_v36, %v11971_v15  ;;  %v10946_v17 = vpack.i.bf16 %v11979_v29, %v11977_v39  ;;  %v10966_v2 = vpack.i.bf16 %v11994_v45, %v12003_v20 }
 0x304   :  { %v10956_v53 = vpack.i.bf16 %v11999_v27, %v12007_v7  ;;  %v10961_v4 = vpack.i.bf16 %v12014_v49, %v12019_v1  ;;  %v10971_v52 = vpack.i.bf16 %v12024_v33, %v12028_v40 }
 0x305   :  { %10937 = vrot.lane.b32.xlu1 %v10936_v38, %s11310_s3 }
 0x306   :  { %10947 = vrot.lane.b32.xlu0 %v10946_v17, %s11310_s3 }
 0x309   :  { %10952 = vrot.lane.b32.xlu1 %v10951_v5, %s11310_s3 }
 0x30a   :  { %10967 = vrot.lane.b32.xlu0 %v10966_v2, %s11310_s3 }
 0x30d   :  { %10957 = vrot.lane.b32.xlu1 %v10956_v53, %s11310_s3 }
 0x311   :  { %10962 = vrot.lane.b32.xlu1 %v10961_v4, %s11310_s3 }
 0x315   :  { %10972 = vrot.lane.b32.xlu1 %v10971_v52, %s11310_s3  ;;  %s11330_s3 = smov 122  }
 0x366   :  { %v10933_v8 = vpop.permute.xlu1 %10932 }
 0x367   :  { %v10935_v6 = vunpack.i.h.bf16 %v10933_v8  ;;  %v10934_v23 = vunpack.i.l.bf16 %v10933_v8 }
 0x369   :  { %v1298_v30 = vsel %vm672_vm14, %v10934_v23, %v10935_v6 }
 0x36a   :  { %v1338_v51 = vmax.f32 %v1218_v48, %v1298_v30 }
 0x370   :  { %v12033_v9 = vpop.permute.xlu0 %10927 }
 0x371   :  { %v10930_v14 = vunpack.i.h.bf16 %v12033_v9  ;;  %v10929_v37 = vunpack.i.l.bf16 %v12033_v9 }
 0x373   :  { %v1306_v56 = vsel %vm672_vm14, %v10929_v37, %v10930_v14 }
 0x374   :  { %v10943_v35 = vpop.permute.xlu0 %10942  ;;  %v1348_v63 = vmax.f32 %v1228_v25, %v1306_v56 }
 0x375   :  { %v10944_v60 = vunpack.i.l.bf16 %v10943_v35  ;;  %v10945_v50 = vunpack.i.h.bf16 %v10943_v35 }
 0x377   :  { %v12039_v55 = vpop.permute.xlu1 %10937  ;;  %v1299_v3 = vsel %vm672_vm14, %v10935_v6, %v10944_v60 }
 0x378   :  { %v10939_v13 = vunpack.i.l.bf16 %v12039_v55  ;;  %v1339_v34 = vmax.f32 %v1219_v31, %v1299_v3  ;;  %v12046_v24 = vpop.permute.xlu0 %10947  ;;  %v10940_v19 = vunpack.i.h.bf16 %v12039_v55 }
 0x379   :  { %v10950_v12 = vunpack.i.h.bf16 %v12046_v24  ;;  %v10949_v16 = vunpack.i.l.bf16 %v12046_v24 }
 0x37a   :  { %v1307_v21 = vsel %vm672_vm14, %v10930_v14, %v10939_v13  ;;  %v12053_v28 = vpack.i.bf16 %v1339_v34, %v1338_v51 }
 0x37b   :  { %v12049_v44 = vmax.f32 %v1229_v43, %v1307_v21  ;;  %v10953_v11 = vpop.permute.xlu1 %10952  ;;  %v1310_v41 = vsel %vm672_vm14, %v10940_v19, %v10949_v16  ;;  %v1311_v31 = vsel %vm672_vm14, %v10949_v16, %v10950_v12 }
 0x37c   :  { %v10955_v26 = vunpack.i.h.bf16 %v10953_v11  ;;  %v10954_v48 = vunpack.i.l.bf16 %v10953_v11  ;;  %v10968_v18 = vpop.permute.xlu0 %10967  ;;  %10987 = vrot.lane.b32.xlu0 %v12053_v28, %s11308_s11  ;;  %v1353_v46 = vmax.f32 %v11973_v36, %v1310_v41  ;;  %v1354_v53 = vmax.f32 %v11977_v39, %v1311_v31 }
 0x37d   :  { %v12058_v25 = vpack.i.bf16 %v12049_v44, %v1348_v63  ;;  %v10970_v17 = vunpack.i.h.bf16 %v10968_v18  ;;  %v10969_v5 = vunpack.i.l.bf16 %v10968_v18 }
 0x37e   :  { %v1302_v43 = vsel %vm672_vm14, %v10945_v50, %v10954_v48  ;;  %v1303_v54 = vsel %vm672_vm14, %v10954_v48, %v10955_v26  ;;  %v10996_v3 = vpack.i.bf16 %v1354_v53, %v1353_v46  ;;  %v1709_v24 = vpack.c.bf16 %v1353_v46, %v1348_v63 }
 0x37f   :  { %v10958_v38 = vpop.permute.xlu1 %10957  ;;  %10977 = vrot.lane.b32.xlu1 %v12058_v25, %s11308_s11  ;;  %v1343_v2 = vmax.f32 %v11964_v62, %v1302_v43  ;;  %v1304_v8 = vsel %vm672_vm14, %v10955_v26, %v10970_v17  ;;  %v1300_v9 = vsel %vm672_vm14, %v10944_v60, %v10969_v5  ;;  %v1344_v6 = vmax.f32 %v11984_v10, %v1303_v54 }
 0x380   :  { %v10960_v4 = vunpack.i.h.bf16 %v10958_v38  ;;  %v10959_v52 = vunpack.i.l.bf16 %v10958_v38  ;;  %v12075_v35 = vmax.f32 %v11987_v0, %v1304_v8  ;;  %10992 = vrot.lane.b32.xlu0 %v12053_v28, %s11311_s7  ;;  %v12082_v30 = vmax.f32 %v11968_v47, %v1300_v9  ;;  %v1753_v38 = vld [vmem:[%s17307_s9] sm:$0xff] }
 0x381   :  { %v1704_v60 = vpack.c.bf16 %v1343_v2, %v1338_v51  ;;  %v1705_v47 = vpack.c.bf16 %v1344_v6, %v1339_v34  ;;  %v1333_v41 = vsel %vm678_vm8, %v10969_v5, 0.0  ;;  %v1754_v5 = vld [vmem:[%s17307_s9 + $0x8] sm:$0xff] }
 0x382   :  { %v1297_v36 = vsel %vm672_vm14, %v10959_v52, %v10934_v23  ;;  %v1301_v14 = vsel %vm672_vm14, %v10960_v4, %v10945_v50  ;;  %v1706_v21 = vpack.c.bf16 %v12075_v35, %v12082_v30 }
 0x383   :  { %v1337_v62 = vmax.f32 %v12007_v7, %v1297_v36  ;;  %v1342_v39 = vmax.f32 %v11999_v27, %v1301_v14  ;;  %v10963_v56 = vpop.permute.xlu1 %10962  ;;  %10982 = vrot.lane.b32.xlu1 %v12058_v25, %s11311_s7  ;;  %1801 = vmatprep.subr.bf16.mxu1 %v1704_v60 }
 0x384   :  { %v10965_v10 = vunpack.i.h.bf16 %v10963_v56  ;;  %v10964_v23 = vunpack.i.l.bf16 %v10963_v56  ;;  %10997 = vrot.lane.b32.xlu0 %v10996_v3, %s11308_s11  ;;  %1854 = vmatprep.subr.bf16.mxu0 %v1706_v21 }
 0x385   :  { %v1703_v0 = vpack.c.bf16 %v1342_v39, %v1337_v62  ;;  %1855 = vmatpush1.bf16.msra.mxu0 %v1705_v47 }
 0x386   :  { %v1309_v7 = vsel %vm672_vm14, %v10965_v10, %v10940_v19  ;;  %v1305_v27 = vsel %vm672_vm14, %v10964_v23, %v10929_v37 }
 0x387   :  { %v1352_v11 = vmax.f32 %v12014_v49, %v1309_v7  ;;  %v1347_v16 = vmax.f32 %v12019_v1, %v1305_v27  ;;  %v10973_v50 = vpop.permute.xlu1 %10972  ;;  %1802 = vmatpush1.bf16.msra.mxu1 %v1703_v0  ;;  %v1334_v49 = vsel %vm678_vm8, %v10970_v17, 0.0  ;;  %v1755_v17 = vld [vmem:[%s17307_s9 + $0x10] sm:$0xff] }
 0x388   :  { %v10975_v51 = vunpack.i.h.bf16 %v10973_v50  ;;  %v10974_v26 = vunpack.i.l.bf16 %v10973_v50  ;;  %1803 = vmatprep.subr.bf16.mxu1 %v1709_v24  ;;  %11007 = vrot.lane.b32.xlu0 %v10996_v3, %s11311_s7  ;;  %v12106_v18 = vmax.f32 %v11994_v45, %v1334_v49 }
 0x389   :  { %v11001_v63 = vpack.i.bf16 %v1352_v11, %v1347_v16  ;;  %v1708_v48 = vpack.c.bf16 %v1352_v11, %v1347_v16 }
 0x38a   :  { %v1308_v37 = vsel %vm672_vm14, %v10939_v13, %v10974_v26  ;;  %v1312_v19 = vsel %vm672_vm14, %v10950_v12, %v10975_v51  ;;  %v1336_v31 = vsel %vm678_vm8, %v10975_v51, 0.0  ;;  %v1335_v55 = vsel %vm678_vm8, %v10974_v26, 0.0  ;;  %vm12428_vm14 = vmpackc.low %vm732_vm7, %vm732_vm7 }
 0x38b   :  { %v1350_v1 = vmax.f32 %v11971_v15, %v1308_v37  ;;  %v1355_v34 = vmax.f32 %v11979_v29, %v1312_v19  ;;  %11002 = vrot.lane.b32.xlu1 %v11001_v63, %s11308_s11  ;;  %1804 = vmatpush1.bf16.msra.mxu1 %v1708_v48  ;;  %v11021_v13 = vpack.i.bf16 %v1342_v39, %v1337_v62  ;;  %vm17315_vm7 = vcmask 457728  }
 0x38c   :  { %v11011_v12 = vpack.i.bf16 %v1344_v6, %v1343_v2  ;;  %v1710_v15 = vpack.c.bf16 %v1354_v53, %v12049_v44  ;;  %v12111_v29 = vmax.f32 %v12003_v20, %v1333_v41  ;;  %v12114_v54 = vmax.f32 %v12024_v33, %v1336_v31  ;;  %v12145_v33 = vld [vmem:[%s17306_s29 + $0x4] ss:$8 sps:$4 sm:$0xff]   ;;  %v1756_v2 = vld [vmem:[%s17307_s9 + $0x18] sm:$0xff]  ;;  %vm7904_vm8 = vmpackc.low %vm17315_vm7, %vm17315_vm7  ;;  %s18381_s9 = sld [smem:[#allocation166_spill]] }
 0x38d   :  { %v1711_v43 = vpack.c.bf16 %v1355_v34, %v1350_v1  ;;  %11022 = vrot.lane.b32.xlu0 %v11021_v13, %s11308_s11  ;;  %v12117_v46 = vmax.f32 %v12028_v40, %v1335_v55  ;;  %7882 = vmatprep.mubr.msk.bf16.mxu1 %vm16857_vm5, %v12145_v33  ;;  %vm16858_vm7 = vmmov 0  }
 0x38e   :  { %v1707_v45 = vpack.c.bf16 %v12106_v18, %v12111_v29  ;;  %v11096_v40 = vpack.i.bf16 %v12111_v29, %v12082_v30  ;;  %7884 = vmatprep.mubr.msk.bf16.mxu0 %vm16857_vm5, %v12145_v33 }
 0x38f   :  { %1856 = vmatprep.subr.bf16.mxu0 %v1711_v43  ;;  %11012 = vrot.lane.b32.xlu1 %v11011_v12, %s11308_s11  ;;  %v1712_v20 = vpack.c.bf16 %v12114_v54, %v12117_v46  ;;  %v11101_v44 = vpack.i.bf16 %v12117_v46, %v1350_v1 }
 0x390   :  { %1857 = vmatpush1.bf16.msra.mxu0 %v1710_v15 }
 0x391   :  { %11027 = vrot.lane.b32.xlu0 %v12053_v28, %s11330_s3 }
 0x393   :  { %11017 = vrot.lane.b32.xlu1 %v11001_v63, %s11311_s7 }
 0x395   :  { %11042 = vrot.lane.b32.xlu0 %v11021_v13, %s11311_s7 }
 0x397   :  { %11032 = vrot.lane.b32.xlu1 %v11011_v12, %s11311_s7 }
 0x399   :  { %11047 = vrot.lane.b32.xlu0 %v10996_v3, %s11330_s3 }
 0x39b   :  { %11037 = vrot.lane.b32.xlu1 %v12058_v25, %s11330_s3 }
 0x39d   :  { %11062 = vrot.lane.b32.xlu0 %v11021_v13, %s11330_s3 }
 0x39f   :  { %11052 = vrot.lane.b32.xlu1 %v11011_v12, %s11330_s3 }
 0x3a1   :  { %11067 = vrot.lane.b32.xlu0 %v12053_v28, %s11314_s0  ;;  %v11106_v28 = vpack.i.bf16 %v12106_v18, %v12075_v35 }
 0x3a3   :  { %11057 = vrot.lane.b32.xlu1 %v11001_v63, %s11330_s3 }
 0x3a5   :  { %11082 = vrot.lane.b32.xlu0 %v11021_v13, %s11314_s0 }
 0x3a7   :  { %11072 = vrot.lane.b32.xlu1 %v11011_v12, %s11314_s0 }
 0x3a9   :  { %11087 = vrot.lane.b32.xlu0 %v10996_v3, %s11314_s0 }
 0x3ab   :  { %11077 = vrot.lane.b32.xlu1 %v12058_v25, %s11314_s0  ;;  %v11111_v25 = vpack.i.bf16 %v12114_v54, %v1355_v34 }
 0x3ad   :  { %11097 = vrot.lane.b32.xlu0 %v11096_v40, %s11308_s11 }
 0x3af   :  { %11092 = vrot.lane.b32.xlu1 %v11001_v63, %s11314_s0 }
 0x3b1   :  { %11102 = vrot.lane.b32.xlu0 %v11101_v44, %s11308_s11 }
 0x3b3   :  { %11107 = vrot.lane.b32.xlu1 %v11106_v28, %s11308_s11 }
 0x3b5   :  { %11117 = vrot.lane.b32.xlu0 %v11096_v40, %s11311_s7 }
 0x3b7   :  { %11112 = vrot.lane.b32.xlu1 %v11111_v25, %s11308_s11  ;;  %s17345_s11 = sld [smem:[#allocation163_spill]] }
 0x3b9   :  { %11122 = vrot.lane.b32.xlu0 %v11101_v44, %s11311_s7 }
 0x3bb   :  { %11127 = vrot.lane.b32.xlu1 %v11106_v28, %s11311_s7 }
 0x3bd   :  { %11137 = vrot.lane.b32.xlu0 %v11096_v40, %s11330_s3 }
 0x3bf   :  { %11132 = vrot.lane.b32.xlu1 %v11111_v25, %s11311_s7  ;;  %s17346_s7 = sld [smem:[#allocation164_spill]] }
 0x3c1   :  { %11142 = vrot.lane.b32.xlu0 %v11101_v44, %s11330_s3 }
 0x3c3   :  { %11147 = vrot.lane.b32.xlu1 %v11106_v28, %s11330_s3 }
 0x3c5   :  { %11157 = vrot.lane.b32.xlu0 %v11096_v40, %s11314_s0 }
 0x3c7   :  { %11152 = vrot.lane.b32.xlu1 %v11111_v25, %s11330_s3  ;;  %s17347_s3 = sld [smem:[#allocation165_spill]] }
 0x3c9   :  { %11162 = vrot.lane.b32.xlu0 %v11101_v44, %s11314_s0 }
 0x3cb   :  { %11167 = vrot.lane.b32.xlu1 %v11106_v28, %s11314_s0 }
 0x3cd   :  { %1759 = vperm.xlu0 %10924, %v1753_v38  }
 0x3cf   :  { %11172 = vrot.lane.b32.xlu1 %v11111_v25, %s11314_s0 }
 0x3d1   :  { %1769 = vperm.xlu0 %10924, %v1755_v17  }
 0x3d3   :  { %1764 = vperm.xlu1 %10925, %v1754_v5  }
 0x3d7   :  { %1774 = vperm.xlu1 %10925, %v1756_v2  }
 0x3ee   :  { %v12186_v53 = vpop.permute.xlu0 %10987 }
 0x3ef   :  { %v10990_v62 = vunpack.i.h.bf16 %v12186_v53  ;;  %v10989_v39 = vunpack.i.l.bf16 %v12186_v53 }
 0x3f1   :  { %v12188_v4 = vpop.permute.xlu1 %10977  ;;  %v1418_v50 = vsel %vm690_vm13, %v10989_v39, %v10990_v62 }
 0x3f2   :  { %v12190_v52 = vpop.permute.xlu0 %10992  ;;  %v10980_v56 = vunpack.i.h.bf16 %v12188_v4  ;;  %v10979_v10 = vunpack.i.l.bf16 %v12188_v4 }
 0x3f3   :  { %v10995_v31 = vunpack.i.h.bf16 %v12190_v52  ;;  %v10994_v55 = vunpack.i.l.bf16 %v12190_v52 }
 0x3f4   :  { %v1426_v37 = vsel %vm690_vm13, %v10979_v10, %v10980_v56 }
 0x3f5   :  { %v12194_v9 = vpop.permute.xlu1 %10982 }
 0x3f6   :  { %v12192_v8 = vpop.permute.xlu0 %10997  ;;  %v10985_v43 = vunpack.i.h.bf16 %v12194_v9  ;;  %v10984_v12 = vunpack.i.l.bf16 %v12194_v9 }
 0x3f7   :  { %v11000_v14 = vunpack.i.h.bf16 %v12192_v8  ;;  %v10999_v35 = vunpack.i.l.bf16 %v12192_v8 }
 0x3f9   :  { %v1430_v47 = vsel %vm690_vm13, %v10999_v35, %v11000_v14 }
 0x3fa   :  { %v12196_v6 = vpop.permute.xlu0 %11007  ;;  %v1719_v19 = vpack.c.bf16 %v1430_v47, %v1426_v37 }
 0x3fb   :  { %v11010_v49 = vunpack.i.h.bf16 %v12196_v6  ;;  %v11009_v1 = vunpack.i.l.bf16 %v12196_v6 }
 0x3fd   :  { %v11003_v36 = vpop.permute.xlu1 %11002 }
 0x3fe   :  { %v11005_v24 = vunpack.i.h.bf16 %v11003_v36  ;;  %v11004_v7 = vunpack.i.l.bf16 %v11003_v36  ;;  %v1510_v36 = vsel %vm726_vm6, %v11009_v1, %v11010_v49 }
 0x3ff   :  { %v11023_v30 = vpop.permute.xlu0 %11022 }
 0x400   :  { %v11025_v23 = vunpack.i.h.bf16 %v11023_v30  ;;  %v11024_v60 = vunpack.i.l.bf16 %v11023_v30  ;;  %v1429_v34 = vsel %vm690_vm13, %v11005_v24, %v10999_v35  ;;  %v1425_v41 = vsel %vm690_vm13, %v11004_v7, %v10979_v10 }
 0x401   :  { %v12204_v3 = vpop.permute.xlu1 %11012  ;;  %v1718_v38 = vpack.c.bf16 %v1429_v34, %v1425_v41  ;;  %v1498_v30 = vsel %vm726_vm6, %v10994_v55, %v10995_v31  ;;  %v1506_v24 = vsel %vm726_vm6, %v10984_v12, %v10985_v43 }
 0x402   :  { %v11015_v0 = vunpack.i.h.bf16 %v12204_v3  ;;  %v11014_v21 = vunpack.i.l.bf16 %v12204_v3  ;;  %v1417_v27 = vsel %vm690_vm13, %v11024_v60, %v10989_v39  ;;  %v1729_v7 = vpack.c.bf16 %v1510_v36, %v1506_v24 }
 0x403   :  { %v12213_v16 = vpop.permute.xlu0 %11027 }
 0x404   :  { %v1421_v11 = vsel %vm690_vm13, %v11025_v23, %v11014_v21  ;;  %v1422_v51 = vsel %vm690_vm13, %v11014_v21, %v11015_v0  ;;  %v11029_v47 = vunpack.i.l.bf16 %v12213_v16 }
 0x405   :  { %v11018_v26 = vpop.permute.xlu1 %11017  ;;  %v1714_v63 = vpack.c.bf16 %v1422_v51, %v1418_v50  ;;  %v1713_v48 = vpack.c.bf16 %v1421_v11, %v1417_v27  ;;  %v11030_v27 = vunpack.i.h.bf16 %v12213_v16 }
 0x406   :  { %v11020_v17 = vunpack.i.h.bf16 %v11018_v26  ;;  %v11019_v5 = vunpack.i.l.bf16 %v11018_v26 }
 0x407   :  { %1805 = vmatprep.subr.bf16.mxu1 %v1714_v63  ;;  %v11043_v13 = vpop.permute.xlu0 %11042 }
 0x408   :  { %1806 = vmatpush1.bf16.msra.mxu1 %v1713_v48  ;;  %v11045_v15 = vunpack.i.h.bf16 %v11043_v13  ;;  %v11044_v40 = vunpack.i.l.bf16 %v11043_v13  ;;  %v1509_v11 = vsel %vm726_vm6, %v11020_v17, %v11009_v1  ;;  %v1505_v50 = vsel %vm726_vm6, %v11019_v5, %v10984_v12 }
 0x409   :  { %v12232_v44 = vpop.permute.xlu1 %11032  ;;  %1807 = vmatprep.subr.bf16.mxu1 %v1719_v19 }
 0x40a   :  { %v11035_v28 = vunpack.i.h.bf16 %v12232_v44  ;;  %v11034_v25 = vunpack.i.l.bf16 %v12232_v44  ;;  %v1497_v2 = vsel %vm726_vm6, %v11044_v40, %v10994_v55  ;;  %v1728_v55 = vpack.c.bf16 %v1509_v11, %v1505_v50 }
 0x40b   :  { %v12241_v39 = vpop.permute.xlu0 %11047 }
 0x40c   :  { %v1501_v35 = vsel %vm726_vm6, %v11045_v15, %v11034_v25  ;;  %1808 = vmatpush1.bf16.msra.mxu1 %v1718_v38  ;;  %v1502_v10 = vsel %vm726_vm6, %v11034_v25, %v11035_v28  ;;  %v11050_v51 = vunpack.i.h.bf16 %v12241_v39  ;;  %v11049_v26 = vunpack.i.l.bf16 %v12241_v39 }
 0x40d   :  { %v1723_v23 = vpack.c.bf16 %v1501_v35, %v1497_v2  ;;  %v12249_v60 = vpop.permute.xlu1 %11037  ;;  %v1724_v21 = vpack.c.bf16 %v1502_v10, %v1498_v30  ;;  %v1579_v15 = vsel %vm1577_vm0, %v11029_v47, %v11030_v27 }
 0x40e   :  { %v11040_v63 = vunpack.i.h.bf16 %v12249_v60  ;;  %v11039_v48 = vunpack.i.l.bf16 %v12249_v60  ;;  %v1591_v5 = vsel %vm1577_vm0, %v11049_v26, %v11050_v51 }
 0x40f   :  { %1809 = vmatprep.subr.bf16.mxu1 %v1724_v21  ;;  %v11063_v37 = vpop.permute.xlu0 %11062 }
 0x410   :  { %1810 = vmatpush1.bf16.msra.mxu1 %v1723_v23  ;;  %v11065_v19 = vunpack.i.h.bf16 %v11063_v37  ;;  %v11064_v34 = vunpack.i.l.bf16 %v11063_v37  ;;  %v1587_v17 = vsel %vm1577_vm0, %v11039_v48, %v11040_v63 }
 0x411   :  { %v12262_v41 = vpop.permute.xlu1 %11052  ;;  %1811 = vmatprep.subr.bf16.mxu1 %v1729_v7  ;;  %v1739_v23 = vpack.c.bf16 %v1591_v5, %v1587_v17 }
 0x412   :  { %v11055_v1 = vunpack.i.h.bf16 %v12262_v41  ;;  %v11054_v13 = vunpack.i.l.bf16 %v12262_v41  ;;  %v1578_v12 = vsel %vm1577_vm0, %v11064_v34, %v11029_v47 }
 0x413   :  { %v12271_v25 = vpop.permute.xlu0 %11067 }
 0x414   :  { %v1582_v40 = vsel %vm1577_vm0, %v11065_v19, %v11054_v13  ;;  %1812 = vmatpush1.bf16.msra.mxu1 %v1728_v55  ;;  %v1583_v38 = vsel %vm1577_vm0, %v11054_v13, %v11055_v1  ;;  %v11070_v21 = vunpack.i.h.bf16 %v12271_v25  ;;  %v11069_v24 = vunpack.i.l.bf16 %v12271_v25 }
 0x415   :  { %v1733_v2 = vpack.c.bf16 %v1582_v40, %v1578_v12  ;;  %v11058_v36 = vpop.permute.xlu1 %11057  ;;  %v1734_v35 = vpack.c.bf16 %v1583_v38, %v1579_v15 }
 0x416   :  { %v11060_v30 = vunpack.i.h.bf16 %v11058_v36  ;;  %v11059_v10 = vunpack.i.l.bf16 %v11058_v36 }
 0x417   :  { %1813 = vmatprep.subr.bf16.mxu1 %v1734_v35  ;;  %v11083_v11 = vpop.permute.xlu0 %11082 }
 0x418   :  { %v1590_v7 = vsel %vm1577_vm0, %v11060_v30, %v11049_v26  ;;  %v1586_v47 = vsel %vm1577_vm0, %v11059_v10, %v11039_v48  ;;  %1814 = vmatpush1.bf16.msra.mxu1 %v1733_v2  ;;  %v11085_v37 = vunpack.i.h.bf16 %v11083_v11  ;;  %v11084_v19 = vunpack.i.l.bf16 %v11083_v11 }
 0x419   :  { %v1738_v50 = vpack.c.bf16 %v1590_v7, %v1586_v47  ;;  %v12286_v34 = vpop.permute.xlu1 %11072  ;;  %1815 = vmatprep.subr.bf16.mxu1 %v1739_v23  ;;  %v1660_v48 = vsel %vm243_vm2, %v11069_v24, %v11070_v21 }
 0x41a   :  { %v11075_v55 = vunpack.i.h.bf16 %v12286_v34  ;;  %v11074_v13 = vunpack.i.l.bf16 %v12286_v34  ;;  %v1659_v12 = vsel %vm243_vm2, %v11084_v19, %v11069_v24 }
 0x41b   :  { %v12292_v26 = vpop.permute.xlu0 %11087 }
 0x41c   :  { %v1663_v15 = vsel %vm243_vm2, %v11085_v37, %v11074_v13  ;;  %1816 = vmatpush1.bf16.msra.mxu1 %v1738_v50  ;;  %v1664_v40 = vsel %vm243_vm2, %v11074_v13, %v11075_v55  ;;  %v11090_v17 = vunpack.i.h.bf16 %v12292_v26  ;;  %v11089_v5 = vunpack.i.l.bf16 %v12292_v26 }
 0x41d   :  { %v1743_v38 = vpack.c.bf16 %v1663_v15, %v1659_v12  ;;  %v12302_v2 = vpop.permute.xlu1 %11077  ;;  %v1744_v36 = vpack.c.bf16 %v1664_v40, %v1660_v48 }
 0x41e   :  { %v11080_v35 = vunpack.i.h.bf16 %v12302_v2  ;;  %v11079_v30 = vunpack.i.l.bf16 %v12302_v2  ;;  %v1672_v10 = vsel %vm243_vm2, %v11089_v5, %v11090_v17 }
 0x41f   :  { %1817 = vmatprep.subr.bf16.mxu1 %v1744_v36  ;;  %v12309_v23 = vpop.permute.xlu0 %11097 }
 0x420   :  { %1818 = vmatpush1.bf16.msra.mxu1 %v1743_v38  ;;  %v1668_v24 = vsel %vm243_vm2, %v11079_v30, %v11080_v35  ;;  %v11099_v37 = vunpack.i.l.bf16 %v12309_v23  ;;  %v11100_v19 = vunpack.i.h.bf16 %v12309_v23 }
 0x421   :  { %v11093_v7 = vpop.permute.xlu1 %11092  ;;  %v1749_v47 = vpack.c.bf16 %v1672_v10, %v1668_v24  ;;  %v12323_v10 = vld [vmem:[%s17306_s29] ss:$8 sps:$4 sm:$0xff]  }
 0x422   :  { %v11095_v11 = vunpack.i.h.bf16 %v11093_v7  ;;  %v11094_v50 = vunpack.i.l.bf16 %v11093_v7  ;;  %v1419_v24 = vsel %vm690_vm13, %v10990_v62, %v11099_v37 }
 0x423   :  { %1819 = vmatprep.subr.bf16.mxu1 %v1749_v47  ;;  %v12318_v15 = vpop.permute.xlu0 %11102  ;;  %v17308_v47 = vmov 0  }
 0x424   :  { %v1671_v13 = vsel %vm243_vm2, %v11095_v11, %v11089_v5  ;;  %v1667_v12 = vsel %vm243_vm2, %v11094_v50, %v11079_v30  ;;  %v11104_v23 = vunpack.i.l.bf16 %v12318_v15  ;;  %v11105_v5 = vunpack.i.h.bf16 %v12318_v15 }
 0x425   :  { %v1748_v48 = vpack.c.bf16 %v1671_v13, %v1667_v12  ;;  %v11108_v40 = vpop.permute.xlu1 %11107  ;;  %v1420_v11 = vsel %vm690_vm13, %v11099_v37, %v11100_v19  ;;  %v12341_v12 = vld [vmem:[%s17306_s29 + $0x14] ss:$8 sps:$4 sm:$0xff]  }
 0x426   :  { %v11110_v38 = vunpack.i.h.bf16 %v11108_v40  ;;  %v11109_v36 = vunpack.i.l.bf16 %v11108_v40  ;;  %v1428_v4 = vsel %vm690_vm13, %v11104_v23, %v11105_v5 }
 0x427   :  { %1820 = vmatpush1.bf16.msra.mxu1 %v1748_v48  ;;  %v12333_v7 = vpop.permute.xlu0 %11117 }
 0x428   :  { %v1423_v30 = vsel %vm690_vm13, %v11015_v0, %v11109_v36  ;;  %1907 = vmatprep.subr.bf16.mxu1 %v17308_v47  ;;  %v1424_v50 = vsel %vm690_vm13, %v11109_v36, %v11110_v38  ;;  %v1427_v0 = vsel %vm690_vm13, %v10980_v56, %v11104_v23  ;;  %v11119_v37 = vunpack.i.l.bf16 %v12333_v7 }
 0x429   :  { %v1715_v53 = vpack.c.bf16 %v1423_v30, %v1419_v24  ;;  %v11113_v13 = vpop.permute.xlu1 %11112  ;;  %v1716_v62 = vpack.c.bf16 %v1424_v50, %v1420_v11  ;;  %v11120_v48 = vunpack.i.h.bf16 %v12333_v7  ;;  %v7887_v46 = vpack.c.bf16 %v11110_v38, %v11100_v19 }
 0x42a   :  { %v11115_v15 = vunpack.i.h.bf16 %v11113_v13  ;;  %v11114_v3 = vunpack.i.l.bf16 %v11113_v13  ;;  %1834 = vmatmul.mubr.bf16.vlgmr.msra.gmra.mrb[8].mxu1 %v12323_v10  ;;  %v1499_v8 = vsel %vm726_vm6, %v10995_v31, %v11119_v37 }
 0x42b   :  { %1858 = vmatprep.subr.bf16.mxu0 %v1716_v62  ;;  %1908 = vmatpush1.bf16.msra.mxu1 %v1707_v45  ;;  %v12355_v36 = vpop.permute.xlu0 %11122  ;;  %v12365_v45 = vld [vmem:[%s17306_s29 + $0x10] ss:$8 sps:$4 sm:$0xff]   ;;  %v1500_v52 = vsel %vm726_vm6, %v11119_v37, %v11120_v48 }
 0x42c   :  { %v1431_v40 = vsel %vm690_vm13, %v11000_v14, %v11114_v3  ;;  %1859 = vmatpush1.bf16.msra.mxu0 %v1715_v53  ;;  %1909 = vmatprep.subr.bf16.mxu1 %v17308_v47  ;;  %v1432_v56 = vsel %vm690_vm13, %v11114_v3, %v11115_v15  ;;  %v11124_v14 = vunpack.i.l.bf16 %v12355_v36  ;;  %v11125_v23 = vunpack.i.h.bf16 %v12355_v36  ;;  %vm12387_vm13 = vmpackc.low %vm696_vm15, %vm696_vm15 }
 0x42d   :  { %v1720_v24 = vpack.c.bf16 %v1431_v40, %v1427_v0  ;;  %v11128_v30 = vpop.permute.xlu1 %11127  ;;  %v1721_v11 = vpack.c.bf16 %v1432_v56, %v1428_v4  ;;  %7883 = vmatprep.mubr.msk.bf16.mxu1 %vm16857_vm5, %v12341_v12  ;;  %v7890_v40 = vpack.c.bf16 %v11115_v15, %v11105_v5  ;;  %vm1614_vm15 = vcmask 474112  }
 0x42e   :  { %v11130_v18 = vunpack.i.h.bf16 %v11128_v30  ;;  %v11129_v29 = vunpack.i.l.bf16 %v11128_v30  ;;  %v1507_v3 = vsel %vm726_vm6, %v10985_v43, %v11124_v14  ;;  %v1508_v9 = vsel %vm726_vm6, %v11124_v14, %v11125_v23 }
 0x42f   :  { %1860 = vmatprep.subr.bf16.mxu0 %v1721_v11  ;;  %1910 = vmatpush1.bf16.msra.mxu1 %v1712_v20  ;;  %v12378_v53 = vpop.permute.xlu0 %11137 }
 0x430   :  { %v1503_v50 = vsel %vm726_vm6, %v11035_v28, %v11129_v29  ;;  %1861 = vmatpush1.bf16.msra.mxu0 %v1720_v24  ;;  %1911 = vmatprep.subr.bf16.mxu1 %v17308_v47  ;;  %v1504_v31 = vsel %vm726_vm6, %v11129_v29, %v11130_v18  ;;  %v11139_v0 = vunpack.i.l.bf16 %v12378_v53  ;;  %v11140_v37 = vunpack.i.h.bf16 %v12378_v53 }
 0x431   :  { %v1725_v20 = vpack.c.bf16 %v1503_v50, %v1499_v8  ;;  %v11133_v44 = vpop.permute.xlu1 %11132  ;;  %v1726_v28 = vpack.c.bf16 %v1504_v31, %v1500_v52  ;;  %v7893_v41 = vpack.c.bf16 %v11130_v18, %v11120_v48 }
 0x432   :  { %v11135_v13 = vunpack.i.h.bf16 %v11133_v44  ;;  %v11134_v62 = vunpack.i.l.bf16 %v11133_v44  ;;  %1844 = vmatmul.mubr.bf16.gmra.mrb[12].mxu1 %v12365_v45  ;;  %v1580_v30 = vsel %vm1577_vm0, %v11030_v27, %v11139_v0  ;;  %v1581_v16 = vsel %vm1577_vm0, %v11139_v0, %v11140_v37 }
 0x433   :  { %1862 = vmatprep.subr.bf16.mxu0 %v1726_v28  ;;  %7888 = vmatpush1.bf16.msk.msra.mxu1 %vm12387_vm13, %v7887_v46  ;;  %v12402_v38 = vpop.permute.xlu0 %11142 }
 0x434   :  { %v1511_v19 = vsel %vm726_vm6, %v11010_v49, %v11134_v62  ;;  %1863 = vmatpush1.bf16.msra.mxu0 %v1725_v20  ;;  %1913 = vmatprep.subr.bf16.mxu1 %v17308_v47  ;;  %v1512_v43 = vsel %vm726_vm6, %v11134_v62, %v11135_v13  ;;  %v11144_v11 = vunpack.i.l.bf16 %v12402_v38  ;;  %v11145_v5 = vunpack.i.h.bf16 %v12402_v38  ;;  %vm12460_vm6 = vmpackc.low %vm1614_vm15, %vm1614_vm15 }
 0x435   :  { %v1730_v4 = vpack.c.bf16 %v1511_v19, %v1507_v3  ;;  %v11148_v56 = vpop.permute.xlu1 %11147  ;;  %v1731_v24 = vpack.c.bf16 %v1512_v43, %v1508_v9  ;;  %7910 = vmatprep.mubr.msk.bf16.mxu1 %vm16857_vm5, %v12145_v33  ;;  %v7896_v18 = vpack.c.bf16 %v11135_v13, %v11125_v23 }
 0x436   :  { %v11150_v6 = vunpack.i.h.bf16 %v11148_v56  ;;  %v11149_v49 = vunpack.i.l.bf16 %v11148_v56  ;;  %v1588_v52 = vsel %vm1577_vm0, %v11040_v63, %v11144_v11  ;;  %v1589_v60 = vsel %vm1577_vm0, %v11144_v11, %v11145_v5 }
 0x437   :  { %1864 = vmatprep.subr.bf16.mxu0 %v1731_v24  ;;  %7891 = vmatpush1.bf16.msk.msra.mxu1 %vm12387_vm13, %v7890_v40  ;;  %v12421_v33 = vpop.permute.xlu0 %11157 }
 0x438   :  { %v1584_v15 = vsel %vm1577_vm0, %v11055_v1, %v11149_v49  ;;  %1865 = vmatpush1.bf16.msra.mxu0 %v1730_v4  ;;  %1915 = vmatprep.subr.bf16.mxu1 %v17308_v47  ;;  %v1585_v27 = vsel %vm1577_vm0, %v11149_v49, %v11150_v6  ;;  %v11159_v31 = vunpack.i.l.bf16 %v12421_v33  ;;  %v11160_v54 = vunpack.i.h.bf16 %v12421_v33 }
 0x439   :  { %v1735_v8 = vpack.c.bf16 %v1584_v15, %v1580_v30  ;;  %v11153_v1 = vpop.permute.xlu1 %11152  ;;  %v1736_v14 = vpack.c.bf16 %v1585_v27, %v1581_v16  ;;  %v273_v33 = vand.u32 1, %v11684_v58  ;;  %v275_v16 = vand.u32 1, %v11690_v61 }
 0x43a   :  { %v11155_v50 = vunpack.i.h.bf16 %v11153_v1  ;;  %v11154_v53 = vunpack.i.l.bf16 %v11153_v1  ;;  %v1661_v39 = vsel %vm243_vm2, %v11070_v21, %v11159_v31  ;;  %v1662_v23 = vsel %vm243_vm2, %v11159_v31, %v11160_v54 }
 0x43b   :  { %1866 = vmatprep.subr.bf16.mxu0 %v1736_v14  ;;  %7894 = vmatpush1.bf16.msk.msra.mxu1 %vm12428_vm14, %v7893_v41  ;;  %v11163_v48 = vpop.permute.xlu0 %11162  ;;  %v7899_v21 = vpack.c.bf16 %v11150_v6, %v11140_v37  ;;  %vm279_vm9 = vcmp.eq.s32.totalorder %v275_v16, 0  ;;  %v17322_v14 = vmov 0.0  }
 0x43c   :  { %v1592_v7 = vsel %vm1577_vm0, %v11050_v51, %v11154_v53  ;;  %1867 = vmatpush1.bf16.msra.mxu0 %v1735_v8  ;;  %1917 = vmatprep.subr.bf16.mxu1 %v17308_v47  ;;  %v1593_v63 = vsel %vm1577_vm0, %v11154_v53, %v11155_v50  ;;  %v11164_v51 = vunpack.i.l.bf16 %v11163_v48  ;;  %v11165_v3 = vunpack.i.h.bf16 %v11163_v48  ;;  %vm12515_vm15 = vmand %vm279_vm9, %vm283_vm11 }
 0x43d   :  { %v1740_v46 = vpack.c.bf16 %v1592_v7, %v1588_v52  ;;  %v11168_v20 = vpop.permute.xlu1 %11167  ;;  %v1741_v44 = vpack.c.bf16 %v1593_v63, %v1589_v60  ;;  %v7902_v4 = vpack.c.bf16 %v11155_v50, %v11145_v5  ;;  %v12540_v31 = vsel %vm12515_vm15, 1.0, %v17322_v14 }
 0x43e   :  { %v11170_v28 = vunpack.i.h.bf16 %v11168_v20  ;;  %v11169_v62 = vunpack.i.l.bf16 %v11168_v20  ;;  %v1669_v34 = vsel %vm243_vm2, %v11080_v35, %v11164_v51  ;;  %v1670_v37 = vsel %vm243_vm2, %v11164_v51, %v11165_v3  ;;  %17327 = vst [vmem:[#allocation7_spill] sm:$0xff] %v12540_v31 }
 0x43f   :  { %1868 = vmatprep.subr.bf16.mxu0 %v1741_v44  ;;  %7897 = vmatpush1.bf16.msk.msra.mxu1 %vm12428_vm14, %v7896_v18  ;;  %vm284_vm14 = vcmp.le.s32.totalorder %v11674_v42, 10  ;;  %v12570_v51 = vrot.slane %v12540_v31, %v11700_v22 }
 0x440   :  { %v1665_v36 = vsel %vm243_vm2, %v11075_v55, %v11169_v62  ;;  %1869 = vmatpush1.bf16.msra.mxu0 %v1740_v46  ;;  %1919 = vmatprep.subr.bf16.mxu1 %v17308_v47  ;;  %v1666_v13 = vsel %vm243_vm2, %v11169_v62, %v11170_v28  ;;  %v7905_v26 = vpack.c.bf16 %v11170_v28, %v11160_v54 }
 0x441   :  { %v1745_v0 = vpack.c.bf16 %v1665_v36, %v1661_v39  ;;  %v11173_v19 = vpop.permute.xlu1 %11172  ;;  %v1746_v38 = vpack.c.bf16 %v1666_v13, %v1662_v23 }
 0x442   :  { %v11175_v9 = vunpack.i.h.bf16 %v11173_v19  ;;  %v11174_v43 = vunpack.i.l.bf16 %v11173_v19 }
 0x443   :  { %1870 = vmatprep.subr.bf16.mxu0 %v1746_v38  ;;  %7900 = vmatpush1.bf16.msk.msra.mxu1 %vm12460_vm6, %v7899_v21 }
 0x444   :  { %v1673_v55 = vsel %vm243_vm2, %v11090_v17, %v11174_v43  ;;  %1871 = vmatpush1.bf16.msra.mxu0 %v1745_v0  ;;  %1921 = vmatprep.subr.bf16.mxu1 %v17308_v47  ;;  %v1674_v40 = vsel %vm243_vm2, %v11174_v43, %v11175_v9  ;;  %v7908_v17 = vpack.c.bf16 %v11175_v9, %v11165_v3  ;;  %vm277_vm2 = vcmp.eq.s32.totalorder %v273_v33, 0 }
 0x445   :  { %v1750_v56 = vpack.c.bf16 %v1673_v55, %v1669_v34  ;;  %v1751_v2 = vpack.c.bf16 %v1674_v40, %v1670_v37  ;;  %vm12497_vm1 = vmand %vm277_vm2, %vm281_vm12 }
 0x446   :  { %v12525_v50 = vsel %vm12497_vm1, 1.0, %v17322_v14 }
 0x447   :  { %1872 = vmatprep.subr.bf16.mxu0 %v1751_v2  ;;  %7903 = vmatpush1.bf16.msk.msra.mxu1 %vm12460_vm6, %v7902_v4  ;;  %17323 = vst [vmem:[#allocation5_spill] sm:$0xff] %v12525_v50  ;;  %v12548_v60 = vrot.slane %v12525_v50, %v11700_v22 }
 0x448   :  { %1873 = vmatpush1.bf16.msra.mxu0 %v1750_v56  ;;  %1923 = vmatprep.subr.bf16.mxu1 %v17308_v47 }
 0x44b   :  { %1887 = vmatmul.mubr.bf16.vlgmr.msra.gmra.mrb[12].mxu0 %v12323_v10  ;;  %7906 = vmatpush1.bf16.msk.msra.mxu1 %vm7904_vm8, %v7905_v26 }
 0x44c   :  { %1925 = vmatprep.subr.bf16.mxu1 %v17308_v47  ;;  %7885 = vmatprep.mubr.msk.bf16.mxu0 %vm16857_vm5, %v12341_v12 }
 0x44f   :  { %7909 = vmatpush1.bf16.msk.msra.mxu1 %vm7904_vm8, %v7908_v17 }
 0x452   :  { %1940 = vmatmul.mubr.bf16.vlgmr.msra.gmra.mrb[16].mxu1 %v12323_v10  ;;  %v274_v10 = vand.u32 1, %v11686_v59  ;;  %v12501_v29 = vpop.permute.xlu1 %1764 }
 0x453   :  { %1897 = vmatmul.mubr.bf16.gmra.mrb[16].mxu0 %v12365_v45  ;;  %7911 = vmatprep.mubr.msk.bf16.mxu1 %vm16857_vm5, %v12341_v12  ;;  %v276_v12 = vand.u32 1, %v11674_v42 }
 0x454   :  { %2251 = vmatprep.mubr.bf16.mxu0 %v17308_v47  ;;  %vm278_vm3 = vcmp.eq.s32.totalorder %v274_v10, 0 }
 0x455   :  { %vm12505_vm0 = vmand %vm278_vm3, %vm282_vm4  ;;  %vm280_vm13 = vcmp.eq.s32.totalorder %v276_v12, 0 }
 0x456   :  { %v12530_v53 = vsel %vm12505_vm0, 1.0, %v17322_v14  ;;  %vm12533_vm6 = vmand %vm280_vm13, %vm284_vm14  ;;  %v12577_v13 = vpop.permute.xlu1 %1774 }
 0x457   :  { %17324 = vst [vmem:[#allocation6_spill] sm:$0xff] %v12530_v53  ;;  %v12556_v20 = vrot.slane %v12530_v53, %v11700_v22  ;;  %v12566_v39 = vsel %vm12533_vm6, 1.0, %v17322_v14 }
 0x458   :  { %17328 = vst [vmem:[#allocation8_spill] sm:$0xff] %v12566_v39  ;;  %v12610_v26 = vrot.slane %v12566_v39, %v11700_v22 }
 0x45a   :  { %1948 = vmatmul.mubr.bf16.gmra.mrb[20].mxu1 %v12365_v45  ;;  %v1760_v45 = vpop.permute.xlu0 %1759 }
 0x45e   :  { %v12542_v54 = vpop.permute.xlu0 %1769 }
 0x4fd   :  { %v1835_v35 = vpop.f32.mrb[8].mxu1 }
 0x4fe   :  { %v1837_v24 = vpop.f32.mrb[9].mxu1  ;;  %v12503_v41 = vadd.f32 %v1835_v35, %v1760_v45 }
 0x4ff   :  { %v1839_v6 = vpop.f32.mrb[10].mxu1  ;;  %v12509_v58 = vadd.f32 %v1837_v24, %v1760_v45 }
 0x500   :  { %v1841_v49 = vpop.f32.mrb[11].mxu1  ;;  %v12512_v59 = vadd.f32 %v1839_v6, %v12501_v29  ;;  %v1956_v52 = vmax.f32 %v12503_v41, 0.0 }
 0x501   :  { %v12520_v1 = vadd.f32 %v1841_v49, %v12501_v29  ;;  %v1957_v7 = vmax.f32 %v12509_v58, 0.0 }
 0x502   :  { %v16850_v48 = vmax.f32 %v12512_v59, 0.0  ;;  %v1992_v3 = vmul.f32 %v12548_v60, %v1956_v52  ;;  %v17331_v41 = vmax.f32 %v12512_v59, 0.0 }
 0x503   :  { %v16849_v63 = vmax.f32 %v12520_v1, 0.0  ;;  %v1993_v25 = vmul.f32 %v12556_v20, %v1957_v7  ;;  %v17332_v58 = vmax.f32 %v12520_v1, 0.0 }
 0x504   :  { %v1997_v21 = vmul.f32 %v12548_v60, %v16850_v48 }
 0x505   :  { %v1845_v30 = vpop.f32.mrb[12].mxu1  ;;  %v1998_v9 = vmul.f32 %v12556_v20, %v16849_v63  ;;  %v2012_v17 = vadd.f32 %v1993_v25, %v1992_v3 }
 0x506   :  { %v1847_v11 = vpop.f32.mrb[13].mxu1  ;;  %v12552_v18 = vadd.f32 %v1845_v30, %v12542_v54 }
 0x507   :  { %v1849_v5 = vpop.f32.mrb[14].mxu1  ;;  %v12559_v44 = vadd.f32 %v1847_v11, %v12542_v54  ;;  %v2019_v49 = vadd.f32 %v1998_v9, %v1997_v21 }
 0x508   :  { %v1851_v15 = vpop.f32.mrb[15].mxu1  ;;  %v16845_v43 = vmax.f32 %v12552_v18, 0.0  ;;  %v12594_v34 = vadd.f32 %v1849_v5, %v12577_v13 }
 0x509   :  { %v16844_v37 = vmax.f32 %v12559_v44, 0.0  ;;  %v12606_v2 = vadd.f32 %v1851_v15, %v12577_v13 }
 0x50a   :  { %v2002_v30 = vmul.f32 %v12548_v60, %v16845_v43  ;;  %v16851_v11 = vmax.f32 %v12594_v34, 0.0 }
 0x50b   :  { %v2003_v10 = vmul.f32 %v12556_v20, %v16844_v37 }
 0x50c   :  { %v2007_v37 = vmul.f32 %v12548_v60, %v16851_v11 }
 0x51e   :  { %v1888_v46 = vpop.f32.mrb[12].mxu0 }
 0x51f   :  { %v12561_v28 = vadd.f32 %v1888_v46, %v1760_v45  ;;  %v1890_v62 = vpop.f32.mrb[13].mxu0 }
 0x520   :  { %v12575_v36 = vadd.f32 %v1890_v62, %v1760_v45  ;;  %v1892_v23 = vpop.f32.mrb[14].mxu0 }
 0x521   :  { %v1958_v0 = vmax.f32 %v12561_v28, 0.0  ;;  %v12587_v19 = vadd.f32 %v1892_v23, %v12501_v29  ;;  %v1894_v38 = vpop.f32.mrb[15].mxu0  ;;  %v1972_v23 = vmax.f32 %v12606_v2, 0.0 }
 0x522   :  { %v12597_v55 = vadd.f32 %v1894_v38, %v12501_v29  ;;  %v1959_v4 = vmax.f32 %v12575_v36, 0.0 }
 0x523   :  { %v1994_v40 = vmul.f32 %v12570_v51, %v1958_v0  ;;  %v16847_v56 = vmax.f32 %v12587_v19, 0.0 }
 0x524   :  { %v16846_v24 = vmax.f32 %v12597_v55, 0.0  ;;  %v1995_v12 = vmul.f32 %v12548_v60, %v1959_v4 }
 0x525   :  { %v1999_v35 = vmul.f32 %v12570_v51, %v16847_v56  ;;  %v1941_v6 = vpop.f32.mrb[16].mxu1  ;;  %v2013_v16 = vadd.f32 %v2012_v17, %v1994_v40  ;;  %v2026_v56 = vadd.f32 %v2003_v10, %v2002_v30 }
 0x526   :  { %v12620_v5 = vadd.f32 %v1941_v6, %v1760_v45  ;;  %v1898_v15 = vpop.f32.mrb[16].mxu0  ;;  %v1943_v33 = vpop.f32.mrb[17].mxu1  ;;  %v2000_v17 = vmul.f32 %v12548_v60, %v16846_v24 }
 0x527   :  { %v12629_v46 = vadd.f32 %v1898_v15, %v12542_v54  ;;  %v1900_v62 = vpop.f32.mrb[17].mxu0  ;;  %v1944_v3 = vpop.f32.mrb[18].mxu1  ;;  %v2020_v40 = vadd.f32 %v2019_v49, %v1999_v35 }
 0x528   :  { %v16853_v45 = vmax.f32 %v12620_v5, 0.0  ;;  %v12634_v25 = vadd.f32 %v1900_v62, %v12542_v54  ;;  %v12637_v21 = vadd.f32 %v1944_v3, %v12501_v29  ;;  %v1902_v38 = vpop.f32.mrb[18].mxu0  ;;  %v1946_v9 = vpop.f32.mrb[19].mxu1 }
 0x529   :  { %v16848_v6 = vmax.f32 %v12629_v46, 0.0  ;;  %v12644_v15 = vadd.f32 %v1902_v38, %v12577_v13  ;;  %v1904_v33 = vpop.f32.mrb[19].mxu0  ;;  %v2014_v38 = vadd.f32 %v2013_v16, %v1995_v12 }
 0x52a   :  { %v1996_v62 = vmul.f32 %v12610_v26, %v16853_v45  ;;  %v1969_v29 = vmax.f32 %v12634_v25, 0.0  ;;  %v16852_v3 = vmax.f32 %v12637_v21, 0.0  ;;  %v12656_v9 = vadd.f32 %v1904_v33, %v12577_v13 }
 0x52b   :  { %v2004_v35 = vmul.f32 %v12570_v51, %v16848_v6  ;;  %v16856_v49 = vmax.f32 %v12644_v15, 0.0  ;;  %v2008_v6 = vmul.f32 %v12556_v20, %v1972_v23  ;;  %v2021_v33 = vadd.f32 %v2020_v40, %v2000_v17 }
 0x52c   :  { %v2001_v43 = vmul.f32 %v12610_v26, %v16852_v3  ;;  %v2015_v24 = vsel %vm16860_vm10, %v1996_v62, 0.0  ;;  %v2005_v16 = vmul.f32 %v12548_v60, %v1969_v29  ;;  %v16855_v10 = vmax.f32 %v12656_v9, 0.0 }
 0x52d   :  { %v1949_v63 = vpop.f32.mrb[20].mxu1  ;;  %v2016_v48 = vadd.f32 %v2015_v24, %v2014_v38  ;;  %v2027_v45 = vadd.f32 %v2026_v56, %v2004_v35  ;;  %v2009_v30 = vmul.f32 %v12570_v51, %v16856_v49 }
 0x52e   :  { %v12672_v12 = vadd.f32 %v1949_v63, %v12542_v54  ;;  %v1951_v11 = vpop.f32.mrb[21].mxu1  ;;  %v2022_v3 = vsel %vm16860_vm10, %v2001_v43, 0.0  ;;  %v2033_v63 = vadd.f32 %v2008_v6, %v2007_v37 }
 0x52f   :  { %v1952_v62 = vpop.f32.mrb[22].mxu1  ;;  %2017 = vadd.xlane.f32.xlu0 %v2016_v48  ;;  %v2023_v24 = vadd.f32 %v2022_v3, %v2021_v33  ;;  %v2010_v48 = vmul.f32 %v12548_v60, %v16855_v10  ;;  %v2028_v3 = vadd.f32 %v2027_v45, %v2005_v16 }
 0x530   :  { %v1970_v40 = vmax.f32 %v12672_v12, 0.0  ;;  %v12681_v17 = vadd.f32 %v1952_v62, %v12577_v13  ;;  %v1954_v54 = vpop.f32.mrb[23].mxu1  ;;  %v2034_v11 = vadd.f32 %v2033_v63, %v2009_v30  ;;  %v32_v30 = vstv %s17329_s1 }
 0x531   :  { %2024 = vadd.xlane.f32.xlu1 %v2023_v24  ;;  %33 = vst [vmem:[#allocation2] sm:$0x1] %v32_v30 }
 0x532   :  { %v2006_v43 = vmul.f32 %v12610_v26, %v1970_v40  ;;  %v16854_v56 = vmax.f32 %v12681_v17, 0.0  ;;  %v2035_v38 = vadd.f32 %v2034_v11, %v2010_v48  ;;  %v17330_v48 = vmax.f32 %v12620_v5, 0.0 }
 0x533   :  { %v17333_v5 = vmax.f32 %v12587_v19, 0.0 }
 0x534   :  { %v2011_v13 = vmul.f32 %v12610_v26, %v16854_v56  ;;  %v2029_v35 = vsel %vm16860_vm10, %v2006_v43, 0.0  ;;  %v17338_v56 = vmax.f32 %v12629_v46, 0.0 }
 0x535   :  { %v2030_v37 = vadd.f32 %v2029_v35, %v2028_v3 }
 0x536   :  { %v2036_v6 = vsel %vm16860_vm10, %v2011_v13, 0.0 }
 0x537   :  { %2031 = vadd.xlane.f32.xlu0 %v2030_v37  ;;  %v2037_v33 = vadd.f32 %v2036_v6, %v2035_v38  ;;  %v17334_v37 = vmax.f32 %v12597_v55, 0.0  ;;  %v17335_v38 = vmax.f32 %v12637_v21, 0.0 }
 0x53b   :  { %2038 = vadd.xlane.f32.xlu0 %v2037_v33 }
 0x5bc   :  { %v2018_v62 = vpop.xlane.xlu0 %2017 }
 0x5bd   :  { %v2041_v45 = vmul.f32 0.0069444445, %v2018_v62 }
 0x5be   :  { %v2025_v16 = vpop.xlane.xlu1 %2024 }
 0x5bf   :  { %v2042_v24 = vmul.f32 0.0069444445, %v2025_v16  ;;  %v12700_v54 = vsub.f32 %v1956_v52, %v2041_v45  ;;  %v12704_v63 = vsub.f32 %v1957_v7, %v2041_v45  ;;  %v12708_v43 = vsub.f32 %v1958_v0, %v2041_v45 }
 0x5c0   :  { %v12712_v11 = vsub.f32 %v1959_v4, %v2041_v45  ;;  %v12716_v3 = vsub.f32 %v17330_v48, %v2041_v45 }
 0x5c1   :  { %v12720_v52 = vsub.f32 %v17331_v41, %v2042_v24  ;;  %v12724_v7 = vsub.f32 %v17332_v58, %v2042_v24  ;;  %v2065_v28 = vmul.f32 %v12700_v54, %v12548_v60  ;;  %v2066_v36 = vmul.f32 %v12704_v63, %v12556_v20 }
 0x5c2   :  { %v2067_v0 = vmul.f32 %v12708_v43, %v12570_v51  ;;  %v2068_v4 = vmul.f32 %v12712_v11, %v12548_v60  ;;  %v2069_v59 = vmul.f32 %v12716_v3, %v12610_v26  ;;  %v12738_v1 = vsub.f32 %v17333_v5, %v2042_v24 }
 0x5c3   :  { %v2085_v13 = vmul.f32 %v2065_v28, %v2065_v28  ;;  %v2086_v35 = vmul.f32 %v2066_v36, %v2066_v36  ;;  %v12742_v6 = vsub.f32 %v17334_v37, %v2042_v24  ;;  %v12746_v33 = vsub.f32 %v17335_v38, %v2042_v24 }
 0x5c4   :  { %v2032_v30 = vpop.xlane.xlu0 %2031  ;;  %v2087_v62 = vmul.f32 %v2067_v0, %v2067_v0  ;;  %v2089_v45 = vmul.f32 %v2069_v59, %v2069_v59  ;;  %v2070_v16 = vmul.f32 %v12720_v52, %v12548_v60  ;;  %v2071_v41 = vmul.f32 %v12724_v7, %v12556_v20 }
 0x5c5   :  { %v2043_v48 = vmul.f32 0.0069444445, %v2032_v30  ;;  %v2105_v19 = vadd.f32 %v2086_v35, %v2085_v13  ;;  %v2072_v55 = vmul.f32 %v12738_v1, %v12570_v51  ;;  %v2088_v58 = vmul.f32 %v2068_v4, %v2068_v4 }
 0x5c6   :  { %v2073_v21 = vmul.f32 %v12742_v6, %v12548_v60  ;;  %v2074_v24 = vmul.f32 %v12746_v33, %v12610_v26  ;;  %v2090_v28 = vmul.f32 %v2070_v16, %v2070_v16  ;;  %v17336_v36 = vmax.f32 %v12552_v18, 0.0 }
 0x5c7   :  { %v17337_v59 = vmax.f32 %v12559_v44, 0.0  ;;  %v2106_v13 = vadd.f32 %v2105_v19, %v2087_v62  ;;  %v2091_v35 = vmul.f32 %v2071_v41, %v2071_v41  ;;  %v2108_v4 = vsel %vm16860_vm10, %v2089_v45, 0.0 }
 0x5c8   :  { %v12760_v0 = vsub.f32 %v17336_v36, %v2043_v48  ;;  %v2039_v37 = vpop.xlane.xlu0 %2038  ;;  %v2092_v38 = vmul.f32 %v2072_v55, %v2072_v55  ;;  %v2093_v30 = vmul.f32 %v2073_v21, %v2073_v21  ;;  %v12769_v10 = vsub.f32 %v17338_v56, %v2043_v48 }
 0x5c9   :  { %v12764_v5 = vsub.f32 %v17337_v59, %v2043_v48  ;;  %v2044_v16 = vmul.f32 0.0069444445, %v2039_v37  ;;  %v2107_v49 = vadd.f32 %v2106_v13, %v2088_v58  ;;  %v2112_v18 = vadd.f32 %v2091_v35, %v2090_v28 }
 0x5ca   :  { %v12773_v36 = vsub.f32 %v1969_v29, %v2043_v48  ;;  %v2094_v44 = vmul.f32 %v2074_v24, %v2074_v24  ;;  %v12777_v62 = vsub.f32 %v1970_v40, %v2043_v48  ;;  %v2075_v45 = vmul.f32 %v12760_v0, %v12548_v60 }
 0x5cb   :  { %v2076_v46 = vmul.f32 %v12764_v5, %v12556_v20  ;;  %v17339_v56 = vmax.f32 %v12594_v34, 0.0  ;;  %v12789_v25 = vsub.f32 %v1972_v23, %v2044_v16  ;;  %v2109_v29 = vadd.f32 %v2108_v4, %v2107_v49 }
 0x5cc   :  { %v2113_v41 = vadd.f32 %v2112_v18, %v2092_v38  ;;  %v2077_v12 = vmul.f32 %v12769_v10, %v12570_v51  ;;  %v2078_v40 = vmul.f32 %v12773_v36, %v12548_v60  ;;  %v2079_v48 = vmul.f32 %v12777_v62, %v12610_v26 }
 0x5cd   :  { %v12785_v19 = vsub.f32 %v17339_v56, %v2044_v16  ;;  %v2095_v55 = vmul.f32 %v2075_v45, %v2075_v45  ;;  %2110 = vadd.xlane.f32.xlu1 %v2109_v29  ;;  %v2096_v58 = vmul.f32 %v2076_v46, %v2076_v46  ;;  %v17340_v21 = vmax.f32 %v12644_v15, 0.0 }
 0x5ce   :  { %v2114_v34 = vadd.f32 %v2113_v41, %v2093_v30  ;;  %v17341_v23 = vmax.f32 %v12656_v9, 0.0  ;;  %v2115_v24 = vsel %vm16860_vm10, %v2094_v44, 0.0  ;;  %v2097_v28 = vmul.f32 %v2077_v12, %v2077_v12 }
 0x5cf   :  { %v12799_v2 = vsub.f32 %v17340_v21, %v2044_v16  ;;  %v17342_v59 = vmax.f32 %v12681_v17, 0.0  ;;  %v2119_v37 = vadd.f32 %v2096_v58, %v2095_v55  ;;  %v2080_v4 = vmul.f32 %v12785_v19, %v12548_v60  ;;  %v2181_v58 = vld [vmem:[%s17343_s8 + $0x10] sm:$0xff]  ;;  %v2182_v21 = vld [vmem:[%s17343_s8 + $0x18] sm:$0xff] }
 0x5d0   :  { %v12803_v49 = vsub.f32 %v17341_v23, %v2044_v16  ;;  %v2116_v35 = vadd.f32 %v2115_v24, %v2114_v34  ;;  %v2081_v15 = vmul.f32 %v12789_v25, %v12556_v20  ;;  %v2098_v38 = vmul.f32 %v2078_v40, %v2078_v40  ;;  %v2375_v34 = vld [vmem:[#allocation2] sm:$0x1]  ;;  %v6753_v23 = vld [vmem:[%s17344_s5 + $0x8] sm:$0xff]  ;;  %v6755_v24 = vld [vmem:[%s17344_s5 + $0x18] sm:$0xff] }
 0x5d1   :  { %v12808_v13 = vsub.f32 %v17342_v59, %v2044_v16  ;;  %v2099_v30 = vmul.f32 %v2079_v48, %v2079_v48  ;;  %v2082_v9 = vmul.f32 %v12799_v2, %v12570_v51  ;;  %v2120_v17 = vadd.f32 %v2119_v37, %v2097_v28  ;;  %v6761_v28 = vld [vmem:[%s17345_s11 + $0x8] sm:$0xff]  ;;  %v12843_v59 = vld [vmem:[%s17346_s7] sm:$0xff]  }
 0x5d2   :  { %2117 = vadd.xlane.f32.xlu0 %v2116_v35  ;;  %v2083_v16 = vmul.f32 %v12803_v49, %v12548_v60  ;;  %v2100_v44 = vmul.f32 %v2080_v4, %v2080_v4  ;;  %v2101_v45 = vmul.f32 %v2081_v15, %v2081_v15  ;;  %v2180_v60 = vld [vmem:[%s17343_s8 + $0x8] sm:$0xff]  ;;  %v6763_v35 = vld [vmem:[%s17345_s11 + $0x18] sm:$0xff]  ;;  %9546 = vmatprep.mubr.msk.bf16.mxu1 %vm16857_vm5, %v12843_v59 }
 0x5d3   :  { %v2084_v18 = vmul.f32 %v12808_v13, %v12610_v26  ;;  %v2121_v46 = vadd.f32 %v2120_v17, %v2098_v38  ;;  %v2102_v56 = vmul.f32 %v2082_v9, %v2082_v9  ;;  %v2122_v20 = vsel %vm16860_vm10, %v2099_v30, 0.0 }
 0x5d4   :  { %v2126_v29 = vadd.f32 %v2101_v45, %v2100_v44  ;;  %v2103_v40 = vmul.f32 %v2083_v16, %v2083_v16 }
 0x5d5   :  { %v2104_v41 = vmul.f32 %v2084_v18, %v2084_v18  ;;  %v2123_v12 = vadd.f32 %v2122_v20, %v2121_v46 }
 0x5d6   :  { %v2127_v48 = vadd.f32 %v2126_v29, %v2102_v56 }
 0x5d7   :  { %2124 = vadd.xlane.f32.xlu1 %v2123_v12  ;;  %v2129_v26 = vsel %vm16860_vm10, %v2104_v41, 0.0 }
 0x5d8   :  { %v2128_v51 = vadd.f32 %v2127_v48, %v2103_v40 }
 0x5da   :  { %v2130_v55 = vadd.f32 %v2129_v26, %v2128_v51 }
 0x5dc   :  { %2131 = vadd.xlane.f32.xlu0 %v2130_v55 }
 0x5e8   :  { %2378 = vperm.xlu1 %10925, %v2375_v34  }
 0x5ec   :  { %2190 = vperm.xlu1 %10925, %v2180_v60  }
 0x5f0   :  { %2195 = vperm.xlu1 %10925, %v2181_v58  }
 0x5f4   :  { %2200 = vperm.xlu1 %10925, %v2182_v21  }
 0x5f8   :  { %6773 = vperm.xlu1 %10925, %v6753_v23  }
 0x5fc   :  { %6783 = vperm.xlu1 %10925, %v6755_v24  }
 0x600   :  { %6884 = vperm.xlu1 %10925, %v6761_v28  }
 0x604   :  { %6894 = vperm.xlu1 %10925, %v6763_v35  }
 0x65a   :  { %v2111_v37 = vpop.xlane.xlu1 %2110 }
 0x65b   :  { %v2133_v4 = vmul.f32 0.0069444445, %v2111_v37 }
 0x65d   :  { %v2137_v15 = vadd.f32 1e-05, %v2133_v4  ;;  %v295_v4 = vadd.s32 8, %v11681_v57 }
 0x65f   :  { %v2118_v38 = vpop.xlane.xlu0 %2117  ;;  %11216 = vrsqrt.f32 %v2137_v15  ;;  %v312_v15 = vadd.s32 144, %v11681_v57 }
 0x660   :  { %v2134_v30 = vmul.f32 0.0069444445, %v2118_v38  ;;  %v313_v38 = vadd.s32 152, %v11681_v57 }
 0x662   :  { %v2138_v9 = vadd.f32 1e-05, %v2134_v30 }
 0x664   :  { %11218 = vrsqrt.f32 %v2138_v9  ;;  %v2125_v18 = vpop.xlane.xlu1 %2124  ;;  %v315_v9 = vadd.s32 168, %v11681_v57 }
 0x665   :  { %v2135_v17 = vmul.f32 0.0069444445, %v2125_v18 }
 0x667   :  { %v2139_v16 = vadd.f32 1e-05, %v2135_v17  ;;  %v298_v17 = vadd.s32 32, %v11681_v57 }
 0x669   :  { %v2132_v44 = vpop.xlane.xlu0 %2131  ;;  %v11217_v46 = vpop.eup %11216  ;;  %11220 = vrsqrt.f32 %v2139_v16 }
 0x66a   :  { %v2136_v45 = vmul.f32 0.0069444445, %v2132_v44  ;;  %v2146_v20 = vmul.f32 %v11217_v46, %v12704_v63  ;;  %v2149_v41 = vmul.f32 %v11217_v46, %v12716_v3  ;;  %v2145_v48 = vmul.f32 %v11217_v46, %v12700_v54 }
 0x66b   :  { %v2148_v35 = vmul.f32 %v11217_v46, %v12712_v11 }
 0x66c   :  { %v2140_v56 = vadd.f32 1e-05, %v2136_v45 }
 0x66e   :  { %v11219_v29 = vpop.eup %11218  ;;  %11222 = vrsqrt.f32 %v2140_v56 }
 0x66f   :  { %v2151_v12 = vmul.f32 %v11219_v29, %v12724_v7  ;;  %v2154_v40 = vmul.f32 %v11219_v29, %v12746_v33  ;;  %v2150_v51 = vmul.f32 %v11219_v29, %v12720_v52  ;;  %v2153_v7 = vmul.f32 %v11219_v29, %v12742_v6  ;;  %v11185_v6 = vld [vmem:[%s17346_s7 + $0x8] sm:$0xff]  }
 0x670   :  { %v2152_v37 = vmul.f32 %v11219_v29, %v12738_v1  ;;  %v297_v29 = vadd.s32 24, %v11681_v57 }
 0x671   :  { %v2170_v26 = vpack.c.bf16 %v2151_v12, %v2146_v20  ;;  %v2173_v55 = vpack.c.bf16 %v2154_v40, %v2149_v41  ;;  %v2169_v34 = vpack.c.bf16 %v2150_v51, %v2145_v48 }
 0x673   :  { %2219 = vmatprep.subr.bf16.mxu0 %v2170_v26  ;;  %9542 = vmatprep.subr.bf16.mxu1 %v2173_v55  ;;  %v11221_v60 = vpop.eup %11220 }
 0x674   :  { %2220 = vmatpush1.bf16.msra.mxu0 %v2169_v34  ;;  %9543 = vmatpush3.bf16.msra.mxu1 %v2173_v55  ;;  %v2156_v63 = vmul.f32 %v11221_v60, %v12764_v5  ;;  %v2159_v3 = vmul.f32 %v11221_v60, %v12777_v62  ;;  %v2155_v52 = vmul.f32 %v11221_v60, %v12760_v0 }
 0x675   :  { %v2172_v5 = vpack.c.bf16 %v2153_v7, %v2148_v35  ;;  %v2147_v0 = vmul.f32 %v11217_v46, %v12708_v43 }
 0x677   :  { %v2171_v11 = vpack.c.bf16 %v2152_v37, %v2147_v0 }
 0x678   :  { %v11223_v58 = vpop.eup %11222 }
 0x679   :  { %v2161_v33 = vmul.f32 %v11223_v58, %v12789_v25  ;;  %v2164_v54 = vmul.f32 %v11223_v58, %v12808_v13  ;;  %v2160_v21 = vmul.f32 %v11223_v58, %v12785_v19  ;;  %v2163_v62 = vmul.f32 %v11223_v58, %v12803_v49 }
 0x67a   :  { %v2158_v19 = vmul.f32 %v11221_v60, %v12773_v36  ;;  %v2162_v1 = vmul.f32 %v11223_v58, %v12799_v2  ;;  %v2157_v49 = vmul.f32 %v11221_v60, %v12769_v10  ;;  %v2374_v36 = vld [vmem:[%s17347_s3] sm:$0x1]  ;;  %v439_v10 = vadd.s32 1, %v11552_v32 }
 0x67b   :  { %v2175_v23 = vpack.c.bf16 %v2161_v33, %v2156_v63  ;;  %v2178_v24 = vpack.c.bf16 %v2164_v54, %v2159_v3  ;;  %v2174_v28 = vpack.c.bf16 %v2160_v21, %v2155_v52  ;;  %v12897_v2 = vmul.u32 24, %v11552_v32 }
 0x67c   :  { %v2177_v25 = vpack.c.bf16 %v2163_v62, %v2158_v19  ;;  %v2176_v43 = vpack.c.bf16 %v2162_v1, %v2157_v49  ;;  %v12899_v13 = vmul.u32 24, %v439_v10  ;;  %v296_v32 = vadd.s32 16, %v11681_v57 }
 0x67d   :  { %2221 = vmatprep.subr.bf16.mxu0 %v2175_v23  ;;  %9544 = vmatprep.subr.bf16.mxu1 %v2178_v24  ;;  %17348 = vst [vmem:[#allocation9_spill] sm:$0xff] %v12897_v2  ;;  %vm367_vm8 = vcmp.ge.s32.totalorder %v11681_v57, %v12897_v2  ;;  %vm368_vm14 = vcmp.ge.s32.totalorder %v295_v4, %v12897_v2  ;;  %v17362_v54 = vmov 0  ;;  %v17369_v1 = vmov 0 }
 0x67e   :  { %2222 = vmatpush1.bf16.msra.mxu0 %v2174_v28  ;;  %9545 = vmatpush3.bf16.msra.mxu1 %v2178_v24  ;;  %17349 = vst [vmem:[#allocation10_spill] sm:$0xff] %v12899_v13  ;;  %vm441_vm2 = vcmp.lt.s32.totalorder %v11681_v57, %v12899_v13 }
 0x67f   :  { %2272 = vmatprep.subr.bf16.mxu0 %v2172_v5  ;;  %2429 = vmatprep.subr.bf16.mxu1 %v2172_v5  ;;  %vm12915_vm11 = vmand %vm367_vm8, %vm441_vm2  ;;  %vm386_vm8 = vcmp.ge.s32.totalorder %v313_v38, %v12897_v2  ;;  %vm459_vm2 = vcmp.lt.s32.totalorder %v312_v15, %v12899_v13 }
 0x680   :  { %v585_v18 = vsel %vm12915_vm11, 1.0, %v17322_v14 }
 0x681   :  { %7914 = vmatmul.mubr.msk.bf16.vlgmr.msra.gmra.mrb[20].mxu0 %vm16857_vm5, %v12843_v59  ;;  %9547 = vmatmul.mubr.msk.bf16.vlgmr.msra.gmra.mrb[24].mxu1 %vm16857_vm5, %v11185_v6  ;;  %v12936_v44 = vsub.f32 %v585_v18, %v585_v18 }
 0x682   :  { %2273 = vmatpush1.bf16.msra.mxu0 %v2171_v11  ;;  %2430 = vmatpush1.bf16.msra.mxu1 %v2171_v11 }
 0x683   :  { %2274 = vmatprep.subr.bf16.mxu0 %v2177_v25  ;;  %2431 = vmatprep.subr.bf16.mxu1 %v2177_v25  ;;  %v16878_v12 = vand.u32 4294901760, %v12936_v44 }
 0x684   :  { %2261 = vmatprep.mubr.bf16.mxu0 %v17308_v47  ;;  %2461 = vmatprep.mubr.bf16.mxu1 %v17308_v47 }
 0x685   :  { %v2633_v60 = vsub.f32 %v12936_v44, %v16878_v12 }
 0x686   :  { %2275 = vmatpush1.bf16.msra.mxu0 %v2176_v43  ;;  %2432 = vmatpush1.bf16.msra.mxu1 %v2176_v43 }
 0x687   :  { %2388 = vmatprep.subr.bf16.mxu0 %v2170_v26  ;;  %v2634_v21 = vand.u32 4294901760, %v2633_v60  ;;  %v299_v26 = vadd.s32 40, %v11681_v57 }
 0x689   :  { %7915 = vmatmul.mubr.msk.bf16.gmra.mrb[24].mxu0 %vm16857_vm5, %v11185_v6  ;;  %7921 = vmatmul.mubr.msk.bf16.vlgmr.msra.gmra.mrb[28].mxu1 %vm16857_vm5, %v2374_v36 }
 0x68a   :  { %2304 = vmatprep.mubr.bf16.mxu0 %v17308_v47 }
 0x691   :  { %7916 = vmatmul.mubr.msk.bf16.vlgmr.msra.gmra.mrb[28].mxu0 %vm16857_vm5, %v12843_v59  ;;  %v311_v59 = vadd.s32 136, %v11681_v57 }
 0x692   :  { %2389 = vmatpush1.bf16.msra.mxu0 %v2169_v34  ;;  %2314 = vmatprep.mubr.bf16.mxu0 %v17308_v47 }
 0x693   :  { %2390 = vmatprep.subr.bf16.mxu0 %v2175_v23  ;;  %vm384_vm3 = vcmp.ge.s32.totalorder %v311_v59, %v12897_v2  ;;  %vm458_vm9 = vcmp.lt.s32.totalorder %v311_v59, %v12899_v13 }
 0x694   :  { %vm12929_vm10 = vmand %vm384_vm3, %vm458_vm9  ;;  %vm460_vm3 = vcmp.lt.s32.totalorder %v313_v38, %v12899_v13 }
 0x695   :  { %v602_v45 = vsel %vm12929_vm10, 1.0, %v17322_v14  ;;  %vm12965_vm9 = vmand %vm386_vm8, %vm460_vm3 }
 0x696   :  { %2391 = vmatpush1.bf16.msra.mxu0 %v2174_v28  ;;  %v12951_v20 = vsub.f32 %v602_v45, %v602_v45  ;;  %v604_v58 = vsel %vm12965_vm9, 1.0, %v17322_v14 }
 0x697   :  { %9550 = vmatprep.subr.bf16.mxu0 %v17322_v14  ;;  %v12986_v33 = vsub.f32 %v604_v58, %v604_v58 }
 0x698   :  { %v16879_v34 = vand.u32 4294901760, %v12951_v20 }
 0x699   :  { %7917 = vmatmul.mubr.msk.bf16.gmra.mrb[32].mxu0 %vm16857_vm5, %v11185_v6  ;;  %v16875_v37 = vand.u32 4294901760, %v12986_v33 }
 0x69a   :  { %2420 = vmatprep.mubr.bf16.mxu0 %v17308_v47  ;;  %v310_v47 = vadd.s32 128, %v11681_v57  ;;  %v2735_v52 = vsub.f32 %v12951_v20, %v16879_v34 }
 0x69b   :  { %v2747_v49 = vsub.f32 %v12986_v33, %v16875_v37 }
 0x69c   :  { %vm383_vm12 = vcmp.ge.s32.totalorder %v310_v47, %v12897_v2  ;;  %vm457_vm4 = vcmp.lt.s32.totalorder %v310_v47, %v12899_v13  ;;  %v2736_v62 = vand.u32 4294901760, %v2735_v52  ;;  %v17446_v52 = vmov 0 }
 0x69d   :  { %vm12919_vm13 = vmand %vm383_vm12, %vm457_vm4 }
 0x69e   :  { %v601_v16 = vsel %vm12919_vm13, 1.0, %v17322_v14  ;;  %vm12993_vm8 = vmpackc.low %vm12929_vm10, %vm12919_vm13 }
 0x69f   :  { %v12943_v46 = vsub.f32 %v601_v16, %v601_v16  ;;  %v17363_v54 = vsel %vm12993_vm8, 4294967295, %v17362_v54 }
 0x6a0   :  { %17364 = vst [vmem:[#allocation11_spill] sm:$0xff] %v17363_v54 }
 0x6a1   :  { %7920 = vmatmul.mubr.msk.bf16.vlgmr.msra.gmra.mrb[36].mxu0 %vm16857_vm5, %v2374_v36  ;;  %v16880_v48 = vand.u32 4294901760, %v12943_v46 }
 0x6a2   :  { %9551 = vmatpush3.bf16.msra.mxu0 %v2173_v55  ;;  %9554 = vmatprep.mubr.msk.bf16.mxu0 %vm16858_vm7, %v17322_v14  ;;  %vm385_vm7 = vcmp.ge.s32.totalorder %v312_v15, %v12897_v2  ;;  %v314_v15 = vadd.s32 160, %v11681_v57 }
 0x6a3   :  { %9552 = vmatprep.subr.bf16.mxu0 %v17322_v14  ;;  %vm12957_vm4 = vmand %vm385_vm7, %vm459_vm2  ;;  %v2729_v3 = vsub.f32 %v12943_v46, %v16880_v48  ;;  %vm443_vm7 = vcmp.lt.s32.totalorder %v296_v32, %v12899_v13  ;;  %vm444_vm2 = vcmp.lt.s32.totalorder %v297_v29, %v12899_v13 }
 0x6a4   :  { %v603_v55 = vsel %vm12957_vm4, 1.0, %v17322_v14 }
 0x6a5   :  { %v12980_v63 = vsub.f32 %v603_v55, %v603_v55  ;;  %v2730_v28 = vand.u32 4294901760, %v2729_v3 }
 0x6a6   :  { %9553 = vmatpush3.bf16.msra.mxu0 %v2178_v24 }
 0x6a7   :  { %v16876_v23 = vand.u32 4294901760, %v12980_v63  ;;  %v13050_v10 = vpack.c.bf16 %v2736_v62, %v2730_v28 }
 0x6a9   :  { %9555 = vmatmul.mubr.msk.bf16.vlgmr.msra.gmra.mrb[40].mxu0 %vm16857_vm5, %v2374_v36  ;;  %vm442_vm5 = vcmp.lt.s32.totalorder %v295_v4, %v12899_v13  ;;  %v2741_v0 = vsub.f32 %v12980_v63, %v16876_v23  ;;  %v17373_v36 = vmov 0  ;;  %17376 = vst [vmem:[#allocation15_spill] sm:$0xff] %v13050_v10  ;;  %v16881_v4 = vmov 1.0|1.0   ;;  %9917 = vmatprep.subr.bf16.mxu0 %v13050_v10 }
 0x6aa   :  { %vm12945_vm12 = vmand %vm368_vm14, %vm442_vm5  ;;  %vm369_vm5 = vcmp.ge.s32.totalorder %v296_v32, %v12897_v2  ;;  %vm370_vm14 = vcmp.ge.s32.totalorder %v297_v29, %v12897_v2  ;;  %9885 = vmatprep.subr.msk.bf16.mxu1 %vm12993_vm8, %v16881_v4  ;;  %v2748_v32 = vand.u32 4294901760, %v2747_v49 }
 0x6ab   :  { %v586_v41 = vsel %vm12945_vm12, 1.0, %v17322_v14  ;;  %vm13004_vm3 = vmand %vm369_vm5, %vm443_vm7  ;;  %v2742_v47 = vand.u32 4294901760, %v2741_v0  ;;  %v317_v0 = vadd.s32 184, %v11681_v57 }
 0x6ac   :  { %v12963_v51 = vsub.f32 %v586_v41, %v586_v41  ;;  %vm13014_vm10 = vmand %vm370_vm14, %vm444_vm2  ;;  %v587_v6 = vsel %vm13004_vm3, 1.0, %v17322_v14  ;;  %vm371_vm2 = vcmp.ge.s32.totalorder %v298_v17, %v12897_v2  ;;  %v17441_v41 = vmov 0 }
 0x6ad   :  { %v588_v19 = vsel %vm13014_vm10, 1.0, %v17322_v14  ;;  %v13027_v11 = vsub.f32 %v587_v6, %v587_v6  ;;  %vm13033_vm13 = vmpackc.low %vm12945_vm12, %vm12915_vm11  ;;  %vm387_vm11 = vcmp.ge.s32.totalorder %v314_v15, %v12897_v2  ;;  %vm461_vm12 = vcmp.lt.s32.totalorder %v314_v15, %v12899_v13 }
 0x6ae   :  { %v16877_v7 = vand.u32 4294901760, %v12963_v51  ;;  %v17370_v1 = vsel %vm13033_vm13, 4294967295, %v17369_v1  ;;  %v13040_v43 = vsub.f32 %v588_v19, %v588_v19  ;;  %vm13046_vm5 = vmpackc.low %vm12965_vm9, %vm12957_vm4  ;;  %9887 = vmatpush3.bf16.msk.msra.mxu1 %vm13033_vm13, %v16881_v4  ;;  %v13075_v16 = vpack.c.bf16 %v2748_v32, %v2742_v47 }
 0x6af   :  { %17371 = vst [vmem:[#allocation12_spill] sm:$0xff] %v17370_v1  ;;  %v17374_v36 = vsel %vm13046_vm5, 4294967295, %v17373_v36  ;;  %v16874_v59 = vand.u32 4294901760, %v13027_v11  ;;  %9889 = vmatprep.subr.msk.bf16.mxu1 %vm13046_vm5, %v16881_v4  ;;  %vm388_vm4 = vcmp.ge.s32.totalorder %v315_v9, %v12897_v2  ;;  %vm462_vm9 = vcmp.lt.s32.totalorder %v315_v9, %v12899_v13  ;;  %vm13082_vm14 = vmand %vm387_vm11, %vm461_vm12 }
 0x6b0   :  { %v2639_v35 = vsub.f32 %v12963_v51, %v16877_v7  ;;  %17372 = vst [vmem:[#allocation13_spill] sm:$0xff] %v13040_v43  ;;  %17375 = vst [vmem:[#allocation14_spill] sm:$0xff] %v17374_v36  ;;  %v16871_v30 = vand.u32 4294901760, %v13040_v43  ;;  %v605_v40 = vsel %vm13082_vm14, 1.0, %v17322_v14  ;;  %vm445_vm11 = vcmp.lt.s32.totalorder %v298_v17, %v12899_v13 }
 0x6b1   :  { %v2645_v18 = vsub.f32 %v13027_v11, %v16874_v59  ;;  %17378 = vst [vmem:[#allocation17_spill] sm:$0xff] %v13075_v16  ;;  %vm13086_vm7 = vmand %vm388_vm4, %vm462_vm9  ;;  %v13099_v58 = vsub.f32 %v605_v40, %v605_v40  ;;  %vm372_vm12 = vcmp.ge.s32.totalorder %v299_v26, %v12897_v2  ;;  %vm446_vm4 = vcmp.lt.s32.totalorder %v299_v26, %v12899_v13 }
 0x6b2   :  { %v2640_v25 = vand.u32 4294901760, %v2639_v35  ;;  %v2651_v45 = vsub.f32 %v13040_v43, %v16871_v30  ;;  %v606_v60 = vsel %vm13086_vm7, 1.0, %v17322_v14  ;;  %vm13106_vm9 = vmand %vm371_vm2, %vm445_vm11  ;;  %vm390_vm11 = vcmp.ge.s32.totalorder %v317_v0, %v12897_v2 }
 0x6b3   :  { %v2646_v29 = vand.u32 4294901760, %v2645_v18  ;;  %17383 = vst [vmem:[#allocation18_spill] sm:$0xff] %v13099_v58  ;;  %v13102_v3 = vsub.f32 %v606_v60, %v606_v60  ;;  %v16869_v35 = vand.u32 4294901760, %v13099_v58  ;;  %vm13114_vm5 = vmand %vm372_vm12, %vm446_vm4  ;;  %v589_v62 = vsel %vm13106_vm9, 1.0, %v17322_v14 }
 0x6b4   :  { %v13057_v38 = vpack.c.bf16 %v2640_v25, %v2634_v21  ;;  %v2652_v55 = vand.u32 4294901760, %v2651_v45  ;;  %v316_v21 = vadd.s32 176, %v11681_v57  ;;  %v590_v25 = vsel %vm13114_vm5, 1.0, %v17322_v14 }
 0x6b5   :  { %17384 = vst [vmem:[#allocation19_spill] sm:$0xff] %v13102_v3  ;;  %v16867_v19 = vand.u32 4294901760, %v13102_v3  ;;  %v13126_v49 = vsub.f32 %v589_v62, %v589_v62  ;;  %v2753_v47 = vsub.f32 %v13099_v58, %v16869_v35  ;;  %v13133_v15 = vsub.f32 %v590_v25, %v590_v25 }
 0x6b6   :  { %17377 = vst [vmem:[#allocation16_spill] sm:$0xff] %v13057_v38  ;;  %9919 = vmatpush3.bf16.msra.mxu0 %v13057_v38  ;;  %v13111_v28 = vpack.c.bf16 %v2652_v55, %v2646_v29  ;;  %vm389_vm2 = vcmp.ge.s32.totalorder %v316_v21, %v12897_v2  ;;  %vm463_vm12 = vcmp.lt.s32.totalorder %v316_v21, %v12899_v13  ;;  %v17392_v18 = vmov 0 }
 0x6b7   :  { %9921 = vmatprep.subr.bf16.mxu0 %v13075_v16  ;;  %17390 = vst [vmem:[#allocation21_spill] sm:$0xff] %v13126_v49  ;;  %17391 = vst [vmem:[#allocation22_spill] sm:$0xff] %v13133_v15  ;;  %v2759_v32 = vsub.f32 %v13102_v3, %v16867_v19  ;;  %v16868_v9 = vand.u32 4294901760, %v13126_v49  ;;  %vm464_vm4 = vcmp.lt.s32.totalorder %v317_v0, %v12899_v13  ;;  %v2754_v17 = vand.u32 4294901760, %v2753_v47 }
 0x6b8   :  { %17387 = vst [vmem:[#allocation20_spill] sm:$0xff] %v13111_v28  ;;  %vm13142_vm13 = vmand %vm389_vm2, %vm463_vm12  ;;  %v16870_v45 = vand.u32 4294901760, %v13133_v15  ;;  %v17394_v29 = vmov 0  ;;  %vm2519_vm2 = vcmask 516096   ;;  %v17431_v3 = vmov 1.0|1.0  }
 0x6b9   :  { %v17393_v18 = vsel %vm13142_vm13, 4294967295, %v17392_v18  ;;  %vm13147_vm8 = vmand %vm390_vm11, %vm464_vm4  ;;  %v607_v40 = vsel %vm13142_vm13, 1.0, %v17322_v14  ;;  %v2760_v26 = vand.u32 4294901760, %v2759_v32  ;;  %v2657_v55 = vsub.f32 %v13126_v49, %v16868_v9 }
 0x6ba   :  { %9923 = vmatpush3.bf16.msra.mxu0 %v13111_v28  ;;  %v17395_v29 = vsel %vm13147_vm8, 4294967295, %v17394_v29  ;;  %v608_v60 = vsel %vm13147_vm8, 1.0, %v17322_v14  ;;  %v13160_v21 = vsub.f32 %v607_v40, %v607_v40  ;;  %v2663_v62 = vsub.f32 %v13133_v15, %v16870_v45 }
 0x6bb   :  { %v13165_v0 = vsub.f32 %v608_v60, %v608_v60  ;;  %v13167_v25 = vpack.c.bf16 %v2760_v26, %v2754_v17  ;;  %v2658_v47 = vand.u32 4294901760, %v2657_v55 }
 0x6bc   :  { %17396 = vst [vmem:[#allocation23_spill] sm:$0xff] %v13160_v21  ;;  %v16872_v32 = vand.u32 4294901760, %v13160_v21  ;;  %v2664_v19 = vand.u32 4294901760, %v2663_v62 }
 0x6bd   :  { %17397 = vst [vmem:[#allocation24_spill] sm:$0xff] %v13165_v0  ;;  %17398 = vst [vmem:[#allocation25_spill] sm:$0xff] %v13167_v25  ;;  %v16873_v9 = vand.u32 4294901760, %v13165_v0  ;;  %9925 = vmatprep.subr.bf16.mxu0 %v13167_v25 }
 0x6be   :  { %v2765_v40 = vsub.f32 %v13160_v21, %v16872_v32  ;;  %v13175_v35 = vpack.c.bf16 %v2664_v19, %v2658_v47 }
 0x6bf   :  { %v2771_v60 = vsub.f32 %v13165_v0, %v16873_v9 }
 0x6c0   :  { %17399 = vst [vmem:[#allocation26_spill] sm:$0xff] %v13175_v35  ;;  %v2766_v17 = vand.u32 4294901760, %v2765_v40  ;;  %9927 = vmatpush3.bf16.msra.mxu0 %v13175_v35 }
 0x6c1   :  { %v2772_v26 = vand.u32 4294901760, %v2771_v60 }
 0x6c3   :  { %v13181_v55 = vpack.c.bf16 %v2772_v26, %v2766_v17 }
 0x6c5   :  { %17400 = vst [vmem:[#allocation27_spill] sm:$0xff] %v13181_v55  ;;  %9929 = vmatprep.subr.bf16.mxu0 %v13181_v55 }
 0x754   :  { %v13184_v62 = vpop.f32.mrb[20].mxu0  ;;  %v13186_v45 = vpop.f32.mrb[24].mxu1 }
 0x755   :  { %17401 = vst [vmem:[#allocation28_spill] sm:$0xff] %v13184_v62  ;;  %17402 = vst [vmem:[#allocation29_spill] sm:$0xff] %v13186_v45  ;;  %v13188_v30 = vpop.f32.mrb[21].mxu0  ;;  %v13190_v19 = vpop.f32.mrb[25].mxu1 }
 0x756   :  { %17403 = vst [vmem:[#allocation30_spill] sm:$0xff] %v13188_v30  ;;  %v13192_v47 = vpop.f32.mrb[22].mxu0  ;;  %v13194_v32 = vpop.f32.mrb[26].mxu1 }
 0x757   :  { %17404 = vst [vmem:[#allocation31_spill] sm:$0xff] %v13194_v32  ;;  %v13196_v40 = vpop.f32.mrb[23].mxu0  ;;  %v13198_v9 = vpop.f32.mrb[27].mxu1 }
 0x758   :  { %17405 = vst [vmem:[#allocation32_spill] sm:$0xff] %v13198_v9 }
 0x75c   :  { %v13200_v60 = vpop.f32.mrb[24].mxu0  ;;  %v2463_v17 = vpop.f32.mrb[28].mxu1 }
 0x75d   :  { %v13202_v26 = vpop.f32.mrb[25].mxu0  ;;  %v2465_v59 = vpop.f32.mrb[29].mxu1 }
 0x75e   :  { %v13204_v37 = vpop.f32.mrb[26].mxu0  ;;  %v2467_v23 = vpop.f32.mrb[30].mxu1 }
 0x75f   :  { %v13206_v7 = vpop.f32.mrb[27].mxu0  ;;  %v2468_v12 = vpop.f32.mrb[31].mxu1 }
 0x760   :  { %v2379_v23 = vpop.permute.xlu1 %2378 }
 0x761   :  { %v2384_v12 = vrot.slane %v2379_v23, %v11700_v22  ;;  %v304_v22 = vadd.s32 80, %v11681_v57 }
 0x763   :  { %v2464_v9 = vadd.f32 %v2463_v17, %v2384_v12  ;;  %v2466_v36 = vadd.f32 %v2465_v59, %v2384_v12  ;;  %v300_v17 = vadd.s32 48, %v11681_v57 }
 0x764   :  { %v13208_v34 = vpop.f32.mrb[28].mxu0 }
 0x765   :  { %v13210_v48 = vpop.f32.mrb[29].mxu0  ;;  %vm447_vm4 = vcmp.lt.s32.totalorder %v300_v17, %v12899_v13 }
 0x766   :  { %v13212_v4 = vpop.f32.mrb[30].mxu0 }
 0x767   :  { %v13214_v55 = vpop.f32.mrb[31].mxu0 }
 0x76c   :  { %v13216_v35 = vpop.f32.mrb[32].mxu0 }
 0x76d   :  { %17406 = vst [vmem:[#allocation33_spill] sm:$0xff] %v13216_v35  ;;  %v13218_v25 = vpop.f32.mrb[33].mxu0  ;;  %v13227_v35 = vsel %vm12515_vm15, %v2464_v9, -1e+30  ;;  %vm17410_vm15 = vcmask 1040384  }
 0x76e   :  { %17407 = vst [vmem:[#allocation34_spill] sm:$0xff] %v13218_v25  ;;  %v13220_v28 = vpop.f32.mrb[34].mxu0  ;;  %vm17411_vm11 = vmmov %vm17410_vm15 }
 0x76f   :  { %17408 = vst [vmem:[#allocation35_spill] sm:$0xff] %v13220_v28  ;;  %v13222_v16 = vpop.f32.mrb[35].mxu0  ;;  %v13231_v28 = vsel %vm12497_vm1, %v2466_v36, -1e+30  ;;  %v2517_v36 = vsel %vm17410_vm15, %v13227_v35, -inf }
 0x770   :  { %17409 = vst [vmem:[#allocation36_spill] sm:$0xff] %v13222_v16  ;;  %v2518_v27 = vsel %vm17411_vm11, %v13231_v28, -inf }
 0x774   :  { %v2422_v38 = vpop.f32.mrb[36].mxu0 }
 0x775   :  { %v2424_v10 = vpop.f32.mrb[37].mxu0  ;;  %v2423_v1 = vadd.f32 %v2422_v38, %v2384_v12 }
 0x776   :  { %v2426_v32 = vpop.f32.mrb[38].mxu0  ;;  %v2425_v39 = vadd.f32 %v2424_v10, %v2384_v12 }
 0x777   :  { %v2427_v45 = vpop.f32.mrb[39].mxu0  ;;  %v13235_v16 = vsel %vm12497_vm1, %v2423_v1, -1e+30  ;;  %vm17412_vm1 = vmmov %vm17411_vm11 }
 0x778   :  { %v13239_v10 = vsel %vm12505_vm0, %v2425_v39, -1e+30  ;;  %v2515_v1 = vsel %vm17412_vm1, %v13235_v16, -inf  ;;  %vm17413_vm0 = vmmov %vm17412_vm1  ;;  %v2523_v39 = vmax.f32 %v2517_v36, %v2518_v27  ;;  %v302_v27 = vadd.s32 64, %v11681_v57 }
 0x779   :  { %v2516_v8 = vsel %vm17413_vm0, %v13239_v10, -inf }
 0x77c   :  { %v2504_v25 = vpop.f32.mrb[40].mxu0 }
 0x77d   :  { %v2505_v23 = vadd.f32 %v2504_v25, %v2384_v12  ;;  %v9556_v45 = vpop.f32.mrb[41].mxu0  ;;  %v301_v12 = vadd.s32 56, %v11681_v57 }
 0x77e   :  { %v2507_v32 = vpop.f32.mrb[42].mxu0  ;;  %v318_v45 = vadd.s32 192, %v11681_v57 }
 0x77f   :  { %v13243_v61 = vsel %vm12533_vm6, %v2505_v23, -1e+30  ;;  %v9557_v59 = vpop.f32.mrb[43].mxu0  ;;  %vm373_vm6 = vcmp.ge.s32.totalorder %v300_v17, %v12897_v2  ;;  %vm374_vm12 = vcmp.ge.s32.totalorder %v301_v12, %v12897_v2  ;;  %v17414_v23 = vmov 0 }
 0x780   :  { %v2520_v38 = vsel %vm2519_vm2, %v13243_v61, -inf  ;;  %vm448_vm2 = vcmp.lt.s32.totalorder %v301_v12, %v12899_v13  ;;  %vm13260_vm15 = vmand %vm373_vm6, %vm447_vm4  ;;  %v319_v32 = vadd.s32 200, %v11681_v57  ;;  %v17416_v59 = vmov 0 }
 0x781   :  { %v2521_v9 = vmax.f32 %v2515_v1, %v2520_v38  ;;  %v17415_v23 = vsel %vm13260_vm15, 4294967295, %v17414_v23  ;;  %vm13266_vm11 = vmand %vm374_vm12, %vm448_vm2  ;;  %v591_v36 = vsel %vm13260_vm15, 1.0, %v17322_v14  ;;  %v303_v1 = vadd.s32 72, %v11681_v57  ;;  %v2179_v38 = vld [vmem:[%s17343_s8] sm:$0xff] }
 0x782   :  { %v17417_v59 = vsel %vm13266_vm11, 4294967295, %v17416_v59  ;;  %vm391_vm1 = vcmp.ge.s32.totalorder %v318_v45, %v12897_v2  ;;  %vm392_vm0 = vcmp.ge.s32.totalorder %v319_v32, %v12897_v2  ;;  %vm465_vm6 = vcmp.lt.s32.totalorder %v318_v45, %v12899_v13 }
 0x783   :  { %v2522_v42 = vmax.f32 %v2521_v9, %v2516_v8  ;;  %v592_v9 = vsel %vm13266_vm11, 1.0, %v17322_v14  ;;  %v13281_v8 = vsub.f32 %v591_v36, %v591_v36  ;;  %vm466_vm12 = vcmp.lt.s32.totalorder %v319_v32, %v12899_v13  ;;  %vm13291_vm2 = vmand %vm391_vm1, %vm465_vm6 }
 0x784   :  { %vm375_vm4 = vcmp.ge.s32.totalorder %v302_v27, %v12897_v2  ;;  %vm376_vm11 = vcmp.ge.s32.totalorder %v303_v1, %v12897_v2  ;;  %vm449_vm15 = vcmp.lt.s32.totalorder %v302_v27, %v12899_v13  ;;  %vm450_vm8 = vcmp.lt.s32.totalorder %v303_v1, %v12899_v13  ;;  %vm13299_vm13 = vmand %vm392_vm0, %vm466_vm12 }
 0x785   :  { %v2524_v25 = vmax.f32 %v2522_v42, %v2523_v39  ;;  %v13285_v39 = vsub.f32 %v592_v9, %v592_v9  ;;  %v16905_v42 = vand.u32 4294901760, %v13281_v8  ;;  %v609_v45 = vsel %vm13291_vm2, 1.0, %v17322_v14  ;;  %v6752_v9 = vld [vmem:[%s17344_s5] sm:$0xff]  ;;  %vm13321_vm1 = vmand %vm375_vm4, %vm449_vm15 }
 0x786   :  { %v320_v32 = vadd.s32 208, %v11681_v57  ;;  %v321_v36 = vadd.s32 216, %v11681_v57  ;;  %v610_v17 = vsel %vm13299_vm13, 1.0, %v17322_v14  ;;  %v13317_v30 = vsub.f32 %v609_v45, %v609_v45  ;;  %vm13335_vm0 = vmand %vm376_vm11, %vm450_vm8 }
 0x787   :  { %2525 = vmax.xlane.f32.xlu0 %v2524_v25  ;;  %v17424_v31 = vand.u32 4294901760, %v13285_v39  ;;  %v13329_v50 = vsub.f32 %v610_v17, %v610_v17  ;;  %v593_v27 = vsel %vm13321_vm1, 1.0, %v17322_v14  ;;  %vm13366_vm12 = vmpackc.low %vm13014_vm10, %vm13004_vm3  ;;  %vm451_vm4 = vcmp.lt.s32.totalorder %v304_v22, %v12899_v13 }
 0x788   :  { %vm393_vm15 = vcmp.ge.s32.totalorder %v320_v32, %v12897_v2  ;;  %v16916_v0 = vand.u32 4294901760, %v13317_v30  ;;  %v13347_v17 = vsub.f32 %v593_v27, %v593_v27  ;;  %vm394_vm8 = vcmp.ge.s32.totalorder %v321_v36, %v12897_v2  ;;  %9891 = vmatpush3.bf16.msk.msra.mxu1 %vm13366_vm12, %v17431_v3  ;;  %vm13414_vm10 = vmpackc.low %vm13086_vm7, %vm13082_vm14 }
 0x789   :  { %v2675_v53 = vsub.f32 %v13285_v39, %v17424_v31  ;;  %v594_v31 = vsel %vm13335_vm0, 1.0, %v17322_v14  ;;  %v16920_v21 = vand.u32 4294901760, %v13329_v50  ;;  %vm467_vm11 = vcmp.lt.s32.totalorder %v320_v32, %v12899_v13  ;;  %9893 = vmatprep.subr.msk.bf16.mxu1 %vm13414_vm10, %v17431_v3  ;;  %vm13433_vm14 = vmpackc.low %vm13114_vm5, %vm13106_vm9 }
 0x78a   :  { %v13350_v15 = vsub.f32 %v594_v31, %v594_v31  ;;  %v2777_v49 = vsub.f32 %v13317_v30, %v16916_v0  ;;  %vm468_vm6 = vcmp.lt.s32.totalorder %v321_v36, %v12899_v13  ;;  %v305_v0 = vadd.s32 88, %v11681_v57  ;;  %vm13385_vm3 = vmand %vm393_vm15, %vm467_vm11 }
 0x78b   :  { %v2676_v1 = vand.u32 4294901760, %v2675_v53  ;;  %v17427_v53 = vmov 0  ;;  %v2783_v27 = vsub.f32 %v13329_v50, %v16920_v21  ;;  %v17432_v5 = vand.u32 4294901760, %v13347_v17  ;;  %vm13399_vm15 = vmand %vm394_vm8, %vm468_vm6 }
 0x78c   :  { %v17428_v53 = vsel %vm13366_vm12, 4294967295, %v17427_v53  ;;  %v16919_v31 = vand.u32 4294901760, %v13350_v15  ;;  %v2778_v24 = vand.u32 4294901760, %v2777_v49  ;;  %v17437_v36 = vmov 0  ;;  %9895 = vmatpush3.bf16.msk.msra.mxu1 %vm13433_vm14, %v17431_v3 }
 0x78d   :  { %17429 = vst [vmem:[#allocation37_spill] sm:$0xff] %v17428_v53  ;;  %v2681_v58 = vsub.f32 %v13347_v17, %v17432_v5  ;;  %v611_v5 = vsel %vm13385_vm3, 1.0, %v17322_v14  ;;  %v17438_v36 = vsel %vm13414_vm10, 4294967295, %v17437_v36  ;;  %vm452_vm8 = vcmp.lt.s32.totalorder %v305_v0, %v12899_v13 }
 0x78e   :  { %v2687_v49 = vsub.f32 %v13350_v15, %v16919_v31  ;;  %17439 = vst [vmem:[#allocation39_spill] sm:$0xff] %v17438_v36  ;;  %v612_v31 = vsel %vm13399_vm15, 1.0, %v17322_v14  ;;  %v13421_v21 = vsub.f32 %v611_v5, %v611_v5  ;;  %v17442_v41 = vsel %vm13433_vm14, 4294967295, %v17441_v41 }
 0x78f   :  { %17443 = vst [vmem:[#allocation41_spill] sm:$0xff] %v17442_v41  ;;  %v322_v5 = vadd.s32 224, %v11681_v57  ;;  %vm17444_vm7 = vnez %v17393_v18  ;;  %vm17445_vm6 = vnez %v17395_v29  ;;  %vm17450_vm5 = vcmp.ge.s32.totalorder %v304_v22, %v12897_v2 }
 0x790   :  { %vm13447_vm11 = vmpackc.low %vm17445_vm6, %vm17444_vm7  ;;  %v16922_v6 = vand.u32 4294901760, %v13421_v21  ;;  %v308_v32 = vadd.s32 112, %v11681_v57  ;;  %v309_v29 = vadd.s32 120, %v11681_v57 }
 0x791   :  { %v17447_v52 = vsel %vm13447_vm11, 4294967295, %v17446_v52  ;;  %vm13463_vm9 = vmand %vm17450_vm5, %vm451_vm4  ;;  %9897 = vmatprep.subr.msk.bf16.mxu1 %vm13447_vm11, %v17431_v3  ;;  %vm17453_vm4 = vcmp.ge.s32.totalorder %v305_v0, %v12897_v2  ;;  %vm17456_vm11 = vnez %v17415_v23  ;;  %v17458_v0 = vmov 0 }
 0x792   :  { %17448 = vst [vmem:[#allocation42_spill] sm:$0xff] %v17447_v52  ;;  %v2789_v22 = vsub.f32 %v13421_v21, %v16922_v6  ;;  %vm13482_vm5 = vmand %vm17453_vm4, %vm452_vm8  ;;  %vm17457_vm8 = vnez %v17417_v59  ;;  %v17500_v59 = vmov 0 }
 0x793   :  { %vm13499_vm4 = vmpackc.low %vm17457_vm8, %vm17456_vm11  ;;  %vm17461_vm11 = vcmp.lt.s32.totalorder %v322_v5, %v12899_v13  ;;  %vm17462_vm8 = vcmp.ge.s32.totalorder %v322_v5, %v12897_v2 }
 0x794   :  { %v17459_v0 = vsel %vm13499_vm4, 4294967295, %v17458_v0  ;;  %9899 = vmatpush3.bf16.msk.msra.mxu1 %vm13499_vm4, %v17431_v3  ;;  %vm13518_vm6 = vmand %vm17462_vm8, %vm17461_vm11 }
 0x795   :  { %17460 = vst [vmem:[#allocation44_spill] sm:$0xff] %v17459_v0  ;;  %v613_v5 = vsel %vm13518_vm6, 1.0, %v17322_v14  ;;  %vm13542_vm8 = vmpackc.low %vm13299_vm13, %vm13291_vm2 }
 0x796   :  { %9901 = vmatprep.subr.msk.bf16.mxu1 %vm13542_vm8, %v17431_v3  ;;  %vm13566_vm13 = vmpackc.low %vm13335_vm0, %vm13321_vm1 }
 0x798   :  { %9903 = vmatpush3.bf16.msk.msra.mxu1 %vm13566_vm13, %v17431_v3 }
 0x79d   :  { %2185 = vperm.xlu0 %10924, %v2179_v38   ;;  %v2669_v38 = vsub.f32 %v13281_v8, %v16905_v42 }
 0x79f   :  { %v2670_v42 = vand.u32 4294901760, %v2669_v38  ;;  %v6754_v38 = vld [vmem:[%s17344_s5 + $0x10] sm:$0xff] }
 0x7a1   :  { %6768 = vperm.xlu0 %10924, %v6752_v9   ;;  %v13370_v9 = vpack.c.bf16 %v2676_v1, %v2670_v42  ;;  %v2784_v1 = vand.u32 4294901760, %v2783_v27  ;;  %v2682_v27 = vand.u32 4294901760, %v2681_v58  ;;  %v2688_v58 = vand.u32 4294901760, %v2687_v49 }
 0x7a2   :  { %v13737_v42 = vpack.c.bf16 %v12951_v20, %v12943_v46 }
 0x7a3   :  { %17430 = vst [vmem:[#allocation38_spill] sm:$0xff] %v13370_v9  ;;  %9931 = vmatpush3.bf16.msra.mxu0 %v13370_v9  ;;  %v13427_v56 = vpack.c.bf16 %v2784_v1, %v2778_v24  ;;  %v13437_v9 = vsub.f32 %v612_v31, %v612_v31  ;;  %v323_v24 = vadd.s32 232, %v11681_v57  ;;  %v306_v31 = vadd.s32 96, %v11681_v57 }
 0x7a4   :  { %v307_v1 = vadd.s32 104, %v11681_v57  ;;  %v13456_v49 = vpack.c.bf16 %v2688_v58, %v2682_v27  ;;  %v595_v58 = vsel %vm13463_vm9, 1.0, %v17322_v14  ;;  %v17496_v27 = vmov 0  ;;  %17512 = vst [vmem:[#allocation57_spill] sm:$0xff] %v13737_v42 }
 0x7a5   :  { %6778 = vperm.xlu0 %10924, %v6754_v38   ;;  %v6760_v38 = vld [vmem:[%s17345_s11] sm:$0xff]  ;;  %17440 = vst [vmem:[#allocation40_spill] sm:$0xff] %v13427_v56  ;;  %9933 = vmatprep.subr.bf16.mxu0 %v13427_v56  ;;  %v16937_v18 = vand.u32 4294901760, %v13437_v9  ;;  %v596_v56 = vsel %vm13482_vm5, 1.0, %v17322_v14  ;;  %v13506_v52 = vsub.f32 %v595_v58, %v595_v58  ;;  %vm453_vm10 = vcmp.lt.s32.totalorder %v306_v31, %v12899_v13 }
 0x7a6   :  { %17449 = vst [vmem:[#allocation43_spill] sm:$0xff] %v13456_v49  ;;  %v13512_v23 = vsub.f32 %v596_v56, %v596_v56  ;;  %vm380_vm14 = vcmp.ge.s32.totalorder %v307_v1, %v12897_v2  ;;  %vm17465_vm7 = vcmp.lt.s32.totalorder %v323_v24, %v12899_v13  ;;  %vm17466_vm4 = vcmp.ge.s32.totalorder %v323_v24, %v12897_v2 }
 0x7a7   :  { %9935 = vmatpush3.bf16.msra.mxu0 %v13456_v49  ;;  %v2795_v6 = vsub.f32 %v13437_v9, %v16937_v18  ;;  %v2790_v49 = vand.u32 4294901760, %v2789_v22  ;;  %vm13529_vm12 = vmand %vm17466_vm4, %vm17465_vm7  ;;  %vm454_vm11 = vcmp.lt.s32.totalorder %v307_v1, %v12899_v13  ;;  %v324_v58 = vadd.s32 240, %v11681_v57 }
 0x7a8   :  { %v614_v24 = vsel %vm13529_vm12, 1.0, %v17322_v14  ;;  %v17473_v18 = vand.u32 4294901760, %v13506_v52  ;;  %vm17478_vm2 = vcmp.ge.s32.totalorder %v306_v31, %v12897_v2  ;;  %vm13594_vm4 = vmand %vm380_vm14, %vm454_vm11 }
 0x7a9   :  { %6879 = vperm.xlu0 %10924, %v6760_v38   ;;  %v6762_v38 = vld [vmem:[%s17345_s11 + $0x10] sm:$0xff]  ;;  %v2796_v22 = vand.u32 4294901760, %v2795_v6  ;;  %v17469_v6 = vmov 0  ;;  %v13560_v12 = vsub.f32 %v614_v24, %v614_v24  ;;  %vm13582_vm1 = vmand %vm17478_vm2, %vm453_vm10  ;;  %vm397_vm0 = vcmp.ge.s32.totalorder %v324_v58, %v12897_v2 }
 0x7aa   :  { %v17470_v6 = vsel %vm13542_vm8, 4294967295, %v17469_v6  ;;  %v2693_v25 = vsub.f32 %v13506_v52, %v17473_v18  ;;  %vm471_vm7 = vcmp.lt.s32.totalorder %v324_v58, %v12899_v13  ;;  %v597_v31 = vsel %vm13582_vm1, 1.0, %v17322_v14  ;;  %vm13614_vm14 = vmpackc.low %vm13399_vm15, %vm13385_vm3 }
 0x7ab   :  { %17471 = vst [vmem:[#allocation45_spill] sm:$0xff] %v17470_v6  ;;  %v13552_v0 = vpack.c.bf16 %v2796_v22, %v2790_v49  ;;  %v325_v49 = vadd.s32 248, %v11681_v57  ;;  %v17477_v22 = vand.u32 4294901760, %v13512_v23  ;;  %v598_v24 = vsel %vm13594_vm4, 1.0, %v17322_v14  ;;  %9905 = vmatprep.subr.msk.bf16.mxu1 %vm13614_vm14, %v17431_v3  ;;  %vm13631_vm3 = vmand %vm397_vm0, %vm471_vm7 }
 0x7ac   :  { %v2694_v45 = vand.u32 4294901760, %v2693_v25  ;;  %v13608_v1 = vsub.f32 %v597_v31, %v597_v31  ;;  %v13621_v36 = vsub.f32 %v598_v24, %v598_v24  ;;  %v615_v58 = vsel %vm13631_vm3, 1.0, %v17322_v14  ;;  %vm13658_vm2 = vmpackc.low %vm13482_vm5, %vm13463_vm9 }
 0x7ad   :  { %6889 = vperm.xlu0 %10924, %v6762_v38   ;;  %v13549_v38 = vsub.f32 %v613_v5, %v613_v5  ;;  %17472 = vst [vmem:[#allocation46_spill] sm:$0xff] %v13552_v0  ;;  %v17474_v5 = vmov 0  ;;  %v2699_v18 = vsub.f32 %v13512_v23, %v17477_v22  ;;  %9937 = vmatprep.subr.bf16.mxu0 %v13552_v0  ;;  %vm13677_vm9 = vmpackc.low %vm13529_vm12, %vm13518_vm6 }
 0x7ae   :  { %v17475_v5 = vsel %vm13566_vm13, 4294967295, %v17474_v5  ;;  %vm398_vm10 = vcmp.ge.s32.totalorder %v325_v49, %v12897_v2  ;;  %vm472_vm11 = vcmp.lt.s32.totalorder %v325_v49, %v12899_v13  ;;  %v16953_v31 = vand.u32 4294901760, %v13608_v1  ;;  %9907 = vmatpush3.bf16.msk.msra.mxu1 %vm13658_vm2, %v17431_v3  ;;  %vm13695_vm12 = vmpackc.low %vm13594_vm4, %vm13582_vm1 }
 0x7af   :  { %17476 = vst [vmem:[#allocation47_spill] sm:$0xff] %v17475_v5  ;;  %v2700_v41 = vand.u32 4294901760, %v2699_v18  ;;  %v17483_v0 = vand.u32 4294901760, %v13549_v38  ;;  %v17484_v5 = vmov 0  ;;  %v17487_v18 = vand.u32 4294901760, %v13560_v12  ;;  %vm13641_vm15 = vmand %vm398_vm10, %vm472_vm11  ;;  %9909 = vmatprep.subr.msk.bf16.mxu1 %vm13677_vm9, %v17431_v3 }
 0x7b0   :  { %v17485_v5 = vsel %vm13614_vm14, 4294967295, %v17484_v5  ;;  %v16954_v53 = vand.u32 4294901760, %v13621_v36  ;;  %v17493_v49 = vmov 0  ;;  %vm381_vm0 = vcmp.ge.s32.totalorder %v308_v32, %v12897_v2  ;;  %vm13720_vm4 = vmpackc.low %vm13641_vm15, %vm13631_vm3 }
 0x7b1   :  { %v2801_v25 = vsub.f32 %v13549_v38, %v17483_v0  ;;  %17486 = vst [vmem:[#allocation48_spill] sm:$0xff] %v17485_v5  ;;  %v2807_v6 = vsub.f32 %v13560_v12, %v17487_v18  ;;  %v13636_v0 = vpack.c.bf16 %v2700_v41, %v2694_v45  ;;  %v616_v41 = vsel %vm13641_vm15, 1.0, %v17322_v14 }
 0x7b2   :  { %v13652_v45 = vsub.f32 %v615_v58, %v615_v58  ;;  %v17494_v49 = vsel %vm13658_vm2, 4294967295, %v17493_v49  ;;  %v17497_v27 = vsel %vm13677_vm9, 4294967295, %v17496_v27  ;;  %vm455_vm5 = vcmp.lt.s32.totalorder %v308_v32, %v12899_v13  ;;  %9911 = vmatpush3.bf16.msk.msra.mxu1 %vm13695_vm12, %v17431_v3 }
 0x7b3   :  { %17490 = vst [vmem:[#allocation49_spill] sm:$0xff] %v13636_v0  ;;  %v2802_v24 = vand.u32 4294901760, %v2801_v25  ;;  %v2808_v5 = vand.u32 4294901760, %v2807_v6  ;;  %17495 = vst [vmem:[#allocation50_spill] sm:$0xff] %v17494_v49  ;;  %9939 = vmatpush3.bf16.msra.mxu0 %v13636_v0  ;;  %v2705_v6 = vsub.f32 %v13608_v1, %v16953_v31  ;;  %v13666_v25 = vsub.f32 %v616_v41, %v616_v41 }
 0x7b4   :  { %17498 = vst [vmem:[#allocation51_spill] sm:$0xff] %v17497_v27  ;;  %v2711_v41 = vsub.f32 %v13621_v36, %v16954_v53  ;;  %v2812_v31 = vand.u32 4294901760, %v13652_v45  ;;  %v17501_v59 = vsel %vm13695_vm12, 4294967295, %v17500_v59  ;;  %vm382_vm6 = vcmp.ge.s32.totalorder %v309_v29, %v12897_v2  ;;  %vm13702_vm10 = vmand %vm381_vm0, %vm455_vm5  ;;  %9913 = vmatprep.subr.msk.bf16.mxu1 %vm13720_vm4, %v17431_v3 }
 0x7b5   :  { %v13681_v58 = vpack.c.bf16 %v2808_v5, %v2802_v24  ;;  %17502 = vst [vmem:[#allocation53_spill] sm:$0xff] %v17501_v59  ;;  %v2706_v56 = vand.u32 4294901760, %v2705_v6  ;;  %v2818_v5 = vand.u32 4294901760, %v13666_v25  ;;  %vm456_vm7 = vcmp.lt.s32.totalorder %v309_v29, %v12899_v13 }
 0x7b6   :  { %v2712_v62 = vand.u32 4294901760, %v2711_v41  ;;  %v2813_v22 = vsub.f32 %v13652_v45, %v2812_v31  ;;  %vm528_vm1 = vmand %vm382_vm6, %vm456_vm7  ;;  %v599_v24 = vsel %vm13702_vm10, 1.0, %v17322_v14  ;;  %v17505_v29 = vmov 0 }
 0x7b7   :  { %17499 = vst [vmem:[#allocation52_spill] sm:$0xff] %v13681_v58  ;;  %9941 = vmatprep.subr.bf16.mxu0 %v13681_v58  ;;  %v2819_v6 = vsub.f32 %v13666_v25, %v2818_v5  ;;  %v600_v53 = vsel %vm528_vm1, 1.0, %v17322_v14  ;;  %v2715_v0 = vsub.f32 %v599_v24, %v599_v24  ;;  %v17506_v29 = vsel %vm13720_vm4, 4294967295, %v17505_v29  ;;  %vm13731_vm11 = vmpackc.low %vm528_vm1, %vm13702_vm10 }
 0x7b8   :  { %17507 = vst [vmem:[#allocation54_spill] sm:$0xff] %v17506_v29  ;;  %v13724_v41 = vpack.c.bf16 %v2712_v62, %v2706_v56  ;;  %v2814_v58 = vand.u32 4294901760, %v2813_v22  ;;  %v2721_v27 = vsub.f32 %v600_v53, %v600_v53  ;;  %v17509_v24 = vmov 0  ;;  %9915 = vmatpush3.bf16.msk.msra.mxu1 %vm13731_vm11, %v17431_v3 }
 0x7b9   :  { %v17510_v24 = vsel %vm13731_vm11, 4294967295, %v17509_v24  ;;  %v2820_v18 = vand.u32 4294901760, %v2819_v6  ;;  %v2716_v59 = vand.u32 4294901760, %v2715_v0  ;;  %v13742_v53 = vpack.c.bf16 %v13285_v39, %v13281_v8  ;;  %9949 = vmatprep.subr.bf16.mxu1 %v13737_v42 }
 0x7ba   :  { %17508 = vst [vmem:[#allocation55_spill] sm:$0xff] %v13724_v41  ;;  %17511 = vst [vmem:[#allocation56_spill] sm:$0xff] %v17510_v24  ;;  %9943 = vmatpush3.bf16.msra.mxu0 %v13724_v41  ;;  %v2722_v56 = vand.u32 4294901760, %v2721_v27  ;;  %v13752_v6 = vpack.c.bf16 %v13329_v50, %v13317_v30  ;;  %v13757_v29 = vpack.c.bf16 %v13350_v15, %v13347_v17  ;;  %vm17520_vm3 = vnez %v17363_v54 }
 0x7bb   :  { %17513 = vst [vmem:[#allocation58_spill] sm:$0xff] %v13742_v53  ;;  %v13744_v62 = vpack.c.bf16 %v2820_v18, %v2814_v58  ;;  %v2717_v32 = vsub.f32 %v2715_v0, %v2716_v59  ;;  %v13763_v24 = vpack.c.bf16 %v13437_v9, %v13421_v21  ;;  %v13767_v42 = vpack.c.bf16 %v13512_v23, %v13506_v52 }
 0x7bc   :  { %v2723_v22 = vsub.f32 %v2721_v27, %v2722_v56  ;;  %17515 = vst [vmem:[#allocation60_spill] sm:$0xff] %v13752_v6  ;;  %17516 = vst [vmem:[#allocation61_spill] sm:$0xff] %v13757_v29  ;;  %v17532_v29 = vand.u32 4294901760, %v13350_v15  ;;  %v17543_v15 = vand.u32 4294901760, %v13608_v1 }
 0x7bd   :  { %17514 = vst [vmem:[#allocation59_spill] sm:$0xff] %v13744_v62  ;;  %9945 = vmatprep.subr.bf16.mxu0 %v13744_v62  ;;  %v2718_v41 = vand.u32 4294901760, %v2717_v32  ;;  %17518 = vst [vmem:[#allocation63_spill] sm:$0xff] %v13763_v24  ;;  %v13775_v32 = vpack.c.bf16 %v13560_v12, %v13549_v38  ;;  %v17526_v62 = vand.u32 4294901760, %v13285_v39  ;;  %v17537_v39 = vand.u32 4294901760, %v13506_v52  ;;  %v13833_v52 = vpop.permute.xlu1 %2190 }
 0x7be   :  { %v2724_v58 = vand.u32 4294901760, %v2723_v22  ;;  %17519 = vst [vmem:[#allocation64_spill] sm:$0xff] %v13767_v42  ;;  %v13783_v22 = vpack.c.bf16 %v13666_v25, %v13652_v45  ;;  %v17528_v42 = vand.u32 4294901760, %v13317_v30  ;;  %v17538_v30 = vand.u32 4294901760, %v13512_v23  ;;  %17548 = vst [vmem:[#allocation78_spill] sm:$0xff] %v13833_v52 }
 0x7bf   :  { %17521 = vst [vmem:[#allocation65_spill] sm:$0xff] %v13775_v32  ;;  %v17529_v32 = vand.u32 4294901760, %v13329_v50  ;;  %v17540_v50 = vand.u32 4294901760, %v13549_v38  ;;  %v330_v38 = vadd.s32 288, %v11681_v57 }
 0x7c0   :  { %v13759_v18 = vpack.c.bf16 %v2724_v58, %v2718_v41  ;;  %v13779_v41 = vpack.c.bf16 %v13621_v36, %v13608_v1  ;;  %17523 = vst [vmem:[#allocation67_spill] sm:$0xff] %v13783_v22  ;;  %v13785_v58 = vpack.c.bf16 %v2721_v27, %v2715_v0  ;;  %v17534_v0 = vand.u32 4294901760, %v13421_v21 }
 0x7c1   :  { %v13797_v24 = vpack.c.bf16 %v17529_v32, %v17528_v42  ;;  %v13815_v27 = vpack.c.bf16 %v17538_v30, %v17537_v39  ;;  %v17544_v21 = vand.u32 4294901760, %v13621_v36  ;;  %v13835_v23 = vpop.permute.xlu1 %2195  ;;  %vm403_vm15 = vcmp.ge.s32.totalorder %v330_v38, %v12897_v2 }
 0x7c2   :  { %17517 = vst [vmem:[#allocation62_spill] sm:$0xff] %v13759_v18  ;;  %9947 = vmatpush3.bf16.msra.mxu0 %v13759_v18  ;;  %17522 = vst [vmem:[#allocation66_spill] sm:$0xff] %v13779_v41  ;;  %v17525_v18 = vand.u32 4294901760, %v13281_v8  ;;  %v17531_v41 = vand.u32 4294901760, %v13347_v17  ;;  %v17535_v8 = vand.u32 4294901760, %v13437_v9  ;;  %v17541_v17 = vand.u32 4294901760, %v13560_v12 }
 0x7c3   :  { %9981 = vmatprep.subr.msk.bf16.mxu0 %vm17520_vm3, %v17431_v3  ;;  %17524 = vst [vmem:[#allocation68_spill] sm:$0xff] %v13785_v58  ;;  %17530 = vst [vmem:[#allocation70_spill] sm:$0xff] %v13797_v24  ;;  %v13829_v9 = vpack.c.bf16 %v2818_v5, %v2812_v31  ;;  %v13844_v31 = vadd.f32 %v13192_v47, %v13833_v52  ;;  %v13849_v5 = vadd.f32 %v13196_v40, %v13833_v52 }
 0x7c4   :  { %v13791_v54 = vpack.c.bf16 %v17526_v62, %v17525_v18  ;;  %v13803_v45 = vpack.c.bf16 %v17532_v29, %v17531_v41  ;;  %v13809_v25 = vpack.c.bf16 %v17535_v8, %v17534_v0  ;;  %17539 = vst [vmem:[#allocation73_spill] sm:$0xff] %v13815_v27  ;;  %v13821_v42 = vpack.c.bf16 %v17541_v17, %v17540_v50 }
 0x7c5   :  { %v13827_v29 = vpack.c.bf16 %v17544_v21, %v17543_v15  ;;  %17546 = vst [vmem:[#allocation76_spill] sm:$0xff] %v13829_v9  ;;  %v13831_v62 = vpack.c.bf16 %v2722_v56, %v2716_v59  ;;  %17549 = vst [vmem:[#allocation79_spill] sm:$0xff] %v13835_v23  ;;  %v13857_v47 = vpop.permute.xlu1 %2200  ;;  %vm477_vm0 = vcmp.lt.s32.totalorder %v330_v38, %v12899_v13  ;;  %v349_v21 = vadd.s32 440, %v11681_v57  ;;  %v17558_v38 = vld [vmem:[#allocation19_spill] sm:$0xff] }
 0x7c6   :  { %17527 = vst [vmem:[#allocation69_spill] sm:$0xff] %v13791_v54  ;;  %17533 = vst [vmem:[#allocation71_spill] sm:$0xff] %v13803_v45  ;;  %v13863_v40 = vadd.f32 %v13202_v26, %v13835_v23  ;;  %v13871_v8 = vadd.f32 %v13206_v7, %v13857_v47  ;;  %v13875_v39 = vadd.f32 %v13212_v4, %v13833_v52  ;;  %v17553_v4 = vmov 0  ;;  %v17580_v45 = vld [vmem:[#allocation6_spill] sm:$0xff] }
 0x7c7   :  { %17536 = vst [vmem:[#allocation72_spill] sm:$0xff] %v13809_v25  ;;  %17542 = vst [vmem:[#allocation74_spill] sm:$0xff] %v13821_v42  ;;  %v13879_v30 = vadd.f32 %v13214_v55, %v13833_v52  ;;  %v13883_v26 = vpack.c.bf16 %v12963_v51, %v12936_v44  ;;  %v13887_v7 = vpack.c.bf16 %v12986_v33, %v12980_v63  ;;  %v13951_v42 = vadd.s32 384, %v11681_v57  ;;  %v17581_v52 = vld [vmem:[#allocation7_spill] sm:$0xff] }
 0x7c8   :  { %17545 = vst [vmem:[#allocation75_spill] sm:$0xff] %v13827_v29  ;;  %17547 = vst [vmem:[#allocation77_spill] sm:$0xff] %v13831_v62  ;;  %v13906_v15 = vpack.c.bf16 %v13040_v43, %v13027_v11  ;;  %v17573_v62 = vand.u32 4294901760, %v12963_v51  ;;  %v17575_v29 = vmov 0  ;;  %v13961_v51 = vadd.s32 256, %v11681_v57 }
 0x7c9   :  { %17550 = vst [vmem:[#allocation80_spill] sm:$0xff] %v13857_v47  ;;  %17551 = vst [vmem:[#allocation81_spill] sm:$0xff] %v13883_v26  ;;  %v335_v24 = vadd.s32 328, %v11681_v57 }
 0x7ca   :  { %17552 = vst [vmem:[#allocation82_spill] sm:$0xff] %v13887_v7  ;;  %vm13893_vm7 = vmand %vm403_vm15, %vm477_vm0 }
 0x7cb   :  { %v17554_v4 = vsel %vm13893_vm7, 4294967295, %v17553_v4  ;;  %17556 = vst [vmem:[#allocation84_spill] sm:$0xff] %v13906_v15 }
 0x7cc   :  { %17555 = vst [vmem:[#allocation83_spill] sm:$0xff] %v17554_v4  ;;  %v17572_v4 = vand.u32 4294901760, %v12936_v44  ;;  %v13958_v44 = vadd.s32 456, %v11681_v57 }
 0x7ce   :  { %v13942_v9 = vpack.c.bf16 %v17573_v62, %v17572_v4 }
 0x7d0   :  { %17574 = vst [vmem:[#allocation90_spill] sm:$0xff] %v13942_v9 }
 0x814   :  { %v2526_v18 = vpop.xlane.xlu0 %2525 }
 0x815   :  { %v2527_v12 = vsub.f32 %v13235_v16, %v2526_v18  ;;  %v2528_v32 = vsub.f32 %v13239_v10, %v2526_v18  ;;  %v2529_v1 = vsub.f32 %v13227_v35, %v2526_v18  ;;  %v2530_v36 = vsub.f32 %v13231_v28, %v2526_v18 }
 0x816   :  { %v2531_v59 = vsub.f32 %v13243_v61, %v2526_v18  ;;  %v13853_v16 = vadd.f32 %v13200_v60, %v13835_v23  ;;  %v331_v28 = vadd.s32 296, %v11681_v57  ;;  %v348_v10 = vadd.s32 432, %v11681_v57  ;;  %v17557_v18 = vld [vmem:[#allocation18_spill] sm:$0xff] }
 0x817   :  { %v2532_v56 = vmul.f32 1.442695, %v2527_v12  ;;  %v2534_v41 = vmul.f32 1.442695, %v2528_v32  ;;  %v2536_v0 = vmul.f32 1.442695, %v2529_v1  ;;  %v13867_v60 = vadd.f32 %v13204_v37, %v13857_v47 }
 0x818   :  { %v2538_v35 = vmul.f32 1.442695, %v2530_v36  ;;  %v2540_v61 = vmul.f32 1.442695, %v2531_v59  ;;  %vm404_vm5 = vcmp.ge.s32.totalorder %v331_v28, %v12897_v2  ;;  %vm478_vm6 = vcmp.lt.s32.totalorder %v331_v28, %v12899_v13  ;;  %v17563_v1 = vld [vmem:[#allocation21_spill] sm:$0xff]  ;;  %v17564_v36 = vld [vmem:[#allocation22_spill] sm:$0xff] }
 0x819   :  { %11224 = vpow2.f32 %v2532_v56  ;;  %vm421_vm10 = vcmp.ge.s32.totalorder %v348_v10, %v12897_v2  ;;  %vm495_vm1 = vcmp.lt.s32.totalorder %v348_v10, %v12899_v13  ;;  %v13911_v12 = vpack.c.bf16 %v17558_v38, %v17557_v18  ;;  %vm13913_vm15 = vmand %vm404_vm5, %vm478_vm6  ;;  %v17566_v56 = vld [vmem:[#allocation23_spill] sm:$0xff]  ;;  %v17587_v18 = vld [vmem:[#allocation30_spill] sm:$0xff] }
 0x81a   :  { %11226 = vpow2.f32 %v2534_v41  ;;  %v13922_v32 = vadd.s32 312, %v11681_v57  ;;  %v13926_v59 = vpack.c.bf16 %v17564_v36, %v17563_v1  ;;  %v17567_v41 = vld [vmem:[#allocation24_spill] sm:$0xff]  ;;  %v17570_v28 = vand.u32 4294901760, %v12951_v20  ;;  %vm13946_vm0 = vmand %vm421_vm10, %vm495_vm1 }
 0x81b   :  { %11228 = vpow2.f32 %v2536_v0  ;;  %17559 = vst [vmem:[#allocation85_spill] sm:$0xff] %v13911_v12  ;;  %v13930_v0 = vpack.c.bf16 %v17567_v41, %v17566_v56  ;;  %v17576_v29 = vsel %vm13946_vm0, 4294967295, %v17575_v29  ;;  %v350_v20 = vadd.s32 448, %v11681_v57  ;;  %v17583_v41 = vld [vmem:[#allocation4_spill] sm:$0xff] }
 0x81c   :  { %11230 = vpow2.f32 %v2538_v35  ;;  %v2186_v37 = vpop.permute.xlu0 %2185  ;;  %17565 = vst [vmem:[#allocation87_spill] sm:$0xff] %v13926_v59  ;;  %v17569_v35 = vand.u32 4294901760, %v12943_v46  ;;  %17577 = vst [vmem:[#allocation91_spill] sm:$0xff] %v17576_v29  ;;  %v13954_v46 = vadd.s32 392, %v11681_v57  ;;  %v13966_v62 = vsel %vm13913_vm15, 1.0, %v17322_v14  ;;  %v17584_v36 = vld [vmem:[#allocation28_spill] sm:$0xff] }
 0x81d   :  { %11232 = vpow2.f32 %v2540_v61  ;;  %v2307_v55 = vadd.f32 %v13208_v34, %v2186_v37  ;;  %v2309_v50 = vadd.f32 %v13210_v48, %v2186_v37  ;;  %v13902_v17 = vadd.f32 %v13190_v19, %v2186_v37  ;;  %17568 = vst [vmem:[#allocation88_spill] sm:$0xff] %v13930_v0 }
 0x81e   :  { %v17560_v34 = vmov 0  ;;  %v621_v48 = vsel %vm13893_vm7, 1.0, %v17322_v14  ;;  %v332_v19 = vadd.s32 304, %v11681_v57  ;;  %v13936_v61 = vpack.c.bf16 %v17570_v28, %v17569_v35 }
 0x81f   :  { %v17561_v34 = vsel %vm13913_vm15, 4294967295, %v17560_v34  ;;  %v13968_v10 = vsub.f32 %v621_v48, %v621_v48  ;;  %v13975_v35 = vsel %vm13946_vm0, 1.0, %v17322_v14  ;;  %v334_v48 = vadd.s32 320, %v11681_v57 }
 0x820   :  { %17562 = vst [vmem:[#allocation86_spill] sm:$0xff] %v17561_v34  ;;  %17571 = vst [vmem:[#allocation89_spill] sm:$0xff] %v13936_v61  ;;  %v17579_v34 = vld [vmem:[#allocation5_spill] sm:$0xff]  ;;  %vm479_vm15 = vcmp.lt.s32.totalorder %v332_v19, %v12899_v13  ;;  %v2254_v1 = vadd.f32 %v17584_v36, %v2186_v37  ;;  %v2256_v23 = vadd.f32 %v17587_v18, %v2186_v37 }
 0x821   :  { %17578 = vst [vmem:[#allocation92_spill] sm:$0xff] %v13968_v10  ;;  %vm17594_vm6 = vcmp.lt.s32.totalorder %v349_v21, %v12899_v13  ;;  %vm17595_vm1 = vcmp.ge.s32.totalorder %v349_v21, %v12897_v2  ;;  %vm17602_vm0 = vcmp.ge.s32.totalorder %v332_v19, %v12897_v2  ;;  %v17603_v21 = vmov 0 }
 0x822   :  { %vm14044_vm5 = vmand %vm17595_vm1, %vm17594_vm6  ;;  %vm481_vm3 = vcmp.lt.s32.totalorder %v334_v48, %v12899_v13  ;;  %vm17616_vm11 = vcmp.ge.s32.totalorder %v350_v20, %v12897_v2 }
 0x823   :  { %v11225_v4 = vpop.eup %11224  ;;  %vm14059_vm7 = vmand %vm17602_vm0, %vm479_vm15  ;;  %vm17610_vm15 = vcmp.lt.s32.totalorder %v13922_v32, %v12899_v13  ;;  %vm17611_vm0 = vcmp.ge.s32.totalorder %v13922_v32, %v12897_v2  ;;  %v336_v32 = vadd.s32 336, %v11681_v57 }
 0x824   :  { %v11227_v28 = vpop.eup %11226  ;;  %v2542_v27 = vmul.f32 %v11225_v4, %v17579_v34  ;;  %v17604_v21 = vsel %vm14059_vm7, 4294967295, %v17603_v21  ;;  %vm14082_vm6 = vmand %vm17611_vm0, %vm17610_vm15  ;;  %vm17620_vm0 = vcmp.lt.s32.totalorder %v13958_v44, %v12899_v13  ;;  %vm17627_vm15 = vcmp.ge.s32.totalorder %v334_v48, %v12897_v2 }
 0x825   :  { %v11229_v25 = vpop.eup %11228  ;;  %v2543_v29 = vmul.f32 %v11227_v28, %v17580_v45  ;;  %17605 = vst [vmem:[#allocation97_spill] sm:$0xff] %v17604_v21  ;;  %vm14117_vm2 = vmand %vm17627_vm15, %vm481_vm3  ;;  %v640_v48 = vsel %vm14044_vm5, 1.0, %v17322_v14  ;;  %vm17633_vm3 = vcmp.lt.s32.totalorder %v335_v24, %v12899_v13  ;;  %vm17634_vm15 = vcmp.ge.s32.totalorder %v335_v24, %v12897_v2 }
 0x826   :  { %v11231_v54 = vpop.eup %11230  ;;  %v13991_v4 = vmul.f32 %v11229_v25, %v17581_v52  ;;  %v13994_v56 = vrot.slane %v2542_v27, %v17583_v41  ;;  %v13997_v47 = vand.u32 4294901760, %v2542_v27  ;;  %v17588_v25 = vld [vmem:[#allocation8_spill] sm:$0xff]  ;;  %v17639_v24 = vmov 0 }
 0x827   :  { %v11233_v38 = vpop.eup %11232  ;;  %v14000_v45 = vmul.f32 %v11231_v54, %v17579_v34  ;;  %v14003_v28 = vrot.slane %v2543_v29, %v17583_v41  ;;  %v14006_v9 = vand.u32 4294901760, %v2543_v29 }
 0x828   :  { %17582 = vst [vmem:[#allocation5_spill] sm:$0xff] %v13991_v4  ;;  %17585 = vst [vmem:[#allocation6_spill] sm:$0xff] %v13997_v47  ;;  %v14009_v52 = vmul.f32 %v11233_v38, %v17588_v25  ;;  %v14013_v43 = vrot.slane %v13991_v4, %v17583_v41  ;;  %v14016_v36 = vmul.f32 %v13994_v56, %v2254_v1  ;;  %v353_v1 = vadd.s32 472, %v11681_v57  ;;  %v17631_v4 = vld [vmem:[#allocation39_spill] sm:$0xff] }
 0x829   :  { %17586 = vst [vmem:[#allocation7_spill] sm:$0xff] %v14000_v45  ;;  %v14019_v54 = vsub.f32 %v2542_v27, %v13997_v47  ;;  %v14023_v34 = vrot.slane %v14000_v45, %v17583_v41  ;;  %v14026_v37 = vmul.f32 %v14003_v28, %v2256_v23  ;;  %2823 = vmatprep.mubr.f32.mxu0 %v14006_v9  ;;  %v17596_v23 = vmov 0 }
 0x82a   :  { %17589 = vst [vmem:[#allocation28_spill] sm:$0xff] %v14009_v52  ;;  %17590 = vst [vmem:[#allocation30_spill] sm:$0xff] %v14016_v36  ;;  %v2615_v18 = vsub.f32 %v2543_v29, %v14006_v9  ;;  %v14033_v38 = vrot.slane %v14009_v52, %v17583_v41  ;;  %v14036_v27 = vmul.f32 %v14013_v43, %v2307_v55  ;;  %2825 = vmatmul.mubr.f32.vlgmr.msra.gmra.mrb[44].mxu0 %v13997_v47  ;;  %v17600_v55 = vld [vmem:[#allocation12_spill] sm:$0xff]  ;;  %v17612_v36 = vmov 0  ;;  %v17625_v52 = vld [vmem:[#allocation37_spill] sm:$0xff] }
 0x82b   :  { %17591 = vst [vmem:[#allocation8_spill] sm:$0xff] %v14026_v37  ;;  %v17597_v23 = vsel %vm14044_vm5, 4294967295, %v17596_v23  ;;  %v352_v29 = vadd.s32 464, %v11681_v57  ;;  %v14050_v25 = vmul.f32 %v14023_v34, %v2309_v50  ;;  %vm17601_vm10 = vnez %v17600_v55 }
 0x82c   :  { %17592 = vst [vmem:[#allocation93_spill] sm:$0xff] %v14033_v38  ;;  %17593 = vst [vmem:[#allocation94_spill] sm:$0xff] %v14036_v27  ;;  %9983 = vmatpush3.bf16.msk.msra.mxu0 %vm17601_vm10, %v17431_v3  ;;  %v2616_v41 = vand.u32 4294901760, %v2615_v18  ;;  %v14068_v50 = vmul.f32 %v14033_v38, %v13902_v17  ;;  %v17607_v27 = vld [vmem:[#allocation14_spill] sm:$0xff]  ;;  %v17613_v36 = vsel %vm14082_vm6, 4294967295, %v17612_v36  ;;  %vm17621_vm10 = vcmp.ge.s32.totalorder %v13958_v44, %v12897_v2 }
 0x82d   :  { %17598 = vst [vmem:[#allocation95_spill] sm:$0xff] %v17597_v23  ;;  %17599 = vst [vmem:[#allocation96_spill] sm:$0xff] %v14050_v25  ;;  %vm17608_vm1 = vnez %v17607_v27  ;;  %v17609_v25 = vand.u32 4294901760, %v14019_v54  ;;  %vm17626_vm12 = vnez %v17625_v52  ;;  %v17628_v37 = vmov 0  ;;  %v17666_v23 = vld [vmem:[#allocation44_spill] sm:$0xff] }
 0x82e   :  { %17606 = vst [vmem:[#allocation98_spill] sm:$0xff] %v14068_v50  ;;  %9985 = vmatprep.subr.msk.bf16.mxu0 %vm17608_vm1, %v17431_v3  ;;  %17614 = vst [vmem:[#allocation99_spill] sm:$0xff] %v17613_v36  ;;  %3003 = vmatprep.mubr.f32.mxu0 %v2616_v41  ;;  %v2617_v17 = vsub.f32 %v2615_v18, %v2616_v41  ;;  %vm17615_vm1 = vcmp.lt.s32.totalorder %v350_v20, %v12899_v13  ;;  %v17622_v41 = vmov 0  ;;  %v337_v20 = vadd.s32 344, %v11681_v57 }
 0x82f   :  { %v2623_v19 = vsub.f32 %v14019_v54, %v17609_v25  ;;  %vm14092_vm4 = vmand %vm17616_vm11, %vm17615_vm1  ;;  %v17617_v25 = vmov 0  ;;  %vm499_vm1 = vcmp.lt.s32.totalorder %v352_v29, %v12899_v13  ;;  %v17629_v37 = vsel %vm14117_vm2, 4294967295, %v17628_v37 }
 0x830   :  { %v17618_v25 = vsel %vm14092_vm4, 4294967295, %v17617_v25  ;;  %vm14105_vm9 = vmand %vm17621_vm10, %vm17620_vm0  ;;  %9987 = vmatpush3.bf16.msk.msra.mxu0 %vm17626_vm12, %v17431_v3  ;;  %17630 = vst [vmem:[#allocation102_spill] sm:$0xff] %v17629_v37  ;;  %v354_v44 = vadd.s32 480, %v11681_v57  ;;  %vm17632_vm11 = vnez %v17631_v4  ;;  %v17635_v45 = vmov 0  ;;  %v17816_v4 = vld [vmem:[#allocation21_spill] sm:$0xff] }
 0x831   :  { %17619 = vst [vmem:[#allocation100_spill] sm:$0xff] %v17618_v25  ;;  %v2624_v50 = vand.u32 4294901760, %v2623_v19  ;;  %v17623_v41 = vsel %vm14105_vm9, 4294967295, %v17622_v41  ;;  %v2618_v19 = vand.u32 4294901760, %v2617_v17  ;;  %9989 = vmatprep.subr.msk.bf16.mxu0 %vm17632_vm11, %v17431_v3  ;;  %v14130_v17 = vsub.f32 %v13966_v62, %v13966_v62  ;;  %vm14139_vm10 = vmand %vm17634_vm15, %vm17633_vm3 }
 0x832   :  { %17624 = vst [vmem:[#allocation101_spill] sm:$0xff] %v17623_v41  ;;  %v17636_v45 = vsel %vm14139_vm10, 4294967295, %v17635_v45  ;;  %v355_v38 = vadd.s32 488, %v11681_v57  ;;  %v14146_v47 = vsub.f32 %v13975_v35, %v13975_v35  ;;  %v623_v62 = vsel %vm14059_vm7, 1.0, %v17322_v14 }
 0x833   :  { %17637 = vst [vmem:[#allocation103_spill] sm:$0xff] %v17636_v45  ;;  %2619 = vmatprep.mubr.f32.mxu1 %v2618_v19  ;;  %vm17638_vm0 = vcmp.ge.s32.totalorder %v352_v29, %v12897_v2  ;;  %v624_v35 = vsel %vm14082_vm6, 1.0, %v17322_v14  ;;  %v641_v19 = vsel %vm14092_vm4, 1.0, %v17322_v14  ;;  %vm17642_vm7 = vcmp.lt.s32.totalorder %v353_v1, %v12899_v13 }
 0x834   :  { %vm14155_vm5 = vmand %vm17638_vm0, %vm499_vm1  ;;  %2625 = vmatmul.mubr.f32.vlgmr.msra.gmra.mrb[32].mxu1 %v2624_v50  ;;  %vm17643_vm1 = vcmp.ge.s32.totalorder %v353_v1, %v12897_v2  ;;  %v17644_v29 = vmov 0  ;;  %v17647_v50 = vld [vmem:[#allocation41_spill] sm:$0xff]  ;;  %v642_v25 = vsel %vm14105_vm9, 1.0, %v17322_v14  ;;  %v625_v1 = vsel %vm14117_vm2, 1.0, %v17322_v14 }
 0x835   :  { %v17640_v24 = vsel %vm14155_vm5, 4294967295, %v17639_v24  ;;  %vm14171_vm0 = vmand %vm17643_vm1, %vm17642_vm7  ;;  %9951 = vmatpush3.bf16.msra.mxu1 %v13883_v26  ;;  %vm17648_vm6 = vnez %v17647_v50  ;;  %2928 = vmatprep.mubr.f32.mxu1 %v2615_v18  ;;  %v626_v26 = vsel %vm14139_vm10, 1.0, %v17322_v14  ;;  %v643_v41 = vsel %vm14155_vm5, 1.0, %v17322_v14  ;;  %v17654_v18 = vld [vmem:[#allocation42_spill] sm:$0xff] }
 0x836   :  { %17641 = vst [vmem:[#allocation104_spill] sm:$0xff] %v17640_v24  ;;  %v17645_v29 = vsel %vm14171_vm0, 4294967295, %v17644_v29  ;;  %9991 = vmatpush3.bf16.msk.msra.mxu0 %vm17648_vm6, %v17431_v3  ;;  %9953 = vmatprep.subr.bf16.mxu1 %v13887_v7  ;;  %vm17649_vm3 = vcmp.lt.s32.totalorder %v336_v32, %v12899_v13  ;;  %vm17650_vm15 = vcmp.ge.s32.totalorder %v336_v32, %v12897_v2  ;;  %v17651_v37 = vmov 0 }
 0x837   :  { %17646 = vst [vmem:[#allocation105_spill] sm:$0xff] %v17645_v29  ;;  %vm14200_vm2 = vmand %vm17650_vm15, %vm17649_vm3  ;;  %vm17655_vm9 = vnez %v17654_v18  ;;  %v14209_v7 = vsub.f32 %v640_v48, %v640_v48  ;;  %v14211_v24 = vsub.f32 %v623_v62, %v623_v62  ;;  %v644_v32 = vsel %vm14171_vm0, 1.0, %v17322_v14 }
 0x838   :  { %v17652_v37 = vsel %vm14200_vm2, 4294967295, %v17651_v37  ;;  %9993 = vmatprep.subr.msk.bf16.mxu0 %vm17655_vm9, %v17431_v3  ;;  %vm17656_vm3 = vcmp.lt.s32.totalorder %v337_v20, %v12899_v13  ;;  %vm17657_vm15 = vcmp.ge.s32.totalorder %v337_v20, %v12897_v2  ;;  %v17658_v45 = vmov 0 }
 0x839   :  { %17653 = vst [vmem:[#allocation106_spill] sm:$0xff] %v17652_v37  ;;  %vm14220_vm5 = vmand %vm17657_vm15, %vm17656_vm3  ;;  %v338_v36 = vadd.s32 352, %v11681_v57  ;;  %v14225_v21 = vsub.f32 %v624_v35, %v624_v35  ;;  %v14227_v48 = vsub.f32 %v641_v19, %v641_v19  ;;  %v14229_v62 = vsub.f32 %v642_v25, %v642_v25  ;;  %9955 = vmatpush3.bf16.msra.mxu1 %v13906_v15 }
 0x83a   :  { %v17659_v45 = vsel %vm14220_vm5, 4294967295, %v17658_v45  ;;  %vm17661_vm7 = vcmp.lt.s32.totalorder %v354_v44, %v12899_v13  ;;  %vm17662_vm1 = vcmp.ge.s32.totalorder %v354_v44, %v12897_v2  ;;  %v17663_v29 = vmov 0  ;;  %9957 = vmatprep.subr.bf16.mxu1 %v13911_v12 }
 0x83b   :  { %17660 = vst [vmem:[#allocation107_spill] sm:$0xff] %v17659_v45  ;;  %vm14235_vm0 = vmand %vm17662_vm1, %vm17661_vm7  ;;  %v339_v20 = vadd.s32 360, %v11681_v57  ;;  %vm17667_vm3 = vnez %v17666_v23  ;;  %v14244_v35 = vsub.f32 %v625_v1, %v625_v1  ;;  %v14246_v25 = vsub.f32 %v626_v26, %v626_v26 }
 0x83c   :  { %v17664_v29 = vsel %vm14235_vm0, 4294967295, %v17663_v29  ;;  %9995 = vmatpush3.bf16.msk.msra.mxu0 %vm17667_vm3, %v17431_v3  ;;  %v14248_v19 = vsub.f32 %v643_v41, %v643_v41  ;;  %vm17669_vm15 = vcmp.lt.s32.totalorder %v355_v38, %v12899_v13  ;;  %vm17670_vm7 = vcmp.ge.s32.totalorder %v355_v38, %v12897_v2 }
 0x83d   :  { %17665 = vst [vmem:[#allocation108_spill] sm:$0xff] %v17664_v29  ;;  %vm14254_vm1 = vmand %vm17670_vm7, %vm17669_vm15  ;;  %v17671_v44 = vmov 0  ;;  %v356_v15 = vadd.s32 496, %v11681_v57  ;;  %9997 = vmatprep.subr.msk.bf16.mxu0 %vm13542_vm8, %v17431_v3  ;;  %v14263_v26 = vsub.f32 %v644_v32, %v644_v32  ;;  %v627_v41 = vsel %vm14200_vm2, 1.0, %v17322_v14  ;;  %9959 = vmatpush3.bf16.msra.mxu1 %v13926_v59 }
 0x83e   :  { %17668 = vst [vmem:[#allocation109_spill] sm:$0xff] %v14248_v19  ;;  %v17672_v44 = vsel %vm14254_vm1, 4294967295, %v17671_v44  ;;  %v628_v38 = vsel %vm14220_vm5, 1.0, %v17322_v14  ;;  %v357_v1 = vadd.s32 504, %v11681_v57  ;;  %v645_v12 = vsel %vm14235_vm0, 1.0, %v17322_v14  ;;  %9961 = vmatprep.subr.bf16.mxu1 %v13930_v0 }
 0x83f   :  { %17673 = vst [vmem:[#allocation110_spill] sm:$0xff] %v17672_v44  ;;  %v340_v32 = vadd.s32 368, %v11681_v57  ;;  %v646_v37 = vsel %vm14254_vm1, 1.0, %v17322_v14  ;;  %v341_v45 = vadd.s32 376, %v11681_v57  ;;  %v14289_v18 = vsub.f32 %v627_v41, %v627_v41 }
 0x840   :  { %9999 = vmatpush3.bf16.msk.msra.mxu0 %vm13566_vm13, %v17431_v3  ;;  %v14298_v50 = vsub.f32 %v628_v38, %v628_v38  ;;  %vm17677_vm2 = vcmp.lt.s32.totalorder %v338_v36, %v12899_v13  ;;  %vm17678_vm5 = vcmp.ge.s32.totalorder %v338_v36, %v12897_v2  ;;  %v17679_v41 = vmov 0 }
 0x841   :  { %10001 = vmatprep.subr.msk.bf16.mxu0 %vm13614_vm14, %v17431_v3  ;;  %vm14304_vm1 = vmand %vm17678_vm5, %vm17677_vm2  ;;  %v14310_v23 = vsub.f32 %v645_v12, %v645_v12  ;;  %v14312_v0 = vsub.f32 %v646_v37, %v646_v37  ;;  %vm17682_vm0 = vcmp.lt.s32.totalorder %v339_v20, %v12899_v13  ;;  %vm17683_vm10 = vcmp.ge.s32.totalorder %v339_v20, %v12897_v2 }
 0x842   :  { %v17680_v41 = vsel %vm14304_vm1, 4294967295, %v17679_v41  ;;  %vm14318_vm4 = vmand %vm17683_vm10, %vm17682_vm0  ;;  %v17684_v38 = vmov 0  ;;  %vm487_vm5 = vcmp.lt.s32.totalorder %v340_v32, %v12899_v13  ;;  %vm17687_vm15 = vcmp.lt.s32.totalorder %v356_v15, %v12899_v13  ;;  %9963 = vmatpush3.bf16.msra.mxu1 %v13742_v53  ;;  %v17698_v53 = vld [vmem:[#allocation51_spill] sm:$0xff] }
 0x843   :  { %17681 = vst [vmem:[#allocation111_spill] sm:$0xff] %v17680_v41  ;;  %v17685_v38 = vsel %vm14318_vm4, 4294967295, %v17684_v38  ;;  %vm17688_vm7 = vcmp.ge.s32.totalorder %v356_v15, %v12897_v2  ;;  %v17689_v12 = vmov 0  ;;  %vm17692_vm2 = vnez %v17494_v49  ;;  %9965 = vmatprep.subr.bf16.mxu1 %v13752_v6 }
 0x844   :  { %17686 = vst [vmem:[#allocation112_spill] sm:$0xff] %v17685_v38  ;;  %vm14330_vm14 = vmand %vm17688_vm7, %vm17687_vm15  ;;  %10003 = vmatpush3.bf16.msk.msra.mxu0 %vm17692_vm2, %v17431_v3  ;;  %vm17693_vm15 = vcmp.lt.s32.totalorder %v357_v1, %v12899_v13  ;;  %vm17694_vm7 = vcmp.ge.s32.totalorder %v357_v1, %v12897_v2  ;;  %v17695_v36 = vmov 0  ;;  %vm17699_vm0 = vnez %v17698_v53  ;;  %v17718_v38 = vld [vmem:[#allocation61_spill] sm:$0xff] }
 0x845   :  { %v17690_v12 = vsel %vm14330_vm14, 4294967295, %v17689_v12  ;;  %vm14348_vm10 = vmand %vm17694_vm7, %vm17693_vm15  ;;  %10005 = vmatprep.subr.msk.bf16.mxu0 %vm17699_vm0, %v17431_v3  ;;  %vm17700_vm15 = vcmp.ge.s32.totalorder %v340_v32, %v12897_v2  ;;  %v17701_v1 = vmov 0  ;;  %v629_v59 = vsel %vm14304_vm1, 1.0, %v17322_v14 }
 0x846   :  { %17691 = vst [vmem:[#allocation113_spill] sm:$0xff] %v17690_v12  ;;  %v17696_v36 = vsel %vm14348_vm10, 4294967295, %v17695_v36  ;;  %vm14364_vm7 = vmand %vm17700_vm15, %vm487_vm5  ;;  %vm17704_vm0 = vcmp.lt.s32.totalorder %v341_v45, %v12899_v13  ;;  %vm17705_vm2 = vcmp.ge.s32.totalorder %v341_v45, %v12897_v2  ;;  %v17706_v32 = vmov 0  ;;  %9967 = vmatpush3.bf16.msra.mxu1 %v17718_v38 }
 0x847   :  { %17697 = vst [vmem:[#allocation114_spill] sm:$0xff] %v17696_v36  ;;  %v17702_v1 = vsel %vm14364_vm7, 4294967295, %v17701_v1  ;;  %vm14378_vm13 = vmand %vm17705_vm2, %vm17704_vm0  ;;  %v630_v6 = vsel %vm14318_vm4, 1.0, %v17322_v14  ;;  %v17709_v53 = vand.u32 4294901760, %v13968_v10  ;;  %v17710_v20 = vand.u32 4294901760, %v14130_v17  ;;  %v17719_v10 = vld [vmem:[#allocation53_spill] sm:$0xff] }
 0x848   :  { %17703 = vst [vmem:[#allocation115_spill] sm:$0xff] %v17702_v1  ;;  %v17707_v32 = vsel %vm14378_vm13, 4294967295, %v17706_v32  ;;  %v17712_v15 = vand.u32 4294901760, %v14146_v47  ;;  %v17713_v41 = vand.u32 4294901760, %v14209_v7  ;;  %v17715_v45 = vand.u32 4294901760, %v14211_v24 }
 0x849   :  { %17708 = vst [vmem:[#allocation116_spill] sm:$0xff] %v17707_v32  ;;  %v14389_v37 = vpack.c.bf16 %v17710_v20, %v17709_v53  ;;  %v17716_v44 = vand.u32 4294901760, %v14225_v21  ;;  %vm17720_vm2 = vnez %v17719_v10  ;;  %v647_v53 = vsel %vm14330_vm14, 1.0, %v17322_v14 }
 0x84a   :  { %v14395_v49 = vpack.c.bf16 %v17713_v41, %v17712_v15  ;;  %10007 = vmatpush3.bf16.msk.msra.mxu0 %vm17720_vm2, %v17431_v3  ;;  %v648_v41 = vsel %vm14348_vm10, 1.0, %v17322_v14  ;;  %v17721_v20 = vand.u32 4294901760, %v14227_v48  ;;  %v17722_v15 = vand.u32 4294901760, %v14229_v62 }
 0x84b   :  { %17711 = vst [vmem:[#allocation117_spill] sm:$0xff] %v14389_v37  ;;  %v14401_v29 = vpack.c.bf16 %v17716_v44, %v17715_v45  ;;  %v17724_v45 = vand.u32 4294901760, %v14244_v35  ;;  %v17725_v38 = vand.u32 4294901760, %v14246_v25  ;;  %v17728_v37 = vld [vmem:[#allocation54_spill] sm:$0xff]  ;;  %v631_v36 = vsel %vm14364_vm7, 1.0, %v17322_v14 }
 0x84c   :  { %17714 = vst [vmem:[#allocation118_spill] sm:$0xff] %v14395_v49  ;;  %v14417_v44 = vpack.c.bf16 %v17722_v15, %v17721_v20  ;;  %v17727_v49 = vld [vmem:[#allocation63_spill] sm:$0xff]  ;;  %vm17729_vm5 = vnez %v17728_v37  ;;  %v632_v20 = vsel %vm14378_vm13, 1.0, %v17322_v14  ;;  %v17730_v15 = vand.u32 4294901760, %v14248_v19 }
 0x84d   :  { %17717 = vst [vmem:[#allocation119_spill] sm:$0xff] %v14401_v29  ;;  %v14423_v29 = vpack.c.bf16 %v17725_v38, %v17724_v45  ;;  %9969 = vmatprep.subr.bf16.mxu1 %v17727_v49  ;;  %10009 = vmatprep.subr.msk.bf16.mxu0 %vm17729_vm5, %v17431_v3  ;;  %v14443_v45 = vmul.f32 %v14003_v28, %v13849_v5  ;;  %v17734_v1 = vand.u32 4294901760, %v14289_v18  ;;  %v17735_v12 = vand.u32 4294901760, %v14298_v50 }
 0x84e   :  { %17723 = vst [vmem:[#allocation120_spill] sm:$0xff] %v14417_v44  ;;  %v17731_v44 = vand.u32 4294901760, %v14263_v26  ;;  %v14445_v49 = vsub.f32 %v629_v59, %v629_v59  ;;  %v14457_v19 = vmul.f32 %v13994_v56, %v13844_v31  ;;  %v14465_v5 = vmul.f32 %v14003_v28, %v13863_v40  ;;  %v17740_v59 = vld [vmem:[#allocation64_spill] sm:$0xff]  ;;  %v17744_v40 = vld [vmem:[#allocation65_spill] sm:$0xff] }
 0x84f   :  { %17726 = vst [vmem:[#allocation121_spill] sm:$0xff] %v14423_v29  ;;  %17733 = vst [vmem:[#allocation123_spill] sm:$0xff] %v14443_v45  ;;  %v14447_v29 = vsub.f32 %v630_v6, %v630_v6  ;;  %v14453_v32 = vpack.c.bf16 %v17735_v12, %v17734_v1  ;;  %v14469_v6 = vmul.f32 %v13994_v56, %v13853_v16  ;;  %9971 = vmatpush3.bf16.msra.mxu1 %v17740_v59  ;;  %v17741_v12 = vld [vmem:[#allocation56_spill] sm:$0xff] }
 0x850   :  { %v14439_v38 = vpack.c.bf16 %v17731_v44, %v17730_v15  ;;  %17737 = vst [vmem:[#allocation125_spill] sm:$0xff] %v14457_v19  ;;  %v14459_v44 = vsub.f32 %v647_v53, %v647_v53  ;;  %v14461_v15 = vsub.f32 %v648_v41, %v648_v41  ;;  %17738 = vst [vmem:[#allocation126_spill] sm:$0xff] %v14465_v5  ;;  %vm17742_vm0 = vnez %v17741_v12  ;;  %v17745_v41 = vld [vmem:[#allocation11_spill] sm:$0xff] }
 0x851   :  { %17736 = vst [vmem:[#allocation124_spill] sm:$0xff] %v14453_v32  ;;  %17739 = vst [vmem:[#allocation127_spill] sm:$0xff] %v14469_v6  ;;  %10011 = vmatpush3.bf16.msk.msra.mxu0 %vm17742_vm0, %v17431_v3  ;;  %v14475_v31 = vsub.f32 %v631_v36, %v631_v36  ;;  %v14477_v1 = vsub.f32 %v632_v20, %v632_v20  ;;  %v14481_v53 = vmul.f32 %v14003_v28, %v13871_v8  ;;  %v17751_v6 = vld [vmem:[#allocation66_spill] sm:$0xff]  ;;  %v17756_v28 = vmov 0 }
 0x852   :  { %17732 = vst [vmem:[#allocation122_spill] sm:$0xff] %v14439_v38  ;;  %9973 = vmatprep.subr.bf16.mxu1 %v17744_v40  ;;  %vm17746_vm15 = vnez %v17745_v41  ;;  %vm415_vm13 = vcmp.ge.s32.totalorder %v13951_v42, %v12897_v2  ;;  %v327_v16 = vadd.s32 264, %v11681_v57  ;;  %v17747_v36 = vand.u32 4294901760, %v14310_v23 }
 0x853   :  { %17743 = vst [vmem:[#allocation128_spill] sm:$0xff] %v14481_v53  ;;  %10045 = vmatprep.subr.msk.bf16.mxu0 %vm17746_vm15, %v17431_v3  ;;  %v17748_v20 = vand.u32 4294901760, %v14312_v0  ;;  %vm489_vm10 = vcmp.lt.s32.totalorder %v13951_v42, %v12899_v13  ;;  %v17750_v59 = vand.u32 4294901760, %v14019_v54  ;;  %v344_v53 = vadd.s32 400, %v11681_v57  ;;  %9975 = vmatpush3.bf16.msra.mxu1 %v17751_v6 }
 0x854   :  { %vm17752_vm15 = vnez %v17600_v55  ;;  %v345_v40 = vadd.s32 408, %v11681_v57  ;;  %v17753_v5 = vand.u32 4294901760, %v14445_v49  ;;  %v17754_v19 = vand.u32 4294901760, %v14447_v29  ;;  %9977 = vmatprep.subr.bf16.mxu1 %v13783_v22  ;;  %vm14532_vm7 = vmand %vm415_vm13, %vm489_vm10 }
 0x855   :  { %v14496_v8 = vpack.c.bf16 %v17748_v20, %v17747_v36  ;;  %3007 = vmatmul.mubr.f32.vlgmr.msra.gmra.mrb[46].mxu0 %v17750_v59  ;;  %v17088_v36 = vand.u32 4294901760, %v14459_v44  ;;  %v17087_v20 = vand.u32 4294901760, %v14461_v15  ;;  %v17757_v28 = vsel %vm14532_vm7, 4294967295, %v17756_v28 }
 0x856   :  { %10047 = vmatpush3.bf16.msk.msra.mxu0 %vm17752_vm15, %v17431_v3  ;;  %v14522_v45 = vpack.c.bf16 %v17754_v19, %v17753_v5  ;;  %3213 = vmatprep.mubr.f32.mxu0 %v14006_v9  ;;  %v328_v19 = vadd.s32 272, %v11681_v57  ;;  %vm17759_vm4 = vnez %v17607_v27  ;;  %vm17760_vm13 = vcmp.lt.s32.totalorder %v13954_v46, %v12899_v13 }
 0x857   :  { %17749 = vst [vmem:[#allocation129_spill] sm:$0xff] %v14496_v8  ;;  %v14544_v5 = vpack.c.bf16 %v17087_v20, %v17088_v36  ;;  %10049 = vmatprep.subr.msk.bf16.mxu0 %vm17759_vm4, %v17431_v3  ;;  %vm17761_vm10 = vcmp.ge.s32.totalorder %v13954_v46, %v12897_v2  ;;  %v17762_v42 = vmov 0  ;;  %v329_v59 = vadd.s32 280, %v11681_v57  ;;  %9979 = vmatpush3.bf16.msra.mxu1 %v13785_v58  ;;  %v17835_v8 = vld [vmem:[#allocation32_spill] sm:$0xff] }
 0x858   :  { %17755 = vst [vmem:[#allocation130_spill] sm:$0xff] %v14522_v45  ;;  %vm14555_vm15 = vmand %vm17761_vm10, %vm17760_vm13  ;;  %v17764_v20 = vand.u32 4294901760, %v14475_v31  ;;  %v17765_v36 = vand.u32 4294901760, %v14477_v1  ;;  %v14569_v6 = vmul.f32 %v13994_v56, %v13867_v60  ;;  %v17768_v46 = vand.u32 4294901760, %v12980_v63  ;;  %10013 = vmatprep.subr.bf16.mxu1 %v13936_v61 }
 0x859   :  { %17758 = vst [vmem:[#allocation131_spill] sm:$0xff] %v14544_v5  ;;  %v17763_v42 = vsel %vm14555_vm15, 4294967295, %v17762_v42  ;;  %v17769_v27 = vand.u32 4294901760, %v12986_v33  ;;  %v346_v55 = vadd.s32 416, %v11681_v57  ;;  %v633_v63 = vsel %vm14532_vm7, 1.0, %v17322_v14 }
 0x85a   :  { %v14565_v22 = vpack.c.bf16 %v17765_v36, %v17764_v20  ;;  %17767 = vst [vmem:[#allocation133_spill] sm:$0xff] %v14569_v6  ;;  %10051 = vmatpush3.bf16.msk.msra.mxu0 %vm17626_vm12, %v17431_v3  ;;  %vm17771_vm14 = vcmp.lt.s32.totalorder %v13961_v51, %v12899_v13  ;;  %vm17772_vm13 = vcmp.ge.s32.totalorder %v13961_v51, %v12897_v2  ;;  %v347_v60 = vadd.s32 424, %v11681_v57  ;;  %v17786_v20 = vld [vmem:[#allocation13_spill] sm:$0xff]  ;;  %v17871_v57 = vld [vmem:[#allocation92_spill] sm:$0xff] }
 0x85b   :  { %v14575_v5 = vpack.c.bf16 %v17769_v27, %v17768_v46  ;;  %vm14593_vm4 = vmand %vm17772_vm13, %vm17771_vm14  ;;  %10053 = vmatprep.subr.msk.bf16.mxu0 %vm17632_vm11, %v17431_v3  ;;  %v634_v56 = vsel %vm14555_vm15, 1.0, %v17322_v14  ;;  %vm17775_vm14 = vcmp.lt.s32.totalorder %v327_v16, %v12899_v13  ;;  %vm17776_vm13 = vcmp.ge.s32.totalorder %v327_v16, %v12897_v2  ;;  %2931 = vmatmul.mubr.f32.vlgmr.msra.gmra.mrb[34].mxu1 %v14019_v54 }
 0x85c   :  { %17766 = vst [vmem:[#allocation132_spill] sm:$0xff] %v14565_v22  ;;  %vm14611_vm12 = vmand %vm17776_vm13, %vm17775_vm14  ;;  %vm475_vm1 = vcmp.lt.s32.totalorder %v328_v19, %v12899_v13  ;;  %v14619_v27 = vmul.f32 %v14023_v34, %v13879_v30  ;;  %vm17780_vm11 = vcmp.lt.s32.totalorder %v344_v53, %v12899_v13  ;;  %vm17781_vm15 = vcmp.ge.s32.totalorder %v344_v53, %v12897_v2  ;;  %v17818_v22 = vld [vmem:[#allocation22_spill] sm:$0xff] }
 0x85d   :  { %17770 = vst [vmem:[#allocation134_spill] sm:$0xff] %v14575_v5  ;;  %vm14625_vm7 = vmand %vm17781_vm15, %vm17780_vm11  ;;  %v14633_v16 = vmul.f32 %v14013_v43, %v13875_v39  ;;  %v17785_v30 = vand.u32 4294901760, %v13027_v11  ;;  %v17787_v46 = vand.u32 4294901760, %v17786_v20  ;;  %v14642_v53 = vsub.f32 %v633_v63, %v633_v63  ;;  %v17793_v39 = vld [vmem:[#allocation90_spill] sm:$0xff]  ;;  %3141 = vmatprep.mubr.f32.mxu1 %v14006_v9 }
 0x85e   :  { %17779 = vst [vmem:[#allocation135_spill] sm:$0xff] %v14619_v27  ;;  %vm17789_vm11 = vcmp.lt.s32.totalorder %v345_v40, %v12899_v13  ;;  %vm17790_vm15 = vcmp.ge.s32.totalorder %v345_v40, %v12897_v2  ;;  %vm419_vm13 = vcmp.ge.s32.totalorder %v346_v55, %v12897_v2  ;;  %vm493_vm10 = vcmp.lt.s32.totalorder %v346_v55, %v12899_v13  ;;  %v17797_v40 = vld [vmem:[#allocation79_spill] sm:$0xff]  ;;  %v17798_v63 = vld [vmem:[#allocation34_spill] sm:$0xff] }
 0x85f   :  { %17784 = vst [vmem:[#allocation136_spill] sm:$0xff] %v14633_v16  ;;  %v14640_v27 = vpack.c.bf16 %v17787_v46, %v17785_v30  ;;  %vm14648_vm14 = vmand %vm17790_vm15, %vm17789_vm11  ;;  %10015 = vmatpush3.bf16.msra.mxu1 %v17793_v39  ;;  %v14656_v11 = vsub.f32 %v634_v56, %v634_v56  ;;  %vm17794_vm0 = vcmp.ge.s32.totalorder %v328_v19, %v12897_v2  ;;  %v17800_v9 = vld [vmem:[#allocation18_spill] sm:$0xff]  ;;  %v17802_v19 = vld [vmem:[#allocation19_spill] sm:$0xff]  ;;  %v617_v39 = vsel %vm14593_vm4, 1.0, %v17322_v14 }
 0x860   :  { %vm14662_vm5 = vmand %vm17794_vm0, %vm475_vm1  ;;  %vm494_vm15 = vcmp.lt.s32.totalorder %v347_v60, %v12899_v13  ;;  %v2319_v30 = vadd.f32 %v17798_v63, %v17797_v40  ;;  %10055 = vmatpush3.bf16.msk.msra.mxu0 %vm17648_vm6, %v17431_v3  ;;  %10017 = vmatprep.subr.bf16.mxu1 %v14575_v5  ;;  %v17801_v56 = vand.u32 4294901760, %v17800_v9  ;;  %v17803_v46 = vand.u32 4294901760, %v17802_v19  ;;  %v17809_v9 = vld [vmem:[#allocation33_spill] sm:$0xff]  ;;  %v17810_v19 = vld [vmem:[#allocation80_spill] sm:$0xff] }
 0x861   :  { %17788 = vst [vmem:[#allocation13_spill] sm:$0xff] %v14640_v27  ;;  %v618_v63 = vsel %vm14611_vm12, 1.0, %v17322_v14  ;;  %vm17805_vm1 = vcmp.lt.s32.totalorder %v329_v59, %v12899_v13  ;;  %vm17806_vm0 = vcmp.ge.s32.totalorder %v329_v59, %v12897_v2  ;;  %10057 = vmatprep.subr.msk.bf16.mxu0 %vm17655_vm9, %v17431_v3  ;;  %v635_v20 = vsel %vm14625_vm7, 1.0, %v17322_v14 }
 0x862   :  { %v14678_v16 = vpack.c.bf16 %v17803_v46, %v17801_v56  ;;  %vm14690_vm11 = vmand %vm17806_vm0, %vm17805_vm1  ;;  %v2317_v56 = vadd.f32 %v17809_v9, %v17797_v40  ;;  %v17811_v46 = vld [vmem:[#allocation35_spill] sm:$0xff]  ;;  %v636_v59 = vsel %vm14648_vm14, 1.0, %v17322_v14  ;;  %v17817_v52 = vand.u32 4294901760, %v17816_v4 }
 0x863   :  { %v2321_v58 = vadd.f32 %v17811_v46, %v17810_v19  ;;  %vm14711_vm1 = vmand %vm419_vm13, %vm493_vm10  ;;  %v17815_v46 = vld [vmem:[#allocation36_spill] sm:$0xff]  ;;  %v17819_v45 = vand.u32 4294901760, %v17818_v22  ;;  %vm17821_vm0 = vcmp.ge.s32.totalorder %v347_v60, %v12897_v2  ;;  %v14733_v32 = vmul.f32 %v14023_v34, %v2319_v30  ;;  %10019 = vmatpush3.bf16.msra.mxu1 %v14640_v27  ;;  %v17825_v4 = vld [vmem:[#allocation23_spill] sm:$0xff] }
 0x864   :  { %17804 = vst [vmem:[#allocation79_spill] sm:$0xff] %v14678_v16  ;;  %v2323_v6 = vadd.f32 %v17815_v46, %v17810_v19  ;;  %vm14728_vm9 = vmand %vm17821_vm0, %vm494_vm15  ;;  %v17826_v46 = vand.u32 4294901760, %v17825_v4  ;;  %v17827_v22 = vld [vmem:[#allocation24_spill] sm:$0xff]  ;;  %v14743_v13 = vsub.f32 %v617_v39, %v617_v39  ;;  %v14745_v60 = vsub.f32 %v618_v63, %v618_v63  ;;  %10059 = vmatpush3.bf16.msk.msra.mxu0 %vm17667_vm3, %v17431_v3 }
 0x865   :  { %v14721_v41 = vpack.c.bf16 %v17819_v45, %v17817_v52  ;;  %17824 = vst [vmem:[#allocation18_spill] sm:$0xff] %v14733_v32  ;;  %v17828_v52 = vand.u32 4294901760, %v17827_v22  ;;  %10021 = vmatprep.subr.bf16.mxu1 %v14678_v16  ;;  %v14751_v30 = vsub.f32 %v635_v20, %v635_v20  ;;  %v14753_v32 = vsub.f32 %v636_v59, %v636_v59 }
 0x866   :  { %v619_v4 = vsel %vm14662_vm5, 1.0, %v17322_v14  ;;  %v620_v39 = vsel %vm14690_vm11, 1.0, %v17322_v14  ;;  %10061 = vmatprep.subr.msk.bf16.mxu0 %vm13542_vm8, %v17431_v3  ;;  %v638_v20 = vsel %vm14728_vm9, 1.0, %v17322_v14  ;;  %v14771_v59 = vmul.f32 %v14013_v43, %v2317_v56 }
 0x867   :  { %17820 = vst [vmem:[#allocation34_spill] sm:$0xff] %v14721_v41  ;;  %v14740_v45 = vpack.c.bf16 %v17828_v52, %v17826_v46  ;;  %v637_v46 = vsel %vm14711_vm1, 1.0, %v17322_v14  ;;  %v14774_v22 = vmul.f32 %v14023_v34, %v2323_v6  ;;  %v17834_v52 = vld [vmem:[#allocation78_spill] sm:$0xff]  ;;  %v17836_v27 = vand.u32 4294901760, %v14642_v53  ;;  %10023 = vmatpush3.bf16.msra.mxu1 %v14721_v41 }
 0x868   :  { %17832 = vst [vmem:[#allocation33_spill] sm:$0xff] %v14771_v59  ;;  %v2363_v16 = vadd.f32 %v17835_v8, %v17834_v52  ;;  %v14782_v2 = vmul.f32 %v14013_v43, %v2321_v58  ;;  %v17838_v14 = vand.u32 4294901760, %v14656_v11  ;;  %v14789_v34 = vsub.f32 %v619_v4, %v619_v4  ;;  %v17839_v8 = vld [vmem:[#allocation47_spill] sm:$0xff]  ;;  %v17847_v43 = vld [vmem:[#allocation93_spill] sm:$0xff] }
 0x869   :  { %17829 = vst [vmem:[#allocation19_spill] sm:$0xff] %v14740_v45  ;;  %17833 = vst [vmem:[#allocation80_spill] sm:$0xff] %v14774_v22  ;;  %v3399_v63 = vsub.f32 %v14642_v53, %v17836_v27  ;;  %v14791_v6 = vsub.f32 %v620_v39, %v620_v39  ;;  %vm17840_vm10 = vnez %v17839_v8  ;;  %10025 = vmatprep.subr.bf16.mxu1 %v14740_v45  ;;  %v17845_v39 = vld [vmem:[#allocation29_spill] sm:$0xff]  ;;  %v17850_v58 = vand.u32 4294901760, %v14743_v13  ;;  %v17856_v4 = vld [vmem:[#allocation51_spill] sm:$0xff] }
 0x86a   :  { %17837 = vst [vmem:[#allocation35_spill] sm:$0xff] %v14782_v2  ;;  %v3405_v56 = vsub.f32 %v14656_v11, %v17838_v14  ;;  %10063 = vmatpush3.bf16.msk.msra.mxu0 %vm17840_vm10, %v17431_v3  ;;  %v14799_v27 = vsub.f32 %v637_v46, %v637_v46  ;;  %v14801_v52 = vsub.f32 %v638_v20, %v638_v20  ;;  %v17843_v14 = vld [vmem:[#allocation48_spill] sm:$0xff]  ;;  %v17846_v2 = vld [vmem:[#allocation31_spill] sm:$0xff]  ;;  %v17849_v46 = vld [vmem:[#allocation69_spill] sm:$0xff]  ;;  %v17905_v33 = vmov 0 }
 0x86b   :  { %vm17844_vm13 = vnez %v17843_v14  ;;  %v2368_v59 = vadd.f32 %v17845_v39, %v17797_v40  ;;  %v2371_v22 = vadd.f32 %v17846_v2, %v17810_v19  ;;  %v3400_v45 = vand.u32 4294901760, %v3399_v63  ;;  %10027 = vmatpush3.bf16.msra.mxu1 %v17849_v46  ;;  %v17851_v40 = vld [vmem:[#allocation50_spill] sm:$0xff]  ;;  %v17858_v8 = vld [vmem:[#allocation7_spill] sm:$0xff] }
 0x86c   :  { %17841 = vst [vmem:[#allocation36_spill] sm:$0xff] %v14799_v27  ;;  %17842 = vst [vmem:[#allocation21_spill] sm:$0xff] %v14801_v52  ;;  %10065 = vmatprep.subr.msk.bf16.mxu0 %vm17844_vm13, %v17431_v3  ;;  %v14812_v41 = vmul.f32 %v17847_v43, %v2363_v16  ;;  %v3406_v20 = vand.u32 4294901760, %v3405_v56  ;;  %v3303_v14 = vsub.f32 %v14743_v13, %v17850_v58  ;;  %vm17852_vm15 = vnez %v17851_v40  ;;  %v17853_v2 = vld [vmem:[#allocation70_spill] sm:$0xff]  ;;  %v17862_v58 = vld [vmem:[#allocation71_spill] sm:$0xff] }
 0x86d   :  { %10029 = vmatprep.subr.bf16.mxu1 %v17853_v2  ;;  %v17854_v16 = vand.u32 4294901760, %v14745_v60  ;;  %v17855_v63 = vand.u32 4294901760, %v14751_v30  ;;  %vm17857_vm0 = vnez %v17856_v4  ;;  %v17859_v2 = vand.u32 4294901760, %v14753_v32 }
 0x86e   :  { %17848 = vst [vmem:[#allocation22_spill] sm:$0xff] %v14812_v41  ;;  %10067 = vmatpush3.bf16.msk.msra.mxu0 %vm17852_vm15, %v17431_v3  ;;  %v14836_v41 = vand.u32 4294901760, %v17858_v8  ;;  %v17863_v39 = vand.u32 4294901760, %v14789_v34  ;;  %v17864_v40 = vand.u32 4294901760, %v14791_v6  ;;  %v17909_v36 = vand.u32 4294901760, %v14289_v18 }
 0x86f   :  { %v3309_v19 = vsub.f32 %v14745_v60, %v17854_v16  ;;  %v3411_v56 = vsub.f32 %v14751_v30, %v17855_v63  ;;  %10069 = vmatprep.subr.msk.bf16.mxu0 %vm17857_vm0, %v17431_v3  ;;  %v3417_v46 = vsub.f32 %v14753_v32, %v17859_v2  ;;  %v14842_v16 = vmul.f32 %v17847_v43, %v2368_v59  ;;  %v17865_v2 = vld [vmem:[#allocation72_spill] sm:$0xff] }
 0x870   :  { %v14845_v63 = vmul.f32 %v17847_v43, %v2371_v22  ;;  %10031 = vmatpush3.bf16.msra.mxu1 %v17862_v58  ;;  %v3315_v4 = vsub.f32 %v14789_v34, %v17863_v39  ;;  %v3321_v38 = vsub.f32 %v14791_v6, %v17864_v40  ;;  %v3304_v59 = vand.u32 4294901760, %v3303_v14 }
 0x871   :  { %17860 = vst [vmem:[#allocation23_spill] sm:$0xff] %v14842_v16  ;;  %10033 = vmatprep.subr.bf16.mxu1 %v17865_v2  ;;  %v3310_v16 = vand.u32 4294901760, %v3309_v19  ;;  %v17866_v22 = vand.u32 4294901760, %v14799_v27  ;;  %vm17868_vm0 = vnez %v17728_v37  ;;  %v14867_v40 = vpack.c.bf16 %v3406_v20, %v3400_v45  ;;  %v17870_v19 = vld [vmem:[#allocation73_spill] sm:$0xff]  ;;  %v17875_v45 = vld [vmem:[#allocation74_spill] sm:$0xff] }
 0x872   :  { %17861 = vst [vmem:[#allocation24_spill] sm:$0xff] %v14845_v63  ;;  %10071 = vmatpush3.bf16.msk.msra.mxu0 %vm17720_vm2, %v17431_v3  ;;  %v17867_v63 = vand.u32 4294901760, %v14801_v52  ;;  %v3412_v58 = vand.u32 4294901760, %v3411_v56  ;;  %v3418_v10 = vand.u32 4294901760, %v3417_v46  ;;  %v14871_v14 = vsub.f32 %v17858_v8, %v14836_v41 }
 0x873   :  { %v3423_v43 = vsub.f32 %v14799_v27, %v17866_v22  ;;  %10073 = vmatprep.subr.msk.bf16.mxu0 %vm17868_vm0, %v17431_v3  ;;  %17869 = vst [vmem:[#allocation78_spill] sm:$0xff] %v14867_v40  ;;  %v3316_v2 = vand.u32 4294901760, %v3315_v4  ;;  %v3322_v22 = vand.u32 4294901760, %v3321_v38  ;;  %v17872_v27 = vand.u32 4294901760, %v17871_v57 }
 0x874   :  { %v3429_v39 = vsub.f32 %v14801_v52, %v17867_v63  ;;  %10035 = vmatpush3.bf16.msra.mxu1 %v17870_v19  ;;  %v17873_v52 = vand.u32 4294901760, %v14130_v17  ;;  %vm17874_vm0 = vnez %v17741_v12  ;;  %v14884_v8 = vpack.c.bf16 %v3310_v16, %v3304_v59  ;;  %v17880_v12 = vld [vmem:[#allocation6_spill] sm:$0xff]  ;;  %v17881_v16 = vld [vmem:[#allocation75_spill] sm:$0xff] }
 0x875   :  { %v3327_v63 = vsub.f32 %v17871_v57, %v17872_v27  ;;  %10037 = vmatprep.subr.bf16.mxu1 %v17875_v45  ;;  %v3424_v46 = vand.u32 4294901760, %v3423_v43  ;;  %v17877_v38 = vand.u32 4294901760, %v14146_v47  ;;  %v14890_v27 = vpack.c.bf16 %v3418_v10, %v3412_v58 }
 0x876   :  { %v3333_v37 = vsub.f32 %v14130_v17, %v17873_v52  ;;  %10075 = vmatpush3.bf16.msk.msra.mxu0 %vm17874_vm0, %v17431_v3  ;;  %17876 = vst [vmem:[#allocation32_spill] sm:$0xff] %v14884_v8  ;;  %v3430_v20 = vand.u32 4294901760, %v3429_v39  ;;  %v17879_v56 = vand.u32 4294901760, %v14209_v7  ;;  %v14898_v59 = vpack.c.bf16 %v3322_v22, %v3316_v2 }
 0x877   :  { %v3435_v4 = vsub.f32 %v14146_v47, %v17877_v38  ;;  %10109 = vmatprep.subr.bf16.mxu0 %v14867_v40  ;;  %17878 = vst [vmem:[#allocation29_spill] sm:$0xff] %v14890_v27  ;;  %v3328_v43 = vand.u32 4294901760, %v3327_v63  ;;  %v17884_v38 = vand.u32 4294901760, %v14211_v24  ;;  %vm17887_vm0 = vnez %v17757_v28  ;;  %v17895_v28 = vld [vmem:[#allocation77_spill] sm:$0xff] }
 0x878   :  { %v3441_v19 = vsub.f32 %v14209_v7, %v17879_v56  ;;  %10039 = vmatpush3.bf16.msra.mxu1 %v17881_v16  ;;  %17882 = vst [vmem:[#allocation31_spill] sm:$0xff] %v14898_v59  ;;  %v3334_v39 = vand.u32 4294901760, %v3333_v37  ;;  %v14902_v10 = vpack.c.bf16 %v3430_v20, %v3424_v46  ;;  %v17885_v56 = vand.u32 4294901760, %v14225_v21  ;;  %v17886_v16 = vld [vmem:[#allocation76_spill] sm:$0xff] }
 0x879   :  { %3215 = vmatmul.mubr.f32.vlgmr.msra.gmra.mrb[48].mxu0 %v17880_v12  ;;  %v3436_v58 = vand.u32 4294901760, %v3435_v4  ;;  %v3339_v52 = vsub.f32 %v14211_v24, %v17884_v38  ;;  %10041 = vmatprep.subr.bf16.mxu1 %v17886_v16  ;;  %vm17888_vm2 = vnez %v17763_v42  ;;  %v17889_v37 = vmov 0 }
 0x87a   :  { %10111 = vmatpush3.bf16.msra.mxu0 %v14884_v8  ;;  %3493 = vmatprep.mubr.f32.mxu0 %v14836_v41  ;;  %17883 = vst [vmem:[#allocation93_spill] sm:$0xff] %v14902_v10  ;;  %v3345_v40 = vsub.f32 %v14225_v21, %v17885_v56  ;;  %vm14916_vm15 = vmpackc.low %vm17888_vm2, %vm17887_vm0  ;;  %v17892_v2 = vand.u32 4294901760, %v14871_v14  ;;  %v3442_v63 = vand.u32 4294901760, %v3441_v19  ;;  %v17893_v46 = vand.u32 4294901760, %v14227_v48 }
 0x87b   :  { %10113 = vmatprep.subr.bf16.mxu0 %v14890_v27  ;;  %v17890_v37 = vsel %vm14916_vm15, 4294967295, %v17889_v37  ;;  %v17894_v4 = vand.u32 4294901760, %v14229_v62  ;;  %v14930_v42 = vpack.c.bf16 %v3334_v39, %v3328_v43  ;;  %v17897_v56 = vand.u32 4294901760, %v14244_v35  ;;  %vm14946_vm2 = vmpackc.low %vm14611_vm12, %vm14593_vm4 }
 0x87c   :  { %17891 = vst [vmem:[#allocation7_spill] sm:$0xff] %v17890_v37  ;;  %v3287_v22 = vsub.f32 %v14871_v14, %v17892_v2  ;;  %v3447_v20 = vsub.f32 %v14227_v48, %v17893_v46  ;;  %10043 = vmatpush3.bf16.msra.mxu1 %v17895_v28  ;;  %v17898_v8 = vand.u32 4294901760, %v14246_v25  ;;  %v17899_v43 = vmov 0  ;;  %v17902_v46 = vld [vmem:[#allocation109_spill] sm:$0xff]  ;;  %vm14961_vm12 = vmpackc.low %vm14648_vm14, %vm14625_vm7 }
 0x87d   :  { %v3453_v38 = vsub.f32 %v14229_v62, %v17894_v4  ;;  %17896 = vst [vmem:[#allocation92_spill] sm:$0xff] %v14930_v42  ;;  %v3351_v27 = vsub.f32 %v14244_v35, %v17897_v56  ;;  %10077 = vmatprep.subr.msk.bf16.mxu1 %vm14916_vm15, %v17431_v3  ;;  %v17900_v43 = vsel %vm14946_vm2, 4294967295, %v17899_v43  ;;  %v3340_v39 = vand.u32 4294901760, %v3339_v52  ;;  %vm14985_vm4 = vmpackc.low %vm14690_vm11, %vm14662_vm5 }
 0x87e   :  { %v3357_v19 = vsub.f32 %v14246_v25, %v17898_v8  ;;  %10115 = vmatpush3.bf16.msra.mxu0 %v14898_v59  ;;  %17901 = vst [vmem:[#allocation74_spill] sm:$0xff] %v17900_v43  ;;  %v3346_v2 = vand.u32 4294901760, %v3345_v40  ;;  %v17903_v4 = vand.u32 4294901760, %v17902_v46  ;;  %v17904_v56 = vand.u32 4294901760, %v14263_v26  ;;  %vm14996_vm7 = vmpackc.low %vm14728_vm9, %vm14711_vm1 }
 0x87f   :  { %10117 = vmatprep.subr.bf16.mxu0 %v14902_v10  ;;  %v3288_v28 = vand.u32 4294901760, %v3287_v22  ;;  %v17906_v33 = vsel %vm14961_vm12, 4294967295, %v17905_v33  ;;  %v14965_v51 = vpack.c.bf16 %v3442_v63, %v3436_v58  ;;  %v3448_v40 = vand.u32 4294901760, %v3447_v20  ;;  %3143 = vmatmul.mubr.f32.vlgmr.msra.gmra.mrb[36].mxu1 %v17880_v12 }
 0x880   :  { %v3459_v8 = vsub.f32 %v17902_v46, %v17903_v4  ;;  %v3465_v59 = vsub.f32 %v14263_v26, %v17904_v56  ;;  %17907 = vst [vmem:[#allocation6_spill] sm:$0xff] %v17906_v33  ;;  %v3454_v52 = vand.u32 4294901760, %v3453_v38  ;;  %10079 = vmatpush3.bf16.msk.msra.mxu1 %vm14946_vm2, %v17431_v3  ;;  %v3352_v22 = vand.u32 4294901760, %v3351_v27 }
 0x881   :  { %17908 = vst [vmem:[#allocation76_spill] sm:$0xff] %v14965_v51  ;;  %3289 = vmatprep.mubr.f32.mxu1 %v3288_v28  ;;  %v3358_v4 = vand.u32 4294901760, %v3357_v19  ;;  %v3363_v61 = vsub.f32 %v14289_v18, %v17909_v36  ;;  %v17910_v56 = vand.u32 4294901760, %v14298_v50  ;;  %10081 = vmatprep.subr.msk.bf16.mxu1 %vm14961_vm12, %v17431_v3  ;;  %v17911_v12 = vmov 0 }
 0x882   :  { %10119 = vmatpush3.bf16.msra.mxu0 %v14930_v42  ;;  %v17912_v12 = vsel %vm14985_vm4, 4294967295, %v17911_v12  ;;  %v14989_v27 = vpack.c.bf16 %v3346_v2, %v3340_v39  ;;  %v3460_v63 = vand.u32 4294901760, %v3459_v8  ;;  %v3466_v20 = vand.u32 4294901760, %v3465_v59  ;;  %v17922_v2 = vld [vmem:[#allocation83_spill] sm:$0xff]  ;;  %v17924_v8 = vld [vmem:[#allocation86_spill] sm:$0xff] }
 0x883   :  { %v3369_v58 = vsub.f32 %v14298_v50, %v17910_v56  ;;  %17913 = vst [vmem:[#allocation109_spill] sm:$0xff] %v17912_v12  ;;  %10121 = vmatprep.subr.bf16.mxu0 %v14965_v51  ;;  %v17915_v38 = vmov 0  ;;  %v15000_v54 = vpack.c.bf16 %v3454_v52, %v3448_v40  ;;  %v17919_v5 = vand.u32 4294901760, %v14310_v23  ;;  %v17932_v56 = vld [vmem:[#allocation91_spill] sm:$0xff] }
 0x884   :  { %17914 = vst [vmem:[#allocation137_spill] sm:$0xff] %v14989_v27  ;;  %v17916_v38 = vsel %vm14996_vm7, 4294967295, %v17915_v38  ;;  %v17920_v19 = vand.u32 4294901760, %v14312_v0  ;;  %10083 = vmatpush3.bf16.msk.msra.mxu1 %vm14985_vm4, %v17431_v3  ;;  %v15011_v9 = vpack.c.bf16 %v3358_v4, %v3352_v22  ;;  %v3364_v55 = vand.u32 4294901760, %v3363_v61 }
 0x885   :  { %17917 = vst [vmem:[#allocation138_spill] sm:$0xff] %v17916_v38  ;;  %17918 = vst [vmem:[#allocation139_spill] sm:$0xff] %v15000_v54  ;;  %v3471_v28 = vsub.f32 %v14310_v23, %v17919_v5  ;;  %v3370_v39 = vand.u32 4294901760, %v3369_v58  ;;  %10085 = vmatprep.subr.msk.bf16.mxu1 %vm14996_vm7, %v17431_v3  ;;  %vm17923_vm9 = vnez %v17922_v2  ;;  %vm17925_vm5 = vnez %v17924_v8  ;;  %v17934_v58 = vld [vmem:[#allocation95_spill] sm:$0xff] }
 0x886   :  { %v3477_v59 = vsub.f32 %v14312_v0, %v17920_v19  ;;  %17921 = vst [vmem:[#allocation140_spill] sm:$0xff] %v15011_v9  ;;  %10123 = vmatpush3.bf16.msra.mxu0 %v14989_v27  ;;  %vm15021_vm14 = vmpackc.low %vm17925_vm5, %vm17923_vm9  ;;  %v17926_v40 = vmov 0  ;;  %v15025_v52 = vpack.c.bf16 %v3466_v20, %v3460_v63  ;;  %v17930_v22 = vand.u32 4294901760, %v14445_v49 }
 0x887   :  { %v17927_v40 = vsel %vm15021_vm14, 4294967295, %v17926_v40  ;;  %v17931_v36 = vand.u32 4294901760, %v14447_v29  ;;  %10125 = vmatprep.subr.bf16.mxu0 %v15000_v54  ;;  %vm17933_vm11 = vnez %v17932_v56  ;;  %vm17935_vm1 = vnez %v17934_v58  ;;  %v17951_v54 = vld [vmem:[#allocation100_spill] sm:$0xff] }
 0x888   :  { %17928 = vst [vmem:[#allocation83_spill] sm:$0xff] %v17927_v40  ;;  %17929 = vst [vmem:[#allocation86_spill] sm:$0xff] %v15025_v52  ;;  %v3375_v4 = vsub.f32 %v14445_v49, %v17930_v22  ;;  %v17936_v5 = vmov 0  ;;  %v3472_v63 = vand.u32 4294901760, %v3471_v28  ;;  %v3478_v20 = vand.u32 4294901760, %v3477_v59  ;;  %10087 = vmatpush3.bf16.msk.msra.mxu1 %vm15021_vm14, %v17431_v3  ;;  %v17942_v28 = vld [vmem:[#allocation97_spill] sm:$0xff] }
 0x889   :  { %v3381_v61 = vsub.f32 %v14447_v29, %v17931_v36  ;;  %vm15038_vm0 = vmpackc.low %vm17935_vm1, %vm17933_vm11  ;;  %v17939_v19 = vand.u32 4294901760, %v14459_v44  ;;  %v17940_v8 = vand.u32 4294901760, %v14461_v15  ;;  %v15051_v36 = vpack.c.bf16 %v3370_v39, %v3364_v55  ;;  %v17944_v59 = vld [vmem:[#allocation99_spill] sm:$0xff] }
 0x88a   :  { %v17937_v5 = vsel %vm15038_vm0, 4294967295, %v17936_v5  ;;  %10127 = vmatpush3.bf16.msra.mxu0 %v15011_v9  ;;  %10089 = vmatprep.subr.msk.bf16.mxu1 %vm15038_vm0, %v17431_v3  ;;  %vm17943_vm9 = vnez %v17942_v28  ;;  %vm17945_vm5 = vnez %v17944_v59  ;;  %v17946_v56 = vmov 0  ;;  %v17953_v28 = vld [vmem:[#allocation101_spill] sm:$0xff] }
 0x88b   :  { %17938 = vst [vmem:[#allocation91_spill] sm:$0xff] %v17937_v5  ;;  %v3483_v2 = vsub.f32 %v14459_v44, %v17939_v19  ;;  %v3489_v22 = vsub.f32 %v14461_v15, %v17940_v8  ;;  %17941 = vst [vmem:[#allocation95_spill] sm:$0xff] %v15051_v36  ;;  %v3376_v58 = vand.u32 4294901760, %v3375_v4  ;;  %v3382_v19 = vand.u32 4294901760, %v3381_v61  ;;  %10129 = vmatprep.subr.bf16.mxu0 %v15025_v52  ;;  %v17970_v52 = vld [vmem:[#allocation105_spill] sm:$0xff] }
 0x88c   :  { %vm15061_vm11 = vmpackc.low %vm17945_vm5, %vm17943_vm9  ;;  %v17949_v8 = vand.u32 4294901760, %v14475_v31  ;;  %v17950_v39 = vand.u32 4294901760, %v14477_v1  ;;  %vm17952_vm1 = vnez %v17951_v54  ;;  %vm17954_vm13 = vnez %v17953_v28  ;;  %v17959_v54 = vld [vmem:[#allocation102_spill] sm:$0xff] }
 0x88d   :  { %v17947_v56 = vsel %vm15061_vm11, 4294967295, %v17946_v56  ;;  %vm15076_vm9 = vmpackc.low %vm17954_vm13, %vm17952_vm1  ;;  %v17955_v59 = vmov 0  ;;  %v15080_v4 = vpack.c.bf16 %v3478_v20, %v3472_v63  ;;  %v3484_v61 = vand.u32 4294901760, %v3483_v2  ;;  %10091 = vmatpush3.bf16.msk.msra.mxu1 %vm15061_vm11, %v17431_v3 }
 0x88e   :  { %17948 = vst [vmem:[#allocation97_spill] sm:$0xff] %v17947_v56  ;;  %v3387_v55 = vsub.f32 %v14475_v31, %v17949_v8  ;;  %v3393_v9 = vsub.f32 %v14477_v1, %v17950_v39  ;;  %v17956_v59 = vsel %vm15076_vm9, 4294967295, %v17955_v59  ;;  %v3490_v27 = vand.u32 4294901760, %v3489_v22  ;;  %10131 = vmatpush3.bf16.msra.mxu0 %v15051_v36  ;;  %10093 = vmatprep.subr.msk.bf16.mxu1 %vm15076_vm9, %v17431_v3  ;;  %v17961_v8 = vld [vmem:[#allocation103_spill] sm:$0xff]  ;;  %v17967_v22 = vld [vmem:[#allocation5_spill] sm:$0xff]  ;;  %v17968_v36 = vld [vmem:[#allocation104_spill] sm:$0xff] }
 0x88f   :  { %17957 = vst [vmem:[#allocation99_spill] sm:$0xff] %v17956_v59  ;;  %17958 = vst [vmem:[#allocation100_spill] sm:$0xff] %v15080_v4  ;;  %vm17960_vm5 = vnez %v17959_v54  ;;  %vm17962_vm13 = vnez %v17961_v8  ;;  %v17963_v39 = vmov 0  ;;  %v15097_v63 = vpack.c.bf16 %v3382_v19, %v3376_v58  ;;  %10133 = vmatprep.subr.bf16.mxu0 %v15080_v4  ;;  %v17984_v19 = vld [vmem:[#allocation108_spill] sm:$0xff]  ;;  %v18018_v4 = vld [vmem:[#allocation21_spill] sm:$0xff] }
 0x890   :  { %vm15093_vm1 = vmpackc.low %vm17962_vm13, %vm17960_vm5  ;;  %v3388_v20 = vand.u32 4294901760, %v3387_v55  ;;  %v3394_v2 = vand.u32 4294901760, %v3393_v9  ;;  %v15100_v28 = vand.u32 4294901760, %v17967_v22  ;;  %vm17969_vm10 = vnez %v17968_v36  ;;  %v17976_v9 = vld [vmem:[#allocation106_spill] sm:$0xff]  ;;  %v17978_v36 = vld [vmem:[#allocation107_spill] sm:$0xff] }
 0x891   :  { %v17964_v39 = vsel %vm15093_vm1, 4294967295, %v17963_v39  ;;  %17966 = vst [vmem:[#allocation102_spill] sm:$0xff] %v15097_v63  ;;  %vm17971_vm8 = vnez %v17970_v52  ;;  %v17972_v54 = vmov 0  ;;  %v15111_v8 = vpack.c.bf16 %v3490_v27, %v3484_v61  ;;  %10095 = vmatpush3.bf16.msk.msra.mxu1 %vm15093_vm1, %v17431_v3  ;;  %v17986_v55 = vld [vmem:[#allocation110_spill] sm:$0xff]  ;;  %v18132_v59 = vld [vmem:[#allocation128_spill] sm:$0xff] }
 0x892   :  { %17965 = vst [vmem:[#allocation101_spill] sm:$0xff] %v17964_v39  ;;  %vm15107_vm3 = vmpackc.low %vm17971_vm8, %vm17969_vm10  ;;  %10135 = vmatpush3.bf16.msra.mxu0 %v15097_v63  ;;  %vm17977_vm5 = vnez %v17976_v9  ;;  %vm17979_vm13 = vnez %v17978_v36  ;;  %v17980_v52 = vmov 0  ;;  %v15128_v27 = vpack.c.bf16 %v3394_v2, %v3388_v20  ;;  %v17991_v20 = vld [vmem:[#allocation111_spill] sm:$0xff]  ;;  %v17993_v2 = vld [vmem:[#allocation112_spill] sm:$0xff] }
 0x893   :  { %v17973_v54 = vsel %vm15107_vm3, 4294967295, %v17972_v54  ;;  %17975 = vst [vmem:[#allocation5_spill] sm:$0xff] %v15111_v8  ;;  %10097 = vmatprep.subr.msk.bf16.mxu1 %vm15107_vm3, %v17431_v3  ;;  %vm15124_vm8 = vmpackc.low %vm17979_vm13, %vm17977_vm5  ;;  %v15132_v58 = vsub.f32 %v17967_v22, %v15100_v28  ;;  %10137 = vmatprep.subr.bf16.mxu0 %v15111_v8  ;;  %vm17985_vm10 = vnez %v17984_v19  ;;  %vm17987_vm6 = vnez %v17986_v55  ;;  %v17998_v36 = vld [vmem:[#allocation113_spill] sm:$0xff]  ;;  %v18000_v19 = vld [vmem:[#allocation114_spill] sm:$0xff] }
 0x894   :  { %17974 = vst [vmem:[#allocation103_spill] sm:$0xff] %v17973_v54  ;;  %v17981_v52 = vsel %vm15124_vm8, 4294967295, %v17980_v52  ;;  %17983 = vst [vmem:[#allocation105_spill] sm:$0xff] %v15128_v27  ;;  %v17988_v61 = vmov 0  ;;  %vm17992_vm5 = vnez %v17991_v20  ;;  %vm17994_vm13 = vnez %v17993_v2  ;;  %v18006_v2 = vld [vmem:[#allocation115_spill] sm:$0xff] }
 0x895   :  { %17982 = vst [vmem:[#allocation104_spill] sm:$0xff] %v17981_v52  ;;  %vm15139_vm3 = vmpackc.low %vm17987_vm6, %vm17985_vm10  ;;  %10099 = vmatpush3.bf16.msk.msra.mxu1 %vm15124_vm8, %v17431_v3  ;;  %v17995_v22 = vmov 0  ;;  %v3292_v9 = vand.u32 4294901760, %v15132_v58  ;;  %vm17999_vm6 = vnez %v17998_v36  ;;  %vm18001_vm10 = vnez %v18000_v19  ;;  %v18008_v36 = vld [vmem:[#allocation116_spill] sm:$0xff] }
 0x896   :  { %v17989_v61 = vsel %vm15139_vm3, 4294967295, %v17988_v61  ;;  %10139 = vmatpush3.bf16.msra.mxu0 %v15128_v27  ;;  %10101 = vmatprep.subr.msk.bf16.mxu1 %vm15139_vm3, %v17431_v3  ;;  %vm15154_vm1 = vmpackc.low %vm17994_vm13, %vm17992_vm5  ;;  %v18002_v55 = vmov 0  ;;  %v18005_v20 = vand.u32 4294901760, %v14871_v14  ;;  %vm18007_vm5 = vnez %v18006_v2 }
 0x897   :  { %17990 = vst [vmem:[#allocation106_spill] sm:$0xff] %v17989_v61  ;;  %v17996_v22 = vsel %vm15154_vm1, 4294967295, %v17995_v22  ;;  %10173 = vmatprep.subr.msk.bf16.mxu0 %vm14916_vm15, %v17431_v3  ;;  %vm15166_vm8 = vmpackc.low %vm18001_vm10, %vm17999_vm6  ;;  %vm18009_vm13 = vnez %v18008_v36  ;;  %v18010_v19 = vmov 0  ;;  %v3293_v27 = vsub.f32 %v15132_v58, %v3292_v9 }
 0x898   :  { %17997 = vst [vmem:[#allocation107_spill] sm:$0xff] %v17996_v22  ;;  %v18003_v55 = vsel %vm15166_vm8, 4294967295, %v18002_v55  ;;  %vm15183_vm6 = vmpackc.low %vm18009_vm13, %vm18007_vm5  ;;  %v15190_v8 = vpack.c.bf16 %v14656_v11, %v14642_v53  ;;  %v15211_v36 = vpack.c.bf16 %v14753_v32, %v14751_v30  ;;  %v15220_v63 = vpack.c.bf16 %v14791_v6, %v14789_v34 }
 0x899   :  { %18004 = vst [vmem:[#allocation108_spill] sm:$0xff] %v18003_v55  ;;  %3495 = vmatmul.mubr.f32.vlgmr.msra.gmra.mrb[50].mxu0 %v15100_v28  ;;  %10103 = vmatpush3.bf16.msk.msra.mxu1 %vm15154_vm1, %v17431_v3  ;;  %v18011_v19 = vsel %vm15183_vm6, 4294967295, %v18010_v19  ;;  %v3294_v2 = vand.u32 4294901760, %v3293_v27  ;;  %v18017_v27 = vld [vmem:[#allocation36_spill] sm:$0xff]  ;;  %vm18023_vm10 = vnez %v17964_v39  ;;  %vm18025_vm5 = vnez %v17973_v54 }
 0x89a   :  { %10175 = vmatpush3.bf16.msk.msra.mxu0 %vm14946_vm2, %v17431_v3  ;;  %3673 = vmatprep.mubr.f32.mxu0 %v18005_v20  ;;  %18012 = vst [vmem:[#allocation110_spill] sm:$0xff] %v18011_v19  ;;  %18013 = vst [vmem:[#allocation111_spill] sm:$0xff] %v15190_v8  ;;  %v15203_v20 = vpack.c.bf16 %v14745_v60, %v14743_v13  ;;  %v15228_v51 = vpack.c.bf16 %v18018_v4, %v18017_v27  ;;  %vm18027_vm13 = vnez %v17981_v52  ;;  %v18128_v52 = vld [vmem:[#allocation51_spill] sm:$0xff] }
 0x89b   :  { %10105 = vmatprep.subr.msk.bf16.mxu1 %vm15166_vm8, %v17431_v3  ;;  %10177 = vmatprep.subr.msk.bf16.mxu0 %vm14961_vm12, %v17431_v3  ;;  %18015 = vst [vmem:[#allocation113_spill] sm:$0xff] %v15211_v36  ;;  %18016 = vst [vmem:[#allocation114_spill] sm:$0xff] %v15220_v63  ;;  %v15690_v56 = vand.u32 4294901760, %v18132_v59 }
 0x89c   :  { %18014 = vst [vmem:[#allocation112_spill] sm:$0xff] %v15203_v20  ;;  %18019 = vst [vmem:[#allocation115_spill] sm:$0xff] %v15228_v51 }
 0x89d   :  { %10107 = vmatpush3.bf16.msk.msra.mxu1 %vm15183_vm6, %v17431_v3  ;;  %v15725_v43 = vsub.f32 %v18132_v59, %v15690_v56 }
 0x89e   :  { %10179 = vmatpush3.bf16.msk.msra.mxu0 %vm14985_vm4, %v17431_v3  ;;  %10141 = vmatprep.subr.bf16.mxu1 %v15190_v8 }
 0x89f   :  { %10181 = vmatprep.subr.msk.bf16.mxu0 %vm14996_vm7, %v17431_v3 }
 0x8a0   :  { %3295 = vmatmul.mubr.f32.vlgmr.msra.gmra.mrb[38].mxu1 %v3294_v2  ;;  %v15244_v2 = vpack.c.bf16 %v14209_v7, %v14146_v47  ;;  %v15260_v47 = vpack.c.bf16 %v14229_v62, %v14227_v48  ;;  %v15268_v7 = vpack.c.bf16 %v14246_v25, %v14244_v35  ;;  %v18037_v48 = vand.u32 4294901760, %v14743_v13 }
 0x8a1   :  { %10143 = vmatpush3.bf16.msra.mxu1 %v15203_v20  ;;  %3598 = vmatprep.mubr.f32.mxu1 %v14871_v14  ;;  %v15236_v14 = vpack.c.bf16 %v14130_v17, %v17871_v57  ;;  %v15252_v57 = vpack.c.bf16 %v14225_v21, %v14211_v24  ;;  %v15276_v21 = vpack.c.bf16 %v14263_v26, %v17902_v46  ;;  %v18038_v62 = vand.u32 4294901760, %v14745_v60  ;;  %v18050_v60 = vld [vmem:[#allocation117_spill] sm:$0xff]  ;;  %v18053_v46 = vld [vmem:[#allocation120_spill] sm:$0xff] }
 0x8a2   :  { %10183 = vmatpush3.bf16.msk.msra.mxu0 %vm15021_vm14, %v17431_v3  ;;  %10145 = vmatprep.subr.bf16.mxu1 %v15211_v36  ;;  %18021 = vst [vmem:[#allocation36_spill] sm:$0xff] %v15244_v2  ;;  %18024 = vst [vmem:[#allocation141_spill] sm:$0xff] %v15260_v47  ;;  %v15284_v17 = vpack.c.bf16 %v14298_v50, %v14289_v18  ;;  %v15292_v24 = vpack.c.bf16 %v14312_v0, %v14310_v23  ;;  %v18034_v23 = vand.u32 4294901760, %v14642_v53 }
 0x8a3   :  { %10185 = vmatprep.subr.msk.bf16.mxu0 %vm15038_vm0, %v17431_v3  ;;  %18020 = vst [vmem:[#allocation116_spill] sm:$0xff] %v15236_v14  ;;  %18022 = vst [vmem:[#allocation21_spill] sm:$0xff] %v15252_v57  ;;  %v15300_v50 = vpack.c.bf16 %v14447_v29, %v14445_v49  ;;  %v15311_v0 = vpack.c.bf16 %v14461_v15, %v14459_v44  ;;  %v15316_v49 = vpack.c.bf16 %v14477_v1, %v14475_v31 }
 0x8a4   :  { %18026 = vst [vmem:[#allocation142_spill] sm:$0xff] %v15268_v7  ;;  %18028 = vst [vmem:[#allocation143_spill] sm:$0xff] %v15276_v21  ;;  %v18035_v29 = vand.u32 4294901760, %v14656_v11  ;;  %v15337_v35 = vpack.c.bf16 %v18038_v62, %v18037_v48  ;;  %v18040_v25 = vand.u32 4294901760, %v14751_v30  ;;  %v18041_v26 = vand.u32 4294901760, %v14753_v32  ;;  %v18051_v30 = vld [vmem:[#allocation118_spill] sm:$0xff] }
 0x8a5   :  { %10147 = vmatpush3.bf16.msra.mxu1 %v15220_v63  ;;  %18029 = vst [vmem:[#allocation144_spill] sm:$0xff] %v15284_v17  ;;  %18030 = vst [vmem:[#allocation145_spill] sm:$0xff] %v15292_v24  ;;  %v18043_v13 = vand.u32 4294901760, %v14789_v34  ;;  %v18044_v15 = vand.u32 4294901760, %v14791_v6  ;;  %v18046_v32 = vand.u32 4294901760, %v18017_v27  ;;  %v18047_v1 = vand.u32 4294901760, %v18018_v4 }
 0x8a6   :  { %10187 = vmatpush3.bf16.msk.msra.mxu0 %vm15061_vm11, %v17431_v3  ;;  %10149 = vmatprep.subr.bf16.mxu1 %v15228_v51  ;;  %18031 = vst [vmem:[#allocation146_spill] sm:$0xff] %v15300_v50  ;;  %18032 = vst [vmem:[#allocation147_spill] sm:$0xff] %v15311_v0  ;;  %v15326_v18 = vpack.c.bf16 %v18035_v29, %v18034_v23  ;;  %v15347_v44 = vpack.c.bf16 %v18041_v26, %v18040_v25  ;;  %v18052_v6 = vld [vmem:[#allocation119_spill] sm:$0xff]  ;;  %v18055_v27 = vld [vmem:[#allocation121_spill] sm:$0xff] }
 0x8a7   :  { %10189 = vmatprep.subr.msk.bf16.mxu0 %vm15076_vm9, %v17431_v3  ;;  %18033 = vst [vmem:[#allocation148_spill] sm:$0xff] %v15316_v49  ;;  %18039 = vst [vmem:[#allocation150_spill] sm:$0xff] %v15337_v35  ;;  %v15359_v31 = vpack.c.bf16 %v18044_v15, %v18043_v13  ;;  %v15369_v53 = vpack.c.bf16 %v18047_v1, %v18046_v32  ;;  %v18056_v29 = vld [vmem:[#allocation122_spill] sm:$0xff]  ;;  %v18057_v62 = vld [vmem:[#allocation9_spill] sm:$0xff] }
 0x8a8   :  { %18036 = vst [vmem:[#allocation149_spill] sm:$0xff] %v15326_v18  ;;  %18042 = vst [vmem:[#allocation151_spill] sm:$0xff] %v15347_v44  ;;  %v18058_v25 = vld [vmem:[#allocation10_spill] sm:$0xff]  ;;  %v18059_v13 = vld [vmem:[#allocation124_spill] sm:$0xff] }
 0x8a9   :  { %10151 = vmatpush3.bf16.msra.mxu1 %v15236_v14  ;;  %18045 = vst [vmem:[#allocation152_spill] sm:$0xff] %v15359_v31  ;;  %18048 = vst [vmem:[#allocation153_spill] sm:$0xff] %v15369_v53  ;;  %v18060_v32 = vld [vmem:[#allocation129_spill] sm:$0xff]  ;;  %v18061_v1 = vld [vmem:[#allocation11_spill] sm:$0xff] }
 0x8aa   :  { %10191 = vmatpush3.bf16.msk.msra.mxu0 %vm18023_vm10, %v17431_v3  ;;  %10153 = vmatprep.subr.bf16.mxu1 %v15244_v2 }
 0x8ab   :  { %10193 = vmatprep.subr.msk.bf16.mxu0 %vm18025_vm5, %v17431_v3 }
 0x8ad   :  { %10155 = vmatpush3.bf16.msra.mxu1 %v15252_v57 }
 0x8ae   :  { %10195 = vmatpush3.bf16.msk.msra.mxu0 %vm18027_vm13, %v17431_v3  ;;  %10157 = vmatprep.subr.bf16.mxu1 %v15260_v47 }
 0x8af   :  { %10197 = vmatprep.subr.msk.bf16.mxu0 %vm15139_vm3, %v17431_v3 }
 0x8b1   :  { %10159 = vmatpush3.bf16.msra.mxu1 %v15268_v7 }
 0x8b2   :  { %10199 = vmatpush3.bf16.msk.msra.mxu0 %vm15154_vm1, %v17431_v3  ;;  %10161 = vmatprep.subr.bf16.mxu1 %v15276_v21 }
 0x8b3   :  { %10201 = vmatprep.subr.msk.bf16.mxu0 %vm15166_vm8, %v17431_v3 }
 0x8b5   :  { %10163 = vmatpush3.bf16.msra.mxu1 %v15284_v17 }
 0x8b6   :  { %10203 = vmatpush3.bf16.msk.msra.mxu0 %vm15183_vm6, %v17431_v3  ;;  %10165 = vmatprep.subr.bf16.mxu1 %v15292_v24  ;;  %v18121_v24 = vld [vmem:[#allocation125_spill] sm:$0xff] }
 0x8b7   :  { %10237 = vmatprep.subr.msk.bf16.mxu0 %vm14916_vm15, %v17431_v3  ;;  %v15649_v51 = vand.u32 4294901760, %v18121_v24 }
 0x8b9   :  { %3677 = vmatmul.mubr.f32.vlgmr.msra.gmra.mrb[52].mxu0 %v3292_v9  ;;  %10167 = vmatpush3.bf16.msra.mxu1 %v15300_v50 }
 0x8ba   :  { %10239 = vmatpush3.bf16.msk.msra.mxu0 %vm14946_vm2, %v17431_v3  ;;  %3883 = vmatprep.mubr.f32.mxu0 %v14836_v41 }
 0x8bb   :  { %10169 = vmatprep.subr.bf16.mxu1 %v15311_v0  ;;  %10241 = vmatprep.subr.msk.bf16.mxu0 %vm14961_vm12, %v17431_v3 }
 0x8bd   :  { %10171 = vmatpush3.bf16.msra.mxu1 %v15316_v49  ;;  %v18085_v49 = vld [vmem:[#allocation39_spill] sm:$0xff] }
 0x8be   :  { %10243 = vmatpush3.bf16.msk.msra.mxu0 %vm14985_vm4, %v17431_v3  ;;  %10205 = vmatprep.subr.bf16.mxu1 %v15326_v18  ;;  %v18081_v18 = vld [vmem:[#allocation37_spill] sm:$0xff] }
 0x8bf   :  { %10245 = vmatprep.subr.msk.bf16.mxu0 %vm14996_vm7, %v17431_v3  ;;  %vm18086_vm7 = vnez %v18085_v49 }
 0x8c0   :  { %3601 = vmatmul.mubr.f32.vlgmr.msra.gmra.mrb[40].mxu1 %v15132_v58  ;;  %v18054_v58 = vld [vmem:[#allocation3_spill] sm:$0xff] }
 0x8c1   :  { %10207 = vmatpush3.bf16.msra.mxu1 %v15337_v35  ;;  %3811 = vmatprep.mubr.f32.mxu1 %v14836_v41  ;;  %v18049_v41 = vld [vmem:[#allocation8_spill] sm:$0xff]  ;;  %v358_v9 = vadd.s32 512, %v18054_v58  ;;  %v359_v23 = vadd.s32 520, %v18054_v58  ;;  %v360_v26 = vadd.s32 528, %v18054_v58  ;;  %v361_v15 = vadd.s32 536, %v18054_v58 }
 0x8c2   :  { %10247 = vmatpush3.bf16.msk.msra.mxu0 %vm15021_vm14, %v17431_v3  ;;  %10209 = vmatprep.subr.bf16.mxu1 %v15347_v44  ;;  %v15383_v11 = vand.u32 4294901760, %v18049_v41 }
 0x8c3   :  { %10249 = vmatprep.subr.msk.bf16.mxu0 %vm15038_vm0, %v17431_v3  ;;  %vm507_vm0 = vcmp.lt.s32.totalorder %v360_v26, %v18058_v25 }
 0x8c4   :  { %v15395_v34 = vsub.f32 %v18049_v41, %v15383_v11 }
 0x8c5   :  { %10211 = vmatpush3.bf16.msra.mxu1 %v15359_v31  ;;  %v364_v31 = vadd.s32 560, %v18054_v58 }
 0x8c6   :  { %10251 = vmatpush3.bf16.msk.msra.mxu0 %vm15061_vm11, %v17431_v3  ;;  %10213 = vmatprep.subr.bf16.mxu1 %v15369_v53  ;;  %v17170_v4 = vand.u32 4294901760, %v15395_v34 }
 0x8c7   :  { %10253 = vmatprep.subr.msk.bf16.mxu0 %vm15076_vm9, %v17431_v3  ;;  %vm18066_vm9 = vcmask 523264  }
 0x8c8   :  { %v4499_v48 = vsub.f32 %v15395_v34, %v17170_v4 }
 0x8c9   :  { %10215 = vmatpush3.bf16.msra.mxu1 %v18050_v60 }
 0x8ca   :  { %10255 = vmatpush3.bf16.msk.msra.mxu0 %vm18023_vm10, %v17431_v3  ;;  %10217 = vmatprep.subr.bf16.mxu1 %v18051_v30 }
 0x8cb   :  { %10257 = vmatprep.subr.msk.bf16.mxu0 %vm18025_vm5, %v17431_v3  ;;  %vm506_vm5 = vcmp.lt.s32.totalorder %v359_v23, %v18058_v25 }
 0x8cd   :  { %10219 = vmatpush3.bf16.msra.mxu1 %v18052_v6  ;;  %v18074_v6 = vld [vmem:[#allocation14_spill] sm:$0xff] }
 0x8ce   :  { %10259 = vmatpush3.bf16.msk.msra.mxu0 %vm18027_vm13, %v17431_v3  ;;  %10221 = vmatprep.subr.bf16.mxu1 %v18053_v46  ;;  %vm505_vm13 = vcmp.lt.s32.totalorder %v358_v9, %v18058_v25  ;;  %v363_v46 = vadd.s32 552, %v18054_v58 }
 0x8cf   :  { %10261 = vmatprep.subr.msk.bf16.mxu0 %vm15139_vm3, %v17431_v3  ;;  %vm431_vm3 = vcmp.ge.s32.totalorder %v358_v9, %v18057_v62  ;;  %v18065_v9 = vld [vmem:[#allocation28_spill] sm:$0xff] }
 0x8d0   :  { %vm15433_vm10 = vmand %vm431_vm3, %vm505_vm13  ;;  %v2548_v4 = vsel %vm18066_vm9, %v18065_v9, 0  ;;  %vm434_vm3 = vcmp.ge.s32.totalorder %v361_v15, %v18057_v62  ;;  %vm508_vm13 = vcmp.lt.s32.totalorder %v361_v15, %v18058_v25  ;;  %v18070_v9 = vmov 0.0   ;;  %v18098_v15 = vld [vmem:[#allocation42_spill] sm:$0xff] }
 0x8d1   :  { %10223 = vmatpush3.bf16.msra.mxu1 %v18055_v27  ;;  %vm15468_vm14 = vmand %vm434_vm3, %vm508_vm13  ;;  %v15473_v60 = vand.u32 4294901760, %v2548_v4  ;;  %vm436_vm3 = vcmp.ge.s32.totalorder %v363_v46, %v18057_v62  ;;  %vm510_vm13 = vcmp.lt.s32.totalorder %v363_v46, %v18058_v25 }
 0x8d2   :  { %10263 = vmatpush3.bf16.msk.msra.mxu0 %vm15154_vm1, %v17431_v3  ;;  %10225 = vmatprep.subr.bf16.mxu1 %v18056_v29  ;;  %vm432_vm1 = vcmp.ge.s32.totalorder %v359_v23, %v18057_v62  ;;  %v4500_v23 = vand.u32 4294901760, %v4499_v48  ;;  %v18069_v29 = vld [vmem:[#allocation130_spill] sm:$0xff]  ;;  %v649_v48 = vsel %vm15433_vm10, 1.0, %v18070_v9  ;;  %v652_v35 = vsel %vm15468_vm14, 1.0, %v18070_v9 }
 0x8d3   :  { %10265 = vmatprep.subr.msk.bf16.mxu0 %vm15166_vm8, %v17431_v3  ;;  %vm18062_vm8 = vnez %v18061_v1  ;;  %vm15439_vm11 = vmand %vm432_vm1, %vm506_vm5  ;;  %vm18075_vm1 = vnez %v18074_v6  ;;  %v15517_v46 = vsub.f32 %v652_v35, %v652_v35  ;;  %v18093_v35 = vld [vmem:[#allocation41_spill] sm:$0xff] }
 0x8d4   :  { %v650_v27 = vsel %vm15439_vm11, 1.0, %v18070_v9  ;;  %vm18094_vm15 = vnez %v18093_v35 }
 0x8d5   :  { %10227 = vmatpush3.bf16.msra.mxu1 %v18059_v13  ;;  %v15477_v53 = vsub.f32 %v650_v27, %v650_v27  ;;  %v17193_v27 = vmov 0.0|0.0   ;;  %v18109_v13 = vld [vmem:[#allocation45_spill] sm:$0xff]  ;;  %v18113_v2 = vand.u32 4294901760, %v15517_v46 }
 0x8d6   :  { %10267 = vmatpush3.bf16.msk.msra.mxu0 %vm15183_vm6, %v17431_v3  ;;  %10229 = vmatprep.subr.bf16.mxu1 %v18060_v32  ;;  %vm433_vm6 = vcmp.ge.s32.totalorder %v360_v26, %v18057_v62  ;;  %v362_v32 = vadd.s32 544, %v18054_v58  ;;  %v18071_v26 = vld [vmem:[#allocation12_spill] sm:$0xff] }
 0x8d7   :  { %10341 = vmatprep.subr.msk.bf16.mxu0 %vm18062_vm8, %v17431_v3  ;;  %vm18072_vm9 = vnez %v18071_v26  ;;  %vm15464_vm5 = vmand %vm433_vm6, %vm507_vm0  ;;  %vm18082_vm0 = vnez %v18081_v18  ;;  %v3986_v14 = vsub.f32 %v15517_v46, %v18113_v2  ;;  %v18116_v2 = vmov 0  ;;  %v18232_v26 = vld [vmem:[#allocation91_spill] sm:$0xff] }
 0x8d8   :  { %vm509_vm4 = vcmp.lt.s32.totalorder %v362_v32, %v18058_v25  ;;  %v651_v44 = vsel %vm15464_vm5, 1.0, %v18070_v9  ;;  %vm15496_vm6 = vmpackc.low %vm15439_vm11, %vm15433_vm10  ;;  %vm18087_vm12 = vcmp.ge.s32.totalorder %v362_v32, %v18057_v62  ;;  %vm18092_vm10 = vmmov 0   ;;  %v18239_v18 = vld [vmem:[#allocation99_spill] sm:$0xff] }
 0x8d9   :  { %3885 = vmatmul.mubr.f32.vlgmr.msra.gmra.mrb[54].mxu0 %v15100_v28  ;;  %10231 = vmatpush3.bf16.msra.mxu1 %v18069_v29  ;;  %v18073_v29 = vld [vmem:[#allocation131_spill] sm:$0xff]  ;;  %vm15509_vm2 = vmand %vm18087_vm12, %vm509_vm4  ;;  %v15515_v0 = vsub.f32 %v651_v44, %v651_v44  ;;  %vm437_vm12 = vcmp.ge.s32.totalorder %v364_v31, %v18057_v62  ;;  %vm511_vm4 = vcmp.lt.s32.totalorder %v364_v31, %v18058_v25  ;;  %v18096_v32 = vmov 0 }
 0x8da   :  { %10343 = vmatpush3.bf16.msk.msra.mxu0 %vm18072_vm9, %v17431_v3  ;;  %4501 = vmatprep.mubr.f32.mxu0 %v4500_v23  ;;  %v15475_v23 = vsub.f32 %v649_v48, %v649_v48  ;;  %v18083_v48 = vmov 0  ;;  %vm15522_vm11 = vmand %vm436_vm3, %vm510_vm13  ;;  %v15531_v44 = vsub.f32 %v2548_v4, %v15473_v60  ;;  %v653_v31 = vsel %vm15509_vm2, 1.0, %v18070_v9 }
 0x8db   :  { %10233 = vmatprep.subr.bf16.mxu1 %v18073_v29  ;;  %10345 = vmatprep.subr.msk.bf16.mxu0 %vm18075_vm1, %v17431_v3  ;;  %v18080_v29 = vld [vmem:[#allocation132_spill] sm:$0xff]  ;;  %v18084_v48 = vsel %vm15496_vm6, 4294967295, %v18083_v48  ;;  %vm15541_vm3 = vmpackc.low %vm15468_vm14, %vm15464_vm5  ;;  %v654_v4 = vsel %vm15522_vm11, 1.0, %v18070_v9  ;;  %v15575_v17 = vsub.f32 %v653_v31, %v653_v31  ;;  %v18112_v57 = vand.u32 4294901760, %v15515_v0 }
 0x8dc   :  { %v17202_v41 = vand.u32 4294901760, %v15475_v23  ;;  %v18097_v32 = vsel %vm15541_vm3, 4294967295, %v18096_v32  ;;  %vm15556_vm14 = vmand %vm437_vm12, %vm511_vm4  ;;  %v15577_v21 = vsub.f32 %v654_v4, %v654_v4  ;;  %v3987_v19 = vand.u32 4294901760, %v3986_v14  ;;  %v18126_v14 = vld [vmem:[#allocation50_spill] sm:$0xff] }
 0x8dd   :  { %10235 = vmatpush3.bf16.msra.mxu1 %v18080_v29  ;;  %v365_v29 = vadd.s32 568, %v18054_v58  ;;  %v18095_v58 = vmov 0.0|0.0   ;;  %vm15587_vm4 = vmpackc.low %vm15522_vm11, %vm15509_vm2  ;;  %v655_v31 = vsel %vm15556_vm14, 1.0, %v18070_v9  ;;  %v3980_v10 = vsub.f32 %v15515_v0, %v18112_v57 }
 0x8de   :  { %10347 = vmatpush3.bf16.msk.msra.mxu0 %vm18082_vm0, %v17431_v3  ;;  %10268 = vmatprep.subr.bf16.mxu1 %v17193_v27  ;;  %v17203_v27 = vand.u32 4294901760, %v15477_v53  ;;  %v15618_v36 = vsub.f32 %v655_v31, %v655_v31  ;;  %v18118_v57 = vand.u32 4294901760, %v15531_v44 }
 0x8df   :  { %10349 = vmatprep.subr.msk.bf16.mxu0 %vm18086_vm7, %v17431_v3  ;;  %vm438_vm13 = vcmp.ge.s32.totalorder %v365_v29, %v18057_v62  ;;  %vm512_vm7 = vcmp.lt.s32.totalorder %v365_v29, %v18058_v25  ;;  %v3968_v29 = vsub.f32 %v15475_v23, %v17202_v41  ;;  %v18104_v41 = vld [vmem:[#allocation44_spill] sm:$0xff]  ;;  %v18108_v25 = vld [vmem:[#allocation30_spill] sm:$0xff]  ;;  %v3981_v8 = vand.u32 4294901760, %v3980_v10 }
 0x8e0   :  { %3813 = vmatmul.mubr.f32.vlgmr.msra.gmra.mrb[42].mxu1 %v15100_v28  ;;  %v3974_v62 = vsub.f32 %v15477_v53, %v17203_v27  ;;  %vm15571_vm5 = vmand %vm438_vm13, %vm512_vm7  ;;  %vm18105_vm12 = vnez %v18104_v41  ;;  %v18106_v27 = vmov 0  ;;  %v15599_v7 = vand.u32 4294901760, %v18108_v25  ;;  %v18111_v28 = vld [vmem:[#allocation123_spill] sm:$0xff]  ;;  %v18252_v41 = vld [vmem:[#allocation106_spill] sm:$0xff] }
 0x8e1   :  { %10270 = vmatpush3.bf16.msk.msra.mxu1 %vm15496_vm6, %v17431_v3  ;;  %9574 = vmatprep.mubr.msk.f32.mxu1 %vm18092_vm10, %v18070_v9  ;;  %v18107_v27 = vsel %vm15587_vm4, 4294967295, %v18106_v27  ;;  %v656_v4 = vsel %vm15571_vm5, 1.0, %v18070_v9  ;;  %vm18110_vm7 = vnez %v18109_v13  ;;  %v15605_v42 = vand.u32 4294901760, %v18111_v28  ;;  %vm15630_vm11 = vmpackc.low %vm15571_vm5, %vm15556_vm14 }
 0x8e2   :  { %10351 = vmatpush3.bf16.msk.msra.mxu0 %vm18094_vm15, %v17431_v3  ;;  %10271 = vmatprep.subr.bf16.mxu1 %v18095_v58  ;;  %vm18099_vm15 = vnez %v18098_v15  ;;  %v3969_v47 = vand.u32 4294901760, %v3968_v29  ;;  %v3975_v50 = vand.u32 4294901760, %v3974_v62  ;;  %v15620_v29 = vsub.f32 %v656_v4, %v656_v4  ;;  %v18114_v62 = vld [vmem:[#allocation47_spill] sm:$0xff]  ;;  %v18119_v4 = vld [vmem:[#allocation48_spill] sm:$0xff] }
 0x8e3   :  { %10353 = vmatprep.subr.msk.bf16.mxu0 %vm18099_vm15, %v17431_v3  ;;  %vm18115_vm2 = vnez %v18114_v62  ;;  %v18117_v2 = vsel %vm15630_vm11, 4294967295, %v18116_v2  ;;  %v3958_v31 = vsub.f32 %v15531_v44, %v18118_v57  ;;  %vm18120_vm13 = vnez %v18119_v4  ;;  %v18123_v57 = vld [vmem:[#allocation126_spill] sm:$0xff] }
 0x8e4   :  { %v15642_v63 = vsub.f32 %v18108_v25, %v15599_v7  ;;  %v15646_v30 = vsub.f32 %v18111_v28, %v15605_v42  ;;  %v15651_v20 = vpack.c.bf16 %v3975_v50, %v3969_v47  ;;  %v15654_v55 = vand.u32 4294901760, %v18123_v57  ;;  %v18130_v47 = vld [vmem:[#allocation127_spill] sm:$0xff] }
 0x8e5   :  { %10273 = vmatpush3.bf16.msk.msra.mxu1 %vm15541_vm3, %v17431_v3  ;;  %v18124_v25 = vand.u32 4294901760, %v15575_v17  ;;  %v18125_v28 = vand.u32 4294901760, %v15577_v21  ;;  %vm18127_vm14 = vnez %v18126_v14  ;;  %v3959_v50 = vand.u32 4294901760, %v3958_v31  ;;  %v18140_v31 = vld [vmem:[#allocation133_spill] sm:$0xff] }
 0x8e6   :  { %10355 = vmatpush3.bf16.msk.msra.mxu0 %vm18105_vm12, %v17431_v3  ;;  %10274 = vmatprep.subr.bf16.mxu1 %v18095_v58  ;;  %18122 = vst [vmem:[#allocation8_spill] sm:$0xff] %v15651_v20  ;;  %vm18129_vm5 = vnez %v18128_v52  ;;  %v15680_v54 = vand.u32 4294901760, %v18130_v47  ;;  %v15682_v10 = vpack.c.bf16 %v3987_v19, %v3981_v8  ;;  %v15687_v39 = vsub.f32 %v18123_v57, %v15654_v55  ;;  %v18135_v57 = vld [vmem:[#allocation53_spill] sm:$0xff] }
 0x8e7   :  { %10357 = vmatprep.subr.msk.bf16.mxu0 %vm18110_vm7, %v17431_v3  ;;  %v3992_v22 = vsub.f32 %v15575_v17, %v18124_v25  ;;  %v3998_v61 = vsub.f32 %v15577_v21, %v18125_v28  ;;  %v15677_v28 = vsub.f32 %v18121_v24, %v15649_v51  ;;  %v18133_v5 = vand.u32 4294901760, %v15618_v36 }
 0x8e8   :  { %18131 = vst [vmem:[#allocation3_spill] sm:$0xff] %v15682_v10  ;;  %v18134_v8 = vand.u32 4294901760, %v15620_v29  ;;  %v18141_v38 = vand.u32 4294901760, %v15646_v30 }
 0x8e9   :  { %10276 = vmatpush3.bf16.msk.msra.mxu1 %vm15587_vm4, %v17431_v3  ;;  %v3993_v25 = vand.u32 4294901760, %v3992_v22  ;;  %v3999_v24 = vand.u32 4294901760, %v3998_v61  ;;  %v4004_v40 = vsub.f32 %v15618_v36, %v18133_v5  ;;  %v18137_v22 = vld [vmem:[#allocation54_spill] sm:$0xff]  ;;  %v18139_v61 = vand.u32 4294901760, %v15642_v63 }
 0x8ea   :  { %10359 = vmatpush3.bf16.msk.msra.mxu0 %vm18115_vm2, %v17431_v3  ;;  %10277 = vmatprep.subr.bf16.mxu1 %v18095_v58  ;;  %v4010_v19 = vsub.f32 %v15620_v29, %v18134_v8  ;;  %v15714_v8 = vsub.f32 %v18130_v47, %v15680_v54  ;;  %v4514_v12 = vsub.f32 %v15646_v30, %v18141_v38  ;;  %v18144_v38 = vld [vmem:[#allocation15_spill] sm:$0xff]  ;;  %v18145_v33 = vand.u32 4294901760, %v15677_v28 }
 0x8eb   :  { %10361 = vmatprep.subr.msk.bf16.mxu0 %vm18120_vm13, %v17431_v3  ;;  %v4505_v5 = vsub.f32 %v15642_v63, %v18139_v61  ;;  %v15728_v61 = vpack.c.bf16 %v3999_v24, %v3993_v25  ;;  %v18146_v24 = vand.u32 4294901760, %v15687_v39 }
 0x8ec   :  { %v4011_v47 = vand.u32 4294901760, %v4010_v19  ;;  %v4520_v59 = vsub.f32 %v15677_v28, %v18145_v33  ;;  %v17253_v37 = vand.u32 4294901760, %v15714_v8  ;;  %v18147_v33 = vld [vmem:[#allocation16_spill] sm:$0xff] }
 0x8ed   :  { %10279 = vmatpush3.bf16.msk.msra.mxu1 %vm15630_vm11, %v17431_v3  ;;  %v4529_v19 = vsub.f32 %v15687_v39, %v18146_v24 }
 0x8ee   :  { %10363 = vmatpush3.bf16.msk.msra.mxu0 %vm18127_vm14, %v17431_v3  ;;  %10280 = vmatprep.subr.bf16.mxu1 %v18095_v58  ;;  %vm18138_vm14 = vnez %v18137_v22  ;;  %v18142_v22 = vld [vmem:[#allocation56_spill] sm:$0xff] }
 0x8ef   :  { %10365 = vmatprep.subr.msk.bf16.mxu0 %vm18129_vm5, %v17431_v3  ;;  %vm18136_vm5 = vnez %v18135_v57  ;;  %v4506_v57 = vand.u32 4294901760, %v4505_v5 }
 0x8f0   :  { %9575 = vmatmul.mubr.f32.vlgmr.msra.gmra.mrb[44].mxu1 %v3959_v50  ;;  %v4005_v50 = vand.u32 4294901760, %v4004_v40  ;;  %v4515_v40 = vand.u32 4294901760, %v4514_v12  ;;  %v4535_v12 = vsub.f32 %v15714_v8, %v17253_v37  ;;  %v18165_v37 = vld [vmem:[#allocation57_spill] sm:$0xff] }
 0x8f1   :  { %10282 = vmatpush3.bf16.msra.mxu1 %v15651_v20  ;;  %9593 = vmatprep.mubr.msk.f32.mxu1 %vm18092_vm10, %v18070_v9  ;;  %v15717_v20 = vand.u32 4294901760, %v18140_v31 }
 0x8f2   :  { %10367 = vmatpush3.bf16.msk.msra.mxu0 %vm18136_vm5, %v17431_v3  ;;  %10283 = vmatprep.subr.bf16.mxu1 %v18095_v58  ;;  %v15748_v5 = vpack.c.bf16 %v4011_v47, %v4005_v50  ;;  %v15763_v47 = vpack.c.bf16 %v15477_v53, %v15475_v23 }
 0x8f3   :  { %10369 = vmatprep.subr.msk.bf16.mxu0 %vm18138_vm14, %v17431_v3  ;;  %vm18143_vm14 = vnez %v18142_v22  ;;  %v15741_v25 = vsub.f32 %v18140_v31, %v15717_v20  ;;  %v18148_v31 = vld [vmem:[#allocation17_spill] sm:$0xff] }
 0x8f5   :  { %10285 = vmatpush3.bf16.msra.mxu1 %v15682_v10  ;;  %v17252_v24 = vand.u32 4294901760, %v15741_v25  ;;  %v4530_v10 = vand.u32 4294901760, %v4529_v19 }
 0x8f6   :  { %10371 = vmatpush3.bf16.msk.msra.mxu0 %vm18143_vm14, %v17431_v3  ;;  %10286 = vmatprep.subr.bf16.mxu1 %v18095_v58 }
 0x8f7   :  { %10373 = vmatprep.subr.bf16.mxu0 %v18144_v38  ;;  %v4521_v38 = vand.u32 4294901760, %v4520_v59  ;;  %v18150_v59 = vld [vmem:[#allocation20_spill] sm:$0xff]  ;;  %v4550_v19 = vsub.f32 %v15741_v25, %v17252_v24 }
 0x8f9   :  { %4507 = vmatmul.mubr.f32.vlgmr.msra.gmra.mrb[56].mxu0 %v4506_v57  ;;  %10288 = vmatpush3.bf16.msra.mxu1 %v15728_v61  ;;  %v18149_v57 = vand.u32 4294901760, %v15725_v43 }
 0x8fa   :  { %4516 = vmatprep.mubr.f32.mxu0 %v4515_v40  ;;  %10375 = vmatpush3.bf16.msra.mxu0 %v18147_v33  ;;  %v4536_v40 = vand.u32 4294901760, %v4535_v12  ;;  %v18151_v33 = vld [vmem:[#allocation25_spill] sm:$0xff]  ;;  %v4551_v12 = vand.u32 4294901760, %v4550_v19  ;;  %v18158_v19 = vld [vmem:[#allocation43_spill] sm:$0xff] }
 0x8fb   :  { %10289 = vmatprep.subr.bf16.mxu1 %v18095_v58  ;;  %10377 = vmatprep.subr.bf16.mxu0 %v18148_v31  ;;  %v4544_v50 = vsub.f32 %v15725_v43, %v18149_v57  ;;  %v18152_v31 = vld [vmem:[#allocation26_spill] sm:$0xff]  ;;  %v18153_v57 = vld [vmem:[#allocation27_spill] sm:$0xff] }
 0x8fd   :  { %4522 = vmatmul.mubr.f32.gmra.mrb[58].mxu0 %v4521_v38  ;;  %10291 = vmatpush3.bf16.msra.mxu1 %v15748_v5  ;;  %v4545_v38 = vand.u32 4294901760, %v4544_v50  ;;  %v15785_v50 = vpack.c.bf16 %v15577_v21, %v15575_v17 }
 0x8fe   :  { %4531 = vmatprep.mubr.f32.mxu0 %v4530_v10  ;;  %10379 = vmatpush3.bf16.msra.mxu0 %v18150_v59  ;;  %v15775_v10 = vpack.c.bf16 %v15517_v46, %v15515_v0  ;;  %v18155_v59 = vld [vmem:[#allocation38_spill] sm:$0xff] }
 0x8ff   :  { %10292 = vmatprep.subr.bf16.mxu1 %v18095_v58  ;;  %10381 = vmatprep.subr.bf16.mxu0 %v18151_v33  ;;  %18154 = vst [vmem:[#allocation9_spill] sm:$0xff] %v15785_v50  ;;  %v15794_v33 = vpack.c.bf16 %v15620_v29, %v15618_v36 }
 0x900   :  { %9594 = vmatmul.mubr.f32.vlgmr.msra.gmra.mrb[44].mxu1 %v15473_v60 }
 0x901   :  { %4537 = vmatmul.mubr.f32.gmra.mrb[60].mxu0 %v4536_v40  ;;  %10294 = vmatpush3.bf16.msra.mxu1 %v15763_v47  ;;  %v18156_v40 = vld [vmem:[#allocation40_spill] sm:$0xff]  ;;  %18157 = vst [vmem:[#allocation10_spill] sm:$0xff] %v15794_v33 }
 0x902   :  { %4546 = vmatprep.mubr.f32.mxu0 %v4545_v38  ;;  %10383 = vmatpush3.bf16.msra.mxu0 %v18152_v31  ;;  %v8488_v38 = vpop.f32.mrb[44].mxu0  ;;  %v18159_v31 = vld [vmem:[#allocation46_spill] sm:$0xff] }
 0x903   :  { %10295 = vmatprep.subr.bf16.mxu1 %v18095_v58  ;;  %10385 = vmatprep.subr.bf16.mxu0 %v18153_v57 }
 0x904   :  { %9612 = vmatprep.mubr.msk.f32.mxu1 %vm18092_vm10, %v18070_v9 }
 0x905   :  { %4552 = vmatmul.mubr.f32.gmra.mrb[62].mxu0 %v4551_v12  ;;  %10297 = vmatpush3.bf16.msra.mxu1 %v15775_v10  ;;  %v8489_v12 = vpop.f32.mrb[45].mxu0 }
 0x906   :  { %10387 = vmatpush3.bf16.msra.mxu0 %v18155_v59  ;;  %4750 = vmatprep.mubr.f32.mxu0 %v15383_v11  ;;  %v8490_v57 = vadd.f32 %v8489_v12, %v8488_v38  ;;  %v18160_v59 = vld [vmem:[#allocation49_spill] sm:$0xff] }
 0x907   :  { %10298 = vmatprep.subr.bf16.mxu1 %v18095_v58  ;;  %10389 = vmatprep.subr.bf16.mxu0 %v18156_v40  ;;  %v18161_v40 = vld [vmem:[#allocation52_spill] sm:$0xff]  ;;  %v8453_v38 = vpop.f32.mrb[32].mxu1 }
 0x908   :  { %v8454_v12 = vpop.f32.mrb[33].mxu1 }
 0x909   :  { %10300 = vmatpush3.bf16.msra.mxu1 %v15785_v50 }
 0x90a   :  { %10391 = vmatpush3.bf16.msra.mxu0 %v18158_v19  ;;  %10301 = vmatprep.subr.bf16.mxu1 %v18095_v58  ;;  %v18162_v19 = vld [vmem:[#allocation55_spill] sm:$0xff] }
 0x90b   :  { %10393 = vmatprep.subr.bf16.mxu0 %v18159_v31  ;;  %v18163_v31 = vld [vmem:[#allocation59_spill] sm:$0xff] }
 0x90d   :  { %10303 = vmatpush3.bf16.msra.mxu1 %v15794_v33 }
 0x90e   :  { %10395 = vmatpush3.bf16.msra.mxu0 %v18160_v59  ;;  %10304 = vmatprep.subr.bf16.mxu1 %v18095_v58  ;;  %v8455_v59 = vadd.f32 %v8454_v12, %v8453_v38  ;;  %v18167_v38 = vld [vmem:[#allocation82_spill] sm:$0xff]  ;;  %v18171_v12 = vld [vmem:[#allocation84_spill] sm:$0xff] }
 0x90f   :  { %10397 = vmatprep.subr.bf16.mxu0 %v18161_v40  ;;  %v18164_v40 = vld [vmem:[#allocation62_spill] sm:$0xff] }
 0x910   :  { %9613 = vmatmul.mubr.f32.vlgmr.msra.gmra.mrb[44].mxu1 %v15531_v44  ;;  %v2827_v24 = vadd.f32 %v8490_v57, %v8455_v59  ;;  %v18169_v57 = vand.u32 4294901760, %v15477_v53  ;;  %v18172_v59 = vld [vmem:[#allocation85_spill] sm:$0xff]  ;;  %v18175_v53 = vand.u32 4294901760, %v15517_v46  ;;  %v18180_v46 = vand.u32 4294901760, %v15577_v21 }
 0x911   :  { %10306 = vmatpush3.bf16.msk.msra.mxu1 %vm15496_vm6, %v17431_v3  ;;  %9631 = vmatprep.mubr.msk.f32.mxu1 %vm18092_vm10, %v18070_v9 }
 0x912   :  { %10399 = vmatpush3.bf16.msra.mxu0 %v18162_v19  ;;  %10307 = vmatprep.subr.bf16.mxu1 %v18095_v58  ;;  %v18166_v19 = vld [vmem:[#allocation81_spill] sm:$0xff] }
 0x913   :  { %10401 = vmatprep.subr.bf16.mxu0 %v18163_v31 }
 0x915   :  { %10309 = vmatpush3.bf16.msk.msra.mxu1 %vm15541_vm3, %v17431_v3 }
 0x916   :  { %10403 = vmatpush3.bf16.msra.mxu0 %v18164_v40  ;;  %10310 = vmatprep.subr.bf16.mxu1 %v18095_v58  ;;  %v18173_v40 = vand.u32 4294901760, %v15531_v44 }
 0x917   :  { %10405 = vmatprep.subr.bf16.mxu0 %v18165_v37  ;;  %v18168_v37 = vand.u32 4294901760, %v15475_v23  ;;  %v18174_v23 = vand.u32 4294901760, %v15515_v0  ;;  %v18179_v0 = vand.u32 4294901760, %v15575_v17  ;;  %v18187_v17 = vld [vmem:[#allocation61_spill] sm:$0xff] }
 0x919   :  { %4752 = vmatmul.mubr.f32.vlgmr.msra.gmra.mrb[64].mxu0 %v15599_v7  ;;  %10312 = vmatpush3.bf16.msk.msra.mxu1 %vm15587_vm4, %v17431_v3  ;;  %v15834_v31 = vpack.c.bf16 %v18169_v57, %v18168_v37  ;;  %v18178_v37 = vld [vmem:[#allocation88_spill] sm:$0xff]  ;;  %v15862_v44 = vpack.c.bf16 %v18180_v46, %v18179_v0  ;;  %v18182_v57 = vld [vmem:[#allocation58_spill] sm:$0xff] }
 0x91a   :  { %4757 = vmatprep.mubr.f32.mxu0 %v15605_v42  ;;  %10407 = vmatpush3.bf16.msra.mxu0 %v18166_v19  ;;  %v15848_v19 = vpack.c.bf16 %v18175_v53, %v18174_v23  ;;  %v18188_v53 = vld [vmem:[#allocation63_spill] sm:$0xff]  ;;  %v18189_v0 = vld [vmem:[#allocation64_spill] sm:$0xff] }
 0x91b   :  { %10313 = vmatprep.subr.bf16.mxu1 %v18095_v58  ;;  %10409 = vmatprep.subr.bf16.mxu0 %v18167_v38  ;;  %18170 = vst [vmem:[#allocation11_spill] sm:$0xff] %v15834_v31  ;;  %v18177_v38 = vld [vmem:[#allocation87_spill] sm:$0xff]  ;;  %18181 = vst [vmem:[#allocation12_spill] sm:$0xff] %v15862_v44 }
 0x91c   :  { %18176 = vst [vmem:[#allocation28_spill] sm:$0xff] %v15848_v19 }
 0x91d   :  { %4759 = vmatmul.mubr.f32.gmra.mrb[66].mxu0 %v15649_v51  ;;  %10315 = vmatpush3.bf16.msk.msra.mxu1 %vm15630_vm11, %v17431_v3 }
 0x91e   :  { %4764 = vmatprep.mubr.f32.mxu0 %v15654_v55  ;;  %10411 = vmatpush3.bf16.msra.mxu0 %v18171_v12  ;;  %v18183_v12 = vld [vmem:[#allocation60_spill] sm:$0xff] }
 0x91f   :  { %10316 = vmatprep.subr.bf16.mxu1 %v18095_v58  ;;  %10413 = vmatprep.subr.bf16.mxu0 %v18172_v59  ;;  %v18184_v59 = vand.u32 4294901760, %v15618_v36  ;;  %v18190_v36 = vld [vmem:[#allocation65_spill] sm:$0xff] }
 0x920   :  { %9632 = vmatmul.mubr.f32.vlgmr.msra.gmra.mrb[44].mxu1 %v18173_v40  ;;  %v18185_v40 = vand.u32 4294901760, %v15620_v29  ;;  %v18191_v29 = vld [vmem:[#allocation66_spill] sm:$0xff] }
 0x921   :  { %4766 = vmatmul.mubr.f32.gmra.mrb[68].mxu0 %v15680_v54  ;;  %10318 = vmatpush3.bf16.msra.mxu1 %v15834_v31 }
 0x922   :  { %4771 = vmatprep.mubr.f32.mxu0 %v15690_v56  ;;  %10415 = vmatpush3.bf16.msra.mxu0 %v18177_v38  ;;  %v15873_v23 = vpack.c.bf16 %v18185_v40, %v18184_v59  ;;  %v18193_v40 = vld [vmem:[#allocation68_spill] sm:$0xff] }
 0x923   :  { %10319 = vmatprep.subr.bf16.mxu1 %v18095_v58  ;;  %10417 = vmatprep.subr.bf16.mxu0 %v18178_v37 }
 0x924   :  { %9650 = vmatprep.mubr.msk.f32.mxu1 %vm18092_vm10, %v18070_v9  ;;  %18186 = vst [vmem:[#allocation14_spill] sm:$0xff] %v15873_v23 }
 0x925   :  { %4773 = vmatmul.mubr.f32.gmra.mrb[70].mxu0 %v15717_v20  ;;  %10321 = vmatpush3.bf16.msra.mxu1 %v15848_v19 }
 0x926   :  { %10419 = vmatpush3.bf16.msra.mxu0 %v18182_v57  ;;  %4876 = vmatprep.mubr.f32.mxu0 %v15395_v34  ;;  %v18192_v57 = vld [vmem:[#allocation67_spill] sm:$0xff] }
 0x927   :  { %10322 = vmatprep.subr.bf16.mxu1 %v18095_v58  ;;  %10421 = vmatprep.subr.bf16.mxu0 %v18183_v12 }
 0x928   :  { %v8558_v21 = vpop.f32.mrb[46].mxu0 }
 0x929   :  { %10324 = vmatpush3.bf16.msra.mxu1 %v15862_v44  ;;  %v8559_v38 = vpop.f32.mrb[47].mxu0 }
 0x92a   :  { %10423 = vmatpush3.bf16.msra.mxu0 %v18187_v17  ;;  %10325 = vmatprep.subr.bf16.mxu1 %v18095_v58  ;;  %v8560_v37 = vadd.f32 %v8559_v38, %v8558_v21  ;;  %v18194_v21 = vld [vmem:[#allocation89_spill] sm:$0xff]  ;;  %v18195_v38 = vld [vmem:[#allocation90_spill] sm:$0xff] }
 0x92b   :  { %10425 = vmatprep.subr.bf16.mxu0 %v18188_v53 }
 0x92d   :  { %10327 = vmatpush3.bf16.msra.mxu1 %v15873_v23  ;;  %v18261_v23 = vld [vmem:[#allocation35_spill] sm:$0xff] }
 0x92e   :  { %10427 = vmatpush3.bf16.msra.mxu0 %v18189_v0  ;;  %10328 = vmatprep.subr.bf16.mxu1 %v18095_v58  ;;  %v8523_v46 = vpop.f32.mrb[34].mxu1  ;;  %v18196_v0 = vld [vmem:[#allocation134_spill] sm:$0xff]  ;;  %v16136_v44 = vand.u32 4294901760, %v18261_v23 }
 0x92f   :  { %10429 = vmatprep.subr.bf16.mxu0 %v18190_v36  ;;  %v8524_v12 = vpop.f32.mrb[35].mxu1  ;;  %v18200_v36 = vld [vmem:[#allocation34_spill] sm:$0xff] }
 0x930   :  { %9651 = vmatmul.mubr.f32.vlgmr.msra.gmra.mrb[44].mxu1 %v15473_v60  ;;  %v8525_v59 = vadd.f32 %v8524_v12, %v8523_v46  ;;  %v18206_v46 = vld [vmem:[#allocation71_spill] sm:$0xff]  ;;  %v18207_v12 = vld [vmem:[#allocation72_spill] sm:$0xff]  ;;  %v16163_v50 = vsub.f32 %v18261_v23, %v16136_v44 }
 0x931   :  { %10330 = vmatpush3.bf16.msk.msra.mxu1 %vm15496_vm6, %v17431_v3  ;;  %9669 = vmatprep.mubr.msk.f32.mxu1 %vm18092_vm10, %v18070_v9  ;;  %vm18202_vm10 = vnez %v18085_v49  ;;  %v18242_v49 = vld [vmem:[#allocation135_spill] sm:$0xff]  ;;  %v18270_v23 = vld [vmem:[#allocation112_spill] sm:$0xff] }
 0x932   :  { %10431 = vmatpush3.bf16.msra.mxu0 %v18191_v29  ;;  %10331 = vmatprep.subr.bf16.mxu1 %v18095_v58  ;;  %v2933_v17 = vadd.f32 %v8525_v59, %v2827_v24  ;;  %v18197_v24 = vld [vmem:[#allocation13_spill] sm:$0xff]  ;;  %v18201_v29 = vld [vmem:[#allocation19_spill] sm:$0xff] }
 0x933   :  { %10433 = vmatprep.subr.bf16.mxu0 %v18192_v57 }
 0x934   :  { %v3009_v53 = vadd.f32 %v8560_v37, %v2933_v17  ;;  %v18198_v37 = vld [vmem:[#allocation79_spill] sm:$0xff]  ;;  %v18208_v17 = vld [vmem:[#allocation73_spill] sm:$0xff] }
 0x935   :  { %10333 = vmatpush3.bf16.msk.msra.mxu1 %vm15541_vm3, %v17431_v3  ;;  %vm18212_vm3 = vnez %v18128_v52 }
 0x936   :  { %10435 = vmatpush3.bf16.msra.mxu0 %v18193_v40  ;;  %10334 = vmatprep.subr.bf16.mxu1 %v18095_v58 }
 0x937   :  { %10469 = vmatprep.subr.bf16.mxu0 %v18194_v21  ;;  %v18209_v21 = vld [vmem:[#allocation75_spill] sm:$0xff] }
 0x939   :  { %4879 = vmatmul.mubr.f32.vlgmr.msra.gmra.mrb[72].mxu0 %v15642_v63  ;;  %10336 = vmatpush3.bf16.msk.msra.mxu1 %vm15587_vm4, %v17431_v3  ;;  %vm18211_vm4 = vnez %v18126_v14 }
 0x93a   :  { %4885 = vmatprep.mubr.f32.mxu0 %v15646_v30  ;;  %10471 = vmatpush3.bf16.msra.mxu0 %v18195_v38 }
 0x93b   :  { %10337 = vmatprep.subr.bf16.mxu1 %v18095_v58  ;;  %10473 = vmatprep.subr.bf16.mxu0 %v18196_v0  ;;  %v18199_v58 = vand.u32 4294901760, %v15395_v34  ;;  %v18204_v34 = vld [vmem:[#allocation70_spill] sm:$0xff] }
 0x93d   :  { %4888 = vmatmul.mubr.f32.gmra.mrb[74].mxu0 %v15677_v28  ;;  %10339 = vmatpush3.bf16.msk.msra.mxu1 %vm15630_vm11, %v17431_v3  ;;  %vm18205_vm11 = vnez %v18093_v35  ;;  %v18246_v35 = vld [vmem:[#allocation103_spill] sm:$0xff] }
 0x93e   :  { %4894 = vmatprep.mubr.f32.mxu0 %v15687_v39  ;;  %10475 = vmatpush3.bf16.msra.mxu0 %v18197_v24  ;;  %v18210_v24 = vld [vmem:[#allocation96_spill] sm:$0xff] }
 0x93f   :  { %10437 = vmatprep.subr.msk.bf16.mxu1 %vm18062_vm8, %v17431_v3  ;;  %10477 = vmatprep.subr.bf16.mxu0 %v18198_v37  ;;  %v15963_v37 = vand.u32 4294901760, %v18210_v24 }
 0x940   :  { %9670 = vmatmul.mubr.f32.vlgmr.msra.gmra.mrb[44].mxu1 %v15473_v60  ;;  %v18203_v60 = vld [vmem:[#allocation69_spill] sm:$0xff] }
 0x941   :  { %4897 = vmatmul.mubr.f32.gmra.mrb[76].mxu0 %v15714_v8  ;;  %10439 = vmatpush3.bf16.msk.msra.mxu1 %vm18072_vm9, %v17431_v3 }
 0x942   :  { %4903 = vmatprep.mubr.f32.mxu0 %v15725_v43  ;;  %4978 = vmatprep.mubr.f32.mxu1 %v18199_v58 }
 0x943   :  { %10479 = vmatpush3.bf16.msra.mxu0 %v18200_v36  ;;  %10441 = vmatprep.subr.msk.bf16.mxu1 %vm18075_vm1, %v17431_v3  ;;  %v18213_v36 = vld [vmem:[#allocation77_spill] sm:$0xff] }
 0x944   :  { %10481 = vmatprep.subr.bf16.mxu0 %v18201_v29  ;;  %v18214_v29 = vld [vmem:[#allocation7_spill] sm:$0xff] }
 0x945   :  { %4906 = vmatmul.mubr.f32.gmra.mrb[78].mxu0 %v15741_v25  ;;  %10443 = vmatpush3.bf16.msk.msra.mxu1 %vm18082_vm0, %v17431_v3  ;;  %vm18215_vm6 = vnez %v18214_v29 }
 0x946   :  { %5149 = vmatprep.mubr.f32.mxu0 %v15383_v11  ;;  %10445 = vmatprep.subr.msk.bf16.mxu1 %vm18202_vm10, %v17431_v3 }
 0x947   :  { %10483 = vmatpush3.bf16.msra.mxu0 %v18203_v60  ;;  %v15980_v60 = vsub.f32 %v18210_v24, %v15963_v37 }
 0x948   :  { %10485 = vmatprep.subr.bf16.mxu0 %v18204_v34 }
 0x949   :  { %10447 = vmatpush3.bf16.msk.msra.mxu1 %vm18205_vm11, %v17431_v3 }
 0x94a   :  { %10449 = vmatprep.subr.msk.bf16.mxu1 %vm18099_vm15, %v17431_v3 }
 0x94b   :  { %10487 = vmatpush3.bf16.msra.mxu0 %v18206_v46  ;;  %v18219_v46 = vld [vmem:[#allocation74_spill] sm:$0xff] }
 0x94c   :  { %v8628_v57 = vpop.f32.mrb[48].mxu0  ;;  %10489 = vmatprep.subr.bf16.mxu0 %v18207_v12  ;;  %v17264_v12 = vand.u32 4294901760, %v15980_v60 }
 0x94d   :  { %v8629_v59 = vpop.f32.mrb[49].mxu0  ;;  %10451 = vmatpush3.bf16.msk.msra.mxu1 %vm18105_vm12, %v17431_v3 }
 0x94e   :  { %v8630_v40 = vadd.f32 %v8629_v59, %v8628_v57  ;;  %10453 = vmatprep.subr.msk.bf16.mxu1 %vm18110_vm7, %v17431_v3  ;;  %v18221_v57 = vld [vmem:[#allocation6_spill] sm:$0xff]  ;;  %v18223_v59 = vld [vmem:[#allocation109_spill] sm:$0xff]  ;;  %v5337_v1 = vsub.f32 %v15980_v60, %v17264_v12 }
 0x94f   :  { %10491 = vmatpush3.bf16.msra.mxu0 %v18208_v17  ;;  %v18226_v17 = vld [vmem:[#allocation138_spill] sm:$0xff] }
 0x950   :  { %10493 = vmatprep.subr.bf16.mxu0 %v17875_v45  ;;  %v5338_v6 = vand.u32 4294901760, %v5337_v1 }
 0x951   :  { %10455 = vmatpush3.bf16.msk.msra.mxu1 %vm18115_vm2, %v17431_v3 }
 0x952   :  { %10457 = vmatprep.subr.msk.bf16.mxu1 %vm18120_vm13, %v17431_v3  ;;  %v8593_v38 = vpop.f32.mrb[36].mxu1 }
 0x953   :  { %10495 = vmatpush3.bf16.msra.mxu0 %v18209_v21  ;;  %v8594_v0 = vpop.f32.mrb[37].mxu1  ;;  %v18228_v21 = vand.u32 4294901760, %v15646_v30  ;;  %v18231_v30 = vand.u32 4294901760, %v15677_v28  ;;  %v18235_v28 = vld [vmem:[#allocation97_spill] sm:$0xff] }
 0x954   :  { %10497 = vmatprep.subr.bf16.mxu0 %v17886_v16  ;;  %v8595_v58 = vadd.f32 %v8594_v0, %v8593_v38  ;;  %v18216_v16 = vld [vmem:[#allocation53_spill] sm:$0xff]  ;;  %v18234_v38 = vand.u32 4294901760, %v15687_v39  ;;  %v18237_v0 = vld [vmem:[#allocation94_spill] sm:$0xff]  ;;  %v18238_v39 = vand.u32 4294901760, %v15714_v8 }
 0x955   :  { %10459 = vmatpush3.bf16.msk.msra.mxu1 %vm18211_vm4, %v17431_v3  ;;  %v16046_v24 = vand.u32 4294901760, %v18237_v0  ;;  %v18243_v8 = vld [vmem:[#allocation101_spill] sm:$0xff] }
 0x956   :  { %10461 = vmatprep.subr.msk.bf16.mxu1 %vm18212_vm3, %v17431_v3  ;;  %v3145_v45 = vadd.f32 %v8595_v58, %v3009_v53  ;;  %v18217_v53 = vld [vmem:[#allocation54_spill] sm:$0xff]  ;;  %v18241_v58 = vand.u32 4294901760, %v15725_v43 }
 0x957   :  { %10499 = vmatpush3.bf16.msra.mxu0 %v18213_v36  ;;  %vm18218_vm3 = vnez %v18217_v53  ;;  %v16069_v36 = vsub.f32 %v18237_v0, %v16046_v24  ;;  %v18250_v0 = vld [vmem:[#allocation104_spill] sm:$0xff] }
 0x958   :  { %10533 = vmatprep.subr.msk.bf16.mxu0 %vm18215_vm6, %v17431_v3  ;;  %v15982_v34 = vadd.f32 %v8630_v40, %v3145_v45  ;;  %vm18220_vm6 = vnez %v18219_v46  ;;  %v18225_v40 = vand.u32 4294901760, %v15642_v63  ;;  %v18229_v63 = vld [vmem:[#allocation83_spill] sm:$0xff]  ;;  %v16059_v45 = vand.u32 4294901760, %v18242_v49 }
 0x959   :  { %10463 = vmatpush3.bf16.msk.msra.mxu1 %vm18136_vm5, %v17431_v3  ;;  %vm18222_vm5 = vnez %v18221_v57 }
 0x95a   :  { %5151 = vmatmul.mubr.f32.vlgmr.msra.gmra.mrb[80].mxu0 %v15599_v7  ;;  %10465 = vmatprep.subr.msk.bf16.mxu1 %vm18218_vm3, %v17431_v3 }
 0x95b   :  { %5156 = vmatprep.mubr.f32.mxu0 %v15605_v42  ;;  %10535 = vmatpush3.bf16.msk.msra.mxu0 %vm18220_vm6, %v17431_v3  ;;  %vm18224_vm6 = vnez %v18223_v59 }
 0x95c   :  { %10537 = vmatprep.subr.msk.bf16.mxu0 %vm18222_vm5, %v17431_v3  ;;  %vm18227_vm5 = vnez %v18226_v17 }
 0x95d   :  { %10467 = vmatpush3.bf16.msk.msra.mxu1 %vm18143_vm14, %v17431_v3 }
 0x95e   :  { %5158 = vmatmul.mubr.f32.gmra.mrb[82].mxu0 %v15649_v51  ;;  %10501 = vmatprep.subr.msk.bf16.mxu1 %vm18062_vm8, %v17431_v3  ;;  %vm18230_vm8 = vnez %v18229_v63 }
 0x95f   :  { %5163 = vmatprep.mubr.f32.mxu0 %v15654_v55  ;;  %10539 = vmatpush3.bf16.msk.msra.mxu0 %vm18224_vm6, %v17431_v3 }
 0x960   :  { %4982 = vmatmul.mubr.f32.vlgmr.msra.gmra.mrb[46].mxu1 %v18225_v40  ;;  %10541 = vmatprep.subr.msk.bf16.mxu0 %vm18227_vm5, %v17431_v3  ;;  %v18245_v40 = vand.u32 4294901760, %v15741_v25  ;;  %v18249_v25 = vld [vmem:[#allocation18_spill] sm:$0xff] }
 0x961   :  { %4989 = vmatprep.mubr.f32.mxu1 %v18228_v21  ;;  %10503 = vmatpush3.bf16.msk.msra.mxu1 %vm18072_vm9, %v17431_v3  ;;  %vm18233_vm9 = vnez %v18232_v26  ;;  %v18248_v21 = vld [vmem:[#allocation136_spill] sm:$0xff] }
 0x962   :  { %5165 = vmatmul.mubr.f32.gmra.mrb[84].mxu0 %v15680_v54  ;;  %10505 = vmatprep.subr.msk.bf16.mxu1 %vm18075_vm1, %v17431_v3  ;;  %vm18236_vm1 = vnez %v18235_v28  ;;  %v16077_v1 = vand.u32 4294901760, %v18248_v21 }
 0x963   :  { %5170 = vmatprep.mubr.f32.mxu0 %v15690_v56  ;;  %10543 = vmatpush3.bf16.msk.msra.mxu0 %vm18230_vm8, %v17431_v3 }
 0x964   :  { %4993 = vmatmul.mubr.f32.gmra.mrb[48].mxu1 %v18231_v30  ;;  %10545 = vmatprep.subr.msk.bf16.mxu0 %vm18233_vm9, %v17431_v3  ;;  %v16085_v30 = vsub.f32 %v18242_v49, %v16059_v45 }
 0x965   :  { %5000 = vmatprep.mubr.f32.mxu1 %v18234_v38  ;;  %10507 = vmatpush3.bf16.msk.msra.mxu1 %vm18082_vm0, %v17431_v3  ;;  %vm18240_vm0 = vnez %v18239_v18  ;;  %v16088_v38 = vand.u32 4294901760, %v18249_v25 }
 0x966   :  { %5172 = vmatmul.mubr.f32.gmra.mrb[86].mxu0 %v15717_v20  ;;  %10509 = vmatprep.subr.msk.bf16.mxu1 %vm18202_vm10, %v17431_v3  ;;  %vm18244_vm10 = vnez %v18243_v8  ;;  %v18262_v31 = vand.u32 4294901760, %v16085_v30 }
 0x967   :  { %10547 = vmatpush3.bf16.msk.msra.mxu0 %vm18236_vm1, %v17431_v3  ;;  %5339 = vmatprep.mubr.f32.mxu0 %v5338_v6 }
 0x968   :  { %5004 = vmatmul.mubr.f32.gmra.mrb[50].mxu1 %v18238_v39  ;;  %10549 = vmatprep.subr.msk.bf16.mxu0 %vm18240_vm0, %v17431_v3  ;;  %v16102_v39 = vsub.f32 %v18248_v21, %v16077_v1  ;;  %v18256_v21 = vld [vmem:[#allocation107_spill] sm:$0xff]  ;;  %v5352_v33 = vsub.f32 %v16085_v30, %v18262_v31 }
 0x969   :  { %5011 = vmatprep.mubr.f32.mxu1 %v18241_v58  ;;  %10511 = vmatpush3.bf16.msk.msra.mxu1 %vm18205_vm11, %v17431_v3  ;;  %vm18247_vm11 = vnez %v18246_v35  ;;  %v18254_v58 = vld [vmem:[#allocation33_spill] sm:$0xff] }
 0x96a   :  { %10513 = vmatprep.subr.msk.bf16.mxu1 %vm18099_vm15, %v17431_v3  ;;  %vm18251_vm15 = vnez %v18250_v0  ;;  %v16105_v49 = vand.u32 4294901760, %v18254_v58  ;;  %v18267_v31 = vand.u32 4294901760, %v16102_v39 }
 0x96b   :  { %10551 = vmatpush3.bf16.msk.msra.mxu0 %vm18244_vm10, %v17431_v3 }
 0x96c   :  { %v8698_v43 = vpop.f32.mrb[50].mxu0  ;;  %5015 = vmatmul.mubr.f32.gmra.mrb[52].mxu1 %v18245_v40  ;;  %10553 = vmatprep.subr.msk.bf16.mxu0 %vm18247_vm11, %v17431_v3  ;;  %v18255_v40 = vld [vmem:[#allocation80_spill] sm:$0xff]  ;;  %v16133_v4 = vsub.f32 %v18254_v58, %v16105_v49  ;;  %v18264_v58 = vld [vmem:[#allocation110_spill] sm:$0xff] }
 0x96d   :  { %v8699_v15 = vpop.f32.mrb[51].mxu0  ;;  %10515 = vmatpush3.bf16.msk.msra.mxu1 %vm18105_vm12, %v17431_v3  ;;  %5242 = vmatprep.mubr.f32.mxu1 %v15383_v11  ;;  %vm18253_vm12 = vnez %v18252_v41  ;;  %v18258_v11 = vld [vmem:[#allocation108_spill] sm:$0xff] }
 0x96e   :  { %v8700_v6 = vadd.f32 %v8699_v15, %v8698_v43  ;;  %10517 = vmatprep.subr.msk.bf16.mxu1 %vm18110_vm7, %v17431_v3  ;;  %v16113_v43 = vsub.f32 %v18249_v25, %v16088_v38  ;;  %v16116_v15 = vand.u32 4294901760, %v18255_v40  ;;  %vm18257_vm7 = vnez %v18256_v21 }
 0x96f   :  { %10555 = vmatpush3.bf16.msk.msra.mxu0 %vm18251_vm15, %v17431_v3  ;;  %v18260_v25 = vand.u32 4294901760, %v16069_v36 }
 0x970   :  { %10557 = vmatprep.subr.msk.bf16.mxu0 %vm18253_vm12, %v17431_v3  ;;  %v16147_v9 = vsub.f32 %v18255_v40, %v16116_v15  ;;  %v18271_v40 = vld [vmem:[#allocation113_spill] sm:$0xff] }
 0x971   :  { %10519 = vmatpush3.bf16.msk.msra.mxu1 %vm18115_vm2, %v17431_v3  ;;  %vm18259_vm2 = vnez %v18258_v11  ;;  %v5343_v13 = vsub.f32 %v16069_v36, %v18260_v25  ;;  %v5358_v25 = vsub.f32 %v16102_v39, %v18267_v31 }
 0x972   :  { %10521 = vmatprep.subr.msk.bf16.mxu1 %vm18120_vm13, %v17431_v3  ;;  %vm18263_vm13 = vnez %v18128_v52  ;;  %v5353_v52 = vand.u32 4294901760, %v5352_v33  ;;  %v18272_v33 = vand.u32 4294901760, %v16133_v4 }
 0x973   :  { %10559 = vmatpush3.bf16.msk.msra.mxu0 %vm18257_vm7, %v17431_v3  ;;  %v8663_v12 = vpop.f32.mrb[38].mxu1  ;;  %v5344_v14 = vand.u32 4294901760, %v5343_v13  ;;  %v5381_v13 = vand.u32 4294901760, %v16147_v9  ;;  %v5359_v31 = vand.u32 4294901760, %v5358_v25  ;;  %v18274_v25 = vld [vmem:[#allocation114_spill] sm:$0xff] }
 0x974   :  { %v8664_v62 = vpop.f32.mrb[39].mxu1  ;;  %10561 = vmatprep.subr.msk.bf16.mxu0 %vm18259_vm2, %v17431_v3  ;;  %vm18265_vm2 = vnez %v18264_v58 }
 0x975   :  { %v8665_v19 = vadd.f32 %v8664_v62, %v8663_v12  ;;  %10523 = vmatpush3.bf16.msk.msra.mxu1 %vm18211_vm4, %v17431_v3  ;;  %v18266_v62 = vld [vmem:[#allocation111_spill] sm:$0xff]  ;;  %vm18268_vm4 = vnez %v18216_v16  ;;  %v5373_v16 = vsub.f32 %v16133_v4, %v18272_v33  ;;  %v5382_v53 = vsub.f32 %v16147_v9, %v5381_v13  ;;  %v18279_v33 = vld [vmem:[#allocation36_spill] sm:$0xff] }
 0x976   :  { %10525 = vmatprep.subr.msk.bf16.mxu1 %vm18263_vm13, %v17431_v3  ;;  %vm18309_vm13 = vnez %v18221_v57 }
 0x977   :  { %v3297_v12 = vadd.f32 %v8665_v19, %v15982_v34  ;;  %10563 = vmatpush3.bf16.msk.msra.mxu0 %vm18265_vm2, %v17431_v3  ;;  %v18269_v19 = vand.u32 4294901760, %v16113_v43 }
 0x978   :  { %10597 = vmatprep.subr.bf16.mxu0 %v18266_v62 }
 0x979   :  { %10527 = vmatpush3.bf16.msk.msra.mxu1 %vm18268_vm4, %v17431_v3  ;;  %v5367_v34 = vsub.f32 %v16113_v43, %v18269_v19  ;;  %v3497_v62 = vadd.f32 %v8700_v6, %v3297_v12  ;;  %v5387_v19 = vand.u32 4294901760, %v16163_v50  ;;  %v18273_v12 = vld [vmem:[#allocation78_spill] sm:$0xff]  ;;  %vm18320_vm4 = vcmask 523264  }
 0x97a   :  { %5345 = vmatmul.mubr.f32.vlgmr.msra.gmra.mrb[88].mxu0 %v5344_v14  ;;  %10529 = vmatprep.subr.msk.bf16.mxu1 %vm18218_vm3, %v17431_v3  ;;  %v5374_v14 = vand.u32 4294901760, %v5373_v16  ;;  %v18280_v16 = vld [vmem:[#allocation31_spill] sm:$0xff]  ;;  %vm18305_vm3 = vnez %v18214_v29  ;;  %v18334_v29 = vand.u32 4294901760, %v16085_v30 }
 0x97b   :  { %5354 = vmatprep.mubr.f32.mxu0 %v5353_v52  ;;  %10599 = vmatpush3.bf16.msra.mxu0 %v18270_v23  ;;  %v5368_v6 = vand.u32 4294901760, %v5367_v34  ;;  %v5388_v22 = vsub.f32 %v16163_v50, %v5387_v19  ;;  %v5383_v52 = vand.u32 4294901760, %v5382_v53  ;;  %v18276_v34 = vld [vmem:[#allocation32_spill] sm:$0xff]  ;;  %v18277_v23 = vld [vmem:[#allocation29_spill] sm:$0xff] }
 0x97c   :  { %10601 = vmatprep.subr.bf16.mxu0 %v18271_v40  ;;  %v18275_v40 = vld [vmem:[#allocation115_spill] sm:$0xff]  ;;  %v18283_v53 = vld [vmem:[#allocation141_spill] sm:$0xff] }
 0x97d   :  { %10531 = vmatpush3.bf16.msk.msra.mxu1 %vm18143_vm14, %v17431_v3  ;;  %vm18308_vm14 = vnez %v18219_v46  ;;  %v18335_v46 = vand.u32 4294901760, %v16102_v39 }
 0x97e   :  { %5360 = vmatmul.mubr.f32.gmra.mrb[90].mxu0 %v5359_v31  ;;  %10565 = vmatprep.subr.bf16.mxu1 %v18273_v12  ;;  %v18278_v31 = vld [vmem:[#allocation116_spill] sm:$0xff] }
 0x97f   :  { %5369 = vmatprep.mubr.f32.mxu0 %v5368_v6  ;;  %10603 = vmatpush3.bf16.msra.mxu0 %v18274_v25  ;;  %v18282_v6 = vld [vmem:[#allocation21_spill] sm:$0xff]  ;;  %v18285_v12 = vld [vmem:[#allocation76_spill] sm:$0xff] }
 0x980   :  { %5244 = vmatmul.mubr.f32.vlgmr.msra.gmra.mrb[54].mxu1 %v15599_v7  ;;  %10605 = vmatprep.subr.bf16.mxu0 %v18275_v40  ;;  %v5389_v7 = vand.u32 4294901760, %v5388_v22  ;;  %v18288_v22 = vld [vmem:[#allocation137_spill] sm:$0xff] }
 0x981   :  { %5249 = vmatprep.mubr.f32.mxu1 %v15605_v42  ;;  %10567 = vmatpush3.bf16.msra.mxu1 %v18276_v34  ;;  %v18281_v42 = vld [vmem:[#allocation93_spill] sm:$0xff] }
 0x982   :  { %5375 = vmatmul.mubr.f32.gmra.mrb[92].mxu0 %v5374_v14  ;;  %10569 = vmatprep.subr.bf16.mxu1 %v18277_v23  ;;  %v18287_v14 = vld [vmem:[#allocation143_spill] sm:$0xff]  ;;  %v18291_v34 = vld [vmem:[#allocation145_spill] sm:$0xff]  ;;  %v18292_v23 = vld [vmem:[#allocation140_spill] sm:$0xff] }
 0x983   :  { %5384 = vmatprep.mubr.f32.mxu0 %v5383_v52  ;;  %10607 = vmatpush3.bf16.msra.mxu0 %v18278_v31  ;;  %v18289_v52 = vld [vmem:[#allocation139_spill] sm:$0xff]  ;;  %v18293_v31 = vld [vmem:[#allocation86_spill] sm:$0xff] }
 0x984   :  { %5251 = vmatmul.mubr.f32.gmra.mrb[56].mxu1 %v15649_v51  ;;  %10609 = vmatprep.subr.bf16.mxu0 %v18279_v33  ;;  %v18284_v51 = vld [vmem:[#allocation92_spill] sm:$0xff] }
 0x985   :  { %5256 = vmatprep.mubr.f32.mxu1 %v15654_v55  ;;  %10571 = vmatpush3.bf16.msra.mxu1 %v18280_v16  ;;  %v18286_v55 = vld [vmem:[#allocation142_spill] sm:$0xff]  ;;  %v18295_v16 = vld [vmem:[#allocation147_spill] sm:$0xff] }
 0x986   :  { %5390 = vmatmul.mubr.f32.gmra.mrb[94].mxu0 %v5389_v7  ;;  %10573 = vmatprep.subr.bf16.mxu1 %v18281_v42  ;;  %v18294_v7 = vld [vmem:[#allocation146_spill] sm:$0xff] }
 0x987   :  { %10611 = vmatpush3.bf16.msra.mxu0 %v18282_v6  ;;  %5714 = vmatprep.mubr.f32.mxu0 %v15980_v60  ;;  %v18296_v6 = vld [vmem:[#allocation95_spill] sm:$0xff] }
 0x988   :  { %5258 = vmatmul.mubr.f32.gmra.mrb[58].mxu1 %v15680_v54  ;;  %10613 = vmatprep.subr.bf16.mxu0 %v18283_v53  ;;  %v18297_v53 = vld [vmem:[#allocation100_spill] sm:$0xff] }
 0x989   :  { %5263 = vmatprep.mubr.f32.mxu1 %v15690_v56  ;;  %10575 = vmatpush3.bf16.msra.mxu1 %v18284_v51  ;;  %v18290_v56 = vld [vmem:[#allocation144_spill] sm:$0xff] }
 0x98a   :  { %10577 = vmatprep.subr.bf16.mxu1 %v18285_v12  ;;  %v18298_v12 = vld [vmem:[#allocation148_spill] sm:$0xff] }
 0x98b   :  { %10615 = vmatpush3.bf16.msra.mxu0 %v18286_v55  ;;  %v18299_v55 = vld [vmem:[#allocation149_spill] sm:$0xff] }
 0x98c   :  { %v8768_v25 = vpop.f32.mrb[52].mxu0  ;;  %5265 = vmatmul.mubr.f32.gmra.mrb[60].mxu1 %v15717_v20  ;;  %10617 = vmatprep.subr.bf16.mxu0 %v18287_v14 }
 0x98d   :  { %v8769_v40 = vpop.f32.mrb[53].mxu0  ;;  %10579 = vmatpush3.bf16.msra.mxu1 %v18288_v22  ;;  %5588 = vmatprep.mubr.f32.mxu1 %v15963_v37  ;;  %v18302_v22 = vld [vmem:[#allocation150_spill] sm:$0xff] }
 0x98e   :  { %v8770_v54 = vadd.f32 %v8769_v40, %v8768_v25  ;;  %10581 = vmatprep.subr.bf16.mxu1 %v18289_v52  ;;  %v18300_v25 = vld [vmem:[#allocation102_spill] sm:$0xff]  ;;  %v18301_v40 = vld [vmem:[#allocation5_spill] sm:$0xff]  ;;  %v18303_v52 = vld [vmem:[#allocation151_spill] sm:$0xff] }
 0x98f   :  { %10619 = vmatpush3.bf16.msra.mxu0 %v18290_v56  ;;  %v18304_v56 = vld [vmem:[#allocation105_spill] sm:$0xff] }
 0x990   :  { %10621 = vmatprep.subr.bf16.mxu0 %v18291_v34  ;;  %v18310_v34 = vld [vmem:[#allocation117_spill] sm:$0xff] }
 0x991   :  { %10583 = vmatpush3.bf16.msra.mxu1 %v18292_v23  ;;  %v18311_v23 = vld [vmem:[#allocation118_spill] sm:$0xff] }
 0x992   :  { %10585 = vmatprep.subr.bf16.mxu1 %v18293_v31  ;;  %v18312_v31 = vld [vmem:[#allocation119_spill] sm:$0xff] }
 0x993   :  { %10623 = vmatpush3.bf16.msra.mxu0 %v18294_v7  ;;  %v8733_v20 = vpop.f32.mrb[40].mxu1  ;;  %v18313_v7 = vld [vmem:[#allocation120_spill] sm:$0xff] }
 0x994   :  { %v8734_v33 = vpop.f32.mrb[41].mxu1  ;;  %10625 = vmatprep.subr.bf16.mxu0 %v18295_v16  ;;  %v18315_v16 = vld [vmem:[#allocation122_spill] sm:$0xff] }
 0x995   :  { %v8735_v42 = vadd.f32 %v8734_v33, %v8733_v20  ;;  %10587 = vmatpush3.bf16.msra.mxu1 %v18296_v6  ;;  %v18314_v20 = vld [vmem:[#allocation121_spill] sm:$0xff]  ;;  %v18316_v6 = vand.u32 4294901760, %v15980_v60 }
 0x996   :  { %10589 = vmatprep.subr.bf16.mxu1 %v18297_v53 }
 0x997   :  { %v3603_v51 = vadd.f32 %v8735_v42, %v3497_v62  ;;  %10627 = vmatpush3.bf16.msra.mxu0 %v18298_v12  ;;  %v18306_v62 = vld [vmem:[#allocation152_spill] sm:$0xff]  ;;  %v18318_v12 = vld [vmem:[#allocation129_spill] sm:$0xff] }
 0x998   :  { %10661 = vmatprep.subr.bf16.mxu0 %v18299_v55  ;;  %v18319_v55 = vld [vmem:[#allocation98_spill] sm:$0xff] }
 0x999   :  { %10591 = vmatpush3.bf16.msra.mxu1 %v18300_v25  ;;  %v3679_v14 = vadd.f32 %v8770_v54, %v3603_v51  ;;  %v18307_v54 = vld [vmem:[#allocation153_spill] sm:$0xff]  ;;  %v18317_v51 = vld [vmem:[#allocation124_spill] sm:$0xff]  ;;  %v4421_v60 = vsel %vm18320_vm4, %v18319_v55, 0  ;;  %v18321_v25 = vld [vmem:[#allocation130_spill] sm:$0xff] }
 0x99a   :  { %5717 = vmatmul.mubr.f32.vlgmr.msra.gmra.mrb[96].mxu0 %v16069_v36  ;;  %10593 = vmatprep.subr.bf16.mxu1 %v18301_v40 }
 0x99b   :  { %5723 = vmatprep.mubr.f32.mxu0 %v16085_v30  ;;  %10663 = vmatpush3.bf16.msra.mxu0 %v18302_v22 }
 0x99c   :  { %10665 = vmatprep.subr.bf16.mxu0 %v18303_v52  ;;  %v18322_v52 = vld [vmem:[#allocation131_spill] sm:$0xff] }
 0x99d   :  { %10595 = vmatpush3.bf16.msra.mxu1 %v18304_v56 }
 0x99e   :  { %5726 = vmatmul.mubr.f32.gmra.mrb[98].mxu0 %v16102_v39  ;;  %10629 = vmatprep.subr.msk.bf16.mxu1 %vm18305_vm3, %v17431_v3 }
 0x99f   :  { %5732 = vmatprep.mubr.f32.mxu0 %v16113_v43  ;;  %10667 = vmatpush3.bf16.msra.mxu0 %v18306_v62  ;;  %v16298_v62 = vand.u32 4294901760, %v4421_v60 }
 0x9a0   :  { %5590 = vmatmul.mubr.f32.vlgmr.msra.gmra.mrb[62].mxu1 %v16046_v24  ;;  %10669 = vmatprep.subr.bf16.mxu0 %v18307_v54  ;;  %v18323_v54 = vld [vmem:[#allocation22_spill] sm:$0xff] }
 0x9a1   :  { %5595 = vmatprep.mubr.f32.mxu1 %v16059_v45  ;;  %10631 = vmatpush3.bf16.msk.msra.mxu1 %vm18308_vm14, %v17431_v3 }
 0x9a2   :  { %5735 = vmatmul.mubr.f32.gmra.mrb[100].mxu0 %v16133_v4  ;;  %10633 = vmatprep.subr.msk.bf16.mxu1 %vm18309_vm13, %v17431_v3 }
 0x9a3   :  { %5741 = vmatprep.mubr.f32.mxu0 %v16147_v9  ;;  %10671 = vmatpush3.bf16.msra.mxu0 %v18310_v34  ;;  %v18340_v9 = vld [vmem:[#allocation3_spill] sm:$0xff] }
 0x9a4   :  { %5597 = vmatmul.mubr.f32.gmra.mrb[64].mxu1 %v16077_v1  ;;  %10673 = vmatprep.subr.bf16.mxu0 %v18311_v23  ;;  %v18325_v23 = vld [vmem:[#allocation23_spill] sm:$0xff] }
 0x9a5   :  { %5602 = vmatprep.mubr.f32.mxu1 %v16088_v38  ;;  %10635 = vmatpush3.bf16.msk.msra.mxu1 %vm18224_vm6, %v17431_v3 }
 0x9a6   :  { %5744 = vmatmul.mubr.f32.gmra.mrb[102].mxu0 %v16163_v50  ;;  %10637 = vmatprep.subr.msk.bf16.mxu1 %vm18227_vm5, %v17431_v3 }
 0x9a7   :  { %10675 = vmatpush3.bf16.msra.mxu0 %v18312_v31  ;;  %5987 = vmatprep.mubr.f32.mxu0 %v15963_v37  ;;  %v4427_v31 = vsel %vm18320_vm4, %v18325_v23, 0 }
 0x9a8   :  { %5604 = vmatmul.mubr.f32.gmra.mrb[66].mxu1 %v16105_v49  ;;  %10677 = vmatprep.subr.bf16.mxu0 %v18313_v7 }
 0x9a9   :  { %5609 = vmatprep.mubr.f32.mxu1 %v16116_v15  ;;  %10639 = vmatpush3.bf16.msk.msra.mxu1 %vm18230_vm8, %v17431_v3 }
 0x9aa   :  { %10641 = vmatprep.subr.msk.bf16.mxu1 %vm18233_vm9, %v17431_v3 }
 0x9ab   :  { %10679 = vmatpush3.bf16.msra.mxu0 %v18314_v20  ;;  %v18326_v20 = vld [vmem:[#allocation132_spill] sm:$0xff] }
 0x9ac   :  { %v8838_v33 = vpop.f32.mrb[54].mxu0  ;;  %5611 = vmatmul.mubr.f32.gmra.mrb[68].mxu1 %v16136_v44  ;;  %10681 = vmatprep.subr.bf16.mxu0 %v18315_v16  ;;  %v16317_v16 = vsub.f32 %v4421_v60, %v16298_v62 }
 0x9ad   :  { %v8839_v42 = vpop.f32.mrb[55].mxu0  ;;  %10643 = vmatpush3.bf16.msk.msra.mxu1 %vm18236_vm1, %v17431_v3  ;;  %5816 = vmatprep.mubr.f32.mxu1 %v18316_v6  ;;  %v18328_v6 = vld [vmem:[#allocation24_spill] sm:$0xff] }
 0x9ae   :  { %v8840_v53 = vadd.f32 %v8839_v42, %v8838_v33  ;;  %10645 = vmatprep.subr.msk.bf16.mxu1 %vm18240_vm0, %v17431_v3  ;;  %v16319_v42 = vand.u32 4294901760, %v4427_v31  ;;  %v6175_v55 = vand.u32 4294901760, %v16317_v16 }
 0x9af   :  { %10683 = vmatpush3.bf16.msra.mxu0 %v18317_v51 }
 0x9b0   :  { %10685 = vmatprep.subr.bf16.mxu0 %v18318_v12  ;;  %v16346_v60 = vsub.f32 %v4427_v31, %v16319_v42 }
 0x9b1   :  { %10647 = vmatpush3.bf16.msk.msra.mxu1 %vm18244_vm10, %v17431_v3  ;;  %vm18324_vm10 = vmmov %vm18320_vm4 }
 0x9b2   :  { %10649 = vmatprep.subr.msk.bf16.mxu1 %vm18247_vm11, %v17431_v3  ;;  %v4424_v34 = vsel %vm18324_vm10, %v18323_v54, 0  ;;  %vm18327_vm11 = vnez %v18084_v48  ;;  %vm18329_vm10 = vmmov %vm18320_vm4  ;;  %vm18330_vm4 = vnez %v18258_v11 }
 0x9b3   :  { %10687 = vmatpush3.bf16.msra.mxu0 %v18321_v25  ;;  %v8803_v40 = vpop.f32.mrb[42].mxu1  ;;  %v16311_v33 = vand.u32 4294901760, %v4424_v34  ;;  %v18332_v25 = vand.u32 4294901760, %v16069_v36  ;;  %v6176_v36 = vsub.f32 %v16317_v16, %v6175_v55 }
 0x9b4   :  { %v8804_v22 = vpop.f32.mrb[43].mxu1  ;;  %10689 = vmatprep.subr.bf16.mxu0 %v18322_v52  ;;  %v6195_v52 = vand.u32 4294901760, %v16346_v60 }
 0x9b5   :  { %v8805_v56 = vadd.f32 %v8804_v22, %v8803_v40  ;;  %10651 = vmatpush3.bf16.msk.msra.mxu1 %vm18251_vm15, %v17431_v3  ;;  %v16337_v12 = vsub.f32 %v4424_v34, %v16311_v33  ;;  %v6177_v54 = vand.u32 4294901760, %v6176_v36  ;;  %v18339_v34 = vld [vmem:[#allocation8_spill] sm:$0xff] }
 0x9b6   :  { %10653 = vmatprep.subr.msk.bf16.mxu1 %vm18253_vm12, %v17431_v3  ;;  %v6196_v39 = vsub.f32 %v16346_v60, %v6195_v52 }
 0x9b7   :  { %v3815_v7 = vadd.f32 %v8805_v56, %v3679_v14  ;;  %10691 = vmatpush3.bf16.msra.mxu0 %v18326_v20  ;;  %v4430_v14 = vsel %vm18329_vm10, %v18328_v6, 0  ;;  %vm18333_vm10 = vnez %v18107_v27  ;;  %v6185_v40 = vand.u32 4294901760, %v16337_v12 }
 0x9b8   :  { %10725 = vmatprep.subr.msk.bf16.mxu0 %vm18327_vm11, %v17431_v3  ;;  %v18337_v56 = vand.u32 4294901760, %v16113_v43  ;;  %v18338_v43 = vand.u32 4294901760, %v16133_v4  ;;  %v6197_v17 = vand.u32 4294901760, %v6196_v39 }
 0x9b9   :  { %10655 = vmatpush3.bf16.msk.msra.mxu1 %vm18257_vm7, %v17431_v3  ;;  %v16323_v51 = vadd.f32 %v8840_v53, %v3815_v7  ;;  %vm18331_vm7 = vnez %v18097_v32  ;;  %v16339_v53 = vand.u32 4294901760, %v4430_v14  ;;  %v6186_v30 = vsub.f32 %v16337_v12, %v6185_v40  ;;  %v18346_v7 = vld [vmem:[#allocation11_spill] sm:$0xff] }
 0x9ba   :  { %5989 = vmatmul.mubr.f32.vlgmr.msra.gmra.mrb[104].mxu0 %v16046_v24  ;;  %10657 = vmatprep.subr.msk.bf16.mxu1 %vm18330_vm4, %v17431_v3 }
 0x9bb   :  { %5994 = vmatprep.mubr.f32.mxu0 %v16059_v45  ;;  %10727 = vmatpush3.bf16.msk.msra.mxu0 %vm18327_vm11, %v17431_v3  ;;  %v16363_v22 = vsub.f32 %v4430_v14, %v16339_v53  ;;  %v6187_v59 = vand.u32 4294901760, %v6186_v30  ;;  %v18347_v14 = vld [vmem:[#allocation28_spill] sm:$0xff] }
 0x9bc   :  { %10729 = vmatprep.subr.msk.bf16.mxu0 %vm18331_vm7, %v17431_v3 }
 0x9bd   :  { %10659 = vmatpush3.bf16.msk.msra.mxu1 %vm18265_vm2, %v17431_v3  ;;  %v6205_v57 = vand.u32 4294901760, %v16363_v22 }
 0x9be   :  { %5996 = vmatmul.mubr.f32.gmra.mrb[106].mxu0 %v16077_v1  ;;  %10693 = vmatprep.subr.msk.bf16.mxu1 %vm18305_vm3, %v17431_v3  ;;  %vm18336_vm3 = vnez %v18117_v2 }
 0x9bf   :  { %6001 = vmatprep.mubr.f32.mxu0 %v16088_v38  ;;  %10731 = vmatpush3.bf16.msk.msra.mxu0 %vm18331_vm7, %v17431_v3  ;;  %v6206_v23 = vsub.f32 %v16363_v22, %v6205_v57 }
 0x9c0   :  { %5820 = vmatmul.mubr.f32.vlgmr.msra.gmra.mrb[70].mxu1 %v18332_v25  ;;  %10733 = vmatprep.subr.msk.bf16.mxu0 %vm18333_vm10, %v17431_v3 }
 0x9c1   :  { %5827 = vmatprep.mubr.f32.mxu1 %v18334_v29  ;;  %10695 = vmatpush3.bf16.msk.msra.mxu1 %vm18308_vm14, %v17431_v3  ;;  %v6207_v31 = vand.u32 4294901760, %v6206_v23 }
 0x9c2   :  { %6003 = vmatmul.mubr.f32.gmra.mrb[108].mxu0 %v16105_v49  ;;  %10697 = vmatprep.subr.msk.bf16.mxu1 %vm18309_vm13, %v17431_v3 }
 0x9c3   :  { %6008 = vmatprep.mubr.f32.mxu0 %v16116_v15  ;;  %10735 = vmatpush3.bf16.msk.msra.mxu0 %vm18333_vm10, %v17431_v3 }
 0x9c4   :  { %5831 = vmatmul.mubr.f32.gmra.mrb[72].mxu1 %v18335_v46  ;;  %10737 = vmatprep.subr.msk.bf16.mxu0 %vm18336_vm3, %v17431_v3 }
 0x9c5   :  { %5838 = vmatprep.mubr.f32.mxu1 %v18337_v56  ;;  %10699 = vmatpush3.bf16.msk.msra.mxu1 %vm18224_vm6, %v17431_v3  ;;  %vm18341_vm6 = vnez %v18243_v8 }
 0x9c6   :  { %6010 = vmatmul.mubr.f32.gmra.mrb[110].mxu0 %v16136_v44  ;;  %10701 = vmatprep.subr.msk.bf16.mxu1 %vm18227_vm5, %v17431_v3  ;;  %vm18342_vm5 = vnez %v18246_v35 }
 0x9c7   :  { %10739 = vmatpush3.bf16.msk.msra.mxu0 %vm18336_vm3, %v17431_v3  ;;  %9688 = vmatprep.mubr.f32.mxu0 %v6177_v54 }
 0x9c8   :  { %5842 = vmatmul.mubr.f32.gmra.mrb[74].mxu1 %v18338_v43  ;;  %10741 = vmatprep.subr.bf16.mxu0 %v18339_v34 }
 0x9c9   :  { %5849 = vmatprep.mubr.f32.mxu1 %v5381_v13  ;;  %10703 = vmatpush3.bf16.msk.msra.mxu1 %vm18230_vm8, %v17431_v3  ;;  %vm18343_vm8 = vnez %v18256_v21 }
 0x9ca   :  { %9689 = vmatmul.mubr.f32.vlgmr.msra.gmra.mrb[112].mxu0 %v6187_v59  ;;  %10705 = vmatprep.subr.msk.bf16.mxu1 %vm18233_vm9, %v17431_v3  ;;  %vm18350_vm9 = vcmask 261120  }
 0x9cb   :  { %9691 = vmatprep.mubr.f32.mxu0 %v6197_v17  ;;  %10743 = vmatpush3.bf16.msra.mxu0 %v18339_v34 }
 0x9cc   :  { %v8927_v4 = vpop.f32.mrb[56].mxu0  ;;  %5853 = vmatmul.mubr.f32.gmra.mrb[76].mxu1 %v5387_v19  ;;  %10745 = vmatprep.subr.bf16.mxu0 %v18340_v9 }
 0x9cd   :  { %v8928_v13 = vpop.f32.mrb[57].mxu0  ;;  %10707 = vmatpush3.bf16.msk.msra.mxu1 %vm18236_vm1, %v17431_v3  ;;  %6080 = vmatprep.mubr.f32.mxu1 %v15963_v37 }
 0x9ce   :  { %v8929_v63 = vadd.f32 %v8928_v13, %v8927_v4  ;;  %9692 = vmatmul.mubr.f32.gmra.mrb[114].mxu0 %v6207_v31  ;;  %10709 = vmatprep.subr.msk.bf16.mxu1 %vm18240_vm0, %v17431_v3 }
 0x9cf   :  { %10747 = vmatpush3.bf16.msra.mxu0 %v18340_v9  ;;  %9710 = vmatprep.mubr.f32.mxu0 %v16298_v62 }
 0x9d0   :  { %v8930_v50 = vpop.f32.mrb[58].mxu0  ;;  %10749 = vmatprep.subr.bf16.mxu0 %v15728_v61 }
 0x9d1   :  { %v8931_v26 = vpop.f32.mrb[59].mxu0  ;;  %10711 = vmatpush3.bf16.msk.msra.mxu1 %vm18341_vm6, %v17431_v3  ;;  %vm18355_vm6 = vcmask 195584  }
 0x9d2   :  { %v8932_v28 = vadd.f32 %v8931_v26, %v8930_v50  ;;  %10713 = vmatprep.subr.msk.bf16.mxu1 %vm18342_vm5, %v17431_v3 }
 0x9d3   :  { %10751 = vmatpush3.bf16.msra.mxu0 %v15728_v61 }
 0x9d4   :  { %v8933_v37 = vpop.f32.mrb[60].mxu0  ;;  %10753 = vmatprep.subr.bf16.mxu0 %v15748_v5 }
 0x9d5   :  { %v8934_v18 = vpop.f32.mrb[61].mxu0  ;;  %10715 = vmatpush3.bf16.msk.msra.mxu1 %vm18251_vm15, %v17431_v3 }
 0x9d6   :  { %v8935_v19 = vadd.f32 %v8934_v18, %v8933_v37  ;;  %10717 = vmatprep.subr.msk.bf16.mxu1 %vm18253_vm12, %v17431_v3  ;;  %vm18352_vm12 = vmmov %vm18350_vm9 }
 0x9d7   :  { %10755 = vmatpush3.bf16.msra.mxu0 %v15748_v5  ;;  %v18344_v5 = vld [vmem:[#allocation9_spill] sm:$0xff] }
 0x9d8   :  { %v8936_v8 = vpop.f32.mrb[62].mxu0  ;;  %10757 = vmatprep.subr.bf16.mxu0 %v15763_v47 }
 0x9d9   :  { %v8937_v35 = vpop.f32.mrb[63].mxu0  ;;  %10719 = vmatpush3.bf16.msk.msra.mxu1 %vm18343_vm8, %v17431_v3 }
 0x9da   :  { %v8938_v61 = vadd.f32 %v8937_v35, %v8936_v8  ;;  %9711 = vmatmul.mubr.f32.vlgmr.msra.gmra.mrb[112].mxu0 %v16311_v33  ;;  %10721 = vmatprep.subr.msk.bf16.mxu1 %vm18330_vm4, %v17431_v3 }
 0x9db   :  { %9713 = vmatprep.mubr.f32.mxu0 %v16319_v42  ;;  %10759 = vmatpush3.bf16.msra.mxu0 %v15763_v47  ;;  %v18345_v47 = vld [vmem:[#allocation10_spill] sm:$0xff] }
 0x9dc   :  { %10761 = vmatprep.subr.bf16.mxu0 %v15775_v10 }
 0x9dd   :  { %10723 = vmatpush3.bf16.msk.msra.mxu1 %vm18265_vm2, %v17431_v3 }
 0x9de   :  { %9714 = vmatmul.mubr.f32.gmra.mrb[114].mxu0 %v16339_v53 }
 0x9df   :  { %10763 = vmatpush3.bf16.msra.mxu0 %v15775_v10  ;;  %9732 = vmatprep.mubr.f32.mxu0 %v16317_v16 }
 0x9e0   :  { %6082 = vmatmul.mubr.f32.vlgmr.msra.gmra.mrb[78].mxu1 %v16046_v24  ;;  %10765 = vmatprep.subr.bf16.mxu0 %v18344_v5 }
 0x9e1   :  { %6087 = vmatprep.mubr.f32.mxu1 %v16059_v45 }
 0x9e3   :  { %10767 = vmatpush3.bf16.msra.mxu0 %v18344_v5 }
 0x9e4   :  { %6089 = vmatmul.mubr.f32.gmra.mrb[80].mxu1 %v16077_v1  ;;  %10769 = vmatprep.subr.bf16.mxu0 %v18345_v47 }
 0x9e5   :  { %6094 = vmatprep.mubr.f32.mxu1 %v16088_v38 }
 0x9e7   :  { %10771 = vmatpush3.bf16.msra.mxu0 %v18345_v47 }
 0x9e8   :  { %6096 = vmatmul.mubr.f32.gmra.mrb[82].mxu1 %v16105_v49  ;;  %10773 = vmatprep.subr.msk.bf16.mxu0 %vm18327_vm11, %v17431_v3 }
 0x9e9   :  { %6101 = vmatprep.mubr.f32.mxu1 %v16116_v15 }
 0x9ea   :  { %9733 = vmatmul.mubr.f32.vlgmr.msra.gmra.mrb[112].mxu0 %v16337_v12  ;;  %v18349_v12 = vld [vmem:[#allocation14_spill] sm:$0xff] }
 0x9eb   :  { %9735 = vmatprep.mubr.f32.mxu0 %v16346_v60  ;;  %10775 = vmatpush3.bf16.msk.msra.mxu0 %vm18327_vm11, %v17431_v3 }
 0x9ec   :  { %v8971_v10 = vpop.f32.mrb[64].mxu0  ;;  %6103 = vmatmul.mubr.f32.gmra.mrb[84].mxu1 %v16136_v44  ;;  %10777 = vmatprep.subr.msk.bf16.mxu0 %vm18331_vm7, %v17431_v3 }
 0x9ed   :  { %v8972_v24 = vpop.f32.mrb[65].mxu0 }
 0x9ee   :  { %v8973_v45 = vadd.f32 %v8972_v24, %v8971_v10  ;;  %9736 = vmatmul.mubr.f32.gmra.mrb[114].mxu0 %v16363_v22 }
 0x9ef   :  { %10779 = vmatpush3.bf16.msk.msra.mxu0 %vm18331_vm7, %v17431_v3  ;;  %9754 = vmatprep.mubr.f32.mxu0 %v6175_v55  ;;  %v18348_v55 = vld [vmem:[#allocation12_spill] sm:$0xff] }
 0x9f0   :  { %v4754_v1 = vadd.f32 %v8973_v45, %v8929_v63  ;;  %v8974_v38 = vpop.f32.mrb[66].mxu0  ;;  %10781 = vmatprep.subr.msk.bf16.mxu0 %vm18333_vm10, %v17431_v3 }
 0x9f1   :  { %v8975_v44 = vpop.f32.mrb[67].mxu0 }
 0x9f2   :  { %v8976_v0 = vadd.f32 %v8975_v44, %v8974_v38 }
 0x9f3   :  { %10783 = vmatpush3.bf16.msk.msra.mxu0 %vm18333_vm10, %v17431_v3 }
 0x9f4   :  { %v4761_v41 = vadd.f32 %v8976_v0, %v8932_v28  ;;  %v8977_v11 = vpop.f32.mrb[68].mxu0  ;;  %10785 = vmatprep.subr.msk.bf16.mxu0 %vm18336_vm3, %v17431_v3 }
 0x9f5   :  { %v8978_v49 = vpop.f32.mrb[69].mxu0 }
 0x9f6   :  { %v8979_v15 = vadd.f32 %v8978_v49, %v8977_v11 }
 0x9f7   :  { %10787 = vmatpush3.bf16.msk.msra.mxu0 %vm18336_vm3, %v17431_v3 }
 0x9f8   :  { %v4768_v21 = vadd.f32 %v8979_v15, %v8935_v19  ;;  %v8980_v58 = vpop.f32.mrb[70].mxu0  ;;  %10789 = vmatprep.subr.bf16.mxu0 %v18346_v7 }
 0x9f9   :  { %v8981_v20 = vpop.f32.mrb[71].mxu0 }
 0x9fa   :  { %v8982_v16 = vadd.f32 %v8981_v20, %v8980_v58  ;;  %9755 = vmatmul.mubr.f32.vlgmr.msra.gmra.mrb[112].mxu0 %v6185_v40 }
 0x9fb   :  { %9757 = vmatprep.mubr.f32.mxu0 %v6195_v52  ;;  %10791 = vmatpush3.bf16.msra.mxu0 %v18346_v7 }
 0x9fc   :  { %v4775_v6 = vadd.f32 %v8982_v16, %v8938_v61  ;;  %10793 = vmatprep.subr.bf16.mxu0 %v18347_v14 }
 0x9fe   :  { %9758 = vmatmul.mubr.f32.gmra.mrb[114].mxu0 %v6205_v57 }
 0x9ff   :  { %10795 = vmatpush3.bf16.msra.mxu0 %v18347_v14  ;;  %9776 = vmatprep.mubr.f32.mxu0 %v16298_v62 }
 0xa00   :  { %10797 = vmatprep.subr.bf16.mxu0 %v18348_v55 }
 0xa03   :  { %10799 = vmatpush3.bf16.msra.mxu0 %v18348_v55 }
 0xa04   :  { %10801 = vmatprep.subr.bf16.mxu0 %v18349_v12 }
 0xa07   :  { %10803 = vmatpush3.bf16.msra.mxu0 %v18349_v12 }
 0xa08   :  { %10805 = vmatprep.subr.msk.bf16.mxu0 %vm18327_vm11, %v17431_v3 }
 0xa0a   :  { %9777 = vmatmul.mubr.f32.vlgmr.msra.gmra.mrb[112].mxu0 %v16311_v33 }
 0xa0b   :  { %9779 = vmatprep.mubr.f32.mxu0 %v16319_v42  ;;  %10807 = vmatpush3.bf16.msk.msra.mxu0 %vm18327_vm11, %v17431_v3 }
 0xa0c   :  { %v9015_v60 = vpop.f32.mrb[72].mxu0  ;;  %10809 = vmatprep.subr.msk.bf16.mxu0 %vm18331_vm7, %v17431_v3 }
 0xa0d   :  { %v9016_v25 = vpop.f32.mrb[73].mxu0 }
 0xa0e   :  { %v9017_v40 = vadd.f32 %v9016_v25, %v9015_v60  ;;  %9780 = vmatmul.mubr.f32.gmra.mrb[114].mxu0 %v16339_v53 }
 0xa0f   :  { %10811 = vmatpush3.bf16.msk.msra.mxu0 %vm18331_vm7, %v17431_v3  ;;  %9798 = vmatprep.mubr.f32.mxu0 %v16298_v62  ;;  %vm18353_vm7 = vmmov %vm18350_vm9 }
 0xa10   :  { %v4881_v22 = vadd.f32 %v9017_v40, %v4754_v1  ;;  %v9018_v29 = vpop.f32.mrb[74].mxu0  ;;  %10813 = vmatprep.subr.msk.bf16.mxu0 %vm18333_vm10, %v17431_v3 }
 0xa11   :  { %v9019_v48 = vpop.f32.mrb[75].mxu0 }
 0xa12   :  { %v9020_v36 = vadd.f32 %v9019_v48, %v9018_v29 }
 0xa13   :  { %10815 = vmatpush3.bf16.msk.msra.mxu0 %vm18333_vm10, %v17431_v3  ;;  %v4375_v52 = vpop.f32.mrb[44].mxu1  ;;  %vm18354_vm10 = vmmov %vm18353_vm7 }
 0xa14   :  { %v4890_v46 = vadd.f32 %v9020_v36, %v4761_v41  ;;  %v16544_v30 = vadd.f32 %v4375_v52, %v16323_v51  ;;  %v9021_v32 = vpop.f32.mrb[76].mxu0  ;;  %v9671_v57 = vpop.f32.mrb[45].mxu1  ;;  %10817 = vmatprep.subr.msk.bf16.mxu0 %vm18336_vm3, %v17431_v3 }
 0xa15   :  { %v9022_v62 = vpop.f32.mrb[77].mxu0 }
 0xa16   :  { %v9023_v56 = vadd.f32 %v9022_v62, %v9021_v32 }
 0xa17   :  { %10819 = vmatpush3.bf16.msk.msra.mxu0 %vm18336_vm3, %v17431_v3 }
 0xa18   :  { %v4899_v54 = vadd.f32 %v9023_v56, %v4768_v21  ;;  %v9024_v27 = vpop.f32.mrb[78].mxu0 }
 0xa19   :  { %v9025_v39 = vpop.f32.mrb[79].mxu0 }
 0xa1a   :  { %v9026_v43 = vadd.f32 %v9025_v39, %v9024_v27  ;;  %9799 = vmatmul.mubr.f32.vlgmr.msra.gmra.mrb[112].mxu0 %v16311_v33 }
 0xa1b   :  { %9801 = vmatprep.mubr.f32.mxu0 %v16319_v42 }
 0xa1c   :  { %v4908_v51 = vadd.f32 %v9026_v43, %v4775_v6 }
 0xa1e   :  { %9802 = vmatmul.mubr.f32.gmra.mrb[114].mxu0 %v16339_v53 }
 0xa2d   :  { %v9103_v59 = vpop.f32.mrb[80].mxu0 }
 0xa2e   :  { %v9104_v34 = vpop.f32.mrb[81].mxu0 }
 0xa2f   :  { %v9105_v23 = vadd.f32 %v9104_v34, %v9103_v59 }
 0xa31   :  { %v9106_v17 = vpop.f32.mrb[82].mxu0 }
 0xa32   :  { %v9107_v4 = vpop.f32.mrb[83].mxu0 }
 0xa33   :  { %v9108_v31 = vadd.f32 %v9107_v4, %v9106_v17  ;;  %v9059_v9 = vpop.f32.mrb[46].mxu1 }
 0xa34   :  { %v9060_v2 = vpop.f32.mrb[47].mxu1 }
 0xa35   :  { %v9109_v3 = vpop.f32.mrb[84].mxu0  ;;  %v9061_v13 = vadd.f32 %v9060_v2, %v9059_v9 }
 0xa36   :  { %v9110_v63 = vpop.f32.mrb[85].mxu0 }
 0xa37   :  { %v4984_v50 = vadd.f32 %v9061_v13, %v4881_v22  ;;  %v9111_v26 = vadd.f32 %v9110_v63, %v9109_v3  ;;  %v9062_v28 = vpop.f32.mrb[48].mxu1 }
 0xa38   :  { %v9063_v33 = vpop.f32.mrb[49].mxu1 }
 0xa39   :  { %v9112_v37 = vpop.f32.mrb[86].mxu0  ;;  %v9064_v42 = vadd.f32 %v9063_v33, %v9062_v28  ;;  %v5153_v18 = vadd.f32 %v9105_v23, %v4984_v50 }
 0xa3a   :  { %v9113_v19 = vpop.f32.mrb[87].mxu0 }
 0xa3b   :  { %v4995_v53 = vadd.f32 %v9064_v42, %v4890_v46  ;;  %v9114_v8 = vadd.f32 %v9113_v19, %v9112_v37  ;;  %v9065_v35 = vpop.f32.mrb[50].mxu1 }
 0xa3c   :  { %v9066_v61 = vpop.f32.mrb[51].mxu1 }
 0xa3d   :  { %v9067_v5 = vadd.f32 %v9066_v61, %v9065_v35  ;;  %v5160_v47 = vadd.f32 %v9108_v31, %v4995_v53 }
 0xa3f   :  { %v5006_v10 = vadd.f32 %v9067_v5, %v4899_v54  ;;  %v9068_v24 = vpop.f32.mrb[52].mxu1 }
 0xa40   :  { %v9069_v45 = vpop.f32.mrb[53].mxu1 }
 0xa41   :  { %v9070_v1 = vadd.f32 %v9069_v45, %v9068_v24  ;;  %v5167_v38 = vadd.f32 %v9111_v26, %v5006_v10 }
 0xa43   :  { %v5017_v44 = vadd.f32 %v9070_v1, %v4908_v51  ;;  %v11186_v1 = vld [vmem:[%s16803_s13] sm:$0xff]  }
 0xa44   :  { %9808 = vmatprep.mubr.msk.bf16.mxu1 %vm18350_vm9, %v11186_v1  ;;  %vm18356_vm9 = vmmov %vm18355_vm6 }
 0xa45   :  { %v5174_v0 = vadd.f32 %v9114_v8, %v5017_v44 }
 0xa4d   :  { %v9191_v41 = vpop.f32.mrb[88].mxu0 }
 0xa4e   :  { %v9192_v11 = vpop.f32.mrb[89].mxu0 }
 0xa4f   :  { %v9193_v49 = vadd.f32 %v9192_v11, %v9191_v41 }
 0xa51   :  { %v9194_v15 = vpop.f32.mrb[90].mxu0 }
 0xa52   :  { %v9195_v21 = vpop.f32.mrb[91].mxu0 }
 0xa53   :  { %v9196_v58 = vadd.f32 %v9195_v21, %v9194_v15  ;;  %v9147_v7 = vpop.f32.mrb[54].mxu1 }
 0xa54   :  { %v9148_v20 = vpop.f32.mrb[55].mxu1 }
 0xa55   :  { %v9197_v16 = vpop.f32.mrb[92].mxu0  ;;  %v9149_v6 = vadd.f32 %v9148_v20, %v9147_v7 }
 0xa56   :  { %v9198_v14 = vpop.f32.mrb[93].mxu0 }
 0xa57   :  { %v5246_v55 = vadd.f32 %v9149_v6, %v5153_v18  ;;  %v9199_v12 = vadd.f32 %v9198_v14, %v9197_v16  ;;  %v9150_v60 = vpop.f32.mrb[56].mxu1 }
 0xa58   :  { %v9151_v25 = vpop.f32.mrb[57].mxu1 }
 0xa59   :  { %v9200_v40 = vpop.f32.mrb[94].mxu0  ;;  %v9152_v22 = vadd.f32 %v9151_v25, %v9150_v60  ;;  %v5347_v29 = vadd.f32 %v9193_v49, %v5246_v55 }
 0xa5a   :  { %v9201_v48 = vpop.f32.mrb[95].mxu0 }
 0xa5b   :  { %v5253_v36 = vadd.f32 %v9152_v22, %v5160_v47  ;;  %v9202_v52 = vadd.f32 %v9201_v48, %v9200_v40  ;;  %v9153_v46 = vpop.f32.mrb[58].mxu1 }
 0xa5c   :  { %v9154_v32 = vpop.f32.mrb[59].mxu1 }
 0xa5d   :  { %v9155_v57 = vadd.f32 %v9154_v32, %v9153_v46  ;;  %v5362_v62 = vadd.f32 %v9196_v58, %v5253_v36 }
 0xa5f   :  { %v5260_v56 = vadd.f32 %v9155_v57, %v5167_v38  ;;  %v9156_v54 = vpop.f32.mrb[60].mxu1 }
 0xa60   :  { %v9157_v27 = vpop.f32.mrb[61].mxu1 }
 0xa61   :  { %v9158_v39 = vadd.f32 %v9157_v27, %v9156_v54  ;;  %v5377_v43 = vadd.f32 %v9199_v12, %v5260_v56 }
 0xa63   :  { %v5267_v51 = vadd.f32 %v9158_v39, %v5174_v0 }
 0xa65   :  { %v5392_v59 = vadd.f32 %v9202_v52, %v5267_v51 }
 0xa6d   :  { %v9279_v34 = vpop.f32.mrb[96].mxu0 }
 0xa6e   :  { %v9280_v23 = vpop.f32.mrb[97].mxu0 }
 0xa6f   :  { %v9281_v17 = vadd.f32 %v9280_v23, %v9279_v34 }
 0xa71   :  { %v9282_v4 = vpop.f32.mrb[98].mxu0 }
 0xa72   :  { %v9283_v31 = vpop.f32.mrb[99].mxu0 }
 0xa73   :  { %v9284_v9 = vadd.f32 %v9283_v31, %v9282_v4  ;;  %v9235_v2 = vpop.f32.mrb[62].mxu1 }
 0xa74   :  { %v9236_v3 = vpop.f32.mrb[63].mxu1 }
 0xa75   :  { %v9285_v13 = vpop.f32.mrb[100].mxu0  ;;  %v9237_v63 = vadd.f32 %v9236_v3, %v9235_v2 }
 0xa76   :  { %v9286_v50 = vpop.f32.mrb[101].mxu0 }
 0xa77   :  { %v5592_v26 = vadd.f32 %v9237_v63, %v5347_v29  ;;  %v9287_v28 = vadd.f32 %v9286_v50, %v9285_v13  ;;  %v9238_v33 = vpop.f32.mrb[64].mxu1 }
 0xa78   :  { %v9239_v37 = vpop.f32.mrb[65].mxu1 }
 0xa79   :  { %v9288_v42 = vpop.f32.mrb[102].mxu0  ;;  %v9240_v18 = vadd.f32 %v9239_v37, %v9238_v33  ;;  %v5719_v19 = vadd.f32 %v9281_v17, %v5592_v26 }
 0xa7a   :  { %v9289_v53 = vpop.f32.mrb[103].mxu0 }
 0xa7b   :  { %v5599_v8 = vadd.f32 %v9240_v18, %v5362_v62  ;;  %v9290_v35 = vadd.f32 %v9289_v53, %v9288_v42  ;;  %v9241_v61 = vpop.f32.mrb[66].mxu1  ;;  %v4379_v53 = vmax.f32 %v16544_v30, 1e-30 }
 0xa7c   :  { %v9242_v5 = vpop.f32.mrb[67].mxu1 }
 0xa7d   :  { %v9243_v47 = vadd.f32 %v9242_v5, %v9241_v61  ;;  %v5728_v10 = vadd.f32 %v9284_v9, %v5599_v8  ;;  %v6726_v8 = vmul.f32 6.0, %v4379_v53 }
 0xa7f   :  { %v5606_v24 = vadd.f32 %v9243_v47, %v5377_v43  ;;  %v9244_v45 = vpop.f32.mrb[68].mxu1 }
 0xa80   :  { %v9245_v38 = vpop.f32.mrb[69].mxu1 }
 0xa81   :  { %v9246_v44 = vadd.f32 %v9245_v38, %v9244_v45  ;;  %v5737_v0 = vadd.f32 %v9287_v28, %v5606_v24 }
 0xa83   :  { %v5613_v41 = vadd.f32 %v9246_v44, %v5392_v59 }
 0xa85   :  { %v5746_v11 = vadd.f32 %v9290_v35, %v5613_v41  ;;  %v18351_v35 = vld [vmem:[#allocation4_spill] sm:$0xff] }
 0xa86   :  { %v6730_v61 = vrot.slane %v6726_v8, %v18351_v35 }
 0xa88   :  { %11234 = vrcp.f32 %v6730_v61 }
 0xa8d   :  { %v9367_v49 = vpop.f32.mrb[104].mxu0 }
 0xa8e   :  { %v9368_v15 = vpop.f32.mrb[105].mxu0 }
 0xa8f   :  { %v9369_v21 = vadd.f32 %v9368_v15, %v9367_v49 }
 0xa91   :  { %v9370_v58 = vpop.f32.mrb[106].mxu0 }
 0xa92   :  { %v9371_v7 = vpop.f32.mrb[107].mxu0  ;;  %v11235_v24 = vpop.eup %11234 }
 0xa93   :  { %v9372_v20 = vadd.f32 %v9371_v7, %v9370_v58  ;;  %v9323_v16 = vpop.f32.mrb[70].mxu1 }
 0xa94   :  { %v9324_v6 = vpop.f32.mrb[71].mxu1 }
 0xa95   :  { %v9373_v14 = vpop.f32.mrb[108].mxu0  ;;  %v9325_v55 = vadd.f32 %v9324_v6, %v9323_v16 }
 0xa96   :  { %v9374_v12 = vpop.f32.mrb[109].mxu0 }
 0xa97   :  { %v5822_v60 = vadd.f32 %v9325_v55, %v5719_v19  ;;  %v9375_v25 = vadd.f32 %v9374_v12, %v9373_v14  ;;  %v9326_v40 = vpop.f32.mrb[72].mxu1 }
 0xa98   :  { %v9327_v22 = vpop.f32.mrb[73].mxu1 }
 0xa99   :  { %v9376_v29 = vpop.f32.mrb[110].mxu0  ;;  %v9328_v48 = vadd.f32 %v9327_v22, %v9326_v40  ;;  %v5991_v36 = vadd.f32 %v9369_v21, %v5822_v60  ;;  %v11187_v60 = vld [vmem:[%s16803_s13 + $0x8] sm:$0xff]   ;;  %v6769_v40 = vpop.permute.xlu0 %6768 }
 0xa9a   :  { %v9377_v52 = vpop.f32.mrb[111].mxu0  ;;  %v6774_v22 = vpop.permute.xlu1 %6773 }
 0xa9b   :  { %v5833_v46 = vadd.f32 %v9328_v48, %v5728_v10  ;;  %v9378_v32 = vadd.f32 %v9377_v52, %v9376_v29  ;;  %v9329_v57 = vpop.f32.mrb[74].mxu1 }
 0xa9c   :  { %v9330_v62 = vpop.f32.mrb[75].mxu1 }
 0xa9d   :  { %v9331_v56 = vadd.f32 %v9330_v62, %v9329_v57  ;;  %v5998_v54 = vadd.f32 %v9372_v20, %v5833_v46  ;;  %v6779_v29 = vpop.permute.xlu0 %6778 }
 0xa9e   :  { %v6784_v46 = vpop.permute.xlu1 %6783 }
 0xa9f   :  { %v5844_v27 = vadd.f32 %v9331_v56, %v5737_v0  ;;  %v9332_v39 = vpop.f32.mrb[76].mxu1 }
 0xaa0   :  { %v9333_v43 = vpop.f32.mrb[77].mxu1 }
 0xaa1   :  { %v9334_v51 = vadd.f32 %v9333_v43, %v9332_v39  ;;  %v6005_v59 = vadd.f32 %v9375_v25, %v5844_v27  ;;  %v11188_v25 = vld [vmem:[%s16804_s15] sm:$0xff]   ;;  %v6880_v53 = vpop.permute.xlu0 %6879 }
 0xaa2   :  { %v6885_v8 = vpop.permute.xlu1 %6884 }
 0xaa3   :  { %v5855_v34 = vadd.f32 %v9334_v51, %v5746_v11 }
 0xaa5   :  { %v6012_v23 = vadd.f32 %v9378_v32, %v5855_v34  ;;  %v6890_v35 = vpop.permute.xlu0 %6889 }
 0xab3   :  { %v9411_v17 = vpop.f32.mrb[78].mxu1 }
 0xab4   :  { %v9412_v4 = vpop.f32.mrb[79].mxu1 }
 0xab5   :  { %v9413_v31 = vadd.f32 %v9412_v4, %v9411_v17 }
 0xab7   :  { %v9414_v9 = vpop.f32.mrb[80].mxu1  ;;  %v6084_v2 = vadd.f32 %v9413_v31, %v5991_v36 }
 0xab8   :  { %v9415_v3 = vpop.f32.mrb[81].mxu1 }
 0xab9   :  { %v9416_v13 = vadd.f32 %v9415_v3, %v9414_v9 }
 0xabb   :  { %v9417_v63 = vpop.f32.mrb[82].mxu1  ;;  %v6091_v50 = vadd.f32 %v9416_v13, %v5998_v54 }
 0xabc   :  { %v9418_v26 = vpop.f32.mrb[83].mxu1 }
 0xabd   :  { %v9419_v28 = vadd.f32 %v9418_v26, %v9417_v63 }
 0xabf   :  { %v9420_v33 = vpop.f32.mrb[84].mxu1  ;;  %v6098_v37 = vadd.f32 %v9419_v28, %v6005_v59 }
 0xac0   :  { %v9421_v42 = vpop.f32.mrb[85].mxu1 }
 0xac1   :  { %v9422_v18 = vadd.f32 %v9421_v42, %v9420_v33 }
 0xac3   :  { %v6105_v19 = vadd.f32 %v9422_v18, %v6012_v23 }
 0xaed   :  { %v9800_v5 = vpop.f32.mrb[112].mxu0 }
 0xaee   :  { %v10821_v47 = vadd.f32 %v9800_v5, %v6091_v50  ;;  %v6704_v10 = vpop.f32.mrb[113].mxu0 }
 0xaef   :  { %v10822_v45 = vadd.f32 %v6704_v10, %v6084_v2  ;;  %v6895_v10 = vpop.permute.xlu1 %6894 }
 0xaf0   :  { %v6733_v1 = vmul.f32 %v11235_v24, %v10821_v47 }
 0xaf1   :  { %v6732_v38 = vmul.f32 %v11235_v24, %v10822_v45  ;;  %v9803_v44 = vpop.f32.mrb[114].mxu0 }
 0xaf2   :  { %vm6737_vm1 = vcmp.gt.f32.partialorder %v6733_v1, 0.0  ;;  %v6741_v0 = vmul.f32 0.01, %v6733_v1  ;;  %v10823_v41 = vadd.f32 %v9803_v44, %v6105_v19  ;;  %v6716_v11 = vpop.f32.mrb[115].mxu0  ;;  %v11189_v19 = vld [vmem:[%s16804_s15 + $0x8] sm:$0xff]  }
 0xaf3   :  { %vm6736_vm0 = vcmp.gt.f32.partialorder %v6732_v38, 0.0  ;;  %v6740_v49 = vmul.f32 0.01, %v6732_v38  ;;  %v10824_v15 = vadd.f32 %v6716_v11, %v6098_v37 }
 0xaf4   :  { %v6735_v30 = vmul.f32 %v11235_v24, %v10823_v41  ;;  %v16561_v21 = vsel %vm6737_vm1, %v6733_v1, %v6741_v0  ;;  %vm18357_vm1 = vmmov %vm18355_vm6 }
 0xaf5   :  { %v6734_v58 = vmul.f32 %v11235_v24, %v10824_v15  ;;  %v16563_v7 = vsel %vm6736_vm0, %v6732_v38, %v6740_v49 }
 0xaf6   :  { %vm6739_vm11 = vcmp.gt.f32.partialorder %v6735_v30, 0.0  ;;  %v6743_v20 = vmul.f32 0.01, %v6735_v30  ;;  %v6764_v16 = vpack.c.bf16 %v16561_v21, %v16563_v7 }
 0xaf7   :  { %vm6738_vm15 = vcmp.gt.f32.partialorder %v6734_v58, 0.0  ;;  %v6742_v6 = vmul.f32 0.01, %v6734_v58 }
 0xaf8   :  { %9804 = vmatprep.subr.bf16.mxu1 %v6764_v16  ;;  %v16567_v14 = vsel %vm6739_vm11, %v6735_v30, %v6743_v20  ;;  %vm18358_vm11 = vmmov %vm18357_vm1 }
 0xaf9   :  { %9805 = vmatpush3.bf16.msra.mxu1 %v6764_v16  ;;  %v16569_v55 = vsel %vm6738_vm15, %v6734_v58, %v6742_v6  ;;  %vm18359_vm15 = vmmov %vm18357_vm1 }
 0xafa   :  { %v6765_v12 = vpack.c.bf16 %v16567_v14, %v16569_v55 }
 0xafc   :  { %9806 = vmatprep.subr.bf16.mxu1 %v6765_v12 }
 0xafd   :  { %9807 = vmatpush3.bf16.msra.mxu1 %v6765_v12 }
 0xb00   :  { %9809 = vmatmul.mubr.msk.bf16.vlgmr.msra.gmra.mrb[88].mxu1 %vm18352_vm12, %v11187_v60  ;;  %vm18360_vm12 = vmmov %vm18357_vm1 }
 0xb01   :  { %9816 = vmatprep.mubr.msk.bf16.mxu1 %vm18353_vm7, %v11188_v25  ;;  %vm18361_vm7 = vmmov %vm18357_vm1 }
 0xbd3   :  { %v9810_v48 = vpop.f32.mrb[88].mxu1 }
 0xbd4   :  { %v6845_v36 = vadd.f32 %v9810_v48, %v6779_v29  ;;  %v6836_v52 = vpop.f32.mrb[89].mxu1 }
 0xbd5   :  { %v6837_v32 = vadd.f32 %v6836_v52, %v6769_v40  ;;  %v9811_v57 = vpop.f32.mrb[90].mxu1 }
 0xbd6   :  { %v6857_v62 = vmin.f32 %v6845_v36, 0.0  ;;  %v6848_v56 = vadd.f32 %v9811_v57, %v6784_v46  ;;  %v6839_v54 = vpop.f32.mrb[91].mxu1  ;;  %vm6853_vm2 = vcmp.gt.f32.partialorder %v6845_v36, 0.0 }
 0xbd7   :  { %v6855_v27 = vmin.f32 %v6837_v32, 0.0  ;;  %v6840_v39 = vadd.f32 %v6839_v54, %v6774_v22  ;;  %vm6851_vm13 = vcmp.gt.f32.partialorder %v6837_v32, 0.0 }
 0xbd8   :  { %v6863_v43 = vmul.f32 1.442695, %v6857_v62  ;;  %v6858_v51 = vmin.f32 %v6848_v56, 0.0  ;;  %vm6854_vm14 = vcmp.gt.f32.partialorder %v6848_v56, 0.0 }
 0xbd9   :  { %v6859_v59 = vmul.f32 1.442695, %v6855_v27  ;;  %v6856_v34 = vmin.f32 %v6840_v39, 0.0  ;;  %vm6852_vm4 = vcmp.gt.f32.partialorder %v6840_v39, 0.0 }
 0xbda   :  { %11236 = vpow2.f32 %v6863_v43  ;;  %v6865_v23 = vmul.f32 1.442695, %v6858_v51 }
 0xbdb   :  { %11238 = vpow2.f32 %v6859_v59  ;;  %v6861_v17 = vmul.f32 1.442695, %v6856_v34 }
 0xbdc   :  { %11240 = vpow2.f32 %v6865_v23 }
 0xbdd   :  { %11242 = vpow2.f32 %v6861_v17 }
 0xbe4   :  { %v11237_v4 = vpop.eup %11236 }
 0xbe5   :  { %v11239_v31 = vpop.eup %11238  ;;  %v8361_v9 = vadd.f32 -1.0, %v11237_v4 }
 0xbe6   :  { %v11241_v2 = vpop.eup %11240  ;;  %v8359_v3 = vadd.f32 -1.0, %v11239_v31 }
 0xbe7   :  { %v11243_v13 = vpop.eup %11242  ;;  %v8362_v63 = vadd.f32 -1.0, %v11241_v2  ;;  %v6873_v26 = vsel %vm6853_vm2, %v6845_v36, %v8361_v9  ;;  %vm18362_vm2 = vmmov %vm18357_vm1 }
 0xbe8   :  { %v8360_v50 = vadd.f32 -1.0, %v11243_v13  ;;  %v6871_v33 = vsel %vm6851_vm13, %v6837_v32, %v8359_v3 }
 0xbe9   :  { %v6874_v28 = vsel %vm6854_vm14, %v6848_v56, %v8362_v63  ;;  %vm18363_vm14 = vcmask 1043456  }
 0xbea   :  { %v6872_v37 = vsel %vm6852_vm4, %v6840_v39, %v8360_v50  ;;  %v6876_v42 = vpack.c.bf16 %v6874_v28, %v6873_v26  ;;  %vm18364_vm13 = vmmov %vm18363_vm14 }
 0xbeb   :  { %v6875_v18 = vpack.c.bf16 %v6872_v37, %v6871_v33  ;;  %v7112_v37 = vld [vmem:[%s16805_s18] sm:$0xff]  ;;  %vm18365_vm4 = vmmov %vm18357_vm1 }
 0xbed   :  { %9812 = vmatprep.subr.bf16.mxu1 %v6875_v18 }
 0xbee   :  { %9813 = vmatpush3.bf16.msra.mxu1 %v6875_v18  ;;  %v7115_v18 = vld [vmem:[%s16805_s18 + $0x18] sm:$0xff] }
 0xbef   :  { %9814 = vmatprep.subr.bf16.mxu1 %v6876_v42 }
 0xbf2   :  { %9815 = vmatpush3.bf16.msra.mxu1 %v6876_v42  ;;  %v7114_v42 = vld [vmem:[%s16805_s18 + $0x10] sm:$0xff] }
 0xbf5   :  { %9817 = vmatmul.mubr.msk.bf16.vlgmr.msra.gmra.mrb[92].mxu1 %vm18354_vm10, %v11189_v19  ;;  %v7113_v19 = vld [vmem:[%s16805_s18 + $0x8] sm:$0xff]  ;;  %vm18366_vm10 = vmmov %vm18357_vm1 }
 0xcc8   :  { %v9818_v61 = vpop.f32.mrb[92].mxu1 }
 0xcc9   :  { %v6956_v5 = vadd.f32 %v9818_v61, %v6890_v35  ;;  %v6947_v47 = vpop.f32.mrb[93].mxu1  ;;  %v7123_v35 = vld [vmem:[%s16806_s20 + $0x18] sm:$0xff]  ;;  %v7122_v61 = vld [vmem:[%s16806_s20 + $0x10] sm:$0xff] }
 0xcca   :  { %v6948_v24 = vadd.f32 %v6947_v47, %v6880_v53  ;;  %v9819_v45 = vpop.f32.mrb[94].mxu1  ;;  %v7121_v53 = vld [vmem:[%s16806_s20 + $0x8] sm:$0xff] }
 0xccb   :  { %v6968_v1 = vmin.f32 %v6956_v5, 0.0  ;;  %v6959_v38 = vadd.f32 %v9819_v45, %v6895_v10  ;;  %v6950_v44 = vpop.f32.mrb[95].mxu1  ;;  %vm6964_vm8 = vcmp.gt.f32.partialorder %v6956_v5, 0.0  ;;  %v7044_v47 = vld [vmem:[%s16807_s10 + $0x8] sm:$0xff]  ;;  %v7045_v10 = vld [vmem:[%s16807_s10 + $0x10] sm:$0xff] }
 0xccc   :  { %v6966_v0 = vmin.f32 %v6948_v24, 0.0  ;;  %v6951_v41 = vadd.f32 %v6950_v44, %v6885_v8  ;;  %vm6962_vm3 = vcmp.gt.f32.partialorder %v6948_v24, 0.0  ;;  %v7120_v8 = vld [vmem:[%s16806_s20] sm:$0xff]  ;;  %v7049_v45 = vpack.c.bf16 %v7045_v10, %v7045_v10 }
 0xccd   :  { %v6974_v11 = vmul.f32 1.442695, %v6968_v1  ;;  %v6969_v49 = vmin.f32 %v6959_v38, 0.0  ;;  %vm6965_vm0 = vcmp.gt.f32.partialorder %v6959_v38, 0.0 }
 0xcce   :  { %v6970_v15 = vmul.f32 1.442695, %v6966_v0  ;;  %v6967_v30 = vmin.f32 %v6951_v41, 0.0  ;;  %vm6963_vm5 = vcmp.gt.f32.partialorder %v6951_v41, 0.0  ;;  %v7057_v1 = vsel %vm18364_vm13, %v7049_v45, 0 }
 0xccf   :  { %11244 = vpow2.f32 %v6974_v11  ;;  %v6976_v58 = vmul.f32 1.442695, %v6969_v49 }
 0xcd0   :  { %11246 = vpow2.f32 %v6970_v15  ;;  %v6972_v20 = vmul.f32 1.442695, %v6967_v30 }
 0xcd1   :  { %11248 = vpow2.f32 %v6976_v58 }
 0xcd2   :  { %11250 = vpow2.f32 %v6972_v20 }
 0xcd9   :  { %v11245_v16 = vpop.eup %11244 }
 0xcda   :  { %v11247_v6 = vpop.eup %11246  ;;  %v8369_v25 = vadd.f32 -1.0, %v11245_v16 }
 0xcdb   :  { %v11249_v12 = vpop.eup %11248  ;;  %v8367_v60 = vadd.f32 -1.0, %v11247_v6 }
 0xcdc   :  { %v11251_v40 = vpop.eup %11250  ;;  %v6984_v52 = vsel %vm6964_vm8, %v6956_v5, %v8369_v25  ;;  %v8370_v46 = vadd.f32 -1.0, %v11249_v12  ;;  %v7043_v5 = vld [vmem:[%s16807_s10] sm:$0xff] }
 0xcdd   :  { %v6982_v22 = vsel %vm6962_vm3, %v6948_v24, %v8367_v60  ;;  %v8368_v29 = vadd.f32 -1.0, %v11251_v40  ;;  %v6992_v57 = vsel %vm18357_vm1, %v6984_v52, 0.0  ;;  %v7048_v24 = vpack.c.bf16 %v7044_v47, %v7043_v5 }
 0xcde   :  { %v6986_v48 = vsel %vm18355_vm6, %v6982_v22, 0.0  ;;  %v6985_v62 = vsel %vm6965_vm0, %v6959_v38, %v8370_v46  ;;  %vm18367_vm3 = vcmask 261120  }
 0xcdf   :  { %6987 = vadd.xlane.f32.xlu0 %v6986_v48  ;;  %v6983_v36 = vsel %vm6963_vm5, %v6951_v41, %v8368_v29  ;;  %v6995_v56 = vsel %vm18358_vm11, %v6985_v62, 0.0  ;;  %9820 = vmatprep.subr.bf16.mxu1 %v7048_v24  ;;  %vm18368_vm6 = vmmov %vm18367_vm3 }
 0xce0   :  { %v6989_v32 = vsel %vm18356_vm9, %v6983_v36, 0.0  ;;  %9821 = vmatpush3.bf16.msra.mxu1 %v7048_v24  ;;  %vm18369_vm5 = vmmov %vm18367_vm3 }
 0xce1   :  { %6990 = vadd.xlane.f32.xlu1 %v6989_v32  ;;  %10855 = vmatprep.subr.msk.bf16.mxu1 %vm18363_vm14, %v7049_v45  ;;  %vm18370_vm11 = vmmov %vm18367_vm3 }
 0xce3   :  { %6993 = vadd.xlane.f32.xlu0 %v6992_v57 }
 0xce4   :  { %9823 = vmatpush3.bf16.msra.mxu1 %v7057_v1 }
 0xce7   :  { %6996 = vadd.xlane.f32.xlu0 %v6995_v56 }
 0xd6c   :  { %v6988_v54 = vpop.xlane.xlu0 %6987 }
 0xd6d   :  { %v6999_v27 = vmul.f32 0.041666668, %v6988_v54 }
 0xd6e   :  { %v6991_v39 = vpop.xlane.xlu1 %6990 }
 0xd6f   :  { %v16589_v43 = vsub.f32 %v6982_v22, %v6999_v27  ;;  %v7000_v51 = vmul.f32 0.041666668, %v6991_v39 }
 0xd70   :  { %v6994_v59 = vpop.xlane.xlu0 %6993 }
 0xd71   :  { %v16591_v34 = vsub.f32 %v6983_v36, %v7000_v51  ;;  %v7001_v23 = vmul.f32 0.041666668, %v6994_v59  ;;  %v7007_v17 = vmul.f32 %v16589_v43, %v16589_v43  ;;  %v11192_v51 = vld [vmem:[%s16809_s19] sm:$0xff]  }
 0xd73   :  { %v16595_v4 = vsub.f32 %v6984_v52, %v7001_v23  ;;  %v7011_v31 = vsel %vm18359_vm15, %v7007_v17, 0.0  ;;  %v7008_v9 = vmul.f32 %v16591_v34, %v16591_v34 }
 0xd74   :  { %7012 = vadd.xlane.f32.xlu1 %v7011_v31  ;;  %v6997_v2 = vpop.xlane.xlu0 %6996 }
 0xd75   :  { %v7002_v3 = vmul.f32 0.041666668, %v6997_v2  ;;  %v7014_v13 = vsel %vm18360_vm12, %v7008_v9, 0.0  ;;  %v7009_v63 = vmul.f32 %v16595_v4, %v16595_v4  ;;  %vm18371_vm12 = vcmask 64512  }
 0xd76   :  { %7015 = vadd.xlane.f32.xlu0 %v7014_v13  ;;  %vm18372_vm14 = vmmov %vm18371_vm12 }
 0xd77   :  { %v7006_v50 = vsub.f32 %v6985_v62, %v7002_v3  ;;  %v7017_v26 = vsel %vm18361_vm7, %v7009_v63, 0.0  ;;  %vm18373_vm13 = vmmov %vm18371_vm12 }
 0xd78   :  { %7018 = vadd.xlane.f32.xlu1 %v7017_v26 }
 0xd79   :  { %v7010_v28 = vmul.f32 %v7006_v50, %v7006_v50 }
 0xd7b   :  { %v7020_v33 = vsel %vm18362_vm2, %v7010_v28, 0.0 }
 0xd7c   :  { %7021 = vadd.xlane.f32.xlu0 %v7020_v33 }
 0xd89   :  { %7128 = vperm.xlu1 %10925, %v7112_v37  }
 0xd8d   :  { %7138 = vperm.xlu1 %10925, %v7114_v42  }
 0xd91   :  { %7143 = vperm.xlu1 %10925, %v7115_v18  }
 0xd92   :  { %7133 = vperm.xlu0 %10924, %v7113_v19  }
 0xd95   :  { %7244 = vperm.xlu1 %10925, %v7121_v53  }
 0xd96   :  { %7239 = vperm.xlu0 %10924, %v7120_v8  }
 0xd99   :  { %7254 = vperm.xlu1 %10925, %v7123_v35  }
 0xd9a   :  { %7249 = vperm.xlu0 %10924, %v7122_v61  }
 0xe01   :  { %v7013_v38 = vpop.xlane.xlu1 %7012 }
 0xe02   :  { %v7023_v44 = vmul.f32 0.041666668, %v7013_v38 }
 0xe03   :  { %v7016_v0 = vpop.xlane.xlu0 %7015 }
 0xe04   :  { %v7027_v41 = vadd.f32 1e-05, %v7023_v44  ;;  %v7024_v11 = vmul.f32 0.041666668, %v7016_v0 }
 0xe05   :  { %v7019_v49 = vpop.xlane.xlu1 %7018 }
 0xe06   :  { %11252 = vrsqrt.f32 %v7027_v41  ;;  %v7028_v15 = vadd.f32 1e-05, %v7024_v11  ;;  %v7025_v30 = vmul.f32 0.041666668, %v7019_v49  ;;  %v11193_v49 = vld [vmem:[%s16809_s19 + $0x8] sm:$0xff]  }
 0xe08   :  { %11254 = vrsqrt.f32 %v7028_v15  ;;  %v7029_v58 = vadd.f32 1e-05, %v7025_v30 }
 0xe09   :  { %v7022_v20 = vpop.xlane.xlu0 %7021  ;;  %v7129_v59 = vpop.permute.xlu1 %7128 }
 0xe0a   :  { %11256 = vrsqrt.f32 %v7029_v58  ;;  %v7026_v16 = vmul.f32 0.041666668, %v7022_v20 }
 0xe0c   :  { %v7030_v6 = vadd.f32 1e-05, %v7026_v16 }
 0xe0e   :  { %11258 = vrsqrt.f32 %v7030_v6 }
 0xe10   :  { %v11253_v12 = vpop.eup %11252 }
 0xe11   :  { %v7035_v60 = vmul.f32 %v11253_v12, %v16589_v43  ;;  %v11191_v43 = vld [vmem:[%s16808_s17 + $0x8] sm:$0xff]   ;;  %v7134_v3 = vpop.permute.xlu0 %7133 }
 0xe12   :  { %v11255_v25 = vpop.eup %11254 }
 0xe13   :  { %v7036_v40 = vmul.f32 %v11255_v25, %v16591_v34  ;;  %v7039_v29 = vadd.f32 %v7035_v60, %v16563_v7  ;;  %v7139_v34 = vpop.permute.xlu1 %7138 }
 0xe14   :  { %v11257_v22 = vpop.eup %11256 }
 0xe15   :  { %v7040_v48 = vadd.f32 %v7036_v40, %v16561_v21  ;;  %v7037_v36 = vmul.f32 %v11257_v22, %v16595_v4  ;;  %v11190_v21 = vld [vmem:[%s16808_s17] sm:$0xff]   ;;  %v7240_v15 = vpop.permute.xlu0 %7239 }
 0xe17   :  { %v16645_v52 = vpack.c.bf16 %v7040_v48, %v7039_v29  ;;  %v7041_v57 = vadd.f32 %v7037_v36, %v16569_v55  ;;  %v7144_v31 = vpop.permute.xlu1 %7143 }
 0xe18   :  { %v11259_v46 = vpop.eup %11258 }
 0xe19   :  { %v7038_v32 = vmul.f32 %v11259_v46, %v7006_v50  ;;  %9824 = vmatprep.mubr.msk.bf16.mxu1 %vm18365_vm4, %v16645_v52  ;;  %v7250_v58 = vpop.permute.xlu0 %7249 }
 0xe1b   :  { %v7042_v62 = vadd.f32 %v7038_v32, %v16567_v14  ;;  %v7245_v30 = vpop.permute.xlu1 %7244 }
 0xe1d   :  { %v16651_v56 = vpack.c.bf16 %v7042_v62, %v7041_v57 }
 0xe1f   :  { %9825 = vmatmul.mubr.msk.bf16.vlgmr.msra.gmra.mrb[96].mxu1 %vm18366_vm10, %v16651_v56  ;;  %v7255_v12 = vpop.permute.xlu1 %7254  ;;  %vm18374_vm10 = vmmov %vm18371_vm12 }
 0xe20   :  { %9832 = vmatprep.mubr.msk.bf16.mxu1 %vm18367_vm3, %v11190_v21  ;;  %vm18375_vm3 = vmmov %vm18374_vm10 }
 0xef2   :  { %v16659_v7 = vpop.f32.mrb[96].mxu1 }
 0xef3   :  { %v16661_v54 = vpop.f32.mrb[97].mxu1 }
 0xef4   :  { %v16663_v27 = vpop.f32.mrb[98].mxu1 }
 0xef5   :  { %v7125_v14 = vpack.c.bf16 %v16663_v27, %v16659_v7  ;;  %v16667_v55 = vpop.f32.mrb[99].mxu1 }
 0xef6   :  { %v7124_v39 = vpack.c.bf16 %v16667_v55, %v16661_v54 }
 0xef8   :  { %9828 = vmatprep.subr.bf16.mxu1 %v7124_v39 }
 0xef9   :  { %9829 = vmatpush3.bf16.msra.mxu1 %v7124_v39 }
 0xefa   :  { %9830 = vmatprep.subr.bf16.mxu1 %v7125_v14 }
 0xefd   :  { %9831 = vmatpush3.bf16.msra.mxu1 %v7125_v14 }
 0xf00   :  { %9833 = vmatmul.mubr.msk.bf16.vlgmr.msra.gmra.mrb[100].mxu1 %vm18368_vm6, %v11191_v43  ;;  %vm18376_vm6 = vmmov %vm18375_vm3 }
 0xf01   :  { %9840 = vmatprep.mubr.msk.bf16.mxu1 %vm18369_vm5, %v11192_v51  ;;  %vm18377_vm5 = vmmov %vm18375_vm3 }
 0xfd3   :  { %v9834_v23 = vpop.f32.mrb[100].mxu1 }
 0xfd4   :  { %v7205_v17 = vadd.f32 %v9834_v23, %v7139_v34  ;;  %v7196_v4 = vpop.f32.mrb[101].mxu1 }
 0xfd5   :  { %v7197_v9 = vadd.f32 %v7196_v4, %v7129_v59  ;;  %v9835_v2 = vpop.f32.mrb[102].mxu1 }
 0xfd6   :  { %v7217_v13 = vmin.f32 %v7205_v17, 0.0  ;;  %v7208_v63 = vadd.f32 %v9835_v2, %v7144_v31  ;;  %v7199_v50 = vpop.f32.mrb[103].mxu1  ;;  %vm7213_vm8 = vcmp.gt.f32.partialorder %v7205_v17, 0.0 }
 0xfd7   :  { %v7215_v26 = vmin.f32 %v7197_v9, 0.0  ;;  %v7200_v28 = vadd.f32 %v7199_v50, %v7134_v3  ;;  %vm7211_vm1 = vcmp.gt.f32.partialorder %v7197_v9, 0.0 }
 0xfd8   :  { %v7223_v33 = vmul.f32 1.442695, %v7217_v13  ;;  %v7218_v37 = vmin.f32 %v7208_v63, 0.0  ;;  %vm7214_vm9 = vcmp.gt.f32.partialorder %v7208_v63, 0.0 }
 0xfd9   :  { %v7219_v42 = vmul.f32 1.442695, %v7215_v26  ;;  %v7216_v18 = vmin.f32 %v7200_v28, 0.0  ;;  %vm7212_vm0 = vcmp.gt.f32.partialorder %v7200_v28, 0.0 }
 0xfda   :  { %11260 = vpow2.f32 %v7223_v33  ;;  %v7225_v19 = vmul.f32 1.442695, %v7218_v37 }
 0xfdb   :  { %11262 = vpow2.f32 %v7219_v42  ;;  %v7221_v53 = vmul.f32 1.442695, %v7216_v18 }
 0xfdc   :  { %11264 = vpow2.f32 %v7225_v19 }
 0xfdd   :  { %11266 = vpow2.f32 %v7221_v53 }
 0xfe4   :  { %v11261_v8 = vpop.eup %11260 }
 0xfe5   :  { %v11263_v35 = vpop.eup %11262  ;;  %v8379_v61 = vadd.f32 -1.0, %v11261_v8 }
 0xfe6   :  { %v11265_v5 = vpop.eup %11264  ;;  %v8377_v47 = vadd.f32 -1.0, %v11263_v35 }
 0xfe7   :  { %v11267_v10 = vpop.eup %11266  ;;  %v8380_v24 = vadd.f32 -1.0, %v11265_v5  ;;  %v7233_v1 = vsel %vm7213_vm8, %v7205_v17, %v8379_v61  ;;  %vm18378_vm8 = vmmov %vm18375_vm3 }
 0xfe8   :  { %v8378_v45 = vadd.f32 -1.0, %v11267_v10  ;;  %v7231_v44 = vsel %vm7211_vm1, %v7197_v9, %v8377_v47 }
 0xfe9   :  { %v7234_v38 = vsel %vm7214_vm9, %v7208_v63, %v8380_v24  ;;  %vm18379_vm9 = vcmask 1043456  }
 0xfea   :  { %v7232_v0 = vsel %vm7212_vm0, %v7200_v28, %v8378_v45  ;;  %v7236_v41 = vpack.c.bf16 %v7234_v38, %v7233_v1  ;;  %vm18380_vm1 = vmmov %vm18379_vm9 }
 0xfeb   :  { %v7235_v11 = vpack.c.bf16 %v7232_v0, %v7231_v44  ;;  %vm18382_vm0 = vmmov %vm18380_vm1 }
 0xfed   :  { %9836 = vmatprep.subr.bf16.mxu1 %v7235_v11 }
 0xfee   :  { %9837 = vmatpush3.bf16.msra.mxu1 %v7235_v11  ;;  %v7527_v11 = vld [vmem:[%s16810_s22] sm:$0xff] }
 0xfef   :  { %9838 = vmatprep.subr.bf16.mxu1 %v7236_v41 }
 0xff2   :  { %9839 = vmatpush3.bf16.msra.mxu1 %v7236_v41 }
 0xff5   :  { %9841 = vmatmul.mubr.msk.bf16.vlgmr.msra.gmra.mrb[104].mxu1 %vm18370_vm11, %v11193_v49  ;;  %v7529_v49 = vld [vmem:[%s16810_s22 + $0x10] sm:$0xff]  ;;  %vm18383_vm11 = vmmov %vm18375_vm3 }
0x10c8   :  { %v9842_v20 = vpop.f32.mrb[104].mxu1 }
0x10c9   :  { %v7316_v16 = vadd.f32 %v9842_v20, %v7250_v58  ;;  %v7307_v6 = vpop.f32.mrb[105].mxu1  ;;  %v7536_v58 = vld [vmem:[%s16811_s24 + $0x8] sm:$0xff]  ;;  %v7535_v20 = vld [vmem:[%s16811_s24] sm:$0xff] }
0x10ca   :  { %v7308_v60 = vadd.f32 %v7307_v6, %v7240_v15  ;;  %v9843_v25 = vpop.f32.mrb[106].mxu1  ;;  %v7530_v15 = vld [vmem:[%s16810_s22 + $0x18] sm:$0xff]  ;;  %v7537_v6 = vld [vmem:[%s16811_s24 + $0x10] sm:$0xff] }
0x10cb   :  { %v7328_v40 = vmin.f32 %v7316_v16, 0.0  ;;  %v7319_v22 = vadd.f32 %v9843_v25, %v7255_v12  ;;  %v7310_v29 = vpop.f32.mrb[107].mxu1  ;;  %vm7324_vm2 = vcmp.gt.f32.partialorder %v7316_v16, 0.0  ;;  %v7403_v12 = vld [vmem:[%s16812_s12] sm:$0xff] }
0x10cc   :  { %v7326_v48 = vmin.f32 %v7308_v60, 0.0  ;;  %v7311_v36 = vadd.f32 %v7310_v29, %v7245_v30  ;;  %vm7322_vm15 = vcmp.gt.f32.partialorder %v7308_v60, 0.0  ;;  %v7528_v30 = vld [vmem:[%s16810_s22 + $0x8] sm:$0xff] }
0x10cd   :  { %v7334_v46 = vmul.f32 1.442695, %v7328_v40  ;;  %v7329_v32 = vmin.f32 %v7319_v22, 0.0  ;;  %vm7325_vm4 = vcmp.gt.f32.partialorder %v7319_v22, 0.0  ;;  %v7465_v40 = vld [vmem:[%s18381_s9] sm:$0xff] }
0x10ce   :  { %v7330_v57 = vmul.f32 1.442695, %v7326_v48  ;;  %v7327_v62 = vmin.f32 %v7311_v36, 0.0  ;;  %vm7323_vm7 = vcmp.gt.f32.partialorder %v7311_v36, 0.0 }
0x10cf   :  { %11268 = vpow2.f32 %v7334_v46  ;;  %v7336_v21 = vmul.f32 1.442695, %v7329_v32 }
0x10d0   :  { %11270 = vpow2.f32 %v7330_v57  ;;  %v7332_v14 = vmul.f32 1.442695, %v7327_v62 }
0x10d1   :  { %11272 = vpow2.f32 %v7336_v21 }
0x10d2   :  { %11274 = vpow2.f32 %v7332_v14 }
0x10d9   :  { %v11269_v39 = vpop.eup %11268 }
0x10da   :  { %v11271_v43 = vpop.eup %11270  ;;  %v8387_v34 = vadd.f32 -1.0, %v11269_v39 }
0x10db   :  { %v11273_v51 = vpop.eup %11272  ;;  %v8385_v59 = vadd.f32 -1.0, %v11271_v43 }
0x10dc   :  { %v11275_v23 = vpop.eup %11274  ;;  %v7344_v2 = vsel %vm7324_vm2, %v7316_v16, %v8387_v34  ;;  %v8388_v3 = vadd.f32 -1.0, %v11273_v51  ;;  %v7538_v16 = vld [vmem:[%s16811_s24 + $0x18] sm:$0xff]  ;;  %vm18387_vm2 = vmmov %vm18375_vm3 }
0x10dd   :  { %v7342_v17 = vsel %vm7322_vm15, %v7308_v60, %v8385_v59  ;;  %v8386_v4 = vadd.f32 -1.0, %v11275_v23  ;;  %v7352_v63 = vsel %vm18373_vm13, %v7344_v2, 0.0  ;;  %v7406_v60 = vpack.c.bf16 %v7403_v12, %v7403_v12  ;;  %vm18384_vm15 = vmmov %vm18382_vm0 }
0x10de   :  { %v7346_v31 = vsel %vm18371_vm12, %v7342_v17, 0.0  ;;  %v7345_v50 = vsel %vm7325_vm4, %v7319_v22, %v8388_v3  ;;  %v7466_v22 = vpack.c.bf16 %v7465_v40, %v7465_v40  ;;  %vm18385_vm12 = vmmov %vm18375_vm3  ;;  %vm18390_vm4 = vcmask 261120  }
0x10df   :  { %7347 = vadd.xlane.f32.xlu0 %v7346_v31  ;;  %v7343_v9 = vsel %vm7323_vm7, %v7311_v36, %v8386_v4  ;;  %v7355_v26 = vsel %vm18374_vm10, %v7345_v50, 0.0  ;;  %10856 = vmatprep.subr.msk.bf16.mxu1 %vm18379_vm9, %v7406_v60  ;;  %v7414_v25 = vsel %vm18380_vm1, %v7406_v60, 0  ;;  %vm18386_vm7 = vmmov %vm18375_vm3  ;;  %vm18393_vm9 = vmmov 0  }
0x10e0   :  { %v7349_v13 = vsel %vm18372_vm14, %v7343_v9, 0.0  ;;  %9845 = vmatpush3.bf16.msra.mxu1 %v7414_v25  ;;  %vm18388_vm14 = vcmask 523264  }
0x10e1   :  { %7350 = vadd.xlane.f32.xlu1 %v7349_v13  ;;  %10857 = vmatprep.subr.msk.bf16.mxu1 %vm18382_vm0, %v7466_v22  ;;  %vm18389_vm13 = vmmov %vm18388_vm14  ;;  %vm18394_vm0 = vcmask 195584  }
0x10e3   :  { %7353 = vadd.xlane.f32.xlu0 %v7352_v63 }
0x10e7   :  { %7356 = vadd.xlane.f32.xlu0 %v7355_v26 }
0x116c   :  { %v7348_v28 = vpop.xlane.xlu0 %7347 }
0x116d   :  { %v7359_v33 = vmul.f32 0.125, %v7348_v28 }
0x116e   :  { %v7351_v37 = vpop.xlane.xlu1 %7350 }
0x116f   :  { %v16687_v42 = vsub.f32 %v7342_v17, %v7359_v33  ;;  %v7360_v18 = vmul.f32 0.125, %v7351_v37  ;;  %v7468_v33 = vsel %vm18384_vm15, %v7466_v22, 0 }
0x1170   :  { %v7354_v19 = vpop.xlane.xlu0 %7353 }
0x1171   :  { %v16689_v53 = vsub.f32 %v7343_v9, %v7360_v18  ;;  %v7361_v8 = vmul.f32 0.125, %v7354_v19  ;;  %v7367_v35 = vmul.f32 %v16687_v42, %v16687_v42 }
0x1173   :  { %v16693_v61 = vsub.f32 %v7344_v2, %v7361_v8  ;;  %v7371_v5 = vsel %vm18375_vm3, %v7367_v35, 0.0  ;;  %v7368_v47 = vmul.f32 %v16689_v53, %v16689_v53 }
0x1174   :  { %7372 = vadd.xlane.f32.xlu1 %v7371_v5  ;;  %v7357_v10 = vpop.xlane.xlu0 %7356 }
0x1175   :  { %v7362_v24 = vmul.f32 0.125, %v7357_v10  ;;  %v7374_v45 = vsel %vm18376_vm6, %v7368_v47, 0.0  ;;  %v7369_v1 = vmul.f32 %v16693_v61, %v16693_v61 }
0x1176   :  { %7375 = vadd.xlane.f32.xlu0 %v7374_v45  ;;  %v11196_v45 = vld [vmem:[%s16815_s23] sm:$0xff]  }
0x1177   :  { %v7366_v38 = vsub.f32 %v7345_v50, %v7362_v24  ;;  %v7377_v44 = vsel %vm18377_vm5, %v7369_v1, 0.0  ;;  %v11195_v24 = vld [vmem:[%s16814_s21 + $0x8] sm:$0xff]   ;;  %9872 = vmatprep.mubr.msk.bf16.mxu0 %vm18390_vm4, %v11196_v45 }
0x1178   :  { %7378 = vadd.xlane.f32.xlu1 %v7377_v44 }
0x1179   :  { %v7370_v0 = vmul.f32 %v7366_v38, %v7366_v38 }
0x117b   :  { %v7380_v41 = vsel %vm18378_vm8, %v7370_v0, 0.0  ;;  %vm18392_vm8 = vmmov %vm18390_vm4 }
0x117c   :  { %7381 = vadd.xlane.f32.xlu0 %v7380_v41  ;;  %vm18399_vm4 = vmmov %vm18394_vm0 }
0x1189   :  { %7543 = vperm.xlu1 %10925, %v7527_v11  }
0x118d   :  { %7553 = vperm.xlu1 %10925, %v7529_v49  }
0x1191   :  { %7558 = vperm.xlu1 %10925, %v7530_v15  }
0x1192   :  { %7548 = vperm.xlu0 %10924, %v7528_v30  }
0x1195   :  { %7659 = vperm.xlu1 %10925, %v7536_v58  }
0x1196   :  { %7654 = vperm.xlu0 %10924, %v7535_v20  }
0x1199   :  { %7669 = vperm.xlu1 %10925, %v7538_v16  }
0x119a   :  { %7664 = vperm.xlu0 %10924, %v7537_v6  }
0x1201   :  { %v7373_v29 = vpop.xlane.xlu1 %7372 }
0x1202   :  { %v7383_v48 = vmul.f32 0.125, %v7373_v29 }
0x1203   :  { %v7376_v36 = vpop.xlane.xlu0 %7375 }
0x1204   :  { %v7387_v46 = vadd.f32 1e-05, %v7383_v48  ;;  %v7384_v32 = vmul.f32 0.125, %v7376_v36 }
0x1205   :  { %v7379_v57 = vpop.xlane.xlu1 %7378 }
0x1206   :  { %11276 = vrsqrt.f32 %v7387_v46  ;;  %v7388_v62 = vadd.f32 1e-05, %v7384_v32  ;;  %v7385_v21 = vmul.f32 0.125, %v7379_v57 }
0x1208   :  { %11278 = vrsqrt.f32 %v7388_v62  ;;  %v7389_v14 = vadd.f32 1e-05, %v7385_v21 }
0x1209   :  { %v7382_v39 = vpop.xlane.xlu0 %7381  ;;  %v7544_v1 = vpop.permute.xlu1 %7543 }
0x120a   :  { %11280 = vrsqrt.f32 %v7389_v14  ;;  %v7386_v43 = vmul.f32 0.125, %v7382_v39 }
0x120c   :  { %v7390_v51 = vadd.f32 1e-05, %v7386_v43 }
0x120e   :  { %11282 = vrsqrt.f32 %v7390_v51 }
0x1210   :  { %v11277_v59 = vpop.eup %11276 }
0x1211   :  { %v7395_v34 = vmul.f32 %v11277_v59, %v16687_v42  ;;  %v7549_v15 = vpop.permute.xlu0 %7548 }
0x1212   :  { %v11279_v23 = vpop.eup %11278 }
0x1213   :  { %v7396_v17 = vmul.f32 %v11279_v23, %v16689_v53  ;;  %v7399_v31 = vadd.f32 %v7395_v34, %v16661_v54  ;;  %v11194_v54 = vld [vmem:[%s16814_s21] sm:$0xff]   ;;  %v11197_v23 = vld [vmem:[%s16815_s23 + $0x8] sm:$0xff]  }
0x1214   :  { %v11281_v4 = vpop.eup %11280 }
0x1215   :  { %v7400_v9 = vadd.f32 %v7396_v17, %v16667_v55  ;;  %v7397_v2 = vmul.f32 %v11281_v4, %v16693_v61  ;;  %v18391_v17 = vmov 0.0   ;;  %v7655_v4 = vpop.permute.xlu0 %7654 }
0x1217   :  { %v7404_v3 = vpack.c.bf16 %v7400_v9, %v7399_v31  ;;  %v7401_v50 = vadd.f32 %v16659_v7, %v7397_v2 }
0x1218   :  { %v11283_v13 = vpop.eup %11282 }
0x1219   :  { %v7398_v63 = vmul.f32 %v11283_v13, %v7366_v38  ;;  %9846 = vmatprep.mubr.msk.bf16.mxu1 %vm18383_vm11, %v7404_v3  ;;  %v7554_v38 = vpop.permute.xlu1 %7553  ;;  %v7665_v9 = vpop.permute.xlu0 %7664 }
0x121b   :  { %v7402_v26 = vadd.f32 %v16663_v27, %v7398_v63 }
0x121d   :  { %v7405_v28 = vpack.c.bf16 %v7402_v26, %v7401_v50  ;;  %v7559_v41 = vpop.permute.xlu1 %7558 }
0x121f   :  { %9847 = vmatmul.mubr.msk.bf16.vlgmr.msra.gmra.mrb[108].mxu1 %vm18385_vm12, %v7405_v28  ;;  %vm18395_vm12 = vmmov %vm18394_vm0 }
0x1220   :  { %9852 = vmatprep.mubr.msk.bf16.mxu1 %vm18386_vm7, %v7404_v3  ;;  %9851 = vmatpush3.bf16.msra.mxu1 %v7468_v33  ;;  %vm18396_vm7 = vmmov %vm18394_vm0 }
0x1221   :  { %v7660_v31 = vpop.permute.xlu1 %7659 }
0x1225   :  { %v7670_v63 = vpop.permute.xlu1 %7669 }
0x1227   :  { %9853 = vmatmul.mubr.msk.bf16.vlgmr.msra.gmra.mrb[112].mxu1 %vm18387_vm2, %v7405_v28 }
0x1228   :  { %9864 = vmatprep.mubr.msk.bf16.mxu1 %vm18388_vm14, %v11194_v54  ;;  %vm18397_vm14 = vmmov %vm18394_vm0 }
0x12f2   :  { %v9848_v55 = vpop.f32.mrb[108].mxu1 }
0x12f3   :  { %v7450_v7 = vpop.f32.mrb[109].mxu1 }
0x12f4   :  { %v9849_v37 = vpop.f32.mrb[110].mxu1 }
0x12f5   :  { %v7453_v27 = vpop.f32.mrb[111].mxu1 }
0x12fa   :  { %v9854_v42 = vpop.f32.mrb[112].mxu1 }
0x12fb   :  { %v7521_v18 = vmul.f32 %v9854_v42, %v9848_v55  ;;  %v7504_v19 = vpop.f32.mrb[113].mxu1 }
0x12fc   :  { %v7519_v53 = vmul.f32 %v7504_v19, %v7450_v7  ;;  %v9855_v8 = vpop.f32.mrb[114].mxu1 }
0x12fd   :  { %v7522_v35 = vmul.f32 %v9855_v8, %v9849_v37  ;;  %v7507_v61 = vpop.f32.mrb[115].mxu1 }
0x12fe   :  { %v7520_v5 = vmul.f32 %v7507_v61, %v7453_v27 }
0x12ff   :  { %v7540_v47 = vpack.c.bf16 %v7522_v35, %v7521_v18 }
0x1300   :  { %v7539_v10 = vpack.c.bf16 %v7520_v5, %v7519_v53 }
0x1302   :  { %9856 = vmatprep.subr.bf16.mxu1 %v7539_v10 }
0x1303   :  { %9857 = vmatpush3.bf16.msra.mxu1 %v7539_v10 }
0x1304   :  { %9858 = vmatprep.subr.bf16.mxu1 %v7540_v47 }
0x1307   :  { %9859 = vmatpush3.bf16.msra.mxu1 %v7540_v47 }
0x1308   :  { %9860 = vmatprep.subr.bf16.mxu1 %v16645_v52 }
0x130b   :  { %9861 = vmatpush3.bf16.msra.mxu1 %v16645_v52 }
0x130c   :  { %9862 = vmatprep.subr.bf16.mxu1 %v16651_v56 }
0x130f   :  { %9863 = vmatpush3.bf16.msra.mxu1 %v16651_v56 }
0x1312   :  { %9865 = vmatmul.mubr.msk.bf16.vlgmr.msra.gmra.mrb[116].mxu1 %vm18389_vm13, %v11195_v24  ;;  %vm18398_vm13 = vmmov %vm18394_vm0 }
0x13e5   :  { %v9866_v44 = vpop.f32.mrb[116].mxu1 }
0x13e6   :  { %v7620_v52 = vadd.f32 %v9866_v44, %v7554_v38  ;;  %v7611_v0 = vpop.f32.mrb[117].mxu1 }
0x13e7   :  { %v7612_v11 = vadd.f32 %v7611_v0, %v7544_v1  ;;  %v9867_v49 = vpop.f32.mrb[118].mxu1 }
0x13e8   :  { %v7632_v30 = vmin.f32 %v7620_v52, 0.0  ;;  %v7623_v58 = vadd.f32 %v9867_v49, %v7559_v41  ;;  %v7614_v56 = vpop.f32.mrb[119].mxu1  ;;  %vm7628_vm10 = vcmp.gt.f32.partialorder %v7620_v52, 0.0 }
0x13e9   :  { %v7630_v20 = vmin.f32 %v7612_v11, 0.0  ;;  %v7615_v16 = vadd.f32 %v7614_v56, %v7549_v15  ;;  %vm7626_vm6 = vcmp.gt.f32.partialorder %v7612_v11, 0.0 }
0x13ea   :  { %v7638_v6 = vmul.f32 1.442695, %v7632_v30  ;;  %v7633_v12 = vmin.f32 %v7623_v58, 0.0  ;;  %vm7629_vm3 = vcmp.gt.f32.partialorder %v7623_v58, 0.0 }
0x13eb   :  { %v7634_v60 = vmul.f32 1.442695, %v7630_v20  ;;  %v7631_v25 = vmin.f32 %v7615_v16, 0.0  ;;  %vm7627_vm5 = vcmp.gt.f32.partialorder %v7615_v16, 0.0 }
0x13ec   :  { %11284 = vpow2.f32 %v7638_v6  ;;  %v7640_v40 = vmul.f32 1.442695, %v7633_v12 }
0x13ed   :  { %11286 = vpow2.f32 %v7634_v60  ;;  %v7636_v22 = vmul.f32 1.442695, %v7631_v25 }
0x13ee   :  { %11288 = vpow2.f32 %v7640_v40 }
0x13ef   :  { %11290 = vpow2.f32 %v7636_v22 }
0x13f6   :  { %v11285_v29 = vpop.eup %11284 }
0x13f7   :  { %v11287_v48 = vpop.eup %11286  ;;  %v8399_v36 = vadd.f32 -1.0, %v11285_v29 }
0x13f8   :  { %v11289_v46 = vpop.eup %11288  ;;  %v8397_v32 = vadd.f32 -1.0, %v11287_v48 }
0x13f9   :  { %v11291_v57 = vpop.eup %11290  ;;  %v8400_v62 = vadd.f32 -1.0, %v11289_v46  ;;  %v7648_v14 = vsel %vm7628_vm10, %v7620_v52, %v8399_v36  ;;  %vm18400_vm10 = vmmov %vm18394_vm0 }
0x13fa   :  { %v8398_v21 = vadd.f32 -1.0, %v11291_v57  ;;  %v7646_v43 = vsel %vm7626_vm6, %v7612_v11, %v8397_v32  ;;  %vm18402_vm6 = vmmov %vm18392_vm8 }
0x13fb   :  { %v7649_v39 = vsel %vm7629_vm3, %v7623_v58, %v8400_v62  ;;  %vm18401_vm3 = vmmov %vm18394_vm0 }
0x13fc   :  { %v7647_v51 = vsel %vm7627_vm5, %v7615_v16, %v8398_v21  ;;  %v7651_v59 = vpack.c.bf16 %v7649_v39, %v7648_v14  ;;  %v7816_v14 = vld [vmem:[%s16816_s26] sm:$0xff]  ;;  %vm18403_vm5 = vmmov %vm18394_vm0 }
0x13fd   :  { %v7650_v34 = vpack.c.bf16 %v7647_v51, %v7646_v43 }
0x13ff   :  { %9868 = vmatprep.subr.bf16.mxu0 %v7650_v34 }
0x1400   :  { %9869 = vmatpush3.bf16.msra.mxu0 %v7650_v34 }
0x1401   :  { %9870 = vmatprep.subr.bf16.mxu0 %v7651_v59 }
0x1404   :  { %9871 = vmatpush3.bf16.msra.mxu0 %v7651_v59 }
0x1405   :  { %9876 = vmatprep.subr.bf16.mxu0 %v18391_v17 }
0x1407   :  { %9873 = vmatmul.mubr.msk.bf16.vlgmr.msra.gmra.mrb[116].mxu0 %vm18392_vm8, %v11197_v23 }
0x1408   :  { %9880 = vmatprep.mubr.msk.bf16.mxu0 %vm18393_vm9, %v18391_v17 }
0x14da   :  { %v9874_v2 = vpop.f32.mrb[116].mxu0 }
0x14db   :  { %v7731_v3 = vadd.f32 %v9874_v2, %v7665_v9  ;;  %v7722_v13 = vpop.f32.mrb[117].mxu0 }
0x14dc   :  { %v7723_v50 = vadd.f32 %v7722_v13, %v7655_v4  ;;  %v9875_v26 = vpop.f32.mrb[118].mxu0 }
0x14dd   :  { %v7743_v28 = vmin.f32 %v7731_v3, 0.0  ;;  %v7734_v33 = vadd.f32 %v9875_v26, %v7670_v63  ;;  %v7725_v54 = vpop.f32.mrb[119].mxu0  ;;  %vm7739_vm15 = vcmp.gt.f32.partialorder %v7731_v3, 0.0 }
0x14de   :  { %v7741_v55 = vmin.f32 %v7723_v50, 0.0  ;;  %v7726_v7 = vadd.f32 %v7725_v54, %v7660_v31  ;;  %vm7737_vm1 = vcmp.gt.f32.partialorder %v7723_v50, 0.0 }
0x14df   :  { %v7749_v37 = vmul.f32 1.442695, %v7743_v28  ;;  %v7744_v27 = vmin.f32 %v7734_v33, 0.0  ;;  %vm7740_vm2 = vcmp.gt.f32.partialorder %v7734_v33, 0.0 }
0x14e0   :  { %v7745_v42 = vmul.f32 1.442695, %v7741_v55  ;;  %v7742_v18 = vmin.f32 %v7726_v7, 0.0  ;;  %vm7738_vm11 = vcmp.gt.f32.partialorder %v7726_v7, 0.0 }
0x14e1   :  { %11292 = vpow2.f32 %v7749_v37  ;;  %v7751_v19 = vmul.f32 1.442695, %v7744_v27 }
0x14e2   :  { %11294 = vpow2.f32 %v7745_v42  ;;  %v7747_v53 = vmul.f32 1.442695, %v7742_v18  ;;  %v7813_v42 = vld [vmem:[%s16817_s25] sm:$0xf] }
0x14e3   :  { %11296 = vpow2.f32 %v7751_v19 }
0x14e4   :  { %11298 = vpow2.f32 %v7747_v53 }
0x14eb   :  { %v11293_v8 = vpop.eup %11292 }
0x14ec   :  { %v11295_v35 = vpop.eup %11294  ;;  %v8407_v47 = vadd.f32 -1.0, %v11293_v8 }
0x14ed   :  { %v11297_v61 = vpop.eup %11296  ;;  %v8405_v5 = vadd.f32 -1.0, %v11295_v35 }
0x14ee   :  { %v11299_v10 = vpop.eup %11298  ;;  %v7759_v44 = vsel %vm7739_vm15, %v7731_v3, %v8407_v47  ;;  %v8408_v52 = vadd.f32 -1.0, %v11297_v61 }
0x14ef   :  { %v7757_v24 = vsel %vm7737_vm1, %v7723_v50, %v8405_v5  ;;  %v8406_v45 = vadd.f32 -1.0, %v11299_v10  ;;  %v7767_v41 = vsel %vm18396_vm7, %v7759_v44, 0.0 }
0x14f0   :  { %v7761_v1 = vsel %vm18394_vm0, %v7757_v24, 0.0  ;;  %v7760_v11 = vsel %vm7740_vm2, %v7734_v33, %v8408_v52 }
0x14f1   :  { %7762 = vadd.xlane.f32.xlu0 %v7761_v1  ;;  %v7758_v38 = vsel %vm7738_vm11, %v7726_v7, %v8406_v45  ;;  %v7770_v49 = vsel %vm18397_vm14, %v7760_v11, 0.0 }
0x14f2   :  { %v7764_v0 = vsel %vm18395_vm12, %v7758_v38, 0.0 }
0x14f3   :  { %7765 = vadd.xlane.f32.xlu1 %v7764_v0 }
0x14f5   :  { %7768 = vadd.xlane.f32.xlu0 %v7767_v41 }
0x14f9   :  { %7771 = vadd.xlane.f32.xlu0 %v7770_v49 }
0x157e   :  { %v7763_v15 = vpop.xlane.xlu0 %7762 }
0x157f   :  { %v7773_v30 = vmul.f32 0.041666668, %v7763_v15 }
0x1580   :  { %v7766_v58 = vpop.xlane.xlu1 %7765 }
0x1581   :  { %v7777_v56 = vsub.f32 %v7757_v24, %v7773_v30  ;;  %v7774_v20 = vmul.f32 0.041666668, %v7766_v58 }
0x1582   :  { %v7769_v16 = vpop.xlane.xlu0 %7768 }
0x1583   :  { %v7778_v6 = vsub.f32 %v7758_v38, %v7774_v20  ;;  %v7775_v12 = vmul.f32 0.041666668, %v7769_v16  ;;  %v7781_v60 = vmul.f32 %v7777_v56, %v7777_v56 }
0x1585   :  { %v7779_v25 = vsub.f32 %v7759_v44, %v7775_v12  ;;  %v7785_v40 = vsel %vm18398_vm13, %v7781_v60, 0.0  ;;  %v7782_v22 = vmul.f32 %v7778_v6, %v7778_v6 }
0x1586   :  { %7786 = vadd.xlane.f32.xlu1 %v7785_v40  ;;  %v7772_v29 = vpop.xlane.xlu0 %7771 }
0x1587   :  { %v7776_v48 = vmul.f32 0.041666668, %v7772_v29  ;;  %v7788_v36 = vsel %vm18399_vm4, %v7782_v22, 0.0  ;;  %v7783_v46 = vmul.f32 %v7779_v25, %v7779_v25 }
0x1588   :  { %7789 = vadd.xlane.f32.xlu0 %v7788_v36 }
0x1589   :  { %v7780_v32 = vsub.f32 %v7760_v11, %v7776_v48  ;;  %v7791_v57 = vsel %vm18400_vm10, %v7783_v46, 0.0 }
0x158a   :  { %7792 = vadd.xlane.f32.xlu1 %v7791_v57 }
0x158b   :  { %v7784_v62 = vmul.f32 %v7780_v32, %v7780_v32 }
0x158d   :  { %v7794_v21 = vsel %vm18401_vm3, %v7784_v62, 0.0 }
0x158e   :  { %7795 = vadd.xlane.f32.xlu0 %v7794_v21 }
0x159b   :  { %7819 = vperm.xlu1 %10925, %v7816_v14  }
0x1613   :  { %v7787_v39 = vpop.xlane.xlu1 %7786 }
0x1614   :  { %v7797_v43 = vmul.f32 0.041666668, %v7787_v39 }
0x1615   :  { %v7790_v51 = vpop.xlane.xlu0 %7789 }
0x1616   :  { %v7801_v59 = vadd.f32 1e-05, %v7797_v43  ;;  %v7798_v34 = vmul.f32 0.041666668, %v7790_v51 }
0x1617   :  { %v7793_v23 = vpop.xlane.xlu1 %7792 }
0x1618   :  { %11300 = vrsqrt.f32 %v7801_v59  ;;  %v7802_v4 = vadd.f32 1e-05, %v7798_v34  ;;  %v7799_v31 = vmul.f32 0.041666668, %v7793_v23 }
0x161a   :  { %11302 = vrsqrt.f32 %v7802_v4  ;;  %v7803_v9 = vadd.f32 1e-05, %v7799_v31 }
0x161b   :  { %v7796_v2 = vpop.xlane.xlu0 %7795  ;;  %v7820_v18 = vpop.permute.xlu1 %7819 }
0x161c   :  { %v7800_v3 = vmul.f32 0.041666668, %v7796_v2  ;;  %11304 = vrsqrt.f32 %v7803_v9 }
0x161e   :  { %v7804_v13 = vadd.f32 1e-05, %v7800_v3 }
0x1620   :  { %11306 = vrsqrt.f32 %v7804_v13 }
0x1622   :  { %v11301_v63 = vpop.eup %11300 }
0x1623   :  { %v7809_v26 = vmul.f32 %v11301_v63, %v7777_v56 }
0x1624   :  { %v11303_v50 = vpop.eup %11302 }
0x1625   :  { %v7810_v28 = vmul.f32 %v11303_v50, %v7778_v6 }
0x1626   :  { %v11305_v54 = vpop.eup %11304 }
0x1627   :  { %v7814_v33 = vpack.c.bf16 %v7810_v28, %v7809_v26  ;;  %v7811_v7 = vmul.f32 %v11305_v54, %v7779_v25 }
0x1629   :  { %9877 = vmatpush3.bf16.msra.mxu0 %v7814_v33 }
0x162a   :  { %v11307_v55 = vpop.eup %11306  ;;  %9878 = vmatprep.subr.bf16.mxu0 %v18391_v17 }
0x162b   :  { %v7812_v37 = vmul.f32 %v11307_v55, %v7780_v32 }
0x162d   :  { %v7815_v27 = vpack.c.bf16 %v7812_v37, %v7811_v7 }
0x162f   :  { %9879 = vmatpush3.bf16.msra.mxu0 %v7815_v27 }
0x1632   :  { %9881 = vmatmul.mubr.msk.bf16.vlgmr.msra.gmra.mrb[120].mxu0 %vm18402_vm6, %v7813_v42 }
0x1705   :  { %v7859_v19 = vpop.f32.mrb[120].mxu0 }
0x1706   :  { %v7860_v53 = vadd.f32 %v7859_v19, %v7820_v18  ;;  %v9882_v8 = vpop.f32.mrb[121].mxu0 }
0x1707   :  { %v7862_v35 = vpop.f32.mrb[122].mxu0 }
0x1708   :  { %7865 = vst.msk [vmem:[%s16818_s27] sm:$0xff] %vm18403_vm5, %v7860_v53  ;;  %v9883_v17 = vpop.f32.mrb[123].mxu0 }

</bundles_post_ra>
